<compile_context>
chip_gen: v5e
topology: v5e:2x2
jax: 0.10.0
libtpu: 0.0.40
codegen_flags: <defaults>
</compile_context>

<pallas_src>
import functools

import jax
import jax.numpy as jnp
from jax.experimental import pallas as pl
from jax.experimental.pallas import tpu as pltpu

D_HID1 = 1024
D_HID2 = 512
D_HID3 = 256
OUT_PAD = 128          # fc4 output (1) padded to 128 lanes inside the kernel
DROP_P = 0.3
LEAKY_SLOPE = 0.2
_KEEP_SCALE = 1.0 / (1.0 - DROP_P)
# Keep iff uniform *signed* int32 bits >= T, with P(keep) = 1 - DROP_P over 2^32.
_KEEP_THRESHOLD_I32 = int(round(DROP_P * (1 << 32))) - (1 << 31)


def _wrap_i32(v):
    """Wrap a Python int into signed 32-bit (two's complement) range."""
    v &= 0xFFFFFFFF
    return v - (1 << 32) if v >= (1 << 31) else v


# Odd 32-bit mixing constants (murmur3 / splitmix / xxhash style).
_SEED_MULT = _wrap_i32(0x9E3779B1)
_TILE_MULT = _wrap_i32(0x27D4EB2F)
_MIX1 = _wrap_i32(0x85EBCA6B)
_MIX2 = _wrap_i32(0xC2B2AE35)
_LAYER_SALT = tuple(_wrap_i32((l + 1) * 0x9E3779B9) for l in range(3))


def _uniform_bits_i32(shape, salt):
    """Uniform int32 bits from a counter-based hash (murmur3 finalizer).

    Plain 32-bit integer VPU ops only (iota, mul, xor, logical shift), so it
    lowers on Mosaic TPU *and* in interpret mode, unlike pltpu.prng_*.
    ~10 VALU ops/element: free filler under the MXU-bound matmuls.
    """
    r = jax.lax.broadcasted_iota(jnp.int32, shape, 0)
    c = jax.lax.broadcasted_iota(jnp.int32, shape, 1)
    h = r * jnp.int32(shape[1]) + c + salt
    h = h ^ jax.lax.shift_right_logical(h, jnp.int32(16))
    h = h * jnp.int32(_MIX1)
    h = h ^ jax.lax.shift_right_logical(h, jnp.int32(13))
    h = h * jnp.int32(_MIX2)
    h = h ^ jax.lax.shift_right_logical(h, jnp.int32(16))
    return h


def _leaky_relu(h):
    return jnp.where(h > 0, h, LEAKY_SLOPE * h)


def _dropout(h, salt):
    # Bernoulli(keep = 1 - p) mask with inverted scaling, like torch.
    bits = _uniform_bits_i32(h.shape, salt)
    keep = bits >= jnp.int32(_KEEP_THRESHOLD_I32)
    return jnp.where(keep, h * _KEEP_SCALE, 0.0)


def _disc_kernel(seed_ref,
                 x_ref, w1_ref, b1_ref, w2_ref, b2_ref,
                 w3_ref, b3_ref, w4_ref, b4_ref,
                 o_ref):
    # Distinct dropout stream per (seed, batch tile, layer); otherwise every
    # tile / TensorCore would reuse the same mask.
    salt0 = (seed_ref[0] * jnp.int32(_SEED_MULT)
             + pl.program_id(0) * jnp.int32(_TILE_MULT))

    # MXU operands are cast to bf16 in-kernel (hidden under the matmul, not a
    # separate HBM-bound wrapper op); accumulation is f32 and all elementwise
    # math (bias, leaky_relu, dropout, sigmoid) stays f32.
    h = jnp.dot(x_ref[...].astype(jnp.bfloat16), w1_ref[...],
                preferred_element_type=jnp.float32) + b1_ref[...]
    h = _dropout(_leaky_relu(h), salt0 + jnp.int32(_LAYER_SALT[0]))

    h = jnp.dot(h.astype(jnp.bfloat16), w2_ref[...],
                preferred_element_type=jnp.float32) + b2_ref[...]
    h = _dropout(_leaky_relu(h), salt0 + jnp.int32(_LAYER_SALT[1]))

    h = jnp.dot(h.astype(jnp.bfloat16), w3_ref[...],
                preferred_element_type=jnp.float32) + b3_ref[...]
    h = _dropout(_leaky_relu(h), salt0 + jnp.int32(_LAYER_SALT[2]))

    logits = jnp.dot(h.astype(jnp.bfloat16), w4_ref[...],
                     preferred_element_type=jnp.float32) + b4_ref[...]
    o_ref[...] = 1.0 / (1.0 + jnp.exp(-logits))      # sigmoid, f32


def _round_up(n, m):
    return ((n + m - 1) // m) * m


def _resident_spec(shape):
    """Grid-invariant block: constant index_map (DMA'd once, stays VMEM
    resident across all batch tiles) and single-buffered so it does not burn
    2x VMEM on a block that never changes."""
    return pl.BlockSpec(shape, lambda *_: (0,) * len(shape),
                        pipeline_mode=pl.Buffered(1))


def _choose_batch_tile(B, block_b):
    """Balanced batch tiles: <= block_b rows each, padding <= ~8 rows per
    tile, and at least 2 grid steps whenever B allows it so both of v7x's
    TensorCores get work under the 'parallel' grid axis."""
    n_tiles = max(pl.cdiv(B, block_b), 2 if B > 8 else 1)
    tm = _round_up(pl.cdiv(B, n_tiles), 8)
    n_tiles = pl.cdiv(B, tm)
    return tm, n_tiles


@functools.partial(jax.jit, static_argnames=("block_b",))
def discriminator_forward(x, params, seed, *, block_b=256):
    """x: (B, d_input_dim) float32.  Returns (B, 1) float32 probabilities.

    Fused fc1..fc4 + leaky_relu(0.2) + dropout(0.3) + sigmoid.  Weight/bias
    BlockSpecs use constant index_maps so their HBM->VMEM DMA happens once and
    they stay resident across batch tiles, while x / out tiles are
    software-pipelined along the batch grid.  Dropout is ACTIVE (training
    semantics), matching F.dropout's training=True default in the reference.
    """
    w1, b1, w2, b2, w3, b3, w4p, b4p = params
    B, d_in = x.shape

    tm, n_tiles = _choose_batch_tile(B, block_b)
    Bp = tm * n_tiles
    if Bp != B:
        x = jnp.pad(x, ((0, Bp - B), (0, 0)))

    in_specs = [
        pl.BlockSpec((tm, d_in), lambda i, seed_ref: (i, 0)),
        _resident_spec((d_in, D_HID1)), _resident_spec((1, D_HID1)),
        _resident_spec((D_HID1, D_HID2)), _resident_spec((1, D_HID2)),
        _resident_spec((D_HID2, D_HID3)), _resident_spec((1, D_HID3)),
        _resident_spec((D_HID3, OUT_PAD)), _resident_spec((1, OUT_PAD)),
    ]
    out_spec = pl.BlockSpec((tm, OUT_PAD), lambda i, seed_ref: (i, 0))

    # VMEM budget derived from the actual buffer sizes (weights counted twice
    # so it still compiles even if single-buffering is not honored) + headroom
    # for in-kernel f32 temporaries.  ~34 MiB for d_in=3072 / tm=256 / bf16:
    # well under v7x's 64 MiB physical VMEM, above v5e's 16 MiB default scope.
    param_bytes = sum(int(p.size) * p.dtype.itemsize for p in params)
    io_bytes = 2 * tm * d_in * x.dtype.itemsize + 2 * tm * OUT_PAD * 4
    temp_bytes = 4 * tm * D_HID1 * 4
    vmem_limit = 2 * param_bytes + io_bytes + temp_bytes + 8 * 1024 * 1024
    vmem_limit = max(min(int(vmem_limit), 60 * 1024 * 1024), 24 * 1024 * 1024)

    # Advisory cost so XLA can overlap neighbouring GAN ops with this call.
    flops = 2 * Bp * (d_in * D_HID1 + D_HID1 * D_HID2
                      + D_HID2 * D_HID3 + D_HID3 * OUT_PAD)
    bytes_accessed = param_bytes + Bp * d_in * x.dtype.itemsize + Bp * OUT_PAD * 4
    cost = pl.CostEstimate(flops=flops, transcendentals=Bp * OUT_PAD,
                           bytes_accessed=bytes_accessed)

    out = pl.pallas_call(
        _disc_kernel,
        out_shape=jax.ShapeDtypeStruct((Bp, OUT_PAD), jnp.float32),
        grid_spec=pltpu.PrefetchScalarGridSpec(
            num_scalar_prefetch=1,
            grid=(n_tiles,),
            in_specs=in_specs,
            out_specs=out_spec,
        ),
        compiler_params=pltpu.CompilerParams(
            # Batch tiles are fully independent -> shard across TensorCores.
            dimension_semantics=("parallel",),
            vmem_limit_bytes=vmem_limit,
        ),
        cost_estimate=cost,
    )(seed, x, w1, b1, w2, b2, w3, b3, w4p, b4p)

    return out[:B, :1]


def init_params(key, d_input_dim, dtype=jnp.bfloat16):
    """nn.Linear-style U(-1/sqrt(fan_in), 1/sqrt(fan_in)) init.

    Weights are stored as (in_features, out_features), default bf16 (halves
    the weight DMA / resident VMEM and enables the fast bf16 MXU path;
    accumulation stays f32).  Biases stay f32 (added after the f32 matmul
    accumulation).  fc4 is pre-padded to OUT_PAD output lanes here, hoisted
    out of the jitted forward pass.
    """
    dims = [(d_input_dim, D_HID1), (D_HID1, D_HID2), (D_HID2, D_HID3), (D_HID3, 1)]
    params = []
    for layer_idx, (fan_in, fan_out) in enumerate(dims):
        key, kw, kb = jax.random.split(key, 3)
        bound = 1.0 / (fan_in ** 0.5)
        w = jax.random.uniform(kw, (fan_in, fan_out), jnp.float32, -bound, bound)
        b = jax.random.uniform(kb, (1, fan_out), jnp.float32, -bound, bound)
        if layer_idx == len(dims) - 1:   # fc4: pad 1 -> OUT_PAD lanes with zeros
            w = jnp.zeros((fan_in, OUT_PAD), jnp.float32).at[:, :1].set(w)
            b = jnp.zeros((1, OUT_PAD), jnp.float32).at[:, :1].set(b)
        params += [w.astype(dtype), b.astype(jnp.float32)]
    return tuple(params)


if __name__ == "__main__":
    key = jax.random.PRNGKey(0)
    kx, kp = jax.random.split(key)

    batch = 64
    d_input_dim = 384   # small stand-in for CIFAR10's 3*32*32 = 3072

    x = jax.random.normal(kx, (batch, d_input_dim), jnp.float32)
    params = init_params(kp, d_input_dim)          # bf16 weights, f32 biases
    seed = jnp.array([42], dtype=jnp.int32)

    y = discriminator_forward(x, params, seed)     # grid=(2,), tm=32
    y = jax.block_until_ready(y)

    assert y.shape == (batch, 1), y.shape
    assert bool(jnp.all(jnp.isfinite(y))), "non-finite output"
    assert bool(jnp.all((y >= 0.0) & (y <= 1.0))), "sigmoid output out of range"
    print("KERNEL_OK")
</pallas_src>

<mosaic_0001>
module attributes {stable_mosaic.version = 11 : i64} {
  func.func @_disc_kernel(%arg0: i32, %arg1: memref<1xi32, #tpu.memory_space<smem>>, %arg2: memref<32x384xf32, #tpu.memory_space<vmem>>, %arg3: memref<384x1024xbf16, #tpu.memory_space<vmem>>, %arg4: memref<1x1024xf32, #tpu.memory_space<vmem>>, %arg5: memref<1024x512xbf16, #tpu.memory_space<vmem>>, %arg6: memref<1x512xf32, #tpu.memory_space<vmem>>, %arg7: memref<512x256xbf16, #tpu.memory_space<vmem>>, %arg8: memref<1x256xf32, #tpu.memory_space<vmem>>, %arg9: memref<256x128xbf16, #tpu.memory_space<vmem>>, %arg10: memref<1x128xf32, #tpu.memory_space<vmem>>, %arg11: memref<32x128xf32, #tpu.memory_space<vmem>>) attributes {dimension_semantics = [#tpu.dimension_semantics<parallel>], iteration_bounds = array<i64: 2>, scalar_prefetch = 1 : i64, scratch_operands = 0 : i64, tpu.core_type = #tpu.core_type<tc>, window_params = [{transform_indices = @transform_0, window_bounds = array<i64: 32, 384>}, {pipeline_mode = #tpu.pipeline_mode<synchronous>, transform_indices = @transform_1, window_bounds = array<i64: 384, 1024>}, {pipeline_mode = #tpu.pipeline_mode<synchronous>, transform_indices = @transform_2, window_bounds = array<i64: 1, 1024>}, {pipeline_mode = #tpu.pipeline_mode<synchronous>, transform_indices = @transform_3, window_bounds = array<i64: 1024, 512>}, {pipeline_mode = #tpu.pipeline_mode<synchronous>, transform_indices = @transform_4, window_bounds = array<i64: 1, 512>}, {pipeline_mode = #tpu.pipeline_mode<synchronous>, transform_indices = @transform_5, window_bounds = array<i64: 512, 256>}, {pipeline_mode = #tpu.pipeline_mode<synchronous>, transform_indices = @transform_6, window_bounds = array<i64: 1, 256>}, {pipeline_mode = #tpu.pipeline_mode<synchronous>, transform_indices = @transform_7, window_bounds = array<i64: 256, 128>}, {pipeline_mode = #tpu.pipeline_mode<synchronous>, transform_indices = @transform_8, window_bounds = array<i64: 1, 128>}, {transform_indices = @transform_9, window_bounds = array<i64: 32, 128>}]} {
    %c0 = arith.constant 0 : index
    %0 = memref.load %arg1[%c0] : memref<1xi32, #tpu.memory_space<smem>>
    %c-1640531535_i32 = arith.constant -1640531535 : i32
    %1 = arith.muli %0, %c-1640531535_i32 : i32
    %c668265263_i32 = arith.constant 668265263 : i32
    %2 = arith.muli %arg0, %c668265263_i32 : i32
    %3 = arith.addi %1, %2 : i32
    %c0_0 = arith.constant 0 : index
    %c0_1 = arith.constant 0 : index
    %4 = vector.load %arg2[%c0_0, %c0_1] : memref<32x384xf32, #tpu.memory_space<vmem>>, vector<32x384xf32>
    %5 = arith.truncf %4 : vector<32x384xf32> to vector<32x384xbf16>
    %c0_2 = arith.constant 0 : index
    %c0_3 = arith.constant 0 : index
    %6 = vector.load %arg3[%c0_2, %c0_3] : memref<384x1024xbf16, #tpu.memory_space<vmem>>, vector<384x1024xbf16>
    %cst = arith.constant dense<0.000000e+00> : vector<32x1024xf32>
    %7 = tpu.matmul %5, %6, %cst {dimension_numbers = #tpu.dot_dimension_numbers<[1], [0], [0], [1], [0, 0, 1, 1], [], []>} : vector<32x384xbf16>, vector<384x1024xbf16>, vector<32x1024xf32> -> vector<32x1024xf32>
    %c0_4 = arith.constant 0 : index
    %c0_5 = arith.constant 0 : index
    %8 = vector.load %arg4[%c0_4, %c0_5] : memref<1x1024xf32, #tpu.memory_space<vmem>>, vector<1x1024xf32>
    %9 = vector.broadcast %8 : vector<1x1024xf32> to vector<32x1024xf32>
    %10 = arith.addf %7, %9 : vector<32x1024xf32>
    %cst_6 = arith.constant 0.000000e+00 : f32
    %11 = vector.broadcast %cst_6 : f32 to vector<32x1024xf32>
    %12 = arith.cmpf ogt, %10, %11 : vector<32x1024xf32>
    %cst_7 = arith.constant 2.000000e-01 : f32
    %13 = vector.broadcast %cst_7 : f32 to vector<32x1024xf32>
    %14 = arith.mulf %13, %10 : vector<32x1024xf32>
    %15 = arith.select %12, %10, %14 : vector<32x1024xi1>, vector<32x1024xf32>
    %c-1640531527_i32 = arith.constant -1640531527 : i32
    %16 = arith.addi %3, %c-1640531527_i32 : i32
    %17 = tpu.iota {dimensions = array<i32: 0>} : vector<32x1024xi32>
    %18 = tpu.iota {dimensions = array<i32: 1>} : vector<32x1024xi32>
    %c1024_i32 = arith.constant 1024 : i32
    %19 = vector.broadcast %c1024_i32 : i32 to vector<32x1024xi32>
    %20 = arith.muli %17, %19 : vector<32x1024xi32>
    %21 = arith.addi %20, %18 : vector<32x1024xi32>
    %22 = vector.broadcast %16 : i32 to vector<32x1024xi32>
    %23 = arith.addi %21, %22 : vector<32x1024xi32>
    %c16_i32 = arith.constant 16 : i32
    %24 = vector.broadcast %c16_i32 : i32 to vector<32x1024xi32>
    %25 = arith.shrui %23, %24 : vector<32x1024xi32>
    %26 = arith.xori %23, %25 : vector<32x1024xi32>
    %c-2048144789_i32 = arith.constant -2048144789 : i32
    %27 = vector.broadcast %c-2048144789_i32 : i32 to vector<32x1024xi32>
    %28 = arith.muli %26, %27 : vector<32x1024xi32>
    %c13_i32 = arith.constant 13 : i32
    %29 = vector.broadcast %c13_i32 : i32 to vector<32x1024xi32>
    %30 = arith.shrui %28, %29 : vector<32x1024xi32>
    %31 = arith.xori %28, %30 : vector<32x1024xi32>
    %c-1028477387_i32 = arith.constant -1028477387 : i32
    %32 = vector.broadcast %c-1028477387_i32 : i32 to vector<32x1024xi32>
    %33 = arith.muli %31, %32 : vector<32x1024xi32>
    %c16_i32_8 = arith.constant 16 : i32
    %34 = vector.broadcast %c16_i32_8 : i32 to vector<32x1024xi32>
    %35 = arith.shrui %33, %34 : vector<32x1024xi32>
    %36 = arith.xori %33, %35 : vector<32x1024xi32>
    %c-858993459_i32 = arith.constant -858993459 : i32
    %37 = vector.broadcast %c-858993459_i32 : i32 to vector<32x1024xi32>
    %38 = arith.cmpi sge, %36, %37 : vector<32x1024xi32>
    %cst_9 = arith.constant 1.42857146 : f32
    %39 = vector.broadcast %cst_9 : f32 to vector<32x1024xf32>
    %40 = arith.mulf %15, %39 : vector<32x1024xf32>
    %cst_10 = arith.constant 0.000000e+00 : f32
    %41 = vector.broadcast %cst_10 : f32 to vector<32x1024xf32>
    %42 = arith.select %38, %40, %41 : vector<32x1024xi1>, vector<32x1024xf32>
    %43 = arith.truncf %42 : vector<32x1024xf32> to vector<32x1024xbf16>
    %c0_11 = arith.constant 0 : index
    %c0_12 = arith.constant 0 : index
    %44 = vector.load %arg5[%c0_11, %c0_12] : memref<1024x512xbf16, #tpu.memory_space<vmem>>, vector<1024x512xbf16>
    %cst_13 = arith.constant dense<0.000000e+00> : vector<32x512xf32>
    %45 = tpu.matmul %43, %44, %cst_13 {dimension_numbers = #tpu.dot_dimension_numbers<[1], [0], [0], [1], [0, 0, 1, 1], [], []>} : vector<32x1024xbf16>, vector<1024x512xbf16>, vector<32x512xf32> -> vector<32x512xf32>
    %c0_14 = arith.constant 0 : index
    %c0_15 = arith.constant 0 : index
    %46 = vector.load %arg6[%c0_14, %c0_15] : memref<1x512xf32, #tpu.memory_space<vmem>>, vector<1x512xf32>
    %47 = vector.broadcast %46 : vector<1x512xf32> to vector<32x512xf32>
    %48 = arith.addf %45, %47 : vector<32x512xf32>
    %cst_16 = arith.constant 0.000000e+00 : f32
    %49 = vector.broadcast %cst_16 : f32 to vector<32x512xf32>
    %50 = arith.cmpf ogt, %48, %49 : vector<32x512xf32>
    %cst_17 = arith.constant 2.000000e-01 : f32
    %51 = vector.broadcast %cst_17 : f32 to vector<32x512xf32>
    %52 = arith.mulf %51, %48 : vector<32x512xf32>
    %53 = arith.select %50, %48, %52 : vector<32x512xi1>, vector<32x512xf32>
    %c1013904242_i32 = arith.constant 1013904242 : i32
    %54 = arith.addi %3, %c1013904242_i32 : i32
    %55 = tpu.iota {dimensions = array<i32: 0>} : vector<32x512xi32>
    %56 = tpu.iota {dimensions = array<i32: 1>} : vector<32x512xi32>
    %c512_i32 = arith.constant 512 : i32
    %57 = vector.broadcast %c512_i32 : i32 to vector<32x512xi32>
    %58 = arith.muli %55, %57 : vector<32x512xi32>
    %59 = arith.addi %58, %56 : vector<32x512xi32>
    %60 = vector.broadcast %54 : i32 to vector<32x512xi32>
    %61 = arith.addi %59, %60 : vector<32x512xi32>
    %c16_i32_18 = arith.constant 16 : i32
    %62 = vector.broadcast %c16_i32_18 : i32 to vector<32x512xi32>
    %63 = arith.shrui %61, %62 : vector<32x512xi32>
    %64 = arith.xori %61, %63 : vector<32x512xi32>
    %c-2048144789_i32_19 = arith.constant -2048144789 : i32
    %65 = vector.broadcast %c-2048144789_i32_19 : i32 to vector<32x512xi32>
    %66 = arith.muli %64, %65 : vector<32x512xi32>
    %c13_i32_20 = arith.constant 13 : i32
    %67 = vector.broadcast %c13_i32_20 : i32 to vector<32x512xi32>
    %68 = arith.shrui %66, %67 : vector<32x512xi32>
    %69 = arith.xori %66, %68 : vector<32x512xi32>
    %c-1028477387_i32_21 = arith.constant -1028477387 : i32
    %70 = vector.broadcast %c-1028477387_i32_21 : i32 to vector<32x512xi32>
    %71 = arith.muli %69, %70 : vector<32x512xi32>
    %c16_i32_22 = arith.constant 16 : i32
    %72 = vector.broadcast %c16_i32_22 : i32 to vector<32x512xi32>
    %73 = arith.shrui %71, %72 : vector<32x512xi32>
    %74 = arith.xori %71, %73 : vector<32x512xi32>
    %c-858993459_i32_23 = arith.constant -858993459 : i32
    %75 = vector.broadcast %c-858993459_i32_23 : i32 to vector<32x512xi32>
    %76 = arith.cmpi sge, %74, %75 : vector<32x512xi32>
    %cst_24 = arith.constant 1.42857146 : f32
    %77 = vector.broadcast %cst_24 : f32 to vector<32x512xf32>
    %78 = arith.mulf %53, %77 : vector<32x512xf32>
    %cst_25 = arith.constant 0.000000e+00 : f32
    %79 = vector.broadcast %cst_25 : f32 to vector<32x512xf32>
    %80 = arith.select %76, %78, %79 : vector<32x512xi1>, vector<32x512xf32>
    %81 = arith.truncf %80 : vector<32x512xf32> to vector<32x512xbf16>
    %c0_26 = arith.constant 0 : index
    %c0_27 = arith.constant 0 : index
    %82 = vector.load %arg7[%c0_26, %c0_27] : memref<512x256xbf16, #tpu.memory_space<vmem>>, vector<512x256xbf16>
    %cst_28 = arith.constant dense<0.000000e+00> : vector<32x256xf32>
    %83 = tpu.matmul %81, %82, %cst_28 {dimension_numbers = #tpu.dot_dimension_numbers<[1], [0], [0], [1], [0, 0, 1, 1], [], []>} : vector<32x512xbf16>, vector<512x256xbf16>, vector<32x256xf32> -> vector<32x256xf32>
    %c0_29 = arith.constant 0 : index
    %c0_30 = arith.constant 0 : index
    %84 = vector.load %arg8[%c0_29, %c0_30] : memref<1x256xf32, #tpu.memory_space<vmem>>, vector<1x256xf32>
    %85 = vector.broadcast %84 : vector<1x256xf32> to vector<32x256xf32>
    %86 = arith.addf %83, %85 : vector<32x256xf32>
    %cst_31 = arith.constant 0.000000e+00 : f32
    %87 = vector.broadcast %cst_31 : f32 to vector<32x256xf32>
    %88 = arith.cmpf ogt, %86, %87 : vector<32x256xf32>
    %cst_32 = arith.constant 2.000000e-01 : f32
    %89 = vector.broadcast %cst_32 : f32 to vector<32x256xf32>
    %90 = arith.mulf %89, %86 : vector<32x256xf32>
    %91 = arith.select %88, %86, %90 : vector<32x256xi1>, vector<32x256xf32>
    %c-626627285_i32 = arith.constant -626627285 : i32
    %92 = arith.addi %3, %c-626627285_i32 : i32
    %93 = tpu.iota {dimensions = array<i32: 0>} : vector<32x256xi32>
    %94 = tpu.iota {dimensions = array<i32: 1>} : vector<32x256xi32>
    %c256_i32 = arith.constant 256 : i32
    %95 = vector.broadcast %c256_i32 : i32 to vector<32x256xi32>
    %96 = arith.muli %93, %95 : vector<32x256xi32>
    %97 = arith.addi %96, %94 : vector<32x256xi32>
    %98 = vector.broadcast %92 : i32 to vector<32x256xi32>
    %99 = arith.addi %97, %98 : vector<32x256xi32>
    %c16_i32_33 = arith.constant 16 : i32
    %100 = vector.broadcast %c16_i32_33 : i32 to vector<32x256xi32>
    %101 = arith.shrui %99, %100 : vector<32x256xi32>
    %102 = arith.xori %99, %101 : vector<32x256xi32>
    %c-2048144789_i32_34 = arith.constant -2048144789 : i32
    %103 = vector.broadcast %c-2048144789_i32_34 : i32 to vector<32x256xi32>
    %104 = arith.muli %102, %103 : vector<32x256xi32>
    %c13_i32_35 = arith.constant 13 : i32
    %105 = vector.broadcast %c13_i32_35 : i32 to vector<32x256xi32>
    %106 = arith.shrui %104, %105 : vector<32x256xi32>
    %107 = arith.xori %104, %106 : vector<32x256xi32>
    %c-1028477387_i32_36 = arith.constant -1028477387 : i32
    %108 = vector.broadcast %c-1028477387_i32_36 : i32 to vector<32x256xi32>
    %109 = arith.muli %107, %108 : vector<32x256xi32>
    %c16_i32_37 = arith.constant 16 : i32
    %110 = vector.broadcast %c16_i32_37 : i32 to vector<32x256xi32>
    %111 = arith.shrui %109, %110 : vector<32x256xi32>
    %112 = arith.xori %109, %111 : vector<32x256xi32>
    %c-858993459_i32_38 = arith.constant -858993459 : i32
    %113 = vector.broadcast %c-858993459_i32_38 : i32 to vector<32x256xi32>
    %114 = arith.cmpi sge, %112, %113 : vector<32x256xi32>
    %cst_39 = arith.constant 1.42857146 : f32
    %115 = vector.broadcast %cst_39 : f32 to vector<32x256xf32>
    %116 = arith.mulf %91, %115 : vector<32x256xf32>
    %cst_40 = arith.constant 0.000000e+00 : f32
    %117 = vector.broadcast %cst_40 : f32 to vector<32x256xf32>
    %118 = arith.select %114, %116, %117 : vector<32x256xi1>, vector<32x256xf32>
    %119 = arith.truncf %118 : vector<32x256xf32> to vector<32x256xbf16>
    %c0_41 = arith.constant 0 : index
    %c0_42 = arith.constant 0 : index
    %120 = vector.load %arg9[%c0_41, %c0_42] : memref<256x128xbf16, #tpu.memory_space<vmem>>, vector<256x128xbf16>
    %cst_43 = arith.constant dense<0.000000e+00> : vector<32x128xf32>
    %121 = tpu.matmul %119, %120, %cst_43 {dimension_numbers = #tpu.dot_dimension_numbers<[1], [0], [0], [1], [0, 0, 1, 1], [], []>} : vector<32x256xbf16>, vector<256x128xbf16>, vector<32x128xf32> -> vector<32x128xf32>
    %c0_44 = arith.constant 0 : index
    %c0_45 = arith.constant 0 : index
    %122 = vector.load %arg10[%c0_44, %c0_45] : memref<1x128xf32, #tpu.memory_space<vmem>>, vector<1x128xf32>
    %123 = vector.broadcast %122 : vector<1x128xf32> to vector<32x128xf32>
    %124 = arith.addf %121, %123 : vector<32x128xf32>
    %cst_46 = arith.constant 0.000000e+00 : f32
    %125 = vector.broadcast %cst_46 : f32 to vector<32x128xf32>
    %126 = arith.subf %125, %124 : vector<32x128xf32>
    %127 = math.exp %126 : vector<32x128xf32>
    %cst_47 = arith.constant 1.000000e+00 : f32
    %128 = vector.broadcast %cst_47 : f32 to vector<32x128xf32>
    %129 = arith.addf %128, %127 : vector<32x128xf32>
    %cst_48 = arith.constant 1.000000e+00 : f32
    %130 = vector.broadcast %cst_48 : f32 to vector<32x128xf32>
    %131 = arith.divf %130, %129 : vector<32x128xf32>
    %c0_49 = arith.constant 0 : index
    %c0_50 = arith.constant 0 : index
    %132 = vector.load %arg11[%c0_49, %c0_50] : memref<32x128xf32, #tpu.memory_space<vmem>>, vector<32x128xf32>
    tpu.vector_store %arg11[%c0_49, %c0_50], %131 {strides = array<i32>} : memref<32x128xf32, #tpu.memory_space<vmem>>, vector<32x128xf32>,
    return
  }
  func.func @transform_0(%arg0: i32, %arg1: memref<1xi32, #tpu.memory_space<smem>>) -> (i32, i32) {
    %c0_i32 = arith.constant 0 : i32
    %c0_i32_0 = arith.constant 0 : i32
    return %arg0, %c0_i32 : i32, i32
  }
  func.func @transform_1(%arg0: i32, %arg1: memref<1xi32, #tpu.memory_space<smem>>) -> (i32, i32) {
    %c0_i32 = arith.constant 0 : i32
    %c0_i32_0 = arith.constant 0 : i32
    %c0_i32_1 = arith.constant 0 : i32
    return %c0_i32, %c0_i32_0 : i32, i32
  }
  func.func @transform_2(%arg0: i32, %arg1: memref<1xi32, #tpu.memory_space<smem>>) -> (i32, i32) {
    %c0_i32 = arith.constant 0 : i32
    %c0_i32_0 = arith.constant 0 : i32
    %c0_i32_1 = arith.constant 0 : i32
    return %c0_i32, %c0_i32_0 : i32, i32
  }
  func.func @transform_3(%arg0: i32, %arg1: memref<1xi32, #tpu.memory_space<smem>>) -> (i32, i32) {
    %c0_i32 = arith.constant 0 : i32
    %c0_i32_0 = arith.constant 0 : i32
    %c0_i32_1 = arith.constant 0 : i32
    return %c0_i32, %c0_i32_0 : i32, i32
  }
  func.func @transform_4(%arg0: i32, %arg1: memref<1xi32, #tpu.memory_space<smem>>) -> (i32, i32) {
    %c0_i32 = arith.constant 0 : i32
    %c0_i32_0 = arith.constant 0 : i32
    %c0_i32_1 = arith.constant 0 : i32
    return %c0_i32, %c0_i32_0 : i32, i32
  }
  func.func @transform_5(%arg0: i32, %arg1: memref<1xi32, #tpu.memory_space<smem>>) -> (i32, i32) {
    %c0_i32 = arith.constant 0 : i32
    %c0_i32_0 = arith.constant 0 : i32
    %c0_i32_1 = arith.constant 0 : i32
    return %c0_i32, %c0_i32_0 : i32, i32
  }
  func.func @transform_6(%arg0: i32, %arg1: memref<1xi32, #tpu.memory_space<smem>>) -> (i32, i32) {
    %c0_i32 = arith.constant 0 : i32
    %c0_i32_0 = arith.constant 0 : i32
    %c0_i32_1 = arith.constant 0 : i32
    return %c0_i32, %c0_i32_0 : i32, i32
  }
  func.func @transform_7(%arg0: i32, %arg1: memref<1xi32, #tpu.memory_space<smem>>) -> (i32, i32) {
    %c0_i32 = arith.constant 0 : i32
    %c0_i32_0 = arith.constant 0 : i32
    %c0_i32_1 = arith.constant 0 : i32
    return %c0_i32, %c0_i32_0 : i32, i32
  }
  func.func @transform_8(%arg0: i32, %arg1: memref<1xi32, #tpu.memory_space<smem>>) -> (i32, i32) {
    %c0_i32 = arith.constant 0 : i32
    %c0_i32_0 = arith.constant 0 : i32
    %c0_i32_1 = arith.constant 0 : i32
    return %c0_i32, %c0_i32_0 : i32, i32
  }
  func.func @transform_9(%arg0: i32, %arg1: memref<1xi32, #tpu.memory_space<smem>>) -> (i32, i32) {
    %c0_i32 = arith.constant 0 : i32
    %c0_i32_0 = arith.constant 0 : i32
    return %arg0, %c0_i32 : i32, i32
  }
}

</mosaic_0001>

<bundles_post_ra>
// kernel: discriminator_forward.1
= control target key start
LH: loop header
LB: loop body
LE: loop exit
PB: predicated region body
PF: predicated region fallthrough
CT: control target
= control target key end

     0   :  { %s11156_s0 = inlined_call_operand.<no memory space> [shape: s32[1], index: 0, kind: input, shape index: {}]   ;;  %s11157_s1 = inlined_call_operand.hbm [shape: f32[64,384], index: 1, kind: input, shape index: {}]   ;;  %s11158_s2 = inlined_call_operand.hbm [shape: bf16[384,1024], index: 2, kind: input, shape index: {}]   ;;  %s11159_s3 = inlined_call_operand.hbm [shape: f32[1,1024], index: 3, kind: input, shape index: {}]   ;;  %s11160_s4 = inlined_call_operand.hbm [shape: bf16[1024,512], index: 4, kind: input, shape index: {}]   ;;  %s11161_s5 = inlined_call_operand.vmem [shape: f32[1,512], index: 5, kind: input, shape index: {}]   ;;  %s11162_s6 = inlined_call_operand.hbm [shape: bf16[512,256], index: 6, kind: input, shape index: {}]   ;;  %s11163_s7 = inlined_call_operand.vmem [shape: f32[1,256], index: 7, kind: input, shape index: {}]   ;;  %s11164_s8 = inlined_call_operand.hbm [shape: bf16[256,128], index: 8, kind: input, shape index: {}]   ;;  %s11165_s9 = inlined_call_operand.vmem [shape: f32[1,128], index: 9, kind: input, shape index: {}]   ;;  %s11166_s10 = inlined_call_operand.vmem [shape: f32[64,128], index: 10, kind: output, shape index: {}]  }
   0x1   :  { %11213 = sst [smem:[#allocation50_spill]] %s11158_s2 }
   0x2   :  { %11214 = sst [smem:[#allocation51_spill]] %s11160_s4 }
   0x3   :  { %15 = sst [smem:[#allocation3]] %s11156_s0 }
   0x4   :  { %16 = vsyncpa [#allocation5], 0 }
   0x5   :  { %18 = vsyncpa [#allocation5 + $0x1], 0 }
   0x6   :  { %19 = vsyncpa [#allocation7], 0 }
   0x7   :  { %20 = vsyncpa [#allocation10], 0 }
   0x8   :  { %21 = vsyncpa [#allocation13], 0  ;;  %s9459_s15 = smov 0   ;;  %s9461_s16 = smov 0  }
   0x9   :  { %s9463_s17 = smov 0   ;;  %s9465_s18 = smov 0  }
   0xa LB: > { %s11215_s2 = sld [smem:[#allocation50_spill]]  ;;  %s9483_s21 = sadd.s32 4294967295, %s9384_s18   ;;  %s9384_s18 = sphi %s9465_s18, %s11363_s18   ;;  %s9380_s17 = sphi %s9463_s17, %s11362_s17   ;;  %s9376_s16 = sphi %s9461_s16, %s11361_s16   ;;  %s9372_s15 = sphi %s9459_s15, %s11360_s15  }
   0xb   : > { %p6108_p0 = scmp.ge.s32.totalorder %s9384_s18, 1  ;;  %p48_p1 = scmp.eq.s32.totalorder %s9483_s21, 0 }
   0xc   : > { %p252_p2 = scmp.lt.s32.totalorder %s9384_s18, 3  ;;  %s9386_s23 = smov [#allocation6]  }
   0xd   : > { %s265_s24 = sshll.u32 %s9386_s23, 4  ;;  %s11217_s4 = sld [smem:[#allocation51_spill]]  ;;  %s266_s24 = int_to_ptr.vmem [resolvable:$true] %s265_s24 }
   0xe   : > { %p9488_p3 = pnand %p6108_p0, %p252_p2  ;;  %s9387_s29 = smov [#allocation9]  }
   0xf   : > { %s291_s30 = sshll.u32 %s9387_s29, 4  ;;  %s9388_s11 = smov 512   ;;  %s292_s30 = int_to_ptr.vmem [resolvable:$true] %s291_s30 }
  0x10   : > { %s263_s20 = sshll.u32 %s11215_s2, 4  ;;  %p9061_p4 = pneg %p9488_p3  ;;  %s264_s20 = int_to_ptr.hbm [resolvable:$true] %s263_s20 }
  0x11   : > { %s9389_s12 = smov 32   ;;  %s9390_s13 = smov 256  }
  0x12   : > { %p9499_p5 = pnand %p9061_p4, %p48_p1  ;;  %s9391_s14 = smov 16  }
  0x13   : > { %s289_s27 = sshll.u32 %s11217_s4, 4  ;;  %s278_s23 = sshll.u32 %s11159_s3, 4  ;;  %s290_s27 = int_to_ptr.hbm [resolvable:$true] %s289_s27  ;;  %s279_s23 = int_to_ptr.hbm [resolvable:$true] %s278_s23 }
  0x14   : > { %9064 = dma.hbm_to_vmem [thread:$0]  (!%p9499_p5), %s264_s20, 24576, %s266_s24, [#allocation7], %s9388_s11, %s9388_s11, %s9389_s12  }
  0x15   : > { %9070 = dma.hbm_to_vmem [thread:$0]  (!%p9499_p5), %s290_s27, 32768, %s292_s30, [#allocation10], %s9390_s13, %s9390_s13, %s9391_s14  }
  0x16   : > { %s9392_s25 = smov [#allocation8]   ;;  %s306_s4 = sshll.u32 %s11162_s6, 4  ;;  %s307_s4 = int_to_ptr.hbm [resolvable:$true] %s306_s4 }
  0x17   : > { %s280_s26 = sshll.u32 %s9392_s25, 4  ;;  %s9393_s20 = smov [#allocation11]   ;;  %s281_s26 = int_to_ptr.vmem [resolvable:$true] %s280_s26 }
  0x18   : > { %9067 = dma.hbm_to_vmem [thread:$0]  (!%p9499_p5), %s279_s23, 128, %s281_s26, [#allocation7]  }
  0x19   : > { %s308_s24 = sshll.u32 %s9393_s20, 4  ;;  %s9394_s27 = smov 128   ;;  %s309_s24 = int_to_ptr.vmem [resolvable:$true] %s308_s24 }
  0x1a   : > { %s9395_s30 = smov 8   ;;  %s323_s12 = sshll.u32 %s11164_s8, 4  ;;  %s324_s12 = int_to_ptr.hbm [resolvable:$true] %s323_s12 }
  0x1b   : > { %9073 = dma.hbm_to_vmem [thread:$0]  (!%p9499_p5), %s307_s4, 8192, %s309_s24, [#allocation10], %s9394_s27, %s9394_s27, %s9395_s30  }
  0x1c   : > { %s9396_s13 = smov [#allocation12]   ;;  %s9397_s0 = smov 64  }
  0x1d   : > { %s325_s14 = sshll.u32 %s9396_s13, 4  ;;  %s9398_s19 = smov 4   ;;  %s326_s14 = int_to_ptr.vmem [resolvable:$true] %s325_s14 }
  0x1e   : > { %9076 = dma.hbm_to_vmem [thread:$0]  (!%p9499_p5), %s324_s12, 2048, %s326_s14, [#allocation13], %s9397_s0, %s9397_s0, %s9398_s19  }
  0x1f   : > { %s9523_s23 = sadd.s32 1, %s9384_s18   ;;  %s34_s25 = sadd.s32 1, %s9380_s17 }
  0x20   : > { %s31_s4 = ssub.s32 %s9384_s18, %s9523_s23  ;;  %p41_p7 = scmp.ne.s32.totalorder %s9380_s17, %s9376_s16 }
  0x21   : > { %p32_p6 = scmp.eq.s32.totalorder %s31_s4, 0  ;;  %p42_p8 = scmp.eq.s32.totalorder %s9384_s18, 0 }
  0x22   : > { %p47_p9 = scmp.ne.s32.totalorder %s9376_s16, %s9372_s15  ;;  %p9086_p12 = scmp.lt.s32.totalorder %s9384_s18, 2 }
  0x23   : > { %s9534_s26 = scalar_select %p32_p6, %s9380_s17, %s34_s25  }
  0x24   : > { %p43_p10 = por %p42_p8, %p41_p7  ;;  %p9538_p11 = por %p48_p1, %p47_p9 }
  0x25   : > { %s342_s28 = sand.u32 1, %s9380_s17   ;;  %s9037_s24 = smul.u32 96, %s9384_s18 }
  0x26   : > { %s9036_s20 = smul.u32 96, %s342_s28  ;;  %p9545_p13 = pnand %p9086_p12, %p43_p10 }
  0x27   : > { %s352_s15 = scalar_lea.hbm %s11157_s1, %s9037_s24  ;;  %s343_s14 = scalar_lea.sflag [#allocation5], %s342_s28 }
  0x28   : > { %s346_s11 = scalar_lea.vmem [#allocation4], %s9036_s20  ;;  %s353_s13 = sshll.u32 %s352_s15, 4  ;;  %s354_s13 = int_to_ptr.hbm [resolvable:$true] %s353_s13 }
  0x29   : > { %s355_s12 = sshll.u32 %s346_s11, 4  ;;  %s9308_s0 = sshra.s32 %s354_s13, 4  ;;  %s356_s12 = int_to_ptr.vmem [resolvable:$true] %s355_s12  ;;  %s9309_s0 = int_to_ptr.hbm [resolvable:$true] %s9308_s0 }
  0x2a   : > { %s9310_s19 = scalar_lea.hbm %s9309_s0, 96  ;;  %p9312_p2 = pneg %p9545_p13 }
  0x2b   : > { %p9311_p0 = scmp.ne.s32.totalorder %s9309_s0, %s9310_s19  ;;  %s9315_s25 = scalar_lea.hbm %s11157_s1, 192 }
  0x2c   : > { %p9316_p6 = scmp.lt.s32.totalorder %s9309_s0, %s11157_s1  ;;  %p9317_p7 = scmp.lt.s32.totalorder %s9315_s25, %s9310_s19 }
  0x2d   : > { %p9313_p4 = pnand %p9312_p2, %p9311_p0 }
  0x2e   : > { %p9318_p8 = por %p9317_p7, %p9316_p6 }
  0x2f   : > { %p9314_p5 = pneg %p9313_p4 }
  0x31   : > { %p9319_p9 = pnand %p9318_p8, %p9314_p5 }
  0x33   : > { %9322 = shalt.err (!%p9319_p9)
}
  0x34   : > { %s9399_s28 = smov 384   ;;  %s9400_s20 = smov 24  }
  0x35   : > { %9080 = dma.hbm_to_vmem [thread:$0]  (!%p9545_p13), %s354_s13, 1536, %s356_s12, %s343_s14, %s9399_s28, %s9399_s28, %s9400_s20  }
  0x36   : > { %367 = sbr.rel (%p9488_p3) target bundleno = 1159 (0x487), region = 56 }
  0x3b   : > { %s369_s2 = sand.u32 1, %s9376_s16  }
  0x3c   : > { %s9038_s15 = smul.u32 96, %s369_s2  ;;  %s370_s11 = scalar_lea.sflag [#allocation5], %s369_s2 }
  0x3e   : > { %s9565_s18 = scalar_lea.vmem [#allocation4], %s9038_s15 }
  0x3f   : > { %9355 = dma.done.wait (%p9538_p11), %s370_s11, 1536  }
  0x40   : > { %9357 = vsyncadd (%p9538_p11), %s370_s11, 4294965760 }
  0x41   : > { %9359 = dma.done.wait (%p48_p1), [#allocation7], 24704  }
  0x42   : > { %9361 = vsyncadd (%p48_p1), [#allocation7], 4294942592 }
  0x43   : > { %9363 = dma.done.wait (%p48_p1), [#allocation10], 40960  }
  0x44   : > { %9365 = vsyncadd (%p48_p1), [#allocation10], 4294926336 }
  0x45   : > { %9367 = dma.done.wait (%p48_p1), [#allocation13], 2048  }
  0x46   : > { %9369 = vsyncadd (%p48_p1), [#allocation13], 4294965248  ;;  %v6352_v0 = vld [vmem:[#allocation6 + $0x1c0] sm:$0xf]  ;;  %v8548_v9 = vld [vmem:[#allocation6 + $0x1c4] sm:$0xf] }
  0x47   : > { %v8552_v1 = vld [vmem:[#allocation6 + $0x1dc] sm:$0xf0]  ;;  %v6354_v10 = vld [vmem:[#allocation6 + $0x1e0] sm:$0xf0]  ;;  %s9635_s22 = sld [smem:[#allocation3]]  ;;  %s6124_s15 = sshll.u32 %s9483_s21, 2 }
  0x48   : > { %v6608_v2 = vld [vmem:[#allocation6 + $0x3c0] sm:$0xf]  ;;  %v6353_v3 = vor.u32 %v8552_v1, %v6352_v0  ;;  %v6357_v12 = vor.u32 %v8548_v9, %v6354_v10  ;;  %v8540_v20 = vld [vmem:[#allocation6 + $0x184] sm:$0xf]  ;;  %s443_s29 = smul.u32 668265263, %s9483_s21 }
  0x49   : > { %v8616_v4 = vld [vmem:[#allocation6 + $0x3dc] sm:$0xf0]  ;;  %v6322_v22 = vld [vmem:[#allocation6 + $0x1a0] sm:$0xf0]  ;;  %p436_p1 = scmp.lt.s32.totalorder %s6124_s15, 7 }
  0x4a   : > { %v6864_v5 = vld [vmem:[#allocation6 + $0x5c0] sm:$0xf]  ;;  %v6609_v7 = vor.u32 %v8616_v4, %v6608_v2  ;;  %1633 = vmatpush.bf16.msra.mxu0 %v6353_v3  ;;  %1690 = vmatpush.bf16.msra.mxu3 %v6357_v12  ;;  %v6325_v25 = vor.u32 %v8540_v20, %v6322_v22  ;;  %v8532_v31 = vld [vmem:[#allocation6 + $0x144] sm:$0xf] }
  0x4b   : > { %v8680_v6 = vld [vmem:[#allocation6 + $0x5dc] sm:$0xf0]  ;;  %v6290_v32 = vld [vmem:[#allocation6 + $0x160] sm:$0xf0]  ;;  %s11365_s15 = smov (!%p436_p1, %s6124_s15), 7 }
  0x4c   : > { %v6865_v8 = vor.u32 %v8680_v6, %v6864_v5  ;;  %v6320_v11 = vld [vmem:[#allocation6 + $0x180] sm:$0xf]  ;;  %1652 = vmatpush.bf16.msra.mxu1 %v6609_v7  ;;  %v6293_v38 = vor.u32 %v8532_v31, %v6290_v32  ;;  %v8524_v42 = vld [vmem:[#allocation6 + $0x104] sm:$0xf]  ;;  %v8553_v31 = vld [vmem:[#allocation6 + $0x1e4] sm:$0xf0] }
  0x4d   : > { %v8544_v13 = vld [vmem:[#allocation6 + $0x19c] sm:$0xf0]  ;;  %v6258_v43 = vld [vmem:[#allocation6 + $0x120] sm:$0xf0]  ;;  %s442_s27 = smul.u32 2654435761, %s9635_s22 }
  0x4e   : > { %v6576_v14 = vld [vmem:[#allocation6 + $0x380] sm:$0xf]  ;;  %1671 = vmatpush.bf16.msra.mxu2 %v6865_v8  ;;  %v6321_v16 = vor.u32 %v8544_v13, %v6320_v11  ;;  %1691 = vmatpush.bf16.msra.mxu3 %v6325_v25  ;;  %v6261_v50 = vor.u32 %v8524_v42, %v6258_v43  ;;  %v8516_v54 = vld [vmem:[#allocation6 + $0xc4] sm:$0xf]  ;;  %s6125_s11 = sshll.u32 %s11365_s15, 3 }
  0x4f   : > { %v8608_v15 = vld [vmem:[#allocation6 + $0x39c] sm:$0xf0]  ;;  %v6226_v55 = vld [vmem:[#allocation6 + $0xe0] sm:$0xf0]  ;;  %s9648_s12 = sadd.s32 %s443_s29, %s442_s27  ;;  %s11137_s22 = scalar_lea.vmem %s11166_s10, %s6125_s11 }
  0x50   : > { %v6577_v17 = vor.u32 %v8608_v15, %v6576_v14  ;;  %v6832_v18 = vld [vmem:[#allocation6 + $0x580] sm:$0xf]  ;;  %1634 = vmatpush.bf16.msra.mxu0 %v6321_v16  ;;  %v6229_v62 = vor.u32 %v8516_v54, %v6226_v55  ;;  %v8508_v2 = vld [vmem:[#allocation6 + $0x84] sm:$0xf]  ;;  %s2185_s13 = sadd.s32 2654435769, %s9648_s12 }
  0x51   : > { %v8672_v19 = vld [vmem:[#allocation6 + $0x59c] sm:$0xf0]  ;;  %v6194_v3 = vld [vmem:[#allocation6 + $0xa0] sm:$0xf0]  ;;  %s4839_s14 = sadd.s32 1013904242, %s9648_s12 }
  0x52   : > { %v6833_v21 = vor.u32 %v8672_v19, %v6832_v18  ;;  %v6288_v23 = vld [vmem:[#allocation6 + $0x140] sm:$0xf]  ;;  %1653 = vmatpush.bf16.msra.mxu1 %v6577_v17  ;;  %1692 = vmatpush.bf16.msra.mxu3 %v6293_v38  ;;  %v6197_v10 = vor.u32 %v8508_v2, %v6194_v3  ;;  %v8500_v14 = vld [vmem:[#allocation6 + $0x44] sm:$0xf]  ;;  %s5627_s30 = sadd.s32 3668340011, %s9648_s12 }
  0x53   : > { %v8536_v24 = vld [vmem:[#allocation6 + $0x15c] sm:$0xf0]  ;;  %v6162_v15 = vld [vmem:[#allocation6 + $0x60] sm:$0xf0] }
  0x54   : > { %v6544_v26 = vld [vmem:[#allocation6 + $0x340] sm:$0xf]  ;;  %v6289_v29 = vor.u32 %v8536_v24, %v6288_v23  ;;  %1672 = vmatpush.bf16.msra.mxu2 %v6833_v21  ;;  %v6165_v25 = vor.u32 %v8500_v14, %v6162_v15  ;;  %v8612_v43 = vld [vmem:[#allocation6 + $0x3c4] sm:$0xf] }
  0x55   : > { %v8600_v27 = vld [vmem:[#allocation6 + $0x35c] sm:$0xf0]  ;;  %v6834_v54 = vld [vmem:[#allocation6 + $0x5a0] sm:$0xf0] }
  0x56   : > { %v6800_v28 = vld [vmem:[#allocation6 + $0x540] sm:$0xf]  ;;  %v6545_v33 = vor.u32 %v8600_v27, %v6544_v26  ;;  %1635 = vmatpush.bf16.msra.mxu0 %v6289_v29  ;;  %1693 = vmatpush.bf16.msra.mxu3 %v6261_v50  ;;  %v8492_v26 = vld [vmem:[#allocation6 + $0x4] sm:$0xf]  ;;  %v448_v29 = vld [vmem:[%s9565_s18 + $0x18] sm:$0xff] }
  0x57   : > { %v8664_v30 = vld [vmem:[#allocation6 + $0x55c] sm:$0xf0]  ;;  %v6130_v27 = vld [vmem:[#allocation6 + $0x20] sm:$0xf0]  ;;  %v8545_v50 = vld [vmem:[#allocation6 + $0x1a4] sm:$0xf0] }
  0x58   : > { %v6801_v34 = vor.u32 %v8664_v30, %v6800_v28  ;;  %v6256_v35 = vld [vmem:[#allocation6 + $0x100] sm:$0xf]  ;;  %1654 = vmatpush.bf16.msra.mxu1 %v6545_v33  ;;  %v6360_v30 = vld [vmem:[#allocation6 + $0x1c8] sm:$0xf]  ;;  %v6802_v2 = vld [vmem:[#allocation6 + $0x560] sm:$0xf0] }
  0x59   : > { %v8528_v36 = vld [vmem:[#allocation6 + $0x11c] sm:$0xf0]  ;;  %v446_v33 = vld [vmem:[%s9565_s18 + $0x8] sm:$0xff]  ;;  %v6361_v42 = vor.u32 %v8553_v31, %v6360_v30  ;;  %v6770_v14 = vld [vmem:[#allocation6 + $0x520] sm:$0xf0] }
  0x5a   : > { %v6512_v37 = vld [vmem:[#allocation6 + $0x300] sm:$0xf]  ;;  %v6257_v44 = vor.u32 %v8528_v36, %v6256_v35  ;;  %1673 = vmatpush.bf16.msra.mxu2 %v6801_v34  ;;  %1694 = vmatpush.bf16.msra.mxu3 %v6229_v62  ;;  %v8676_v34 = vld [vmem:[#allocation6 + $0x5c4] sm:$0xf]  ;;  %v8609_v62 = vld [vmem:[#allocation6 + $0x3a4] sm:$0xf0] }
  0x5b   : > { %v8592_v39 = vld [vmem:[#allocation6 + $0x31c] sm:$0xf0]  ;;  %v6866_v35 = vld [vmem:[#allocation6 + $0x5e0] sm:$0xf0]  ;;  %v455_v31 = vld [vmem:[%s9565_s18 + $0x50] sm:$0xff] }
  0x5c   : > { %v6768_v40 = vld [vmem:[#allocation6 + $0x500] sm:$0xf]  ;;  %v6513_v45 = vor.u32 %v8592_v39, %v6512_v37  ;;  %1636 = vmatpush.bf16.msra.mxu0 %v6257_v44  ;;  %v447_v39 = vld [vmem:[%s9565_s18 + $0x10] sm:$0xff]  ;;  %v6610_v44 = vld [vmem:[#allocation6 + $0x3e0] sm:$0xf0] }
  0x5d   : > { %v8656_v41 = vld [vmem:[#allocation6 + $0x51c] sm:$0xf0]  ;;  %v6613_v55 = vor.u32 %v8612_v43, %v6610_v44  ;;  %v8513_v43 = vld [vmem:[#allocation6 + $0xa4] sm:$0xf0] }
  0x5e   : > { %v6769_v46 = vor.u32 %v8656_v41, %v6768_v40  ;;  %v6224_v47 = vld [vmem:[#allocation6 + $0xc0] sm:$0xf]  ;;  %1655 = vmatpush.bf16.msra.mxu1 %v6513_v45  ;;  %1695 = vmatpush.bf16.msra.mxu3 %v6197_v10  ;;  %v450_v40 = vld [vmem:[%s9565_s18 + $0x28] sm:$0xff]  ;;  %v6133_v41 = vor.u32 %v8492_v26, %v6130_v27  ;;  %v452_v27 = vld [vmem:[%s9565_s18 + $0x38] sm:$0xff] }
  0x5f   : > { %v8520_v48 = vld [vmem:[#allocation6 + $0xdc] sm:$0xf0]  ;;  %v6616_v45 = vld [vmem:[#allocation6 + $0x3c8] sm:$0xf]  ;;  %v9607_v44 = vpack.c.bf16 %v455_v31, %v452_v27 }
  0x60   : > { %v6480_v49 = vld [vmem:[#allocation6 + $0x2c0] sm:$0xf]  ;;  %v6225_v56 = vor.u32 %v8520_v48, %v6224_v47  ;;  %1674 = vmatpush.bf16.msra.mxu2 %v6769_v46  ;;  %v6869_v47 = vor.u32 %v8676_v34, %v6866_v35  ;;  %v8617_v48 = vld [vmem:[#allocation6 + $0x3e4] sm:$0xf0] }
  0x61   : > { %v8584_v51 = vld [vmem:[#allocation6 + $0x2dc] sm:$0xf0]  ;;  %v8601_v10 = vld [vmem:[#allocation6 + $0x364] sm:$0xf0]  ;;  %11222 = vst [vmem:[#allocation19_spill] sm:$0xff] %v9607_v44 }
  0x62   : > { %v6736_v52 = vld [vmem:[#allocation6 + $0x4c0] sm:$0xf]  ;;  %v6481_v57 = vor.u32 %v8584_v51, %v6480_v49  ;;  %1637 = vmatpush.bf16.msra.mxu0 %v6225_v56  ;;  %1696 = vmatpush.bf16.msra.mxu3 %v6165_v25  ;;  %v6328_v49 = vld [vmem:[#allocation6 + $0x188] sm:$0xf]  ;;  %v6617_v56 = vor.u32 %v8617_v48, %v6616_v45  ;;  %v6706_v48 = vld [vmem:[#allocation6 + $0x4a0] sm:$0xf0] }
  0x63   : > { %v8648_v53 = vld [vmem:[#allocation6 + $0x4dc] sm:$0xf0]  ;;  %v6232_v25 = vld [vmem:[#allocation6 + $0xc8] sm:$0xf] }
  0x64   : > { %v6737_v58 = vor.u32 %v8648_v53, %v6736_v52  ;;  %v6192_v59 = vld [vmem:[#allocation6 + $0x80] sm:$0xf]  ;;  %1656 = vmatpush.bf16.msra.mxu1 %v6481_v57  ;;  %v9593_v52 = vpack.c.bf16 %v450_v40, %v447_v39  ;;  %v8668_v53 = vld [vmem:[#allocation6 + $0x584] sm:$0xf]  ;;  %v6329_v57 = vor.u32 %v8545_v50, %v6328_v49  ;;  %v8521_v26 = vld [vmem:[#allocation6 + $0xe4] sm:$0xf0] }
  0x65   : > { %v8512_v60 = vld [vmem:[#allocation6 + $0x9c] sm:$0xf0]  ;;  %v6233_v35 = vor.u32 %v8521_v26, %v6232_v25  ;;  %v8681_v25 = vld [vmem:[#allocation6 + $0x5e4] sm:$0xf0]  ;;  %v8677_v26 = vld [vmem:[#allocation6 + $0x5cc] sm:$0xf] }
  0x66   : > { %v6448_v61 = vld [vmem:[#allocation6 + $0x280] sm:$0xf]  ;;  %v6193_v4 = vor.u32 %v8512_v60, %v6192_v59  ;;  %1675 = vmatpush.bf16.msra.mxu2 %v6737_v58  ;;  %1697 = vmatpush.bf16.msra.mxu3 %v6133_v41  ;;  %v8604_v58 = vld [vmem:[#allocation6 + $0x384] sm:$0xf]  ;;  %v6584_v60 = vld [vmem:[#allocation6 + $0x388] sm:$0xf] }
  0x67   : > { %v8576_v63 = vld [vmem:[#allocation6 + $0x29c] sm:$0xf0]  ;;  %v6578_v59 = vld [vmem:[#allocation6 + $0x3a0] sm:$0xf0]  ;;  %v8585_v41 = vld [vmem:[#allocation6 + $0x2e4] sm:$0xf0] }
  0x68   : > { %v6704_v0 = vld [vmem:[#allocation6 + $0x480] sm:$0xf]  ;;  %v6449_v5 = vor.u32 %v8576_v63, %v6448_v61  ;;  %1638 = vmatpush.bf16.msra.mxu0 %v6193_v4  ;;  %v6837_v61 = vor.u32 %v8668_v53, %v6834_v54  ;;  %v6296_v63 = vld [vmem:[#allocation6 + $0x148] sm:$0xf]  ;;  %v6581_v3 = vor.u32 %v8604_v58, %v6578_v59  ;;  %v6585_v4 = vor.u32 %v8609_v62, %v6584_v60  ;;  %v8572_v54 = vld [vmem:[#allocation6 + $0x284] sm:$0xf] }
  0x69   : > { %v8640_v1 = vld [vmem:[#allocation6 + $0x49c] sm:$0xf0]  ;;  %v8577_v58 = vld [vmem:[#allocation6 + $0x2a4] sm:$0xf0]  ;;  %v6674_v62 = vld [vmem:[#allocation6 + $0x460] sm:$0xf0] }
  0x6a   : > { %v6705_v6 = vor.u32 %v8640_v1, %v6704_v0  ;;  %v6160_v7 = vld [vmem:[#allocation6 + $0x40] sm:$0xf]  ;;  %1657 = vmatpush.bf16.msra.mxu1 %v6449_v5  ;;  %v8537_v0 = vld [vmem:[#allocation6 + $0x164] sm:$0xf0]  ;;  %v8660_v1 = vld [vmem:[#allocation6 + $0x544] sm:$0xf]  ;;  %1766 = vmatpush.bf16.msrb.mxu3 %v6617_v56 }
  0x6b   : > { %v8504_v8 = vld [vmem:[#allocation6 + $0x5c] sm:$0xf0]  ;;  %v6297_v5 = vor.u32 %v8537_v0, %v6296_v63  ;;  %v6456_v56 = vld [vmem:[#allocation6 + $0x288] sm:$0xf]  ;;  %v8564_v0 = vld [vmem:[#allocation6 + $0x244] sm:$0xf] }
  0x6c   : > { %v6416_v9 = vld [vmem:[#allocation6 + $0x240] sm:$0xf]  ;;  %v6161_v16 = vor.u32 %v8504_v8, %v6160_v7  ;;  %1676 = vmatpush.bf16.msra.mxu2 %v6705_v6  ;;  %v8596_v6 = vld [vmem:[#allocation6 + $0x344] sm:$0xf]  ;;  %v6552_v8 = vld [vmem:[#allocation6 + $0x348] sm:$0xf] }
  0x6d   : > { %v8568_v11 = vld [vmem:[#allocation6 + $0x25c] sm:$0xf0]  ;;  %v6546_v7 = vld [vmem:[#allocation6 + $0x360] sm:$0xf0]  ;;  %v6168_v59 = vld [vmem:[#allocation6 + $0x48] sm:$0xf] }
  0x6e   : > { %v6672_v12 = vld [vmem:[#allocation6 + $0x440] sm:$0xf]  ;;  %v6417_v20 = vor.u32 %v8568_v11, %v6416_v9  ;;  %1639 = vmatpush.bf16.msra.mxu0 %v6161_v16  ;;  %v6805_v9 = vor.u32 %v8660_v1, %v6802_v2  ;;  %v6264_v11 = vld [vmem:[#allocation6 + $0x108] sm:$0xf]  ;;  %v6549_v15 = vor.u32 %v8596_v6, %v6546_v7  ;;  %v8588_v16 = vld [vmem:[#allocation6 + $0x304] sm:$0xf]  ;;  %1767 = vmatpush.bf16.msrb.mxu3 %v6585_v4 }
  0x6f   : > { %v8632_v13 = vld [vmem:[#allocation6 + $0x45c] sm:$0xf0]  ;;  %v8505_v60 = vld [vmem:[#allocation6 + $0x64] sm:$0xf0]  ;;  %v6457_v1 = vor.u32 %v8577_v58, %v6456_v56  ;;  %v8533_v56 = vld [vmem:[#allocation6 + $0x14c] sm:$0xf] }
  0x70   : > { %v6128_v17 = vld [vmem:[#allocation6] sm:$0xf]  ;;  %v6673_v21 = vor.u32 %v8632_v13, %v6672_v12  ;;  %1658 = vmatpush.bf16.msra.mxu1 %v6417_v20  ;;  %v8529_v12 = vld [vmem:[#allocation6 + $0x124] sm:$0xf0]  ;;  %v8652_v13 = vld [vmem:[#allocation6 + $0x504] sm:$0xf]  ;;  %v6169_v2 = vor.u32 %v8505_v60, %v6168_v59 }
  0x71   : > { %v8496_v18 = vld [vmem:[#allocation6 + $0x1c] sm:$0xf0]  ;;  %v6520_v20 = vld [vmem:[#allocation6 + $0x308] sm:$0xf]  ;;  %v8661_v58 = vld [vmem:[#allocation6 + $0x54c] sm:$0xf] }
  0x72   : > { %v6384_v19 = vld [vmem:[#allocation6 + $0x200] sm:$0xf]  ;;  %v6129_v32 = vor.u32 %v8496_v18, %v6128_v17  ;;  %1677 = vmatpush.bf16.msra.mxu2 %v6673_v21  ;;  %v6514_v17 = vld [vmem:[#allocation6 + $0x320] sm:$0xf0]  ;;  %v6553_v18 = vor.u32 %v8601_v10, %v6552_v8  ;;  %v8593_v21 = vld [vmem:[#allocation6 + $0x324] sm:$0xf0] }
  0x73   : > { %v8560_v22 = vld [vmem:[#allocation6 + $0x21c] sm:$0xf0]  ;;  %v6517_v30 = vor.u32 %v8588_v16, %v6514_v17  ;;  %v6521_v34 = vor.u32 %v8593_v21, %v6520_v20  ;;  %v6424_v4 = vld [vmem:[#allocation6 + $0x248] sm:$0xf]  ;;  %v6642_v10 = vld [vmem:[#allocation6 + $0x420] sm:$0xf0] }
  0x74   : > { %v6640_v23 = vld [vmem:[#allocation6 + $0x400] sm:$0xf]  ;;  %v6385_v36 = vor.u32 %v8560_v22, %v6384_v19  ;;  %1640 = vmatpush.bf16.msra.mxu0 %v6129_v32  ;;  %v6265_v19 = vor.u32 %v8529_v12, %v6264_v11  ;;  %v451_v22 = vld [vmem:[%s9565_s18 + $0x30] sm:$0xff]  ;;  %1768 = vmatpush.bf16.msrb.mxu3 %v6553_v18  ;;  %v6136_v7 = vld [vmem:[#allocation6 + $0x8] sm:$0xf] }
  0x75   : > { %v8624_v24 = vld [vmem:[#allocation6 + $0x41c] sm:$0xf0]  ;;  %v8497_v8 = vld [vmem:[#allocation6 + $0x24] sm:$0xf0]  ;;  %v8613_v11 = vld [vmem:[#allocation6 + $0x3cc] sm:$0xf] }
  0x76   : > { %v445_v28 = vld [vmem:[%s9565_s18] sm:$0xff]  ;;  %v6641_v37 = vor.u32 %v8624_v24, %v6640_v23  ;;  %1659 = vmatpush.bf16.msra.mxu1 %v6385_v36  ;;  %v6773_v23 = vor.u32 %v8652_v13, %v6770_v14  ;;  %v454_v24 = vld [vmem:[%s9565_s18 + $0x48] sm:$0xff]  ;;  %v6137_v18 = vor.u32 %v8497_v8, %v6136_v7 }
  0x77   : > { %v449_v38 = vld [vmem:[%s9565_s18 + $0x20] sm:$0xff]  ;;  %v9589_v46 = vpack.c.bf16 %v448_v29, %v445_v28  ;;  %v9605_v39 = vpack.c.bf16 %v454_v24, %v451_v22  ;;  %v6618_v12 = vld [vmem:[#allocation6 + $0x3e8] sm:$0xf0]  ;;  %v6392_v20 = vld [vmem:[#allocation6 + $0x208] sm:$0xf] }
  0x78   : > { %v9591_v51 = vpack.c.bf16 %v449_v38, %v446_v33  ;;  %1678 = vmatpush.bf16.msra.mxu2 %v6641_v37  ;;  %1709 = vmatpush.bf16.msrb.mxu0 %v6613_v55  ;;  %v8644_v28 = vld [vmem:[#allocation6 + $0x4c4] sm:$0xf]  ;;  %v456_v33 = vld [vmem:[%s9565_s18 + $0x58] sm:$0xff]  ;;  %v6488_v38 = vld [vmem:[#allocation6 + $0x2c8] sm:$0xf] }
  0x79   : > { %1641 = vmatmul.bf16.vlgmr.msra.gmra.mxu0 %v9589_v46  ;;  %1698 = vmatmul.bf16.vlgmr.msra.gmra.mxu3 %v9589_v46  ;;  %v6738_v29 = vld [vmem:[#allocation6 + $0x4e0] sm:$0xf0]  ;;  %11221 = vst [vmem:[#allocation18_spill] sm:$0xff] %v9605_v39  ;;  %v6489_v50 = vor.u32 %v8585_v41, %v6488_v38  ;;  %v6362_v16 = vld [vmem:[#allocation6 + $0x1e8] sm:$0xf0] }
  0x7a   : > { %1728 = vmatpush.bf16.msrb.mxu1 %v6869_v47  ;;  %v453_v32 = vld [vmem:[%s9565_s18 + $0x40] sm:$0xff]  ;;  %v6741_v40 = vor.u32 %v8644_v28, %v6738_v29  ;;  %1769 = vmatpush.bf16.msrb.mxu3 %v6521_v34  ;;  %v8561_v21 = vld [vmem:[#allocation6 + $0x224] sm:$0xf0]  ;;  %v6874_v28 = vld [vmem:[#allocation6 + $0x5e8] sm:$0xf0] }
  0x7b   : > { %1660 = vmatmul.bf16.vlgmr.msra.gmra.mxu1 %v9591_v51  ;;  %1679 = vmatmul.bf16.vlgmr.msra.gmra.mxu2 %v9593_v52  ;;  %v8580_v36 = vld [vmem:[#allocation6 + $0x2c4] sm:$0xf]  ;;  %v9609_v45 = vpack.c.bf16 %v456_v33, %v453_v32  ;;  %v6872_v24 = vld [vmem:[#allocation6 + $0x5c8] sm:$0xf]  ;;  %v8605_v29 = vld [vmem:[#allocation6 + $0x38c] sm:$0xf]  ;;  %v6393_v32 = vor.u32 %v8561_v21, %v6392_v20 }
  0x7c   : > { %1747 = vmatpush.bf16.msrb.mxu2 %v6361_v42  ;;  %1710 = vmatpush.bf16.msrb.mxu0 %v6581_v3  ;;  %v6482_v37 = vld [vmem:[#allocation6 + $0x2e0] sm:$0xf0]  ;;  %v6200_v42 = vld [vmem:[#allocation6 + $0x88] sm:$0xf]  ;;  %v6873_v33 = vor.u32 %v8681_v25, %v6872_v24  ;;  %v8541_v38 = vld [vmem:[#allocation6 + $0x18c] sm:$0xf] }
  0x7d   : > { %v8636_v47 = vld [vmem:[#allocation6 + $0x484] sm:$0xf]  ;;  %v6485_v49 = vor.u32 %v8580_v36, %v6482_v37  ;;  %v6201_v53 = vor.u32 %v8513_v43, %v6200_v42  ;;  %v6840_v34 = vld [vmem:[#allocation6 + $0x588] sm:$0xf]  ;;  %v6877_v36 = vor.u32 %v8677_v26, %v6874_v28  ;;  %v8669_v41 = vld [vmem:[#allocation6 + $0x58c] sm:$0xf] }
  0x7e   : > { %1729 = vmatpush.bf16.msrb.mxu1 %v6837_v61  ;;  %v6450_v55 = vld [vmem:[#allocation6 + $0x2a0] sm:$0xf0]  ;;  %1770 = vmatpush.bf16.msrb.mxu3 %v6489_v50  ;;  %v6842_v42 = vld [vmem:[#allocation6 + $0x5a8] sm:$0xf0]  ;;  %v6808_v50 = vld [vmem:[#allocation6 + $0x548] sm:$0xf] }
  0x7f   : > { %v8628_v61 = vld [vmem:[#allocation6 + $0x444] sm:$0xf]  ;;  %v6453_v63 = vor.u32 %v8572_v54, %v6450_v55  ;;  %v8597_v43 = vld [vmem:[#allocation6 + $0x34c] sm:$0xf]  ;;  %v6845_v54 = vor.u32 %v8669_v41, %v6842_v42  ;;  %v6712_v24 = vld [vmem:[#allocation6 + $0x488] sm:$0xf] }
  0x80   : > { %1748 = vmatpush.bf16.msrb.mxu2 %v6329_v57  ;;  %1711 = vmatpush.bf16.msrb.mxu0 %v6549_v15  ;;  %v6709_v57 = vor.u32 %v8636_v47, %v6706_v48  ;;  %v6418_v3 = vld [vmem:[#allocation6 + $0x260] sm:$0xf0]  ;;  %v6677_v6 = vor.u32 %v8628_v61, %v6674_v62  ;;  %v8549_v15 = vld [vmem:[#allocation6 + $0x1cc] sm:$0xf]  ;;  %v8641_v25 = vld [vmem:[#allocation6 + $0x4a4] sm:$0xf0] }
  0x81   : > { %v6421_v13 = vor.u32 %v8564_v0, %v6418_v3  ;;  %v8556_v14 = vld [vmem:[#allocation6 + $0x204] sm:$0xf]  ;;  %v6365_v27 = vor.u32 %v8549_v15, %v6362_v16  ;;  %v6554_v47 = vld [vmem:[#allocation6 + $0x368] sm:$0xf0]  ;;  %v6776_v0 = vld [vmem:[#allocation6 + $0x508] sm:$0xf] }
  0x82   : > { %1730 = vmatpush.bf16.msrb.mxu1 %v6805_v9  ;;  %v8620_v9 = vld [vmem:[#allocation6 + $0x404] sm:$0xf]  ;;  %1771 = vmatpush.bf16.msrb.mxu3 %v6457_v1  ;;  %v6557_v55 = vor.u32 %v8597_v43, %v6554_v47  ;;  %v6810_v59 = vld [vmem:[#allocation6 + $0x568] sm:$0xf0]  ;;  %v8657_v1 = vld [vmem:[#allocation6 + $0x524] sm:$0xf0] }
  0x83   : > { %v6645_v22 = vor.u32 %v8620_v9, %v6642_v10  ;;  %v8589_v60 = vld [vmem:[#allocation6 + $0x30c] sm:$0xf]  ;;  %v6777_v10 = vor.u32 %v8657_v1, %v6776_v0  ;;  %v6368_v1 = vld [vmem:[#allocation6 + $0x1d0] sm:$0xf] }
  0x84   : > { %1749 = vmatpush.bf16.msrb.mxu2 %v6297_v5  ;;  %1712 = vmatpush.bf16.msrb.mxu0 %v6517_v30  ;;  %v8569_v5 = vld [vmem:[#allocation6 + $0x264] sm:$0xf0]  ;;  %v6586_v30 = vld [vmem:[#allocation6 + $0x3a8] sm:$0xf0] }
  0x85   : > { %v6425_v17 = vor.u32 %v8569_v5, %v6424_v4  ;;  %v6589_v37 = vor.u32 %v8605_v29, %v6586_v30  ;;  %v6522_v61 = vld [vmem:[#allocation6 + $0x328] sm:$0xf0] }
  0x86   : > { %1731 = vmatpush.bf16.msrb.mxu1 %v6773_v23  ;;  %v6621_v23 = vor.u32 %v8613_v11, %v6618_v12  ;;  %v6525_v3 = vor.u32 %v8589_v60, %v6522_v61  ;;  %v8525_v4 = vld [vmem:[#allocation6 + $0x10c] sm:$0xf]  ;;  %v6744_v12 = vld [vmem:[#allocation6 + $0x4c8] sm:$0xf] }
  0x87   : > { %1772 = vmatpush.bf16.msrb.mxu3 %v6425_v17  ;;  %v6266_v5 = vld [vmem:[#allocation6 + $0x128] sm:$0xf0] }
  0x88   : > { %1750 = vmatpush.bf16.msrb.mxu2 %v6265_v19  ;;  %1713 = vmatpush.bf16.msrb.mxu0 %v6485_v49  ;;  %v6386_v19 = vld [vmem:[#allocation6 + $0x220] sm:$0xf0]  ;;  %v6778_v7 = vld [vmem:[#allocation6 + $0x528] sm:$0xf0]  ;;  %v6269_v11 = vor.u32 %v8525_v4, %v6266_v5  ;;  %v8618_v4 = vld [vmem:[#allocation6 + $0x3ec] sm:$0xf0] }
  0x89   : > { %1646 = vmatmul.bf16.gmra.mxu0 %v9605_v39  ;;  %1703 = vmatmul.bf16.gmra.mxu3 %v9605_v39  ;;  %v6389_v31 = vor.u32 %v8556_v14, %v6386_v19  ;;  %v8581_v8 = vld [vmem:[#allocation6 + $0x2cc] sm:$0xf]  ;;  %v8550_v5 = vld [vmem:[#allocation6 + $0x1d4] sm:$0xf] }
  0x8a   : > { %1732 = vmatpush.bf16.msrb.mxu1 %v6741_v40  ;;  %v6330_v40 = vld [vmem:[#allocation6 + $0x1a8] sm:$0xf0] }
  0x8b   : > { %1665 = vmatmul.bf16.gmra.mxu1 %v9607_v44  ;;  %1684 = vmatmul.bf16.gmra.mxu2 %v9609_v45  ;;  %v6333_v49 = vor.u32 %v8541_v38, %v6330_v40  ;;  %v6490_v9 = vld [vmem:[#allocation6 + $0x2e8] sm:$0xf0] }
  0x8c   : > { %1751 = vmatpush.bf16.msrb.mxu2 %v6233_v35  ;;  %1714 = vmatpush.bf16.msrb.mxu0 %v6453_v63  ;;  %v8673_v35 = vld [vmem:[#allocation6 + $0x5a4] sm:$0xf0]  ;;  %v6493_v15 = vor.u32 %v8581_v8, %v6490_v9  ;;  %v8517_v16 = vld [vmem:[#allocation6 + $0xcc] sm:$0xf]  ;;  %v6848_v9 = vld [vmem:[#allocation6 + $0x590] sm:$0xf] }
  0x8d   : > { %1773 = vmatpush.bf16.msrb.mxu3 %v6393_v32  ;;  %v6841_v48 = vor.u32 %v8673_v35, %v6840_v34  ;;  %v6234_v17 = vld [vmem:[#allocation6 + $0xe8] sm:$0xf0]  ;;  %v6713_v34 = vor.u32 %v8641_v25, %v6712_v24  ;;  %v8666_v24 = vld [vmem:[#allocation6 + $0x56c] sm:$0xf0] }
  0x8e   : > { %1733 = vmatpush.bf16.msrb.mxu1 %v6709_v57  ;;  %v6298_v57 = vld [vmem:[#allocation6 + $0x168] sm:$0xf0]  ;;  %v6304_v25 = vld [vmem:[#allocation6 + $0x150] sm:$0xf] }
  0x8f   : > { %v6301_v63 = vor.u32 %v8533_v56, %v6298_v57  ;;  %v6746_v19 = vld [vmem:[#allocation6 + $0x4e8] sm:$0xf0]  ;;  %v6648_v56 = vld [vmem:[#allocation6 + $0x408] sm:$0xf] }
  0x90   : > { %1752 = vmatpush.bf16.msrb.mxu2 %v6201_v53  ;;  %1715 = vmatpush.bf16.msrb.mxu0 %v6421_v13  ;;  %v8665_v53 = vld [vmem:[#allocation6 + $0x564] sm:$0xf0]  ;;  %v8573_v20 = vld [vmem:[#allocation6 + $0x28c] sm:$0xf] }
  0x91   : > { %1842 = vmatpush.bf16.msra.mxu3 %v6877_v36  ;;  %v6809_v62 = vor.u32 %v8665_v53, %v6808_v50  ;;  %v8649_v13 = vld [vmem:[#allocation6 + $0x4e4] sm:$0xf0]  ;;  %v6458_v21 = vld [vmem:[#allocation6 + $0x2a8] sm:$0xf0]  ;;  %v6880_v50 = vld [vmem:[#allocation6 + $0x5d0] sm:$0xf] }
  0x92   : > { %1734 = vmatpush.bf16.msrb.mxu1 %v6677_v6  ;;  %v8653_v6 = vld [vmem:[#allocation6 + $0x50c] sm:$0xf]  ;;  %v6461_v28 = vor.u32 %v8573_v20, %v6458_v21  ;;  %v6680_v36 = vld [vmem:[#allocation6 + $0x448] sm:$0xf]  ;;  %v8682_v53 = vld [vmem:[#allocation6 + $0x5ec] sm:$0xf0] }
  0x93   : > { %v6781_v14 = vor.u32 %v8653_v6, %v6778_v7  ;;  %v8509_v26 = vld [vmem:[#allocation6 + $0x8c] sm:$0xf]  ;;  %v8625_v57 = vld [vmem:[#allocation6 + $0x424] sm:$0xf0]  ;;  %v6881_v0 = vor.u32 %v8682_v53, %v6880_v50  ;;  %v6370_v6 = vld [vmem:[#allocation6 + $0x1f0] sm:$0xf0] }
  0x94   : > { %1753 = vmatpush.bf16.msrb.mxu2 %v6169_v2  ;;  %1716 = vmatpush.bf16.msrb.mxu0 %v6389_v31  ;;  %v6813_v2 = vor.u32 %v8661_v58, %v6810_v59  ;;  %v6202_v29 = vld [vmem:[#allocation6 + $0xa8] sm:$0xf0]  ;;  %v6649_v7 = vor.u32 %v8625_v57, %v6648_v56  ;;  %v8542_v21 = vld [vmem:[#allocation6 + $0x194] sm:$0xf]  ;;  %v6752_v53 = vld [vmem:[#allocation6 + $0x4d0] sm:$0xf] }
  0x95   : > { %1843 = vmatpush.bf16.msra.mxu3 %v6845_v54  ;;  %v8637_v30 = vld [vmem:[#allocation6 + $0x48c] sm:$0xf]  ;;  %v6205_v35 = vor.u32 %v8509_v26, %v6202_v29  ;;  %v8538_v26 = vld [vmem:[#allocation6 + $0x16c] sm:$0xf0]  ;;  %v6274_v50 = vld [vmem:[#allocation6 + $0x130] sm:$0xf0] }
  0x96   : > { %1735 = vmatpush.bf16.msrb.mxu1 %v6645_v22  ;;  %v6745_v22 = vor.u32 %v8649_v13, %v6744_v12  ;;  %v6714_v31 = vld [vmem:[#allocation6 + $0x4a8] sm:$0xf0]  ;;  %v6560_v29 = vld [vmem:[#allocation6 + $0x350] sm:$0xf] }
  0x97   : > { %v8565_v32 = vld [vmem:[#allocation6 + $0x24c] sm:$0xf]  ;;  %v6717_v38 = vor.u32 %v8637_v30, %v6714_v31  ;;  %v8602_v30 = vld [vmem:[#allocation6 + $0x36c] sm:$0xf0] }
  0x98   : > { %1754 = vmatpush.bf16.msrb.mxu2 %v6137_v18  ;;  %1785 = vmatpush.bf16.msra.mxu0 %v6873_v33  ;;  %v8645_v18 = vld [vmem:[#allocation6 + $0x4cc] sm:$0xf]  ;;  %v8522_v56 = vld [vmem:[#allocation6 + $0xec] sm:$0xf0] }
  0x99   : > { %1717 = vmatmul.bf16.vlgmr.msrb.gmra.mxu0 %v9591_v51  ;;  %1774 = vmatmul.bf16.vlgmr.msrb.gmra.mxu3 %v9591_v51  ;;  %v6426_v33 = vld [vmem:[#allocation6 + $0x268] sm:$0xf0] }
  0x9a   : > { %1804 = vmatpush.bf16.msra.mxu1 %v6365_v27  ;;  %1844 = vmatpush.bf16.msra.mxu3 %v6813_v2  ;;  %v6749_v27 = vor.u32 %v8645_v18, %v6746_v19  ;;  %v6429_v40 = vor.u32 %v8565_v32, %v6426_v33  ;;  %v8501_v41 = vld [vmem:[#allocation6 + $0x4c] sm:$0xf]  ;;  %v8554_v2 = vld [vmem:[#allocation6 + $0x1ec] sm:$0xf0]  ;;  %v6305_v32 = vor.u32 %v8538_v26, %v6304_v25  ;;  %v8534_v33 = vld [vmem:[#allocation6 + $0x154] sm:$0xf] }
  0x9b   : > { %1736 = vmatmul.bf16.vlgmr.msrb.gmra.mxu1 %v9593_v52  ;;  %1755 = vmatmul.bf16.vlgmr.msrb.gmra.mxu2 %v9589_v46  ;;  %v6170_v42 = vld [vmem:[#allocation6 + $0x68] sm:$0xf0]  ;;  %v6369_v12 = vor.u32 %v8554_v2, %v6368_v1  ;;  %v6592_v18 = vld [vmem:[#allocation6 + $0x390] sm:$0xf] }
  0x9c   : > { %1823 = vmatpush.bf16.msra.mxu2 %v6621_v23  ;;  %1786 = vmatpush.bf16.msra.mxu0 %v6841_v48  ;;  %v6237_v23 = vor.u32 %v8517_v16, %v6234_v17  ;;  %v8629_v43 = vld [vmem:[#allocation6 + $0x44c] sm:$0xf]  ;;  %v8546_v16 = vld [vmem:[#allocation6 + $0x1ac] sm:$0xf0] }
  0x9d   : > { %v6682_v47 = vld [vmem:[#allocation6 + $0x468] sm:$0xf0]  ;;  %v8610_v19 = vld [vmem:[#allocation6 + $0x3ac] sm:$0xf0] }
  0x9e   : > { %1805 = vmatpush.bf16.msra.mxu1 %v6333_v49  ;;  %1845 = vmatpush.bf16.msra.mxu3 %v6781_v14  ;;  %v8557_v48 = vld [vmem:[#allocation6 + $0x20c] sm:$0xf]  ;;  %v6685_v59 = vor.u32 %v8629_v43, %v6682_v47  ;;  %v6373_v14 = vor.u32 %v8550_v5, %v6370_v6  ;;  %v8594_v43 = vld [vmem:[#allocation6 + $0x32c] sm:$0xf0] }
  0x9f   : > { %v6394_v49 = vld [vmem:[#allocation6 + $0x228] sm:$0xf0]  ;;  %v6720_v1 = vld [vmem:[#allocation6 + $0x490] sm:$0xf] }
  0xa0   : > { %1824 = vmatpush.bf16.msra.mxu2 %v6589_v37  ;;  %1787 = vmatpush.bf16.msra.mxu0 %v6809_v62  ;;  %v8633_v37 = vld [vmem:[#allocation6 + $0x464] sm:$0xf0]  ;;  %v8493_v58 = vld [vmem:[#allocation6 + $0xc] sm:$0xf]  ;;  %v6397_v60 = vor.u32 %v8557_v48, %v6394_v49  ;;  %v8526_v49 = vld [vmem:[#allocation6 + $0x114] sm:$0xf] }
  0xa1   : > { %v6681_v54 = vor.u32 %v8633_v37, %v6680_v36  ;;  %v6138_v61 = vld [vmem:[#allocation6 + $0x28] sm:$0xf0]  ;;  %v8658_v36 = vld [vmem:[#allocation6 + $0x52c] sm:$0xf0] }
  0xa2   : > { %1806 = vmatpush.bf16.msra.mxu1 %v6301_v63  ;;  %1846 = vmatpush.bf16.msra.mxu3 %v6749_v27  ;;  %v8621_v62 = vld [vmem:[#allocation6 + $0x40c] sm:$0xf]  ;;  %v6141_v8 = vor.u32 %v8493_v58, %v6138_v61  ;;  %v6593_v27 = vor.u32 %v8610_v19, %v6592_v18  ;;  %v6272_v37 = vld [vmem:[#allocation6 + $0x110] sm:$0xf]  ;;  %v6277_v58 = vor.u32 %v8526_v49, %v6274_v50  ;;  %v6632_v49 = vld [vmem:[#allocation6 + $0x3d8] sm:$0xf] }
  0xa3   : > { %v6650_v63 = vld [vmem:[#allocation6 + $0x428] sm:$0xf0]  ;;  %v8642_v2 = vld [vmem:[#allocation6 + $0x4ac] sm:$0xf0]  ;;  %v8619_v50 = vld [vmem:[#allocation6 + $0x3f4] sm:$0xf0] }
  0xa4   : > { %1825 = vmatpush.bf16.msra.mxu2 %v6557_v55  ;;  %1788 = vmatpush.bf16.msra.mxu0 %v6777_v10  ;;  %v6173_v55 = vor.u32 %v8501_v41, %v6170_v42  ;;  %v8674_v10 = vld [vmem:[#allocation6 + $0x5ac] sm:$0xf0] }
  0xa5   : > { %v6849_v17 = vor.u32 %v8674_v10, %v6848_v9  ;;  %v6528_v42 = vld [vmem:[#allocation6 + $0x310] sm:$0xf]  ;;  %v6721_v9 = vor.u32 %v8642_v2, %v6720_v1  ;;  %v6600_v1 = vld [vmem:[#allocation6 + $0x398] sm:$0xf] }
  0xa6   : > { %1807 = vmatpush.bf16.msra.mxu1 %v6269_v11  ;;  %1847 = vmatpush.bf16.msra.mxu3 %v6717_v38  ;;  %v6653_v11 = vor.u32 %v8621_v62, %v6650_v63  ;;  %v8530_v38 = vld [vmem:[#allocation6 + $0x12c] sm:$0xf0]  ;;  %v6529_v57 = vor.u32 %v8594_v43, %v6528_v42  ;;  %v8518_v63 = vld [vmem:[#allocation6 + $0xd4] sm:$0xf]  ;;  %v8611_v2 = vld [vmem:[#allocation6 + $0x3b4] sm:$0xf0] }
  0xa7   : > { %v6273_v48 = vor.u32 %v8530_v38, %v6272_v37  ;;  %v6432_v19 = vld [vmem:[#allocation6 + $0x250] sm:$0xf]  ;;  %v8494_v37 = vld [vmem:[#allocation6 + $0x14] sm:$0xf] }
  0xa8   : > { %1826 = vmatpush.bf16.msra.mxu2 %v6525_v3  ;;  %1789 = vmatpush.bf16.msra.mxu0 %v6745_v22  ;;  %v6624_v3 = vld [vmem:[#allocation6 + $0x3d0] sm:$0xf]  ;;  %v6338_v22 = vld [vmem:[#allocation6 + $0x1b0] sm:$0xf0] }
  0xa9   : > { %1722 = vmatmul.bf16.gmra.mxu0 %v9607_v44  ;;  %1779 = vmatmul.bf16.gmra.mxu3 %v9607_v44  ;;  %v6625_v13 = vor.u32 %v8618_v4, %v6624_v3  ;;  %v6208_v3 = vld [vmem:[#allocation6 + $0x90] sm:$0xf]  ;;  %v8678_v42 = vld [vmem:[#allocation6 + $0x5d4] sm:$0xf] }
  0xaa   : > { %1808 = vmatpush.bf16.msra.mxu1 %v6237_v23  ;;  %1848 = vmatpush.bf16.msra.mxu3 %v6685_v59  ;;  %v6816_v23 = vld [vmem:[#allocation6 + $0x550] sm:$0xf]  ;;  %v6882_v43 = vld [vmem:[#allocation6 + $0x5f0] sm:$0xf0] }
  0xab   : > { %1741 = vmatmul.bf16.gmra.mxu1 %v9609_v45  ;;  %1760 = vmatmul.bf16.gmra.mxu2 %v9605_v39  ;;  %v6817_v31 = vor.u32 %v8666_v24, %v6816_v23  ;;  %v6496_v59 = vld [vmem:[#allocation6 + $0x2d0] sm:$0xf]  ;;  %v6178_v24 = vld [vmem:[#allocation6 + $0x70] sm:$0xf0] }
  0xac   : > { %1827 = vmatpush.bf16.msra.mxu2 %v6493_v15  ;;  %1790 = vmatpush.bf16.msra.mxu0 %v6713_v34  ;;  %v6336_v15 = vld [vmem:[#allocation6 + $0x190] sm:$0xf]  ;;  %v6306_v34 = vld [vmem:[#allocation6 + $0x170] sm:$0xf0] }
  0xad   : > { %v6337_v20 = vor.u32 %v8546_v16, %v6336_v15  ;;  %v6309_v41 = vor.u32 %v8534_v33, %v6306_v34  ;;  %v8514_v4 = vld [vmem:[#allocation6 + $0xac] sm:$0xf0] }
  0xae   : > { %1809 = vmatpush.bf16.msra.mxu1 %v6205_v35  ;;  %1849 = vmatpush.bf16.msra.mxu3 %v6653_v11  ;;  %v6784_v35 = vld [vmem:[#allocation6 + $0x510] sm:$0xf]  ;;  %v6209_v10 = vor.u32 %v8514_v4, %v6208_v3  ;;  %v8510_v11 = vld [vmem:[#allocation6 + $0x94] sm:$0xf]  ;;  %v6312_v3 = vld [vmem:[#allocation6 + $0x158] sm:$0xf] }
  0xaf   : > { %v6785_v47 = vor.u32 %v8658_v36, %v6784_v35  ;;  %v6176_v15 = vld [vmem:[#allocation6 + $0x50] sm:$0xf]  ;;  %v8539_v4 = vld [vmem:[#allocation6 + $0x174] sm:$0xf0] }
  0xb0   : > { %1828 = vmatpush.bf16.msra.mxu2 %v6461_v28  ;;  %1791 = vmatpush.bf16.msra.mxu0 %v6681_v54  ;;  %v6341_v28 = vor.u32 %v8542_v21, %v6338_v22  ;;  %v8650_v54 = vld [vmem:[#allocation6 + $0x4ec] sm:$0xf0]  ;;  %v8502_v21 = vld [vmem:[#allocation6 + $0x54] sm:$0xf] }
  0xb1   : > { %v6753_v61 = vor.u32 %v8650_v54, %v6752_v53  ;;  %v8506_v16 = vld [vmem:[#allocation6 + $0x6c] sm:$0xf0]  ;;  %v6181_v34 = vor.u32 %v8502_v21, %v6178_v24  ;;  %v6344_v53 = vld [vmem:[#allocation6 + $0x198] sm:$0xf]  ;;  %v8654_v21 = vld [vmem:[#allocation6 + $0x514] sm:$0xf] }
  0xb2   : > { %1810 = vmatpush.bf16.msra.mxu1 %v6173_v55  ;;  %1918 = vmatpush.bf16.msrb.mxu3 %v6373_v14  ;;  %v6240_v55 = vld [vmem:[#allocation6 + $0xd0] sm:$0xf]  ;;  %v6177_v23 = vor.u32 %v8506_v16, %v6176_v15  ;;  %v8547_v54 = vld [vmem:[#allocation6 + $0x1b4] sm:$0xf0] }
  0xb3   : > { %v6241_v62 = vor.u32 %v8522_v56, %v6240_v55  ;;  %v8634_v14 = vld [vmem:[#allocation6 + $0x46c] sm:$0xf0]  ;;  %v8606_v55 = vld [vmem:[#allocation6 + $0x394] sm:$0xf]  ;;  %v6280_v15 = vld [vmem:[#allocation6 + $0x118] sm:$0xf] }
  0xb4   : > { %1829 = vmatpush.bf16.msra.mxu2 %v6429_v40  ;;  %1792 = vmatpush.bf16.msra.mxu0 %v6649_v7  ;;  %v6561_v40 = vor.u32 %v8602_v30, %v6560_v29  ;;  %v6464_v7 = vld [vmem:[#allocation6 + $0x290] sm:$0xf]  ;;  %v6376_v29 = vld [vmem:[#allocation6 + $0x1d8] sm:$0xf]  ;;  %v6594_v56 = vld [vmem:[#allocation6 + $0x3b0] sm:$0xf0] }
  0xb5   : > { %v6656_v25 = vld [vmem:[#allocation6 + $0x410] sm:$0xf]  ;;  %v8555_v30 = vld [vmem:[#allocation6 + $0x1f4] sm:$0xf0] }
  0xb6   : > { %1811 = vmatpush.bf16.msra.mxu1 %v6141_v8  ;;  %1919 = vmatpush.bf16.msrb.mxu3 %v6341_v28  ;;  %v8578_v8 = vld [vmem:[#allocation6 + $0x2ac] sm:$0xf0]  ;;  %v8531_v16 = vld [vmem:[#allocation6 + $0x134] sm:$0xf0] }
  0xb7   : > { %v8626_v26 = vld [vmem:[#allocation6 + $0x42c] sm:$0xf0]  ;;  %v8595_v24 = vld [vmem:[#allocation6 + $0x334] sm:$0xf0] }
  0xb8   : > { %1830 = vmatpush.bf16.msra.mxu2 %v6397_v60  ;;  %1861 = vmatpush.bf16.msrb.mxu0 %v6369_v12  ;;  %v8586_v60 = vld [vmem:[#allocation6 + $0x2ec] sm:$0xf0]  ;;  %v6210_v12 = vld [vmem:[#allocation6 + $0xb0] sm:$0xf0]  ;;  %v6657_v38 = vor.u32 %v8626_v26, %v6656_v25  ;;  %v6281_v25 = vor.u32 %v8531_v16, %v6280_v15  ;;  %v8615_v15 = vld [vmem:[#allocation6 + $0x3dc] sm:$0xf] }
  0xb9   : > { %1793 = vmatmul.bf16.vlgmr.msra.gmra.mxu0 %v9593_v52  ;;  %1850 = vmatmul.bf16.vlgmr.msra.gmra.mxu3 %v9593_v52  ;;  %v6497_v5 = vor.u32 %v8586_v60, %v6496_v59  ;;  %v6213_v18 = vor.u32 %v8510_v11, %v6210_v12  ;;  %v8498_v28 = vld [vmem:[#allocation6 + $0x2c] sm:$0xf0]  ;;  %v6885_v59 = vor.u32 %v8678_v42, %v6882_v43  ;;  %v6568_v11 = vld [vmem:[#allocation6 + $0x358] sm:$0xf]  ;;  %v6634_v16 = vld [vmem:[#allocation6 + $0x3f8] sm:$0xf0] }
  0xba   : > { %1880 = vmatpush.bf16.msrb.mxu1 %v6625_v13  ;;  %1920 = vmatpush.bf16.msrb.mxu3 %v6309_v41  ;;  %v6688_v13 = vld [vmem:[#allocation6 + $0x450] sm:$0xf]  ;;  %v6146_v41 = vld [vmem:[#allocation6 + $0x30] sm:$0xf0]  ;;  %v6633_v60 = vor.u32 %v8619_v50, %v6632_v49  ;;  %v8603_v12 = vld [vmem:[#allocation6 + $0x374] sm:$0xf0] }
  0xbb   : > { %1812 = vmatmul.bf16.vlgmr.msra.gmra.mxu1 %v9589_v46  ;;  %1831 = vmatmul.bf16.vlgmr.msra.gmra.mxu2 %v9591_v51  ;;  %v6689_v22 = vor.u32 %v8634_v14, %v6688_v13  ;;  %v6400_v35 = vld [vmem:[#allocation6 + $0x210] sm:$0xf]  ;;  %v6313_v13 = vor.u32 %v8539_v4, %v6312_v3  ;;  %v8638_v49 = vld [vmem:[#allocation6 + $0x494] sm:$0xf]  ;;  %v6152_v3 = vld [vmem:[#allocation6 + $0x18] sm:$0xf] }
  0xbc   : > { %1899 = vmatpush.bf16.msrb.mxu2 %v6881_v0  ;;  %1862 = vmatpush.bf16.msrb.mxu0 %v6337_v20  ;;  %v6242_v0 = vld [vmem:[#allocation6 + $0xf0] sm:$0xf0]  ;;  %v8570_v20 = vld [vmem:[#allocation6 + $0x26c] sm:$0xf0] }
  0xbd   : > { %v6245_v6 = vor.u32 %v8518_v63, %v6242_v0  ;;  %v6433_v33 = vor.u32 %v8570_v20, %v6432_v19  ;;  %v8562_v36 = vld [vmem:[#allocation6 + $0x22c] sm:$0xf0]  ;;  %v6597_v63 = vor.u32 %v8606_v55, %v6594_v56  ;;  %v6850_v0 = vld [vmem:[#allocation6 + $0x5b0] sm:$0xf0] }
  0xbe   : > { %1881 = vmatpush.bf16.msrb.mxu1 %v6593_v27  ;;  %1921 = vmatpush.bf16.msrb.mxu3 %v6277_v58  ;;  %v6144_v27 = vld [vmem:[#allocation6 + $0x10] sm:$0xf]  ;;  %v6149_v58 = vor.u32 %v8494_v37, %v6146_v41  ;;  %v8590_v19 = vld [vmem:[#allocation6 + $0x314] sm:$0xf]  ;;  %v8515_v41 = vld [vmem:[#allocation6 + $0xb4] sm:$0xf0] }
  0xbf   : > { %v6530_v20 = vld [vmem:[#allocation6 + $0x330] sm:$0xf0] }
  0xc0   : > { %1900 = vmatpush.bf16.msrb.mxu2 %v6849_v17  ;;  %1863 = vmatpush.bf16.msrb.mxu0 %v6305_v32  ;;  %v6465_v17 = vor.u32 %v8578_v8, %v6464_v7  ;;  %v6626_v32 = vld [vmem:[#allocation6 + $0x3f0] sm:$0xf0]  ;;  %v6533_v26 = vor.u32 %v8590_v19, %v6530_v20  ;;  %v8551_v19 = vld [vmem:[#allocation6 + $0x1dc] sm:$0xf] }
  0xc1   : > { %v8598_v7 = vld [vmem:[#allocation6 + $0x354] sm:$0xf] }
  0xc2   : > { %1882 = vmatpush.bf16.msrb.mxu1 %v6561_v40  ;;  %1922 = vmatpush.bf16.msrb.mxu3 %v6245_v6  ;;  %v6145_v40 = vor.u32 %v8498_v28, %v6144_v27  ;;  %v6601_v6 = vor.u32 %v8611_v2, %v6600_v1  ;;  %v6562_v8 = vld [vmem:[#allocation6 + $0x370] sm:$0xf0]  ;;  %v6248_v27 = vld [vmem:[#allocation6 + $0xd8] sm:$0xf] }
  0xc3   : > { %v6565_v14 = vor.u32 %v8598_v7, %v6562_v8  ;;  %v8523_v28 = vld [vmem:[#allocation6 + $0xf4] sm:$0xf0]  ;;  %v6722_v50 = vld [vmem:[#allocation6 + $0x4b0] sm:$0xf0] }
  0xc4   : > { %1901 = vmatpush.bf16.msrb.mxu2 %v6817_v31  ;;  %1864 = vmatpush.bf16.msrb.mxu0 %v6273_v48  ;;  %v8614_v31 = vld [vmem:[#allocation6 + $0x3d4] sm:$0xf]  ;;  %v6249_v37 = vor.u32 %v8523_v28, %v6248_v27  ;;  %v6440_v1 = vld [vmem:[#allocation6 + $0x258] sm:$0xf]  ;;  %v6637_v27 = vor.u32 %v8615_v15, %v6634_v16  ;;  %v8519_v16 = vld [vmem:[#allocation6 + $0xdc] sm:$0xf] }
  0xc5   : > { %v6629_v48 = vor.u32 %v8614_v31, %v6626_v32  ;;  %v8582_v31 = vld [vmem:[#allocation6 + $0x2d4] sm:$0xf]  ;;  %v8571_v2 = vld [vmem:[#allocation6 + $0x274] sm:$0xf0] }
  0xc6   : > { %1883 = vmatpush.bf16.msrb.mxu1 %v6529_v57  ;;  %1923 = vmatpush.bf16.msrb.mxu3 %v6213_v18  ;;  %v6401_v57 = vor.u32 %v8562_v36, %v6400_v35  ;;  %v6569_v18 = vor.u32 %v8603_v12, %v6568_v11  ;;  %v6498_v32 = vld [vmem:[#allocation6 + $0x2f0] sm:$0xf0]  ;;  %v6504_v35 = vld [vmem:[#allocation6 + $0x2d8] sm:$0xf] }
  0xc7   : > { %v8587_v36 = vld [vmem:[#allocation6 + $0x2f4] sm:$0xf0]  ;;  %v8558_v7 = vld [vmem:[#allocation6 + $0x214] sm:$0xf] }
  0xc8   : > { %1902 = vmatpush.bf16.msrb.mxu2 %v6785_v47  ;;  %1865 = vmatpush.bf16.msrb.mxu0 %v6241_v62  ;;  %v6377_v47 = vor.u32 %v8555_v30, %v6376_v29  ;;  %v6345_v62 = vor.u32 %v8547_v54, %v6344_v53  ;;  %v6505_v43 = vor.u32 %v8587_v36, %v6504_v35  ;;  %v6472_v53 = vld [vmem:[#allocation6 + $0x298] sm:$0xf]  ;;  %v6402_v8 = vld [vmem:[#allocation6 + $0x230] sm:$0xf0]  ;;  %v8543_v35 = vld [vmem:[#allocation6 + $0x19c] sm:$0xf] }
  0xc9   : > { %1798 = vmatmul.bf16.gmra.mxu0 %v9609_v45  ;;  %1855 = vmatmul.bf16.gmra.mxu3 %v9609_v45  ;;  %v8579_v54 = vld [vmem:[#allocation6 + $0x2b4] sm:$0xf0]  ;;  %v8622_v11 = vld [vmem:[#allocation6 + $0x414] sm:$0xf]  ;;  %v6346_v36 = vld [vmem:[#allocation6 + $0x1b8] sm:$0xf0] }
  0xca   : > { %1884 = vmatpush.bf16.msrb.mxu1 %v6497_v5  ;;  %1924 = vmatpush.bf16.msrb.mxu3 %v6181_v34  ;;  %v6754_v34 = vld [vmem:[#allocation6 + $0x4f0] sm:$0xf0]  ;;  %v8651_v15 = vld [vmem:[#allocation6 + $0x4f4] sm:$0xf0] }
  0xcb   : > { %1817 = vmatmul.bf16.gmra.mxu1 %v9605_v39  ;;  %1836 = vmatmul.bf16.gmra.mxu2 %v9607_v44  ;;  %v6658_v12 = vld [vmem:[#allocation6 + $0x430] sm:$0xf0] }
  0xcc   : > { %1903 = vmatpush.bf16.msrb.mxu2 %v6753_v61  ;;  %1866 = vmatpush.bf16.msrb.mxu0 %v6209_v10  ;;  %v8670_v61 = vld [vmem:[#allocation6 + $0x594] sm:$0xf] }
  0xcd   : > { %v6853_v5 = vor.u32 %v8670_v61, %v6850_v0  ;;  %v6818_v10 = vld [vmem:[#allocation6 + $0x570] sm:$0xf0] }
  0xce   : > { %1885 = vmatpush.bf16.msrb.mxu1 %v6465_v17  ;;  %1925 = vmatpush.bf16.msrb.mxu3 %v6149_v58  ;;  %v8507_v58 = vld [vmem:[#allocation6 + $0x74] sm:$0xf0]  ;;  %v8566_v61 = vld [vmem:[#allocation6 + $0x254] sm:$0xf] }
  0xcf   : > { %v6690_v0 = vld [vmem:[#allocation6 + $0x470] sm:$0xf0] }
  0xd0   : > { %1904 = vmatpush.bf16.msrb.mxu2 %v6721_v9  ;;  %1867 = vmatpush.bf16.msrb.mxu0 %v6177_v23  ;;  %v8662_v9 = vld [vmem:[#allocation6 + $0x554] sm:$0xf]  ;;  %v6536_v23 = vld [vmem:[#allocation6 + $0x318] sm:$0xf] }
  0xd1   : > { %v6821_v17 = vor.u32 %v8662_v9, %v6818_v10  ;;  %v6537_v30 = vor.u32 %v8595_v24, %v6536_v23  ;;  %v6441_v10 = vor.u32 %v8571_v2, %v6440_v1  ;;  %v8679_v23 = vld [vmem:[#allocation6 + $0x5dc] sm:$0xf] }
  0xd2   : > { %1886 = vmatpush.bf16.msrb.mxu1 %v6433_v33  ;;  %1994 = vmatpush.bf16.msra.mxu3 %v6633_v60  ;;  %v8646_v33 = vld [vmem:[#allocation6 + $0x4d4] sm:$0xf]  ;;  %v6473_v60 = vor.u32 %v8579_v54, %v6472_v53  ;;  %v6890_v24 = vld [vmem:[#allocation6 + $0x5f8] sm:$0xf0]  ;;  %v6824_v53 = vld [vmem:[#allocation6 + $0x558] sm:$0xf] }
  0xd3   : > { %v6757_v42 = vor.u32 %v8646_v33, %v6754_v34  ;;  %v6856_v33 = vld [vmem:[#allocation6 + $0x598] sm:$0xf] }
  0xd4   : > { %1905 = vmatpush.bf16.msrb.mxu2 %v6689_v22  ;;  %1868 = vmatpush.bf16.msrb.mxu0 %v6145_v40  ;;  %v6786_v22 = vld [vmem:[#allocation6 + $0x530] sm:$0xf0]  ;;  %v6216_v40 = vld [vmem:[#allocation6 + $0x98] sm:$0xf] }
  0xd5   : > { %v6789_v29 = vor.u32 %v8654_v21, %v6786_v22  ;;  %v6217_v55 = vor.u32 %v8515_v41, %v6216_v40  ;;  %v6405_v21 = vor.u32 %v8558_v7, %v6402_v8  ;;  %v6378_v22 = vld [vmem:[#allocation6 + $0x1f8] sm:$0xf0]  ;;  %v8675_v34 = vld [vmem:[#allocation6 + $0x5b4] sm:$0xf0]  ;;  %v9641_v40 = vld [vmem:[#allocation8] sm:$0xff] }
  0xd6   : > { %1887 = vmatpush.bf16.msrb.mxu1 %v6401_v57  ;;  %1995 = vmatpush.bf16.msra.mxu3 %v6601_v6  ;;  %v6184_v57 = vld [vmem:[#allocation6 + $0x58] sm:$0xf]  ;;  %v6282_v7 = vld [vmem:[#allocation6 + $0x138] sm:$0xf0] }
  0xd7   : > { %v6185_v4 = vor.u32 %v8507_v58, %v6184_v57  ;;  %v8499_v6 = vld [vmem:[#allocation6 + $0x34] sm:$0xf0]  ;;  %v6314_v57 = vld [vmem:[#allocation6 + $0x178] sm:$0xf0] }
  0xd8   : > { %1906 = vmatpush.bf16.msrb.mxu2 %v6657_v38  ;;  %1937 = vmatpush.bf16.msra.mxu0 %v6629_v48  ;;  %v6501_v38 = vor.u32 %v8582_v31, %v6498_v32  ;;  %v6466_v48 = vld [vmem:[#allocation6 + $0x2b0] sm:$0xf0]  ;;  %v6153_v20 = vor.u32 %v8499_v6, %v6152_v3  ;;  %v6381_v31 = vor.u32 %v8551_v19, %v6378_v22  ;;  %v8667_v54 = vld [vmem:[#allocation6 + $0x574] sm:$0xf0]  ;;  %v8663_v58 = vld [vmem:[#allocation6 + $0x55c] sm:$0xf] }
  0xd9   : > { %1869 = vmatmul.bf16.vlgmr.msrb.gmra.mxu0 %v9589_v46  ;;  %1926 = vmatmul.bf16.vlgmr.msrb.gmra.mxu3 %v9589_v46  ;;  %v6893_v32 = vor.u32 %v8679_v23, %v6890_v24  ;;  %v8527_v6 = vld [vmem:[#allocation6 + $0x11c] sm:$0xf]  ;;  %v2186_v24 = vlaneseq }
  0xda   : > { %1956 = vmatpush.bf16.msra.mxu1 %v6885_v59  ;;  %1996 = vmatpush.bf16.msra.mxu3 %v6569_v18  ;;  %v6725_v59 = vor.u32 %v8638_v49, %v6722_v50  ;;  %v8683_v18 = vld [vmem:[#allocation6 + $0x5f4] sm:$0xf0]  ;;  %v8599_v49 = vld [vmem:[#allocation6 + $0x35c] sm:$0xf]  ;;  %v6285_v19 = vor.u32 %v8527_v6, %v6282_v7 }
  0xdb   : > { %1888 = vmatmul.bf16.vlgmr.msrb.gmra.mxu1 %v9591_v51  ;;  %1907 = vmatmul.bf16.vlgmr.msrb.gmra.mxu2 %v9593_v52  ;;  %v6570_v50 = vld [vmem:[#allocation6 + $0x378] sm:$0xf0]  ;;  %v9718_v7 = vld [vmem:[#allocation6 + $0x418] sm:$0xf] }
  0xdc   : > { %1975 = vmatpush.bf16.msra.mxu2 %v6377_v47  ;;  %1938 = vmatpush.bf16.msra.mxu0 %v6597_v63  ;;  %v8574_v47 = vld [vmem:[#allocation6 + $0x294] sm:$0xf]  ;;  %v8655_v8 = vld [vmem:[#allocation6 + $0x51c] sm:$0xf] }
  0xdd   : > { %v6469_v56 = vor.u32 %v8574_v47, %v6466_v48  ;;  %v8630_v63 = vld [vmem:[#allocation6 + $0x454] sm:$0xf]  ;;  %v9646_v48 = vperm.slane %v9641_v40, 0  ;;  %v8647_v22 = vld [vmem:[#allocation6 + $0x4dc] sm:$0xf] }
  0xde   : > { %1957 = vmatpush.bf16.msra.mxu1 %v6853_v5  ;;  %1997 = vmatpush.bf16.msra.mxu3 %v6537_v30  ;;  %v6693_v9 = vor.u32 %v8630_v63, %v6690_v0  ;;  %v6602_v30 = vld [vmem:[#allocation6 + $0x3b8] sm:$0xf0] }
  0xdf   : > { %v8591_v63 = vld [vmem:[#allocation6 + $0x31c] sm:$0xf] }
  0xe0   : > { %1976 = vmatpush.bf16.msra.mxu2 %v6345_v62  ;;  %1939 = vmatpush.bf16.msra.mxu0 %v6565_v14  ;;  %v6434_v62 = vld [vmem:[#allocation6 + $0x270] sm:$0xf0]  ;;  %v8563_v14 = vld [vmem:[#allocation6 + $0x234] sm:$0xf0]  ;;  %v6538_v0 = vld [vmem:[#allocation6 + $0x338] sm:$0xf0] }
  0xe1   : > { %v6437_v5 = vor.u32 %v8566_v61, %v6434_v62  ;;  %v6573_v61 = vor.u32 %v8599_v49, %v6570_v50  ;;  %v6825_v62 = vor.u32 %v8667_v54, %v6824_v53  ;;  %v6762_v23 = vld [vmem:[#allocation6 + $0x4f8] sm:$0xf0]  ;;  %v9684_v54 = vld [vmem:[#allocation6 + $0x458] sm:$0xf] }
  0xe2   : > { %1958 = vmatpush.bf16.msra.mxu1 %v6821_v17  ;;  %1998 = vmatpush.bf16.msra.mxu3 %v6505_v43  ;;  %v6888_v17 = vld [vmem:[#allocation6 + $0x5d8] sm:$0xf]  ;;  %v6349_v43 = vor.u32 %v8543_v35, %v6346_v36  ;;  %v9673_v35 = vshrl.u32 %v2186_v24, 7  ;;  %v6765_v50 = vor.u32 %v8647_v22, %v6762_v23  ;;  %v9682_v53 = vld [vmem:[#allocation6 + $0x278] sm:$0xf0]  ;;  %v9744_v22 = vstv %s2185_s13 }
  0xe3   : > { %v6889_v28 = vor.u32 %v8683_v18, %v6888_v17 }
  0xe4   : > { %1977 = vmatpush.bf16.msra.mxu2 %v6313_v13  ;;  %1940 = vmatpush.bf16.msra.mxu0 %v6533_v26  ;;  %v6408_v13 = vld [vmem:[#allocation6 + $0x218] sm:$0xf]  ;;  %11223 = vst [vmem:[#allocation20_spill] sm:$0xff] %v9673_v35 }
  0xe5   : > { %v6409_v26 = vor.u32 %v8563_v14, %v6408_v13  ;;  %v6760_v14 = vld [vmem:[#allocation6 + $0x4d8] sm:$0xf] }
  0xe6   : > { %1959 = vmatpush.bf16.msra.mxu1 %v6789_v29  ;;  %1999 = vmatpush.bf16.msra.mxu3 %v6473_v60  ;;  %v8607_v29 = vld [vmem:[#allocation6 + $0x39c] sm:$0xf] }
  0xe7   : > { %v6605_v41 = vor.u32 %v8607_v29, %v6602_v30  ;;  %v9662_v29 = vld [vmem:[#allocation6 + $0x498] sm:$0xf] }
  0xe8   : > { %1978 = vmatpush.bf16.msra.mxu2 %v6281_v25  ;;  %1941 = vmatpush.bf16.msra.mxu0 %v6501_v38  ;;  %v6661_v25 = vor.u32 %v8622_v11, %v6658_v12  ;;  %v6858_v38 = vld [vmem:[#allocation6 + $0x5b8] sm:$0xf0]  ;;  %v6541_v12 = vor.u32 %v8591_v63, %v6538_v0  ;;  %v9664_v30 = vld [vmem:[#allocation6 + $0x4b4] sm:$0xf0] }
  0xe9   : > { %1874 = vmatmul.bf16.gmra.mxu0 %v9605_v39  ;;  %1931 = vmatmul.bf16.gmra.mxu3 %v9605_v39  ;;  %v6506_v11 = vld [vmem:[#allocation6 + $0x2f8] sm:$0xf0]  ;;  %v6729_v63 = vor.u32 %v9664_v30, %v9662_v29  ;;  %v9753_v29 = vld [vmem:[#allocation9 + $0xe0] sm:$0xf]  ;;  %v9755_v30 = vld [vmem:[#allocation9 + $0xec] sm:$0xf0] }
  0xea   : > { %1960 = vmatpush.bf16.msra.mxu1 %v6757_v42  ;;  %2000 = vmatpush.bf16.msra.mxu3 %v6441_v10  ;;  %v6857_v42 = vor.u32 %v8675_v34, %v6856_v33  ;;  %v8583_v10 = vld [vmem:[#allocation6 + $0x2dc] sm:$0xf] }
  0xeb   : > { %1893 = vmatmul.bf16.gmra.mxu1 %v9607_v44  ;;  %1912 = vmatmul.bf16.gmra.mxu2 %v9609_v45  ;;  %v9669_v33 = vld [vmem:[#allocation6 + $0x9c] sm:$0xf] }
  0xec   : > { %1979 = vmatpush.bf16.msra.mxu2 %v6249_v37  ;;  %1942 = vmatpush.bf16.msra.mxu0 %v6469_v56  ;;  %v8671_v37 = vld [vmem:[#allocation6 + $0x59c] sm:$0xf] }
  0xed   : > { %v6861_v47 = vor.u32 %v8671_v37, %v6858_v38  ;;  %v9671_v34 = vld [vmem:[#allocation6 + $0xb8] sm:$0xf0]  ;;  %v6509_v37 = vor.u32 %v8583_v10, %v6506_v11  ;;  %v6761_v38 = vor.u32 %v8651_v15, %v6760_v14 }
  0xee   : > { %1961 = vmatpush.bf16.msra.mxu1 %v6725_v59  ;;  %2001 = vmatpush.bf16.msra.mxu3 %v6409_v26  ;;  %v6826_v59 = vld [vmem:[#allocation6 + $0x578] sm:$0xf0]  ;;  %v6221_v0 = vor.u32 %v9669_v33, %v9671_v34 }
  0xef   : > { %v6829_v3 = vor.u32 %v8663_v58, %v6826_v59  ;;  %v9692_v58 = vld [vmem:[#allocation6 + $0x45c] sm:$0xf] }
  0xf0   : > { %1980 = vmatpush.bf16.msra.mxu2 %v6217_v55  ;;  %1943 = vmatpush.bf16.msra.mxu0 %v6437_v5  ;;  %v8535_v55 = vld [vmem:[#allocation6 + $0x15c] sm:$0xf]  ;;  %v8659_v5 = vld [vmem:[#allocation6 + $0x534] sm:$0xf0] }
  0xf1   : > { %v6317_v2 = vor.u32 %v8535_v55, %v6314_v57  ;;  %v9686_v55 = vld [vmem:[#allocation6 + $0x474] sm:$0xf0]  ;;  %v9690_v57 = vld [vmem:[#allocation6 + $0x78] sm:$0xf0] }
  0xf2   : > { %1962 = vmatpush.bf16.msra.mxu1 %v6693_v9  ;;  %2070 = vmatpush.bf16.msrb.mxu3 %v6893_v32  ;;  %v6794_v9 = vld [vmem:[#allocation6 + $0x538] sm:$0xf0] }
  0xf3   : > { %v9694_v59 = vld [vmem:[#allocation6 + $0x478] sm:$0xf0] }
  0xf4   : > { %1981 = vmatpush.bf16.msra.mxu2 %v6185_v4  ;;  %1944 = vmatpush.bf16.msra.mxu0 %v6405_v21  ;;  %v6792_v4 = vld [vmem:[#allocation6 + $0x518] sm:$0xf]  ;;  %v6250_v21 = vld [vmem:[#allocation6 + $0xf8] sm:$0xf0] }
  0xf5   : > { %v6793_v13 = vor.u32 %v8659_v5, %v6792_v4  ;;  %v6253_v49 = vor.u32 %v8519_v16, %v6250_v21 }
  0xf6   : > { %1963 = vmatpush.bf16.msra.mxu1 %v6661_v25  ;;  %v1642_v56 = vpop.f32.mrf.mxu0  ;;  %2071 = vmatpush.bf16.msrb.mxu3 %v6861_v47 }
  0xf7   : > { %v1643_v1 = vadd.f32 %v1642_v56, %v9646_v48  ;;  %v9688_v56 = vld [vmem:[#allocation6 + $0x5c] sm:$0xf] }
  0xf8   : > { %1982 = vmatpush.bf16.msra.mxu2 %v6153_v20  ;;  %2013 = vmatpush.bf16.msrb.mxu0 %v6889_v28  ;;  %v1661_v60 = vpop.f32.mrf.mxu1  ;;  %v6797_v20 = vor.u32 %v8655_v8, %v6794_v9  ;;  %v9660_v28 = vld [vmem:[#allocation6 + $0x2b8] sm:$0xf0]  ;;  %v9720_v8 = vld [vmem:[#allocation6 + $0x434] sm:$0xf0] }
  0xf9   : > { %1945 = vmatmul.bf16.vlgmr.msra.gmra.mxu0 %v9591_v51  ;;  %2002 = vmatmul.bf16.vlgmr.msra.gmra.mxu3 %v9591_v51  ;;  %v1662_v17 = vadd.f32 %v1661_v60, %v1643_v1  ;;  %v9697_v60 = vadd.s32 8, %v9673_v35  ;;  %v9707_v1 = vld [vmem:[#allocation6 + $0x21c] sm:$0xf] }
  0xfa   : > { %2032 = vmatpush.bf16.msrb.mxu1 %v6381_v31  ;;  %2072 = vmatpush.bf16.msrb.mxu3 %v6829_v3  ;;  %v9667_v31 = vperm.slane %v9641_v40, 1  ;;  %v9712_v3 = vmul.u32 1024, %v9673_v35 }
  0xfb   : > { %1964 = vmatmul.bf16.vlgmr.msra.gmra.mxu1 %v9593_v52  ;;  %1983 = vmatmul.bf16.vlgmr.msra.gmra.mxu2 %v9589_v46  ;;  %11224 = vst [vmem:[#allocation21_spill] sm:$0xff] %v9697_v60  ;;  %v9723_v9 = vmul.u32 1024, %v9697_v60  ;;  %v9868_v60 = vld [vmem:[#allocation9 + $0x20] sm:$0xf] }
  0xfc   : > { %2051 = vmatpush.bf16.msrb.mxu2 %v6637_v27  ;;  %2014 = vmatpush.bf16.msrb.mxu0 %v6857_v42  ;;  %v9656_v25 = vpop.f32.mrf.mxu3  ;;  %v9658_v27 = vld [vmem:[#allocation6 + $0x29c] sm:$0xf] }
  0xfd   : > { %v9678_v42 = vld [vmem:[#allocation6 + $0x4b8] sm:$0xf0] }
  0xfe   : > { %2033 = vmatpush.bf16.msrb.mxu1 %v6349_v43  ;;  %v1680_v18 = vpop.f32.mrf.mxu2  ;;  %v1644_v26 = vpop.f32.mrf.mxu0  ;;  %v9680_v43 = vld [vmem:[#allocation6 + $0x25c] sm:$0xf]  ;;  %2073 = vmatpush.bf16.msrb.mxu3 %v6797_v20 }
  0xff   : > { %v1645_v36 = vadd.f32 %v1644_v26, %v9646_v48  ;;  %v1681_v47 = vadd.f32 %v1680_v18, %v1662_v17  ;;  %v6445_v6 = vor.u32 %v9680_v43, %v9682_v53  ;;  %v9738_v20 = vld [vmem:[#allocation6 + $0x41c] sm:$0xf]  ;;  %v6189_v26 = vor.u32 %v9688_v56, %v9690_v57  ;;  %v9768_v43 = vld [vmem:[#allocation9 + $0xc0] sm:$0xf]  ;;  %v9782_v56 = vld [vmem:[#allocation9 + $0x1cc] sm:$0xf0] }
 0x100   : > { %2052 = vmatpush.bf16.msrb.mxu2 %v6605_v41  ;;  %2015 = vmatpush.bf16.msrb.mxu0 %v6825_v62  ;;  %v1663_v32 = vpop.f32.mrf.mxu1  ;;  %v9676_v41 = vld [vmem:[#allocation6 + $0x49c] sm:$0xf]  ;;  %v6477_v62 = vor.u32 %v9658_v27, %v9660_v28  ;;  %v6701_v27 = vor.u32 %v9692_v58, %v9694_v59  ;;  %v7009_v59 = vor.u32 %v9755_v30, %v9753_v29 }
 0x101   : > { %v1664_v4 = vadd.f32 %v1663_v32, %v1645_v36  ;;  %v6733_v5 = vor.u32 %v9676_v41, %v9678_v42  ;;  %v2121_v10 = vmul.f32 0.2, %v1681_v47  ;;  %vm2089_vm0 = vcmp.gt.f32.partialorder %v1681_v47, 0.0  ;;  %v9751_v28 = vld [vmem:[#allocation6 + $0x438] sm:$0xf0] }
 0x102   : > { %2034 = vmatpush.bf16.msrb.mxu1 %v6317_v2  ;;  %v9709_v2 = vld [vmem:[#allocation6 + $0x238] sm:$0xf0]  ;;  %2074 = vmatpush.bf16.msrb.mxu3 %v6765_v50  ;;  %v9760_v36 = vld [vmem:[#allocation9 + $0x1e0] sm:$0xf]  ;;  %v6665_v41 = vor.u32 %v9720_v8, %v9718_v7  ;;  %v9766_v42 = vld [vmem:[#allocation9 + $0x1ec] sm:$0xf0] }
 0x103   : > { %v6413_v34 = vor.u32 %v9707_v1, %v9709_v2  ;;  %v7137_v7 = vor.u32 %v9766_v42, %v9760_v36  ;;  %v9833_v42 = vld [vmem:[#allocation9 + $0x160] sm:$0xf]  ;;  %v8810_v2 = vld [vmem:[#allocation9 + $0x3ec] sm:$0xf0] }
 0x104   : > { %2053 = vmatpush.bf16.msrb.mxu2 %v6573_v61  ;;  %2016 = vmatpush.bf16.msrb.mxu0 %v6793_v13  ;;  %v9699_v61 = vand.u32 127, %v2186_v24  ;;  %v9727_v13 = vld [vmem:[#allocation6 + $0x1c] sm:$0xf]  ;;  %v9734_v17 = vpop.f32.mrf.mxu3  ;;  %v7392_v1 = vld [vmem:[#allocation9 + $0x3e0] sm:$0xf] }
 0x106   : > { %2035 = vmatpush.bf16.msrb.mxu1 %v6285_v19  ;;  %11225 = vst [vmem:[#allocation22_spill] sm:$0xff] %v9699_v61  ;;  %v1682_v11 = vpop.f32.mrf.mxu2  ;;  %v2204_v14 = vadd.s32 %v9712_v3, %v9699_v61  ;;  %v9732_v15 = vadd.s32 128, %v9699_v61  ;;  %v1647_v18 = vpop.f32.mrf.mxu0  ;;  %v9736_v19 = vld [vmem:[#allocation6 + $0x38] sm:$0xf0]  ;;  %v2212_v21 = vadd.s32 %v9723_v9, %v9699_v61  ;;  %2075 = vmatpush.bf16.msrb.mxu3 %v6733_v5 }
 0x107   : > { %v1683_v16 = vadd.f32 %v1682_v11, %v1664_v4  ;;  %v1648_v23 = vadd.f32 %v1647_v18, %v9646_v48  ;;  %v9804_v11 = vld [vmem:[#allocation9 + $0x1ac] sm:$0xf0]  ;;  %v9808_v18 = vadd.f32 %v9656_v25, %v9667_v31 }
 0x108   : > { %2054 = vmatpush.bf16.msrb.mxu2 %v6541_v12  ;;  %2017 = vmatpush.bf16.msrb.mxu0 %v6761_v38  ;;  %v6697_v12 = vor.u32 %v9686_v55, %v9684_v54  ;;  %11226 = vst [vmem:[#allocation23_spill] sm:$0xff] %v9732_v15  ;;  %v1666_v24 = vpop.f32.mrf.mxu1  ;;  %v2237_v32 = vadd.s32 %v9744_v22, %v2204_v14  ;;  %v9780_v55 = vld [vmem:[#allocation9 + $0x1c0] sm:$0xf]  ;;  %v8778_v14 = vld [vmem:[#allocation9 + $0x2ec] sm:$0xf0] }
 0x109   : > { %vm2097_vm1 = vcmp.gt.f32.partialorder %v1683_v16, 0.0  ;;  %v2129_v33 = vmul.f32 0.2, %v1683_v16  ;;  %v2153_v38 = vsel %vm2089_vm0, %v1681_v47, %v2121_v10  ;;  %v2205_v50 = vadd.s32 %v9712_v3, %v9732_v15  ;;  %1950 = vmatmul.bf16.gmra.mxu0 %v9607_v44  ;;  %2007 = vmatmul.bf16.gmra.mxu3 %v9607_v44  ;;  %v9802_v10 = vld [vmem:[#allocation9 + $0x1a0] sm:$0xf] }
 0x10a   : > { %2036 = vmatpush.bf16.msrb.mxu1 %v6253_v49  ;;  %v9770_v49 = vld [vmem:[#allocation9 + $0xcc] sm:$0xf0]  ;;  %v1667_v53 = vadd.f32 %v1666_v24, %v1648_v23  ;;  %v6157_v47 = vor.u32 %v9727_v13, %v9736_v19  ;;  %v6669_v54 = vor.u32 %v9738_v20, %v9751_v28  ;;  %v2269_v57 = vshrl.u32 %v2237_v32, 16  ;;  %v7264_v13 = vld [vmem:[#allocation9 + $0x2e0] sm:$0xf]  ;;  %2076 = vmatpush.bf16.msrb.mxu3 %v6701_v27 }
 0x10b   : > { %1969 = vmatmul.bf16.gmra.mxu1 %v9609_v45  ;;  %v2161_v58 = vsel %vm2097_vm1, %v1683_v16, %v2129_v33  ;;  %1988 = vmatmul.bf16.gmra.mxu2 %v9605_v39  ;;  %v9796_v5 = vmul.f32 1.4285715, %v2153_v38  ;;  %v9814_v20 = vld [vmem:[#allocation9 + $0x180] sm:$0xf]  ;;  %v9819_v23 = vadd.s32 %v9744_v22, %v2205_v50  ;;  %v9825_v27 = vld [vmem:[#allocation9 + $0x18c] sm:$0xf0]  ;;  %v7265_v36 = vor.u32 %v8778_v14, %v7264_v13 }
 0x10c   : > { %2055 = vmatpush.bf16.msrb.mxu2 %v6509_v37  ;;  %2018 = vmatpush.bf16.msrb.mxu0 %v6729_v63  ;;  %v2245_v37 = vadd.s32 %v9744_v22, %v2212_v21  ;;  %v9792_v63 = vld [vmem:[#allocation9 + $0xa0] sm:$0xf]  ;;  %v2301_v16 = vxor.u32 %v2269_v57, %v2237_v32  ;;  %v2565_v24 = vmul.f32 1.4285715, %v2161_v58  ;;  %v9821_v29 = vpop.f32.mrf.mxu3  ;;  %v9831_v38 = vld [vmem:[#allocation9 + $0x6c] sm:$0xf0] }
 0x10d   : > { %v9835_v50 = vld [vmem:[#allocation9 + $0x16c] sm:$0xf0]  ;;  %v9844_v13 = vld [vmem:[#allocation9 + $0x40] sm:$0xf] }
 0x10e   : > { %2037 = vmatpush.bf16.msrb.mxu1 %v6221_v0  ;;  %v9794_v0 = vld [vmem:[#allocation9 + $0xac] sm:$0xf0]  ;;  %v2277_v4 = vshrl.u32 %v2245_v37, 16  ;;  %v1685_v19 = vpop.f32.mrf.mxu2  ;;  %v1649_v25 = vpop.f32.mrf.mxu0  ;;  %v2333_v30 = vmul.u32 2246822507, %v2301_v16  ;;  %2077 = vmatpush.bf16.msrb.mxu3 %v6669_v54 }
 0x10f   : > { %v1686_v28 = vadd.f32 %v1685_v19, %v1667_v53  ;;  %v7248_v53 = vld [vmem:[#allocation9 + $0x2c0] sm:$0xf]  ;;  %v8774_v57 = vld [vmem:[#allocation9 + $0x2cc] sm:$0xf0]  ;;  %v1650_v19 = vadd.f32 %v1649_v25, %v9646_v48  ;;  %v7393_v48 = vor.u32 %v8810_v2, %v7392_v1 }
 0x110   : > { %2056 = vmatpush.bf16.msrb.mxu2 %v6477_v62  ;;  %v9790_v62 = vperm.slane %v9641_v40, 2  ;;  %2019 = vmatpush.bf16.msrb.mxu0 %v6697_v12  ;;  %v9812_v12 = vld [vmem:[#allocation9 + $0x8c] sm:$0xf0]  ;;  %v9816_v21 = vxor.u32 %v2277_v4, %v2245_v37  ;;  %v1668_v32 = vpop.f32.mrf.mxu1  ;;  %v9829_v37 = vld [vmem:[#allocation9 + $0x60] sm:$0xf]  ;;  %v2213_v4 = vadd.s32 %v9723_v9, %v9732_v15  ;;  %v2365_v33 = vshrl.u32 %v2333_v30, 13 }
 0x111   : > { %vm2105_vm2 = vcmp.gt.f32.partialorder %v1686_v28, 0.0  ;;  %v2137_v16 = vmul.f32 0.2, %v1686_v28  ;;  %v9846_v14 = vld [vmem:[#allocation9 + $0x4c] sm:$0xf0]  ;;  %v7249_v8 = vor.u32 %v8774_v57, %v7248_v53  ;;  %v9884_v57 = vpack.c.bf16 %v2565_v24, %v9796_v5 }
 0x112   : > { %2038 = vmatpush.bf16.msrb.mxu1 %v6189_v26  ;;  %v2341_v58 = vmul.u32 2246822507, %v9816_v21  ;;  %v9850_v21 = vadd.f32 %v9734_v17, %v9667_v31  ;;  %v9860_v25 = vld [vmem:[#allocation9 + $0x140] sm:$0xf]  ;;  %v9866_v26 = vld [vmem:[#allocation9 + $0x2ac] sm:$0xf0]  ;;  %v1669_v17 = vadd.f32 %v1668_v32, %v1650_v19  ;;  %4240 = vmatpush.bf16.msra.mxu3 %v7393_v48  ;;  %v9897_v48 = vadd.f32 %v9821_v29, %v9667_v31 }
 0x113   : > { %v9864_v54 = vld [vmem:[#allocation9 + $0x2a0] sm:$0xf]  ;;  %v9870_v44 = vld [vmem:[#allocation9 + $0x2c] sm:$0xf0]  ;;  %11227 = vst [vmem:[#allocation24_spill] sm:$0xff] %v9884_v57  ;;  %v11228_v24 = vor.u32 %v9770_v49, %v9768_v43 }
 0x114   : > { %2057 = vmatpush.bf16.msrb.mxu2 %v6445_v6  ;;  %v9810_v6 = vld [vmem:[#allocation9 + $0x80] sm:$0xf]  ;;  %2020 = vmatpush.bf16.msrb.mxu0 %v6665_v41  ;;  %v2169_v41 = vsel %vm2105_vm2, %v1686_v28, %v2137_v16  ;;  %v2246_v28 = vadd.s32 %v9744_v22, %v2213_v4  ;;  %v9888_v4 = vld [vmem:[#allocation9 + $0x12c] sm:$0xf0]  ;;  %v1706_v5 = vpop.f32.mrf.mxu3  ;;  %v7233_v43 = vor.u32 %v9866_v26, %v9864_v54 }
 0x115   : > { %v9875_v16 = vmul.f32 1.4285715, %v2169_v41  ;;  %v7376_v53 = vld [vmem:[#allocation9 + $0x3c0] sm:$0xf]  ;;  %v8806_v19 = vld [vmem:[#allocation9 + $0x3cc] sm:$0xf0] }
 0x116   : > { %2039 = vmatpush.bf16.msrb.mxu1 %v6157_v47  ;;  %v9862_v47 = vld [vmem:[#allocation9 + $0x14c] sm:$0xf0]  ;;  %v9890_v32 = vld [vmem:[#allocation9 + $0x280] sm:$0xf] }
 0x117   : > { %v9905_v39 = vld [vmem:[#allocation9 + $0x28c] sm:$0xf0] }
 0x118   : > { %2058 = vmatpush.bf16.msrb.mxu2 %v6413_v34  ;;  %v2270_v34 = vshrl.u32 %v9819_v23, 16  ;;  %4183 = vmatpush.bf16.msra.mxu0 %v7009_v59  ;;  %v2373_v59 = vshrl.u32 %v2341_v58, 13  ;;  %v1737_v29 = vpop.f32.mrf.mxu1  ;;  %v9914_v49 = vld [vmem:[#allocation9 + $0xc] sm:$0xf0] }
 0x119   : > { %2021 = vmatmul.bf16.vlgmr.msrb.gmra.mxu0 %v9593_v52  ;;  %2078 = vmatmul.bf16.vlgmr.msrb.gmra.mxu3 %v9593_v52  ;;  %v8758_v57 = vld [vmem:[#allocation9 + $0x24c] sm:$0xf0] }
 0x11a   : > { %4202 = vmatpush.bf16.msra.mxu1 %v7137_v7  ;;  %v9872_v7 = vxor.u32 %v2365_v33, %v2333_v30  ;;  %v1687_v30 = vpop.f32.mrf.mxu2  ;;  %v9892_v2 = vxor.u32 %v2373_v59, %v2341_v58  ;;  %v2302_v41 = vxor.u32 %v2270_v34, %v9819_v23  ;;  %v11229_v33 = vor.u32 %v9782_v56, %v9780_v55  ;;  %v9907_v59 = vld [vmem:[#allocation9] sm:$0xf]  ;;  %v1718_v34 = vpop.f32.mrf.mxu0 }
 0x11b   : > { %v1688_v1 = vadd.f32 %v1687_v30, %v1669_v17  ;;  %v7377_v58 = vor.u32 %v8806_v19, %v7376_v53  ;;  %v2278_v56 = vshrl.u32 %v2246_v28, 16  ;;  %v1719_v30 = vadd.f32 %v1718_v34, %v9808_v18  ;;  %v9924_v19 = vld [vmem:[#allocation9 + $0x10c] sm:$0xf0]  ;;  %2040 = vmatmul.bf16.vlgmr.msrb.gmra.mxu1 %v9589_v46  ;;  %v7360_v34 = vld [vmem:[#allocation9 + $0x3a0] sm:$0xf]  ;;  %2059 = vmatmul.bf16.vlgmr.msrb.gmra.mxu2 %v9591_v51 }
 0x11c   : > { %4221 = vmatpush.bf16.msra.mxu2 %v7265_v36  ;;  %v9881_v36 = vld [vmem:[#allocation9 + $0x120] sm:$0xf]  ;;  %4184 = vmatpush.bf16.msra.mxu0 %v11228_v24  ;;  %v2429_v23 = vmul.u32 3266489909, %v9872_v7  ;;  %v2437_v55 = vmul.u32 3266489909, %v9892_v2  ;;  %v7217_v18 = vor.u32 %v9905_v39, %v9890_v32  ;;  %v11231_v32 = vor.u32 %v9794_v0, %v9792_v63  ;;  %v1775_v0 = vpop.f32.mrf.mxu3 }
 0x11d   : > { %vm2113_vm3 = vcmp.gt.f32.partialorder %v1688_v1, 0.0  ;;  %v2145_v53 = vmul.f32 0.2, %v1688_v1  ;;  %4241 = vmatpush.bf16.msra.mxu3 %v7377_v58  ;;  %v2310_v54 = vxor.u32 %v2278_v56, %v2246_v28  ;;  %v2334_v24 = vmul.u32 2246822507, %v2302_v41 }
 0x11e   : > { %4203 = vmatpush.bf16.msra.mxu1 %v11229_v33  ;;  %v2461_v26 = vshrl.u32 %v2429_v23, 16  ;;  %v1738_v2 = vadd.f32 %v1737_v29, %v1719_v30  ;;  %v8802_v7 = vld [vmem:[#allocation9 + $0x3ac] sm:$0xf0]  ;;  %v9933_v33 = vadd.s32 256, %v9699_v61  ;;  %v9937_v28 = vadd.f32 %v1706_v5, %v9667_v31  ;;  %v7200_v5 = vld [vmem:[#allocation9 + $0x260] sm:$0xf] }
 0x11f   : > { %v2177_v17 = vsel %vm2113_vm3, %v1688_v1, %v2145_v53  ;;  %v2469_v46 = vshrl.u32 %v2437_v55, 16  ;;  %v2342_v41 = vmul.u32 2246822507, %v2310_v54  ;;  %v11232_v29 = vor.u32 %v9804_v11, %v9802_v10  ;;  %v8762_v10 = vld [vmem:[#allocation9 + $0x26c] sm:$0xf0] }
 0x120   : > { %4222 = vmatpush.bf16.msra.mxu2 %v7249_v8  ;;  %v9920_v8 = vld [vmem:[#allocation9 + $0x100] sm:$0xf]  ;;  %11230 = vst [vmem:[#allocation25_spill] sm:$0xff] %v9933_v33  ;;  %vm2090_vm4 = vcmp.gt.f32.partialorder %v1738_v2, 0.0  ;;  %v2122_v39 = vmul.f32 0.2, %v1738_v2  ;;  %4185 = vmatpush.bf16.msra.mxu0 %v11231_v32  ;;  %v9949_v51 = vxor.u32 %v2461_v26, %v2429_v23  ;;  %v7361_v56 = vor.u32 %v8802_v7, %v7360_v34  ;;  %v1739_v7 = vpop.f32.mrf.mxu1 }
 0x121   : > { %v2366_v1 = vshrl.u32 %v2334_v24, 13  ;;  %v2374_v52 = vshrl.u32 %v2342_v41, 13  ;;  %v9952_v53 = vadd.s32 16, %v9673_v35  ;;  %v9954_v30 = vmul.f32 1.4285715, %v2177_v17 }
 0x122   : > { %4204 = vmatpush.bf16.msra.mxu1 %v11232_v29  ;;  %v1756_v63 = vpop.f32.mrf.mxu2  ;;  %v7344_v11 = vld [vmem:[#allocation9 + $0x380] sm:$0xf]  ;;  %v2206_v32 = vadd.s32 %v9712_v3, %v9933_v33  ;;  %v2214_v23 = vadd.s32 %v9723_v9, %v9933_v33  ;;  %v1720_v26 = vpop.f32.mrf.mxu0  ;;  %v9962_v34 = vperm.slane %v9641_v40, 3  ;;  %v9964_v17 = vxor.u32 %v2469_v46, %v2437_v55  ;;  %4242 = vmatpush.bf16.msra.mxu3 %v7361_v56  ;;  %v8794_v56 = vld [vmem:[#allocation9 + $0x36c] sm:$0xf0] }
 0x123   : > { %11233 = vst [vmem:[#allocation26_spill] sm:$0xff] %v9952_v53  ;;  %v2398_v54 = vxor.u32 %v2366_v1, %v2334_v24  ;;  %v2406_v29 = vxor.u32 %v2374_v52, %v2342_v41  ;;  %v8798_v24 = vld [vmem:[#allocation9 + $0x38c] sm:$0xf0]  ;;  %v1721_v1 = vadd.f32 %v1720_v26, %v9850_v21  ;;  %v11234_v31 = vor.u32 %v9812_v12, %v9810_v6  ;;  %v7328_v21 = vld [vmem:[#allocation9 + $0x360] sm:$0xf] }
 0x124   : > { %4223 = vmatpush.bf16.msra.mxu2 %v7233_v43  ;;  %v2154_v43 = vsel %vm2090_vm4, %v1738_v2, %v2122_v39  ;;  %v11235_v58 = vor.u32 %v9825_v27, %v9814_v20  ;;  %v7184_v39 = vld [vmem:[#allocation9 + $0x240] sm:$0xf]  ;;  %v7345_v40 = vor.u32 %v8798_v24, %v7344_v11  ;;  %v2239_v55 = vadd.s32 %v9744_v22, %v2206_v32  ;;  %v9980_v11 = vld [vmem:[#allocation9 + $0x22c] sm:$0xf0] }
 0x125   : > { %4186 = vmatpush.bf16.msra.mxu0 %v11234_v31  ;;  %v2430_v2 = vmul.u32 3266489909, %v2398_v54  ;;  %v1757_v46 = vadd.f32 %v1756_v63, %v9790_v62  ;;  %v2438_v41 = vmul.u32 3266489909, %v2406_v29  ;;  %v7201_v52 = vor.u32 %v8762_v10, %v7200_v5  ;;  %v9978_v27 = vld [vmem:[#allocation9 + $0x220] sm:$0xf] }
 0x126   : > { %4205 = vmatpush.bf16.msra.mxu1 %v11235_v58  ;;  %v2247_v6 = vadd.s32 %v9744_v22, %v2214_v23  ;;  %v9976_v12 = vmul.f32 1.4285715, %v2154_v43  ;;  %v1740_v31 = vadd.f32 %v1739_v7, %v1721_v1  ;;  %v2271_v58 = vshrl.u32 %v2239_v55, 16  ;;  %4243 = vmatpush.bf16.msra.mxu3 %v7345_v40  ;;  %v9991_v43 = vld [vmem:[#allocation9 + $0x200] sm:$0xf] }
 0x127   : > { %v2462_v20 = vshrl.u32 %v2430_v2, 16  ;;  %v2470_v54 = vshrl.u32 %v2438_v41, 16  ;;  %v7329_v32 = vor.u32 %v8794_v56, %v7328_v21  ;;  %v11236_v10 = vor.u32 %v9831_v38, %v9829_v37  ;;  %v9998_v1 = vld [vmem:[#allocation9 + $0x20c] sm:$0xf0]  ;;  %v7312_v40 = vld [vmem:[#allocation9 + $0x340] sm:$0xf]  ;;  %v1777_v56 = vpop.f32.mrf.mxu3 }
 0x128   : > { %4224 = vmatpush.bf16.msra.mxu2 %v7217_v18  ;;  %v2279_v63 = vshrl.u32 %v2247_v6, 16  ;;  %v9983_v18 = vmul.u32 1024, %v9952_v53  ;;  %vm2098_vm5 = vcmp.gt.f32.partialorder %v1740_v31, 0.0  ;;  %v2130_v5 = vmul.f32 0.2, %v1740_v31 }
 0x129   : > { %4187 = vmatpush.bf16.msra.mxu0 %v11236_v10  ;;  %v11237_v23 = vor.u32 %v9835_v50, %v9833_v42  ;;  %v2303_v26 = vxor.u32 %v2271_v58, %v2239_v55  ;;  %v9994_v7 = vadd.s32 24, %v9673_v35  ;;  %v9996_v29 = vadd.f32 %v1775_v0, %v1757_v46  ;;  %v8790_v21 = vld [vmem:[#allocation9 + $0x34c] sm:$0xf0]  ;;  %2083 = vmatmul.bf16.gmra.mxu3 %v9609_v45  ;;  %v8808_v35 = vld [vmem:[#allocation9 + $0x3e4] sm:$0xf] }
 0x12a   : > { %v7185_v24 = vor.u32 %v8758_v57, %v7184_v39  ;;  %v2311_v37 = vxor.u32 %v2279_v63, %v2247_v6  ;;  %v2220_v38 = vadd.s32 %v9983_v18, %v9699_v61  ;;  %v2162_v42 = vsel %vm2098_vm5, %v1740_v31, %v2130_v5  ;;  %v1758_v50 = vpop.f32.mrf.mxu2  ;;  %v1723_v46 = vpop.f32.mrf.mxu0  ;;  %4244 = vmatpush.bf16.msra.mxu3 %v7329_v32  ;;  %v11242_v63 = vld [vmem:[#allocation19_spill] sm:$0xff] }
 0x12b   : > { %4206 = vmatpush.bf16.msra.mxu1 %v11237_v23  ;;  %11238 = vst [vmem:[#allocation27_spill] sm:$0xff] %v9994_v7  ;;  %v10002_v10 = vxor.u32 %v2462_v20, %v2430_v2  ;;  %v10004_v55 = vxor.u32 %v2470_v54, %v2438_v41  ;;  %v7169_v0 = vor.u32 %v9980_v11, %v9978_v27  ;;  %v1742_v57 = vpop.f32.mrf.mxu1  ;;  %v2335_v6 = vmul.u32 2246822507, %v2303_v26 }
 0x12c   : > { %4225 = vmatpush.bf16.msra.mxu2 %v7201_v52  ;;  %v7153_v39 = vor.u32 %v9998_v1, %v9991_v43  ;;  %v7313_v52 = vor.u32 %v8790_v21, %v7312_v40  ;;  %v10012_v31 = vpack.c.bf16 %v9954_v30, %v9875_v16  ;;  %v1724_v2 = vadd.f32 %v1723_v46, %v9897_v48 }
 0x12d   : > { %v11239_v41 = vor.u32 %v9846_v14, %v9844_v13  ;;  %v11240_v20 = vor.u32 %v9862_v47, %v9860_v25  ;;  %v2343_v27 = vmul.u32 2246822507, %v2311_v37  ;;  %v10022_v58 = vmul.u32 1024, %v9994_v7  ;;  %2026 = vmatmul.bf16.gmra.mxu0 %v9609_v45  ;;  %v11241_v14 = vld [vmem:[#allocation18_spill] sm:$0xff]  ;;  %2064 = vmatmul.bf16.gmra.mxu2 %v11242_v63 }
 0x12e   : > { %v2253_v54 = vadd.s32 %v9744_v22, %v2220_v38  ;;  %v2566_v11 = vmul.f32 1.4285715, %v2162_v42  ;;  %v1759_v16 = vadd.f32 %v1758_v50, %v9790_v62  ;;  %v2367_v30 = vshrl.u32 %v2335_v6, 13  ;;  %2045 = vmatmul.bf16.gmra.mxu1 %v11241_v14  ;;  %4245 = vmatpush.bf16.msra.mxu3 %v7313_v52 }
 0x12f   : > { %4188 = vmatpush.bf16.msra.mxu0 %v11239_v41  ;;  %4207 = vmatpush.bf16.msra.mxu1 %v11240_v20  ;;  %v2221_v48 = vadd.s32 %v9983_v18, %v9732_v15  ;;  %v1743_v13 = vadd.f32 %v1742_v57, %v1724_v2  ;;  %v2375_v25 = vshrl.u32 %v2343_v27, 13  ;;  %v2228_v47 = vadd.s32 %v10022_v58, %v9699_v61 }
 0x130   : > { %4226 = vmatpush.bf16.msra.mxu2 %v7185_v24  ;;  %v2285_v32 = vshrl.u32 %v2253_v54, 16  ;;  %vm2525_vm6 = vcmp.ge.s32.totalorder %v9949_v51, 3435973837  ;;  %vm2533_vm7 = vcmp.ge.s32.totalorder %v9964_v17, 3435973837  ;;  %v2399_v5 = vxor.u32 %v2367_v30, %v2335_v6 }
 0x131   : > { %v2229_v23 = vadd.s32 %v10022_v58, %v9732_v15  ;;  %v2254_v43 = vadd.s32 %v9744_v22, %v2221_v48  ;;  %v10040_v26 = vadd.s32 384, %v9699_v61  ;;  %vm2106_vm8 = vcmp.gt.f32.partialorder %v1743_v13, 0.0  ;;  %v8786_v30 = vld [vmem:[#allocation9 + $0x32c] sm:$0xf0]  ;;  %vm10080_vm12 = vmpackc.low %vm2533_vm7, %vm2525_vm6 }
 0x132   : > { %v2138_v24 = vmul.f32 0.2, %v1743_v13  ;;  %v11244_v1 = vor.u32 %v9870_v44, %v9868_v60  ;;  %v11245_v45 = vor.u32 %v9888_v4, %v9881_v36  ;;  %vm2526_vm9 = vcmp.ge.s32.totalorder %v10002_v10, 3435973837  ;;  %v1761_v44 = vpop.f32.mrf.mxu2  ;;  %v1780_v60 = vpop.f32.mrf.mxu3 }
 0x133   : > { %11243 = vst [vmem:[#allocation18_spill] sm:$0xff] %v10040_v26  ;;  %v2407_v40 = vxor.u32 %v2375_v25, %v2343_v27  ;;  %v2261_v21 = vadd.s32 %v9744_v22, %v2228_v47  ;;  %v2431_v37 = vmul.u32 3266489909, %v2399_v5  ;;  %v2317_v38 = vxor.u32 %v2285_v32, %v2253_v54  ;;  %v1725_v52 = vpop.f32.mrf.mxu0  ;;  %v1744_v2 = vpop.f32.mrf.mxu1 }
 0x134   : > { %4189 = vmatpush.bf16.msra.mxu0 %v11244_v1  ;;  %4208 = vmatpush.bf16.msra.mxu1 %v11245_v45  ;;  %v2262_v42 = vadd.s32 %v9744_v22, %v2229_v23  ;;  %v2286_v50 = vshrl.u32 %v2254_v43, 16  ;;  %v10052_v46 = vpack.c.bf16 %v2566_v11, %v9976_v12  ;;  %vm2534_vm10 = vcmp.ge.s32.totalorder %v10004_v55, 3435973837 }
 0x135   : > { %4227 = vmatpush.bf16.msra.mxu2 %v7169_v0  ;;  %v2439_v36 = vmul.u32 3266489909, %v2407_v40  ;;  %v2293_v4 = vshrl.u32 %v2261_v21, 16  ;;  %v10055_v57 = vadd.f32 %v1777_v56, %v1759_v16  ;;  %v2170_v6 = vsel %vm2106_vm8, %v1743_v13, %v2138_v24  ;;  %v7296_v16 = vld [vmem:[#allocation9 + $0x320] sm:$0xf]  ;;  %vm10092_vm13 = vmpackc.low %vm2534_vm10, %vm2526_vm9 }
 0x136   : > { %v1762_v0 = vadd.f32 %v1761_v44, %v9790_v62  ;;  %v2349_v41 = vmul.u32 2246822507, %v2317_v38  ;;  %v1726_v20 = vadd.f32 %v1725_v52, %v9937_v28  ;;  %v11246_v12 = vor.u32 %v9914_v49, %v9907_v59  ;;  %v8782_v52 = vld [vmem:[#allocation9 + $0x30c] sm:$0xf0] }
 0x137   : > { %v11247_v27 = vor.u32 %v9924_v19, %v9920_v8  ;;  %v2463_v54 = vshrl.u32 %v2431_v37, 16  ;;  %v2325_v56 = vxor.u32 %v2293_v4, %v2261_v21  ;;  %v2294_v11 = vshrl.u32 %v2262_v42, 16 }
 0x138   : > { %4190 = vmatpush.bf16.msra.mxu0 %v11246_v12  ;;  %v2471_v48 = vshrl.u32 %v2439_v36, 16  ;;  %v2381_v13 = vshrl.u32 %v2349_v41, 13  ;;  %v2318_v14 = vxor.u32 %v2286_v50, %v2254_v43  ;;  %v2207_v28 = vadd.s32 %v9712_v3, %v10040_v26  ;;  %v7280_v50 = vld [vmem:[#allocation9 + $0x300] sm:$0xf] }
 0x139   : > { %4209 = vmatpush.bf16.msra.mxu1 %v11247_v27  ;;  %4228 = vmatpush.bf16.msra.mxu2 %v7153_v39  ;;  %v10068_v25 = vmul.f32 1.4285715, %v2170_v6  ;;  %v1745_v59 = vadd.f32 %v1744_v2, %v1726_v20  ;;  %v2357_v49 = vmul.u32 2246822507, %v2325_v56  ;;  %v2326_v47 = vxor.u32 %v2294_v11, %v2262_v42  ;;  %v7520_v2 = vld [vmem:[#allocation9 + $0x4e0] sm:$0xf] }
 0x13a   : > { %v10070_v32 = vadd.f32 %v1780_v60, %v1762_v0  ;;  %v2413_v8 = vxor.u32 %v2381_v13, %v2349_v41  ;;  %v2350_v19 = vmul.u32 2246822507, %v2318_v14  ;;  %v7297_v63 = vor.u32 %v8786_v30, %v7296_v16  ;;  %v1763_v21 = vpop.f32.mrf.mxu2  ;;  %v1782_v38 = vpop.f32.mrf.mxu3  ;;  %v8842_v27 = vld [vmem:[#allocation9 + $0x4ec] sm:$0xf0]  ;;  %v7504_v16 = vld [vmem:[#allocation9 + $0x4c0] sm:$0xf] }
 0x13b   : > { %vm2114_vm11 = vcmp.gt.f32.partialorder %v1745_v59, 0.0  ;;  %v2146_v5 = vmul.f32 0.2, %v1745_v59  ;;  %v10072_v23 = vxor.u32 %v2463_v54, %v2431_v37  ;;  %v2389_v39 = vshrl.u32 %v2357_v49, 13  ;;  %v1794_v4 = vpop.f32.mrf.mxu0  ;;  %v1813_v6 = vpop.f32.mrf.mxu1  ;;  %v8838_v30 = vld [vmem:[#allocation9 + $0x4cc] sm:$0xf0] }
 0x13c   : > { %v10074_v24 = vxor.u32 %v2471_v48, %v2439_v36  ;;  %v2445_v43 = vmul.u32 3266489909, %v2413_v8  ;;  %v2358_v1 = vmul.u32 2246822507, %v2326_v47  ;;  %v2382_v45 = vshrl.u32 %v2350_v19, 13  ;;  %4246 = vmatpush.bf16.msra.mxu3 %v7297_v63  ;;  %v11252_v13 = vld [vmem:[#allocation24_spill] sm:$0xff] }
 0x13d   : > { %v2178_v40 = vsel %vm2114_vm11, %v1745_v59, %v2146_v5  ;;  %v2421_v37 = vxor.u32 %v2389_v39, %v2357_v49  ;;  %v2215_v44 = vadd.s32 %v9723_v9, %v10040_v26  ;;  %v2240_v60 = vadd.s32 %v9744_v22, %v2207_v28  ;;  %7920 = vmatmul.msk.bf16.vlgmr.msra.gmra.mxu0 %vm10080_vm12, %v11252_v13 }
 0x13e   : > { %v1764_v36 = vadd.f32 %v1763_v21, %v9790_v62  ;;  %v2477_v17 = vshrl.u32 %v2445_v43, 16  ;;  %v2390_v0 = vshrl.u32 %v2358_v1, 13  ;;  %v10098_v41 = vadd.s32 %v9983_v18, %v9933_v33  ;;  %7926 = vmatmul.msk.bf16.vlgmr.msra.gmra.mxu1 %vm10092_vm13, %v10052_v46 }
 0x13f   : > { %v10100_v20 = vmul.f32 1.4285715, %v2178_v40  ;;  %v1795_v62 = vadd.f32 %v1794_v4, %v9996_v29  ;;  %v2453_v12 = vmul.u32 3266489909, %v2421_v37  ;;  %v2414_v10 = vxor.u32 %v2382_v45, %v2350_v19  ;;  %v7488_v45 = vld [vmem:[#allocation9 + $0x4a0] sm:$0xf] }
 0x140   : > { %v10103_v55 = vadd.f32 %v1782_v38, %v1764_v36  ;;  %v1814_v54 = vadd.f32 %v1813_v6, %v9962_v34  ;;  %v10106_v56 = vxor.u32 %v2477_v17, %v2445_v43  ;;  %v2422_v11 = vxor.u32 %v2390_v0, %v2358_v1  ;;  %v10118_v36 = vld [vmem:[#allocation8] sm:$0xff]  ;;  %v8834_v4 = vld [vmem:[#allocation9 + $0x4ac] sm:$0xf0] }
 0x141   : > { %vm2091_vm14 = vcmp.gt.f32.partialorder %v1795_v62, 0.0  ;;  %v2123_v48 = vmul.f32 0.2, %v1795_v62  ;;  %vm2527_vm15 = vcmp.ge.s32.totalorder %v10072_v23, 3435973837  ;;  %v2485_v29 = vshrl.u32 %v2453_v12, 16 }
 0x142   : > { %vm2535_vm0 = vcmp.ge.s32.totalorder %v10074_v24, 3435973837  ;;  %v2446_v14 = vmul.u32 3266489909, %v2414_v10  ;;  %vm2541_vm1 = vcmp.ge.s32.totalorder %v10106_v56, 3435973837  ;;  %v7281_v59 = vor.u32 %v8782_v52, %v7280_v50  ;;  %v1832_v40 = vpop.f32.mrf.mxu2  ;;  %v1851_v21 = vpop.f32.mrf.mxu3 }
 0x143   : > { %v2454_v28 = vmul.u32 3266489909, %v2422_v11  ;;  %v7521_v49 = vor.u32 %v8842_v27, %v7520_v2  ;;  %v2155_v47 = vsel %vm2091_vm14, %v1795_v62, %v2123_v48  ;;  %v2517_v8 = vxor.u32 %v2485_v29, %v2453_v12  ;;  %v1815_v17 = vpop.f32.mrf.mxu1  ;;  %v7472_v27 = vld [vmem:[#allocation9 + $0x480] sm:$0xf]  ;;  %vm10134_vm7 = vmpackc.low %vm2535_vm0, %vm2527_vm15  ;;  %v8897_v56 = vld [vmem:[#allocation9 + $0x6ac] sm:$0xf] }
 0x144   : > { %v2478_v19 = vshrl.u32 %v2446_v14, 16  ;;  %v2248_v63 = vadd.s32 %v9744_v22, %v2215_v44  ;;  %v2559_v5 = vmul.f32 1.4285715, %v2155_v47  ;;  %4247 = vmatpush.bf16.msra.mxu3 %v7281_v59  ;;  %v2272_v43 = vshrl.u32 %v2240_v60, 16  ;;  %v1796_v44 = vpop.f32.mrf.mxu0 }
 0x145   : > { %v2486_v39 = vshrl.u32 %v2454_v28, 16  ;;  %4259 = vmatpush.bf16.msrb.mxu0 %v7521_v49  ;;  %v7505_v1 = vor.u32 %v8838_v30, %v7504_v16  ;;  %vm2549_vm2 = vcmp.ge.s32.totalorder %v2517_v8, 3435973837  ;;  %v10121_v50 = vperm.slane %v10118_v36, 4 }
 0x146   : > { %v2510_v38 = vxor.u32 %v2478_v19, %v2446_v14  ;;  %v2280_v37 = vshrl.u32 %v2248_v63, 16  ;;  %v1833_v6 = vadd.f32 %v1832_v40, %v1814_v54  ;;  %v2304_v52 = vxor.u32 %v2272_v43, %v2240_v60  ;;  %v8830_v54 = vld [vmem:[#allocation9 + $0x48c] sm:$0xf0]  ;;  %vm10141_vm8 = vmpackc.low %vm2549_vm2, %vm2541_vm1 }
 0x147   : > { %v2518_v0 = vxor.u32 %v2486_v39, %v2454_v28  ;;  %v7489_v2 = vor.u32 %v8834_v4, %v7488_v45  ;;  %v1797_v62 = vadd.f32 %v1796_v44, %v10055_v57  ;;  %v1816_v12 = vadd.f32 %v1815_v17, %v9962_v34  ;;  %v8826_v44 = vld [vmem:[#allocation9 + $0x46c] sm:$0xf0] }
 0x148   : > { %vm2542_vm3 = vcmp.ge.s32.totalorder %v2510_v38, 3435973837  ;;  %v2312_v10 = vxor.u32 %v2280_v37, %v2248_v63  ;;  %v1852_v11 = vadd.f32 %v1851_v21, %v1833_v6  ;;  %v2336_v16 = vmul.u32 2246822507, %v2304_v52  ;;  %v7456_v6 = vld [vmem:[#allocation9 + $0x460] sm:$0xf] }
 0x149   : > { %vm2550_vm4 = vcmp.ge.s32.totalorder %v2518_v0, 3435973837  ;;  %4260 = vmatpush.bf16.msrb.mxu0 %v7505_v1  ;;  %v2230_v30 = vadd.s32 %v10022_v58, %v9933_v33  ;;  %vm2099_vm5 = vcmp.gt.f32.partialorder %v1797_v62, 0.0  ;;  %v2131_v48 = vmul.f32 0.2, %v1797_v62 }
 0x14a   : > { %v2344_v29 = vmul.u32 2246822507, %v2312_v10  ;;  %v2255_v60 = vadd.s32 %v9744_v22, %v10098_v41  ;;  %vm2092_vm6 = vcmp.gt.f32.partialorder %v1852_v11, 0.0  ;;  %v2124_v57 = vmul.f32 0.2, %v1852_v11  ;;  %v1834_v40 = vpop.f32.mrf.mxu2  ;;  %v1853_v21 = vpop.f32.mrf.mxu3  ;;  %vm10153_vm9 = vmpackc.low %vm2550_vm4, %vm2542_vm3 }
 0x14b   : > { %v2368_v14 = vshrl.u32 %v2336_v16, 13  ;;  %v2263_v28 = vadd.s32 %v9744_v22, %v2230_v30  ;;  %v2163_v59 = vsel %vm2099_vm5, %v1797_v62, %v2131_v48  ;;  %v7473_v19 = vor.u32 %v8830_v54, %v7472_v27  ;;  %v1818_v62 = vpop.f32.mrf.mxu1  ;;  %v8902_v33 = vld [vmem:[#allocation9 + $0x6cc] sm:$0xf0] }
 0x14c   : > { %v2376_v49 = vshrl.u32 %v2344_v29, 13  ;;  %v2287_v47 = vshrl.u32 %v2255_v60, 16  ;;  %v2156_v63 = vsel %vm2092_vm6, %v1852_v11, %v2124_v57  ;;  %v2567_v39 = vmul.f32 1.4285715, %v2163_v59  ;;  %v7440_v59 = vld [vmem:[#allocation9 + $0x440] sm:$0xf] }
 0x14d   : > { %v11253_v43 = vmov 0  ;;  %v2400_v41 = vxor.u32 %v2368_v14, %v2336_v16  ;;  %4261 = vmatpush.bf16.msrb.mxu0 %v7489_v2  ;;  %v2295_v1 = vshrl.u32 %v2263_v28, 16  ;;  %v2560_v45 = vmul.f32 1.4285715, %v2156_v63  ;;  %v1799_v2 = vpop.f32.mrf.mxu0 }
 0x14e   : > { %v11254_v43 = vsel %vm10134_vm7, 4294967295, %v11253_v43  ;;  %v10147_v23 = vpack.c.bf16 %v10100_v20, %v10068_v25  ;;  %v2408_v24 = vxor.u32 %v2376_v49, %v2344_v29  ;;  %v2319_v4 = vxor.u32 %v2287_v47, %v2255_v60  ;;  %7923 = vmatmul.msk.bf16.gmra.mxu0 %vm10141_vm8, %v10012_v31  ;;  %v8822_v49 = vld [vmem:[#allocation9 + $0x44c] sm:$0xf0] }
 0x14f   : > { %11255 = vst [vmem:[#allocation19_spill] sm:$0xff] %v11254_v43  ;;  %v10149_v17 = vpack.c.bf16 %v2567_v39, %v2559_v5  ;;  %v1835_v52 = vadd.f32 %v1834_v40, %v1816_v12  ;;  %v2432_v8 = vmul.u32 3266489909, %v2400_v41  ;;  %v2327_v10 = vxor.u32 %v2295_v1, %v2263_v28  ;;  %v7450_v43 = vld [vmem:[#allocation9 + $0x458] sm:$0xf0] }
 0x150   : > { %v1800_v25 = vadd.f32 %v1799_v2, %v10070_v32  ;;  %v1819_v20 = vadd.f32 %v1818_v62, %v9962_v34  ;;  %v2440_v27 = vmul.u32 3266489909, %v2408_v24  ;;  %v2351_v11 = vmul.u32 2246822507, %v2319_v4  ;;  %7929 = vmatmul.msk.bf16.gmra.mxu1 %vm10153_vm9, %v10147_v23 }
 0x151   : > { %v1854_v16 = vadd.f32 %v1853_v21, %v1835_v52  ;;  %7932 = vmatmul.msk.bf16.vlgmr.msra.gmra.mxu2 %vm10134_vm7, %v10149_v17  ;;  %v2464_v5 = vshrl.u32 %v2432_v8, 16  ;;  %v2359_v38 = vmul.u32 2246822507, %v2327_v10  ;;  %4262 = vmatpush.bf16.msrb.mxu0 %v7473_v19  ;;  %v7457_v0 = vor.u32 %v8826_v44, %v7456_v6  ;;  %v8818_v10 = vld [vmem:[#allocation9 + $0x42c] sm:$0xf0] }
 0x152   : > { %vm2107_vm10 = vcmp.gt.f32.partialorder %v1800_v25, 0.0  ;;  %v2139_v12 = vmul.f32 0.2, %v1800_v25  ;;  %v2472_v32 = vshrl.u32 %v2440_v27, 16  ;;  %v2383_v30 = vshrl.u32 %v2351_v11, 13  ;;  %v1837_v41 = vpop.f32.mrf.mxu2  ;;  %v1856_v1 = vpop.f32.mrf.mxu3 }
 0x153   : > { %vm2100_vm11 = vcmp.gt.f32.partialorder %v1854_v16, 0.0  ;;  %v2132_v54 = vmul.f32 0.2, %v1854_v16  ;;  %v2496_v48 = vxor.u32 %v2464_v5, %v2432_v8  ;;  %v2391_v29 = vshrl.u32 %v2359_v38, 13  ;;  %v1820_v6 = vpop.f32.mrf.mxu1  ;;  %v7424_v8 = vld [vmem:[#allocation9 + $0x420] sm:$0xf] }
 0x154   : > { %v2171_v60 = vsel %vm2107_vm10, %v1800_v25, %v2139_v12  ;;  %v2504_v57 = vxor.u32 %v2472_v32, %v2440_v27  ;;  %v2415_v14 = vxor.u32 %v2383_v30, %v2351_v11  ;;  %v2223_v28 = vadd.s32 %v9983_v18, %v10040_v26  ;;  %v7408_v12 = vld [vmem:[#allocation9 + $0x400] sm:$0xf]  ;;  %v8814_v32 = vld [vmem:[#allocation9 + $0x40c] sm:$0xf0] }
 0x155   : > { %v2164_v47 = vsel %vm2100_vm11, %v1854_v16, %v2132_v54  ;;  %v10170_v19 = vmul.f32 1.4285715, %v2171_v60  ;;  %vm2528_vm14 = vcmp.ge.s32.totalorder %v2496_v48, 3435973837  ;;  %v2423_v63 = vxor.u32 %v2391_v29, %v2359_v38  ;;  %4263 = vmatpush.bf16.msrb.mxu0 %v7457_v0  ;;  %v1801_v4 = vpop.f32.mrf.mxu0  ;;  %v8874_v60 = vld [vmem:[#allocation9 + $0x5ec] sm:$0xf0] }
 0x156   : > { %v2568_v39 = vmul.f32 1.4285715, %v2164_v47  ;;  %vm2536_vm15 = vcmp.ge.s32.totalorder %v2504_v57, 3435973837  ;;  %v2447_v40 = vmul.u32 3266489909, %v2415_v14  ;;  %v2231_v21 = vadd.s32 %v10022_v58, %v10040_v26 }
 0x157   : > { %v1838_v24 = vadd.f32 %v1837_v41, %v1819_v20  ;;  %vm10174_vm0 = vmpackc.low %vm2536_vm15, %vm2528_vm14  ;;  %v11260_v44 = vmov 0  ;;  %v2455_v52 = vmul.u32 3266489909, %v2423_v63  ;;  %v2256_v2 = vadd.s32 %v9744_v22, %v2223_v28  ;;  %v8712_v41 = vld [vmem:[#allocation9 + $0xe4] sm:$0xf] }
 0x158   : > { %v11261_v44 = vsel %vm10174_vm0, 4294967295, %v11260_v44  ;;  %v7441_v62 = vor.u32 %v8822_v49, %v7440_v59  ;;  %v10179_v25 = vpack.c.bf16 %v2568_v39, %v2560_v45  ;;  %v1802_v27 = vadd.f32 %v1801_v4, %v10103_v55  ;;  %v7648_v55 = vld [vmem:[#allocation9 + $0x5e0] sm:$0xf]  ;;  %v8870_v49 = vld [vmem:[#allocation9 + $0x5cc] sm:$0xf0] }
 0x159   : > { %11262 = vst [vmem:[#allocation24_spill] sm:$0xff] %v11261_v44  ;;  %v1821_v11 = vadd.f32 %v1820_v6, %v9962_v34  ;;  %v2479_v16 = vshrl.u32 %v2447_v40, 16  ;;  %v1857_v20 = vadd.f32 %v1856_v1, %v1838_v24  ;;  %v2487_v5 = vshrl.u32 %v2455_v52, 16  ;;  %v7632_v59 = vld [vmem:[#allocation9 + $0x5c0] sm:$0xf] }
 0x15a   : > { %11263 = vst [vmem:[#allocation28_spill] sm:$0xff] %v10179_v25  ;;  %v2264_v38 = vadd.s32 %v9744_v22, %v2231_v21  ;;  %v2288_v0 = vshrl.u32 %v2256_v2, 16  ;;  %4264 = vmatpush.bf16.msrb.mxu0 %v7441_v62  ;;  %vm2115_vm1 = vcmp.gt.f32.partialorder %v1802_v27, 0.0  ;;  %v2147_v30 = vmul.f32 0.2, %v1802_v27  ;;  %7938 = vmatmul.msk.bf16.vlgmr.msra.gmra.mxu3 %vm10174_vm0, %v10179_v25  ;;  %v1858_v21 = vpop.f32.mrf.mxu3 }
 0x15b   : > { %v2511_v45 = vxor.u32 %v2479_v16, %v2447_v40  ;;  %v7425_v54 = vor.u32 %v8818_v10, %v7424_v8  ;;  %vm2108_vm2 = vcmp.gt.f32.partialorder %v1857_v20, 0.0  ;;  %v2140_v34 = vmul.f32 0.2, %v1857_v20  ;;  %v1839_v40 = vpop.f32.mrf.mxu2  ;;  %v1889_v8 = vpop.f32.mrf.mxu1  ;;  %v7418_v44 = vld [vmem:[#allocation9 + $0x418] sm:$0xf0] }
 0x15c   : > { %v2519_v48 = vxor.u32 %v2487_v5, %v2455_v52  ;;  %v2296_v29 = vshrl.u32 %v2264_v38, 16  ;;  %v2179_v57 = vsel %vm2115_vm1, %v1802_v27, %v2147_v30  ;;  %v2320_v14 = vxor.u32 %v2288_v0, %v2256_v2  ;;  %v8708_v30 = vld [vmem:[#allocation9 + $0xc4] sm:$0xf] }
 0x15d   : > { %vm2543_vm3 = vcmp.ge.s32.totalorder %v2511_v45, 3435973837  ;;  %v7409_v28 = vor.u32 %v8814_v32, %v7408_v12  ;;  %v2172_v47 = vsel %vm2108_vm2, %v1857_v20, %v2140_v34  ;;  %v2583_v63 = vmul.f32 1.4285715, %v2179_v57  ;;  %v1870_v62 = vpop.f32.mrf.mxu0  ;;  %v7010_v20 = vld [vmem:[#allocation9 + $0xf0] sm:$0xf0] }
 0x15e   : > { %vm2551_vm4 = vcmp.ge.s32.totalorder %v2519_v48, 3435973837  ;;  %v2328_v39 = vxor.u32 %v2296_v29, %v2264_v38  ;;  %4265 = vmatpush.bf16.msrb.mxu0 %v7425_v54  ;;  %v10187_v1 = vmul.f32 1.4285715, %v2172_v47  ;;  %v11264_v24 = vmov 0 }
 0x15f   : > { %vm10189_vm5 = vmpackc.low %vm2551_vm4, %vm2543_vm3  ;;  %v2352_v4 = vmul.u32 2246822507, %v2320_v14  ;;  %v7649_v6 = vor.u32 %v8874_v60, %v7648_v55  ;;  %v2196_v52 = vadd.s32 512, %v9699_v61  ;;  %v1840_v2 = vadd.f32 %v1839_v40, %v1821_v11  ;;  %v7616_v32 = vld [vmem:[#allocation9 + $0x5a0] sm:$0xf] }
 0x160   : > { %v11265_v24 = vsel %vm10189_vm5, 4294967295, %v11264_v24  ;;  %v10195_v10 = vpack.c.bf16 %v2583_v63, %v10170_v19  ;;  %v2360_v27 = vmul.u32 2246822507, %v2328_v39  ;;  %v7633_v16 = vor.u32 %v8870_v49, %v7632_v59  ;;  %v8866_v54 = vld [vmem:[#allocation9 + $0x5ac] sm:$0xf0] }
 0x161   : > { %11266 = vst [vmem:[#allocation29_spill] sm:$0xff] %v11265_v24  ;;  %v1871_v5 = vadd.f32 %v1870_v62, %v10121_v50  ;;  %v2384_v38 = vshrl.u32 %v2352_v4, 13  ;;  %4278 = vmatpush.bf16.msrb.mxu1 %v7649_v6  ;;  %v2208_v0 = vadd.s32 %v9712_v3, %v2196_v52  ;;  %v2216_v12 = vadd.s32 %v9723_v9, %v2196_v52  ;;  %v6994_v55 = vld [vmem:[#allocation9 + $0xd0] sm:$0xf0]  ;;  %v7600_v40 = vld [vmem:[#allocation9 + $0x580] sm:$0xf] }
 0x162   : > { %11267 = vst [vmem:[#allocation30_spill] sm:$0xff] %v10195_v10  ;;  %v1859_v45 = vadd.f32 %v1858_v21, %v1840_v2  ;;  %7935 = vmatmul.msk.bf16.gmra.mxu2 %vm10189_vm5, %v10195_v10  ;;  %v2392_v19 = vshrl.u32 %v2360_v27, 13  ;;  %4266 = vmatpush.bf16.msrb.mxu0 %v7409_v28  ;;  %v7013_v11 = vor.u32 %v8712_v41, %v7010_v20  ;;  %v8862_v21 = vld [vmem:[#allocation9 + $0x58c] sm:$0xf0]  ;;  %v10206_v62 = vpop.f32.mrf.mxu3  ;;  %v10585_v37 = vstv %s4839_s14 }
 0x163   : > { %v1890_v34 = vadd.f32 %v1889_v8, %v1871_v5  ;;  %v2416_v48 = vxor.u32 %v2384_v38, %v2352_v4  ;;  %v2241_v29 = vadd.s32 %v9744_v22, %v2208_v0  ;;  %v2249_v60 = vadd.s32 %v9744_v22, %v2216_v12  ;;  %v1908_v2 = vpop.f32.mrf.mxu2  ;;  %v8704_v5 = vld [vmem:[#allocation9 + $0xa4] sm:$0xf]  ;;  %v1891_v12 = vpop.f32.mrf.mxu1 }
 0x164   : > { %vm2116_vm6 = vcmp.gt.f32.partialorder %v1859_v45, 0.0  ;;  %v2148_v57 = vmul.f32 0.2, %v1859_v45  ;;  %v2424_v14 = vxor.u32 %v2392_v19, %v2360_v27  ;;  %v6997_v59 = vor.u32 %v8708_v30, %v6994_v55 }
 0x165   : > { %v2448_v49 = vmul.u32 3266489909, %v2416_v48  ;;  %v2273_v47 = vshrl.u32 %v2241_v29, 16  ;;  %v2281_v63 = vshrl.u32 %v2249_v60, 16  ;;  %4279 = vmatpush.bf16.msrb.mxu1 %v7633_v16  ;;  %v7617_v39 = vor.u32 %v8866_v54, %v7616_v32  ;;  %v1872_v0 = vpop.f32.mrf.mxu0  ;;  %v6978_v32 = vld [vmem:[#allocation9 + $0xb0] sm:$0xf0] }
 0x166   : > { %4335 = vmatpush.bf16.msra.mxu0 %v7013_v11  ;;  %v2180_v28 = vsel %vm2116_vm6, %v1859_v45, %v2148_v57  ;;  %v2456_v41 = vmul.u32 3266489909, %v2424_v14  ;;  %v2224_v4 = vadd.s32 %v9983_v18, %v2196_v52  ;;  %v1909_v38 = vadd.f32 %v1908_v2, %v1890_v34  ;;  %v7584_v45 = vld [vmem:[#allocation9 + $0x560] sm:$0xf] }
 0x167   : > { %v2584_v6 = vmul.f32 1.4285715, %v2180_v28  ;;  %v2480_v8 = vshrl.u32 %v2448_v49, 16  ;;  %v2305_v20 = vxor.u32 %v2273_v47, %v2241_v29  ;;  %v2313_v27 = vxor.u32 %v2281_v63, %v2249_v60  ;;  %v8858_v29 = vld [vmem:[#allocation9 + $0x56c] sm:$0xf0] }
 0x168   : > { %v2488_v30 = vshrl.u32 %v2456_v41, 16  ;;  %v7601_v16 = vor.u32 %v8862_v21, %v7600_v40  ;;  %v2232_v19 = vadd.s32 %v10022_v58, %v2196_v52  ;;  %v1873_v11 = vadd.f32 %v1872_v0, %v10121_v50  ;;  %v8700_v60 = vld [vmem:[#allocation9 + $0x84] sm:$0xf]  ;;  %v6962_v63 = vld [vmem:[#allocation9 + $0x90] sm:$0xf0] }
 0x169   : > { %v2512_v54 = vxor.u32 %v2480_v8, %v2448_v49  ;;  %v10211_v55 = vpack.c.bf16 %v2584_v6, %v10187_v1  ;;  %v2337_v48 = vmul.u32 2246822507, %v2305_v20  ;;  %4280 = vmatpush.bf16.msrb.mxu1 %v7617_v39  ;;  %vm2093_vm10 = vcmp.gt.f32.partialorder %v1909_v38, 0.0  ;;  %v7568_v20 = vld [vmem:[#allocation9 + $0x540] sm:$0xf] }
 0x16a   : > { %4336 = vmatpush.bf16.msra.mxu0 %v6997_v59  ;;  %v2125_v34 = vmul.f32 0.2, %v1909_v38  ;;  %v2520_v57 = vxor.u32 %v2488_v30, %v2456_v41  ;;  %v2345_v14 = vmul.u32 2246822507, %v2313_v27  ;;  %v6981_v47 = vor.u32 %v8704_v5, %v6978_v32  ;;  %v8854_v27 = vld [vmem:[#allocation9 + $0x54c] sm:$0xf0]  ;;  %v10225_v30 = vpop.f32.mrf.mxu3 }
 0x16b   : > { %11268 = vst [vmem:[#allocation31_spill] sm:$0xff] %v10211_v55  ;;  %vm2544_vm11 = vcmp.ge.s32.totalorder %v2512_v54, 3435973837  ;;  %v2369_v59 = vshrl.u32 %v2337_v48, 13  ;;  %v11269_v49 = vmov 0  ;;  %v7585_v39 = vor.u32 %v8858_v29, %v7584_v45  ;;  %v1910_v0 = vpop.f32.mrf.mxu2  ;;  %v1894_v54 = vpop.f32.mrf.mxu1 }
 0x16c   : > { %v2157_v28 = vsel %vm2093_vm10, %v1909_v38, %v2125_v34  ;;  %vm2552_vm14 = vcmp.ge.s32.totalorder %v2520_v57, 3435973837  ;;  %v2377_v52 = vshrl.u32 %v2345_v14, 13  ;;  %v6965_v21 = vor.u32 %v8700_v60, %v6962_v63  ;;  %v8696_v5 = vld [vmem:[#allocation9 + $0x64] sm:$0xf] }
 0x16d   : > { %v2561_v40 = vmul.f32 1.4285715, %v2157_v28  ;;  %vm10213_vm15 = vmpackc.low %vm2552_vm14, %vm2544_vm11  ;;  %v2401_v1 = vxor.u32 %v2369_v59, %v2337_v48  ;;  %4281 = vmatpush.bf16.msrb.mxu1 %v7601_v16  ;;  %v1892_v6 = vadd.f32 %v1891_v12, %v1873_v11  ;;  %v2257_v2 = vadd.s32 %v9744_v22, %v2224_v4  ;;  %v6946_v12 = vld [vmem:[#allocation9 + $0x70] sm:$0xf0]  ;;  %v1875_v11 = vpop.f32.mrf.mxu0  ;;  %v7552_v63 = vld [vmem:[#allocation9 + $0x520] sm:$0xf] }
 0x16e   : > { %v11270_v49 = vsel %vm10213_vm15, 4294967295, %v11269_v49  ;;  %4337 = vmatpush.bf16.msra.mxu0 %v6981_v47  ;;  %7941 = vmatmul.msk.bf16.gmra.mxu3 %vm10213_vm15, %v10211_v55  ;;  %v2409_v41 = vxor.u32 %v2377_v52, %v2345_v14  ;;  %v2265_v8 = vadd.s32 %v9744_v22, %v2232_v19  ;;  %v10223_v38 = vperm.slane %v10118_v36, 5 }
 0x16f   : > { %11271 = vst [vmem:[#allocation32_spill] sm:$0xff] %v11270_v49  ;;  %v2433_v16 = vmul.u32 3266489909, %v2401_v1  ;;  %v10228_v32 = vadd.s32 640, %v9699_v61  ;;  %v1911_v45 = vadd.f32 %v1910_v0, %v1892_v6  ;;  %v2289_v48 = vshrl.u32 %v2257_v2, 16 }
 0x170   : > { %v2441_v4 = vmul.u32 3266489909, %v2409_v41  ;;  %v7569_v19 = vor.u32 %v8854_v27, %v7568_v20  ;;  %v1876_v29 = vadd.f32 %v1875_v11, %v10121_v50  ;;  %v2297_v34 = vshrl.u32 %v2265_v8, 16  ;;  %v8850_v1 = vld [vmem:[#allocation9 + $0x52c] sm:$0xf0] }
 0x171   : > { %v2465_v60 = vshrl.u32 %v2433_v16, 16  ;;  %4282 = vmatpush.bf16.msrb.mxu1 %v7585_v39  ;;  %v6949_v57 = vor.u32 %v8696_v5, %v6946_v12  ;;  %vm2101_vm1 = vcmp.gt.f32.partialorder %v1911_v45, 0.0  ;;  %v2133_v14 = vmul.f32 0.2, %v1911_v45  ;;  %v8692_v6 = vld [vmem:[#allocation9 + $0x44] sm:$0xf] }
 0x172   : > { %4338 = vmatpush.bf16.msra.mxu0 %v6965_v21  ;;  %v2473_v59 = vshrl.u32 %v2441_v4, 16  ;;  %v2321_v47 = vxor.u32 %v2289_v48, %v2257_v2  ;;  %v2329_v52 = vxor.u32 %v2297_v34, %v2265_v8  ;;  %v6930_v0 = vld [vmem:[#allocation9 + $0x50] sm:$0xf0]  ;;  %v2209_v41 = vadd.s32 %v9712_v3, %v10228_v32  ;;  %v7536_v8 = vld [vmem:[#allocation9 + $0x500] sm:$0xf]  ;;  %v10236_v26 = vpop.f32.mrf.mxu3 }
 0x173   : > { %v2497_v28 = vxor.u32 %v2465_v60, %v2433_v16  ;;  %v2165_v20 = vsel %vm2101_vm1, %v1911_v45, %v2133_v14  ;;  %v1895_v27 = vadd.f32 %v1894_v54, %v1876_v29  ;;  %v7553_v12 = vor.u32 %v8850_v1, %v7552_v63  ;;  %v1913_v34 = vpop.f32.mrf.mxu2  ;;  %v8906_v1 = vld [vmem:[#allocation9 + $0x6ec] sm:$0xf0]  ;;  %v7394_v49 = vld [vmem:[#allocation9 + $0x3f0] sm:$0xf0] }
 0x174   : > { %v2505_v11 = vxor.u32 %v2473_v59, %v2441_v4  ;;  %v2353_v39 = vmul.u32 2246822507, %v2321_v47  ;;  %v2569_v21 = vmul.f32 1.4285715, %v2165_v20  ;;  %v2361_v5 = vmul.u32 2246822507, %v2329_v52  ;;  %v1896_v59 = vpop.f32.mrf.mxu1 }
 0x175   : > { %vm2529_vm2 = vcmp.ge.s32.totalorder %v2497_v28, 3435973837  ;;  %4283 = vmatpush.bf16.msrb.mxu1 %v7569_v19  ;;  %v6933_v16 = vor.u32 %v8692_v6, %v6930_v0  ;;  %v2242_v48 = vadd.s32 %v9744_v22, %v2209_v41  ;;  %v8846_v4 = vld [vmem:[#allocation9 + $0x50c] sm:$0xf0]  ;;  %v8688_v19 = vld [vmem:[#allocation9 + $0x24] sm:$0xf]  ;;  %v2217_v29 = vadd.s32 %v9723_v9, %v10228_v32 }
 0x176   : > { %4339 = vmatpush.bf16.msra.mxu0 %v6949_v57  ;;  %vm2537_vm3 = vcmp.ge.s32.totalorder %v2505_v11, 3435973837  ;;  %v2385_v2 = vshrl.u32 %v2353_v39, 13  ;;  %v10234_v60 = vpack.c.bf16 %v2569_v21, %v2561_v40  ;;  %v2393_v54 = vshrl.u32 %v2361_v5, 13  ;;  %v1877_v40 = vpop.f32.mrf.mxu0  ;;  %v6914_v28 = vld [vmem:[#allocation9 + $0x30] sm:$0xf0] }
 0x177   : > { %vm10238_vm4 = vmpackc.low %vm2537_vm3, %vm2529_vm2  ;;  %v10246_v57 = vadd.f32 %v10206_v62, %v10223_v38  ;;  %v1914_v14 = vadd.f32 %v1913_v34, %v1895_v27  ;;  %v7537_v63 = vor.u32 %v8846_v4, %v7536_v8  ;;  %v7776_v52 = vld [vmem:[#allocation9 + $0x6e0] sm:$0xf]  ;;  %v1878_v6 = vadd.f32 %v1877_v40, %v10121_v50  ;;  %v8684_v62 = vld [vmem:[#allocation9 + $0x4] sm:$0xf] }
 0x178   : > { %v2417_v47 = vxor.u32 %v2385_v2, %v2353_v39  ;;  %7944 = vmatmul.msk.bf16.vlgmr.msrb.gmra.mxu0 %vm10238_vm4, %v10234_v60  ;;  %v2425_v0 = vxor.u32 %v2393_v54, %v2361_v5  ;;  %v6917_v41 = vor.u32 %v8688_v19, %v6914_v28  ;;  %v2274_v20 = vshrl.u32 %v2242_v48, 16  ;;  %v6898_v11 = vld [vmem:[#allocation9 + $0x10] sm:$0xf0]  ;;  %v8744_v50 = vld [vmem:[#allocation9 + $0x1e4] sm:$0xf] }
 0x179   : > { %4284 = vmatpush.bf16.msrb.mxu1 %v7553_v12  ;;  %vm2109_vm6 = vcmp.gt.f32.partialorder %v1914_v14, 0.0  ;;  %v2141_v27 = vmul.f32 0.2, %v1914_v14  ;;  %v7777_v39 = vor.u32 %v8906_v1, %v7776_v52  ;;  %v2250_v8 = vadd.s32 %v9744_v22, %v2217_v29  ;;  %v7138_v4 = vld [vmem:[#allocation9 + $0x1f0] sm:$0xf0] }
 0x17a   : > { %v2449_v21 = vmul.u32 3266489909, %v2417_v47  ;;  %4340 = vmatpush.bf16.msra.mxu0 %v6933_v16  ;;  %v2457_v2 = vmul.u32 3266489909, %v2425_v0  ;;  %v2306_v34 = vxor.u32 %v2274_v20, %v2242_v48  ;;  %v2225_v40 = vadd.s32 %v9983_v18, %v10228_v32  ;;  %v7760_v28 = vld [vmem:[#allocation9 + $0x6c0] sm:$0xf] }
 0x17b   : > { %v2173_v5 = vsel %vm2109_vm6, %v1914_v14, %v2141_v27  ;;  %v1897_v12 = vadd.f32 %v1896_v59, %v1878_v6  ;;  %4297 = vmatpush.bf16.msrb.mxu2 %v7777_v39  ;;  %v7141_v19 = vor.u32 %v8744_v50, %v7138_v4  ;;  %v2282_v47 = vshrl.u32 %v2250_v8, 16  ;;  %v8740_v0 = vld [vmem:[#allocation9 + $0x1c4] sm:$0xf]  ;;  %v7122_v20 = vld [vmem:[#allocation9 + $0x1d0] sm:$0xf0]  ;;  %v1915_v59 = vpop.f32.mrf.mxu2  ;;  %v10257_v6 = vpop.f32.mrf.mxu3 }
 0x17c   : > { %v2481_v54 = vshrl.u32 %v2449_v21, 16  ;;  %v10255_v15 = vmul.f32 1.4285715, %v2173_v5  ;;  %v2489_v16 = vshrl.u32 %v2457_v2, 16  ;;  %v2338_v52 = vmul.u32 2246822507, %v2306_v34  ;;  %v1965_v53 = vpop.f32.mrf.mxu1 }
 0x17d   : > { %4285 = vmatpush.bf16.msrb.mxu1 %v7537_v63  ;;  %v6901_v48 = vor.u32 %v8684_v62, %v6898_v11  ;;  %v7761_v1 = vor.u32 %v8902_v33, %v7760_v28  ;;  %v8840_v14 = vld [vmem:[#allocation9 + $0x4e4] sm:$0xf]  ;;  %v2314_v39 = vxor.u32 %v2282_v47, %v2250_v8  ;;  %v7125_v4 = vor.u32 %v8740_v0, %v7122_v20  ;;  %v7522_v5 = vld [vmem:[#allocation9 + $0x4f0] sm:$0xf0]  ;;  %v7904_v62 = vld [vmem:[#allocation9 + $0x7e0] sm:$0xf] }
 0x17e   : > { %v2513_v29 = vxor.u32 %v2481_v54, %v2449_v21  ;;  %4341 = vmatpush.bf16.msra.mxu0 %v6917_v41  ;;  %v2521_v27 = vxor.u32 %v2489_v16, %v2457_v2  ;;  %v2370_v50 = vshrl.u32 %v2338_v52, 13  ;;  %v1916_v7 = vadd.f32 %v1915_v59, %v1897_v12  ;;  %v1946_v63 = vpop.f32.mrf.mxu0  ;;  %v8938_v11 = vld [vmem:[#allocation9 + $0x7ec] sm:$0xf0]  ;;  %v7744_v8 = vld [vmem:[#allocation9 + $0x6a0] sm:$0xf] }
 0x17f   : > { %4298 = vmatpush.bf16.msrb.mxu2 %v7761_v1  ;;  %v7525_v41 = vor.u32 %v8840_v14, %v7522_v5  ;;  %v2233_v33 = vadd.s32 %v10022_v58, %v10228_v32  ;;  %v1947_v21 = vadd.f32 %v1946_v63, %v10246_v57  ;;  %v2346_v34 = vmul.u32 2246822507, %v2314_v39  ;;  %v8898_v28 = vld [vmem:[#allocation9 + $0x6ac] sm:$0xf0]  ;;  %v8736_v0 = vld [vmem:[#allocation9 + $0x1a4] sm:$0xf] }
 0x180   : > { %vm2545_vm10 = vcmp.ge.s32.totalorder %v2513_v29, 3435973837  ;;  %vm2553_vm11 = vcmp.ge.s32.totalorder %v2521_v27, 3435973837  ;;  %v2402_v2 = vxor.u32 %v2370_v50, %v2338_v52  ;;  %vm2117_vm14 = vcmp.gt.f32.partialorder %v1916_v7, 0.0 }
 0x181   : > { %4354 = vmatpush.bf16.msra.mxu1 %v7141_v19  ;;  %v2149_v54 = vmul.f32 0.2, %v1916_v7  ;;  %v10263_v12 = vperm.slane %v10118_v36, 6  ;;  %v7905_v19 = vor.u32 %v8938_v11, %v7904_v62  ;;  %v1966_v16 = vadd.f32 %v1965_v53, %v1947_v21  ;;  %v7106_v20 = vld [vmem:[#allocation9 + $0x1b0] sm:$0xf0]  ;;  %vm10271_vm2 = vmpackc.low %vm2553_vm11, %vm2545_vm10 }
 0x182   : > { %4342 = vmatpush.bf16.msra.mxu0 %v6901_v48  ;;  %v2378_v47 = vshrl.u32 %v2346_v34, 13  ;;  %v2434_v1 = vmul.u32 3266489909, %v2402_v2  ;;  %v7745_v32 = vor.u32 %v8898_v28, %v7744_v8  ;;  %v1930_v57 = vadd.f32 %v10225_v30, %v10223_v38  ;;  %v8836_v14 = vld [vmem:[#allocation9 + $0x4c4] sm:$0xf] }
 0x183   : > { %v2181_v52 = vsel %vm2117_vm14, %v1916_v7, %v2149_v54  ;;  %4316 = vmatpush.bf16.msrb.mxu3 %v7905_v19  ;;  %v7506_v59 = vld [vmem:[#allocation9 + $0x4d0] sm:$0xf0]  ;;  %v2258_v39 = vadd.s32 %v9744_v22, %v2225_v40  ;;  %v2266_v48 = vadd.s32 %v9744_v22, %v2233_v33  ;;  %vm2094_vm1 = vcmp.gt.f32.partialorder %v1966_v16, 0.0  ;;  %v8934_v62 = vld [vmem:[#allocation9 + $0x7cc] sm:$0xf0]  ;;  %v1984_v33 = vpop.f32.mrf.mxu2  ;;  %v10278_v21 = vpop.f32.mrf.mxu3 }
 0x184   : > { %v2585_v50 = vmul.f32 1.4285715, %v2181_v52  ;;  %v2126_v53 = vmul.f32 0.2, %v1966_v16  ;;  %4299 = vmatpush.bf16.msrb.mxu2 %v7745_v32  ;;  %v11274_v5 = vmov 0  ;;  %v2466_v7 = vshrl.u32 %v2434_v1, 16  ;;  %v1967_v28 = vpop.f32.mrf.mxu1 }
 0x185   : > { %4355 = vmatpush.bf16.msra.mxu1 %v7125_v4  ;;  %v2410_v4 = vxor.u32 %v2378_v47, %v2346_v34  ;;  %v11275_v5 = vsel %vm10271_vm2, 4294967295, %v11274_v5  ;;  %v7109_v30 = vor.u32 %v8736_v0, %v7106_v20  ;;  %v7509_v63 = vor.u32 %v8836_v14, %v7506_v59  ;;  %v7728_v2 = vld [vmem:[#allocation9 + $0x680] sm:$0xf]  ;;  %v8894_v8 = vld [vmem:[#allocation9 + $0x68c] sm:$0xf0] }
 0x186   : > { %4411 = vmatpush.bf16.msrb.mxu0 %v7525_v41  ;;  %11276 = vst [vmem:[#allocation33_spill] sm:$0xff] %v11275_v5  ;;  %v7888_v41 = vld [vmem:[#allocation9 + $0x7c0] sm:$0xf]  ;;  %v10276_v40 = vperm.slane %v10118_v36, 7  ;;  %v2158_v11 = vsel %vm2094_vm1, %v1966_v16, %v2126_v53  ;;  %v10281_v34 = vpack.c.bf16 %v2585_v50, %v10255_v15  ;;  %v1948_v19 = vpop.f32.mrf.mxu0  ;;  %v2498_v47 = vxor.u32 %v2466_v7, %v2434_v1  ;;  %v8732_v32 = vld [vmem:[#allocation9 + $0x184] sm:$0xf] }
 0x187   : > { %v2442_v29 = vmul.u32 3266489909, %v2410_v4  ;;  %v7889_v27 = vor.u32 %v8934_v62, %v7888_v41  ;;  %v10283_v54 = vmul.f32 1.4285715, %v2158_v11  ;;  %v7729_v36 = vor.u32 %v8894_v8, %v7728_v2  ;;  %v7090_v16 = vld [vmem:[#allocation9 + $0x190] sm:$0xf0] }
 0x188   : > { %11277 = vst [vmem:[#allocation34_spill] sm:$0xff] %v10281_v34  ;;  %v1949_v0 = vadd.f32 %v1948_v19, %v1930_v57  ;;  %7947 = vmatmul.msk.bf16.gmra.mxu0 %vm10271_vm2, %v10281_v34  ;;  %v7093_v52 = vor.u32 %v8732_v32, %v7090_v16  ;;  %v8832_v20 = vld [vmem:[#allocation9 + $0x4a4] sm:$0xf]  ;;  %v7490_v14 = vld [vmem:[#allocation9 + $0x4b0] sm:$0xf0]  ;;  %v2290_v59 = vshrl.u32 %v2258_v39, 16 }
 0x189   : > { %4356 = vmatpush.bf16.msra.mxu1 %v7109_v30  ;;  %v2474_v15 = vshrl.u32 %v2442_v29, 16  ;;  %4317 = vmatpush.bf16.msrb.mxu3 %v7889_v27  ;;  %vm2530_vm3 = vcmp.ge.s32.totalorder %v2498_v47, 3435973837  ;;  %v7493_v50 = vor.u32 %v8832_v20, %v7490_v14  ;;  %v7872_v1 = vld [vmem:[#allocation9 + $0x7a0] sm:$0xf]  ;;  %v2298_v41 = vshrl.u32 %v2266_v48, 16 }
 0x18a   : > { %4412 = vmatpush.bf16.msrb.mxu0 %v7509_v63  ;;  %4300 = vmatpush.bf16.msrb.mxu2 %v7729_v36  ;;  %v8930_v53 = vld [vmem:[#allocation9 + $0x7ac] sm:$0xf0]  ;;  %v1968_v4 = vadd.f32 %v1967_v28, %v1949_v0  ;;  %v7712_v63 = vld [vmem:[#allocation9 + $0x660] sm:$0xf]  ;;  %v2322_v11 = vxor.u32 %v2290_v59, %v2258_v39  ;;  %v8728_v27 = vld [vmem:[#allocation9 + $0x164] sm:$0xf]  ;;  %v1933_v28 = vadd.f32 %v10236_v26, %v10223_v38 }
 0x18b   : > { %v2506_v7 = vxor.u32 %v2474_v15, %v2442_v29  ;;  %v7873_v30 = vor.u32 %v8930_v53, %v7872_v1  ;;  %v8890_v57 = vld [vmem:[#allocation9 + $0x66c] sm:$0xf0]  ;;  %v7074_v2 = vld [vmem:[#allocation9 + $0x170] sm:$0xf0]  ;;  %v8828_v8 = vld [vmem:[#allocation9 + $0x484] sm:$0xf]  ;;  %v2330_v36 = vxor.u32 %v2298_v41, %v2266_v48  ;;  %v10292_v15 = vadd.f32 %v10257_v6, %v10223_v38  ;;  %v2005_v20 = vpop.f32.mrf.mxu3 }
 0x18c   : > { %v7713_v62 = vor.u32 %v8890_v57, %v7712_v63  ;;  %vm2102_vm6 = vcmp.gt.f32.partialorder %v1968_v4, 0.0  ;;  %v2134_v19 = vmul.f32 0.2, %v1968_v4  ;;  %v2354_v29 = vmul.u32 2246822507, %v2322_v11 }
 0x18d   : > { %4357 = vmatpush.bf16.msra.mxu1 %v7093_v52  ;;  %vm2538_vm10 = vcmp.ge.s32.totalorder %v2506_v7, 3435973837  ;;  %4318 = vmatpush.bf16.msrb.mxu3 %v7873_v30  ;;  %v7077_v32 = vor.u32 %v8728_v27, %v7074_v2  ;;  %v7474_v16 = vld [vmem:[#allocation9 + $0x490] sm:$0xf0]  ;;  %v7856_v0 = vld [vmem:[#allocation9 + $0x780] sm:$0xf]  ;;  %v1986_v52 = vpop.f32.mrf.mxu2  ;;  %v1985_v48 = vadd.f32 %v1984_v33, %v10263_v12  ;;  %v1970_v30 = vpop.f32.mrf.mxu1 }
 0x18e   : > { %4413 = vmatpush.bf16.msrb.mxu0 %v7493_v50  ;;  %4301 = vmatpush.bf16.msrb.mxu2 %v7713_v62  ;;  %v2166_v39 = vsel %vm2102_vm6, %v1968_v4, %v2134_v19  ;;  %v2362_v14 = vmul.u32 2246822507, %v2330_v36  ;;  %v7477_v59 = vor.u32 %v8828_v8, %v7474_v16  ;;  %v8926_v50 = vld [vmem:[#allocation9 + $0x78c] sm:$0xf0]  ;;  %v7696_v1 = vld [vmem:[#allocation9 + $0x640] sm:$0xf]  ;;  %v1951_v26 = vpop.f32.mrf.mxu0  ;;  %vm10297_vm11 = vmpackc.low %vm2538_vm10, %vm2530_vm3  ;;  %v1987_v8 = vadd.f32 %v1986_v52, %v10263_v12 }
 0x18f   : > { %v2570_v53 = vmul.f32 1.4285715, %v2166_v39  ;;  %v2386_v63 = vshrl.u32 %v2354_v29, 13  ;;  %v7857_v57 = vor.u32 %v8926_v50, %v7856_v0  ;;  %v8886_v41 = vld [vmem:[#allocation9 + $0x64c] sm:$0xf0]  ;;  %v1952_v62 = vadd.f32 %v1951_v26, %v1933_v28 }
 0x190   : > { %v11278_v38 = vmov 0  ;;  %v2394_v6 = vshrl.u32 %v2362_v14, 13  ;;  %v7697_v4 = vor.u32 %v8886_v41, %v7696_v1  ;;  %v8724_v11 = vld [vmem:[#allocation9 + $0x144] sm:$0xf]  ;;  %v7058_v27 = vld [vmem:[#allocation9 + $0x150] sm:$0xf0]  ;;  %v10316_v41 = vadd.f32 %v10278_v21, %v1985_v48 }
 0x191   : > { %4358 = vmatpush.bf16.msra.mxu1 %v7077_v32  ;;  %v11279_v38 = vsel %vm10297_vm11, 4294967295, %v11278_v38  ;;  %v10302_v33 = vadd.s32 768, %v9699_v61  ;;  %v10305_v2 = vpack.c.bf16 %v2570_v53, %v10283_v54  ;;  %v2418_v19 = vxor.u32 %v2386_v63, %v2354_v29  ;;  %4319 = vmatpush.bf16.msrb.mxu3 %v7857_v57  ;;  %v8824_v7 = vld [vmem:[#allocation9 + $0x464] sm:$0xf]  ;;  %v7458_v36 = vld [vmem:[#allocation9 + $0x470] sm:$0xf0] }
 0x192   : > { %11280 = vst [vmem:[#allocation35_spill] sm:$0xff] %v11279_v38  ;;  %4414 = vmatpush.bf16.msrb.mxu0 %v7477_v59  ;;  %v7061_v47 = vor.u32 %v8724_v11, %v7058_v27  ;;  %v7840_v28 = vld [vmem:[#allocation9 + $0x760] sm:$0xf]  ;;  %v1971_v32 = vadd.f32 %v1970_v30, %v1952_v62  ;;  %v2426_v16 = vxor.u32 %v2394_v6, %v2362_v14  ;;  %v8922_v39 = vld [vmem:[#allocation9 + $0x76c] sm:$0xf0] }
 0x193   : > { %11281 = vst [vmem:[#allocation36_spill] sm:$0xff] %v10305_v2  ;;  %4302 = vmatpush.bf16.msrb.mxu2 %v7697_v4  ;;  %v7461_v0 = vor.u32 %v8824_v7, %v7458_v36  ;;  %v7680_v59 = vld [vmem:[#allocation9 + $0x620] sm:$0xf]  ;;  %v8882_v50 = vld [vmem:[#allocation9 + $0x62c] sm:$0xf0]  ;;  %v2210_v1 = vadd.s32 %v9712_v3, %v10302_v33  ;;  %7950 = vmatmul.msk.bf16.vlgmr.msrb.gmra.mxu1 %vm10297_vm11, %v10305_v2  ;;  %v2008_v36 = vpop.f32.mrf.mxu3 }
 0x194   : > { %v2450_v54 = vmul.u32 3266489909, %v2418_v19  ;;  %v7841_v29 = vor.u32 %v8922_v39, %v7840_v28  ;;  %v7681_v52 = vor.u32 %v8882_v50, %v7680_v59  ;;  %v8720_v53 = vld [vmem:[#allocation9 + $0x124] sm:$0xf]  ;;  %v7042_v26 = vld [vmem:[#allocation9 + $0x130] sm:$0xf0]  ;;  %v2218_v14 = vadd.s32 %v9723_v9, %v10302_v33 }
 0x195   : > { %vm2110_vm14 = vcmp.gt.f32.partialorder %v1971_v32, 0.0  ;;  %v2142_v30 = vmul.f32 0.2, %v1971_v32  ;;  %v2458_v63 = vmul.u32 3266489909, %v2426_v16  ;;  %4359 = vmatpush.bf16.msra.mxu1 %v7061_v47  ;;  %v7045_v57 = vor.u32 %v8720_v53, %v7042_v26  ;;  %v1989_v7 = vpop.f32.mrf.mxu2  ;;  %v1972_v48 = vpop.f32.mrf.mxu1 }
 0x196   : > { %4415 = vmatpush.bf16.msrb.mxu0 %v7461_v0  ;;  %v10318_v62 = vadd.f32 %v2005_v20, %v1987_v8  ;;  %v2482_v6 = vshrl.u32 %v2450_v54, 16  ;;  %4320 = vmatpush.bf16.msrb.mxu3 %v7841_v29  ;;  %v8820_v4 = vld [vmem:[#allocation9 + $0x444] sm:$0xf]  ;;  %v7442_v11 = vld [vmem:[#allocation9 + $0x450] sm:$0xf0]  ;;  %v2243_v27 = vadd.s32 %v9744_v22, %v2210_v1  ;;  %v2251_v39 = vadd.s32 %v9744_v22, %v2218_v14  ;;  %v1953_v21 = vpop.f32.mrf.mxu0 }
 0x197   : > { %v2174_v19 = vsel %vm2110_vm14, %v1971_v32, %v2142_v30  ;;  %v2490_v28 = vshrl.u32 %v2458_v63, 16  ;;  %4303 = vmatpush.bf16.msrb.mxu2 %v7681_v52  ;;  %v7445_v16 = vor.u32 %v8820_v4, %v7442_v11  ;;  %v7824_v47 = vld [vmem:[#allocation9 + $0x740] sm:$0xf]  ;;  %v8918_v0 = vld [vmem:[#allocation9 + $0x74c] sm:$0xf0]  ;;  %v10325_v29 = vadd.s32 896, %v9699_v61 }
 0x198   : > { %v10322_v20 = vxor.u32 %v2482_v6, %v2450_v54  ;;  %v7825_v8 = vor.u32 %v8918_v0, %v7824_v47  ;;  %v7664_v59 = vld [vmem:[#allocation9 + $0x600] sm:$0xf]  ;;  %v8878_v50 = vld [vmem:[#allocation9 + $0x60c] sm:$0xf0]  ;;  %v10329_v32 = vadd.s32 %v9983_v18, %v10302_v33  ;;  %v1954_v1 = vadd.f32 %v1953_v21, %v10292_v15  ;;  %7968 = vmatmul.msk.bf16.vlgmr.msra.gmra.mxu0 %vm10080_vm12, %v11252_v13  ;;  %v8716_v53 = vld [vmem:[#allocation9 + $0x104] sm:$0xf] }
 0x199   : > { %v2522_v52 = vxor.u32 %v2490_v28, %v2458_v63  ;;  %4360 = vmatpush.bf16.msra.mxu1 %v7045_v57  ;;  %v7665_v54 = vor.u32 %v8878_v50, %v7664_v59  ;;  %v7026_v26 = vld [vmem:[#allocation9 + $0x110] sm:$0xf0]  ;;  %v8816_v14 = vld [vmem:[#allocation9 + $0x424] sm:$0xf]  ;;  %v2578_v30 = vmul.f32 1.4285715, %v2174_v19  ;;  %v1990_v6 = vadd.f32 %v1989_v7, %v10263_v12 }
 0x19a   : > { %4416 = vmatpush.bf16.msrb.mxu0 %v7445_v16  ;;  %4321 = vmatpush.bf16.msrb.mxu3 %v7825_v8  ;;  %v7029_v4 = vor.u32 %v8716_v53, %v7026_v26  ;;  %v7426_v11 = vld [vmem:[#allocation9 + $0x430] sm:$0xf0]  ;;  %v2275_v47 = vshrl.u32 %v2243_v27, 16  ;;  %v1973_v0 = vadd.f32 %v1972_v48, %v1954_v1  ;;  %vm2546_vm1 = vcmp.ge.s32.totalorder %v10322_v20, 3435973837 }
 0x19b   : > { %4304 = vmatpush.bf16.msrb.mxu2 %v7665_v54  ;;  %v7429_v15 = vor.u32 %v8816_v14, %v7426_v11  ;;  %v2283_v21 = vshrl.u32 %v2251_v39, 16  ;;  %v7808_v63 = vld [vmem:[#allocation9 + $0x720] sm:$0xf]  ;;  %vm2554_vm3 = vcmp.ge.s32.totalorder %v2522_v52, 3435973837  ;;  %v2211_v19 = vadd.s32 %v9712_v3, %v10325_v29 }
 0x19c   : > { %v2307_v57 = vxor.u32 %v2275_v47, %v2243_v27  ;;  %v8914_v28 = vld [vmem:[#allocation9 + $0x72c] sm:$0xf0]  ;;  %v8776_v59 = vld [vmem:[#allocation9 + $0x2e4] sm:$0xf]  ;;  %v2219_v7 = vadd.s32 %v9723_v9, %v10325_v29  ;;  %vm2118_vm6 = vcmp.gt.f32.partialorder %v1973_v0, 0.0  ;;  %v10341_v1 = vadd.f32 %v2008_v36, %v1990_v6  ;;  %v10344_v47 = vpop.f32.mrf.mxu3  ;;  %vm10353_vm10 = vmpackc.low %vm2554_vm3, %vm2546_vm1 }
 0x19d   : > { %v2150_v16 = vmul.f32 0.2, %v1973_v0  ;;  %4361 = vmatpush.bf16.msra.mxu1 %v7029_v4  ;;  %v2315_v48 = vxor.u32 %v2283_v21, %v2251_v39  ;;  %v7809_v8 = vor.u32 %v8914_v28, %v7808_v63  ;;  %v7266_v50 = vld [vmem:[#allocation9 + $0x2f0] sm:$0xf0]  ;;  %v8812_v27 = vld [vmem:[#allocation9 + $0x404] sm:$0xf]  ;;  %v2244_v14 = vadd.s32 %v9744_v22, %v2211_v19  ;;  %v1991_v3 = vpop.f32.mrf.mxu2  ;;  %v2041_v21 = vpop.f32.mrf.mxu1 }
 0x19e   : > { %4417 = vmatpush.bf16.msrb.mxu0 %v7429_v15  ;;  %v2339_v54 = vmul.u32 2246822507, %v2307_v57  ;;  %v7269_v53 = vor.u32 %v8776_v59, %v7266_v50  ;;  %v7410_v26 = vld [vmem:[#allocation9 + $0x410] sm:$0xf0]  ;;  %v8872_v4 = vld [vmem:[#allocation9 + $0x5e4] sm:$0xf]  ;;  %v2234_v36 = vadd.s32 %v10022_v58, %v10302_v33  ;;  %v2022_v15 = vpop.f32.mrf.mxu0  ;;  %v10359_v50 = vadd.s32 %v9744_v22, %v10329_v32 }
 0x19f   : > { %v2182_v11 = vsel %vm2118_vm6, %v1973_v0, %v2150_v16  ;;  %v2347_v9 = vmul.u32 2246822507, %v2315_v48  ;;  %4322 = vmatpush.bf16.msrb.mxu3 %v7809_v8  ;;  %v7413_v61 = vor.u32 %v8812_v27, %v7410_v26  ;;  %v7650_v39 = vld [vmem:[#allocation9 + $0x5f0] sm:$0xf0]  ;;  %v7792_v28 = vld [vmem:[#allocation9 + $0x700] sm:$0xf]  ;;  %v2252_v0 = vadd.s32 %v9744_v22, %v2219_v7 }
 0x1a0   : > { %v2586_v6 = vmul.f32 1.4285715, %v2182_v11  ;;  %v2371_v63 = vshrl.u32 %v2339_v54, 13  ;;  %4373 = vmatpush.bf16.msra.mxu2 %v7269_v53  ;;  %v7653_v57 = vor.u32 %v8872_v4, %v7650_v39  ;;  %v2023_v59 = vadd.f32 %v2022_v15, %v10316_v41  ;;  %v8910_v33 = vld [vmem:[#allocation9 + $0x70c] sm:$0xf0] }
 0x1a1   : > { %v11282_v19 = vmov 0  ;;  %v2379_v16 = vshrl.u32 %v2347_v9, 13  ;;  %v8772_v48 = vld [vmem:[#allocation9 + $0x2c4] sm:$0xf]  ;;  %v2276_v8 = vshrl.u32 %v2244_v14, 16  ;;  %v2042_v53 = vadd.f32 %v2041_v21, %v10276_v40 }
 0x1a2   : > { %v11283_v19 = vsel %vm10353_vm10, 4294967295, %v11282_v19  ;;  %v10362_v7 = vpack.c.bf16 %v2586_v6, %v2578_v30  ;;  %v2403_v41 = vxor.u32 %v2371_v63, %v2339_v54  ;;  %4418 = vmatpush.bf16.msrb.mxu0 %v7413_v61  ;;  %4430 = vmatpush.bf16.msrb.mxu1 %v7653_v57  ;;  %v7250_v20 = vld [vmem:[#allocation9 + $0x2d0] sm:$0xf0]  ;;  %v8868_v52 = vld [vmem:[#allocation9 + $0x5c4] sm:$0xf]  ;;  %vm2095_vm14 = vcmp.gt.f32.partialorder %v2023_v59, 0.0 }
 0x1a3   : > { %11284 = vst [vmem:[#allocation37_spill] sm:$0xff] %v11283_v19  ;;  %v7634_v27 = vld [vmem:[#allocation9 + $0x5d0] sm:$0xf0]  ;;  %v2127_v26 = vmul.f32 0.2, %v2023_v59  ;;  %v2411_v11 = vxor.u32 %v2379_v16, %v2347_v9  ;;  %v7793_v4 = vor.u32 %v8910_v33, %v7792_v28  ;;  %v7253_v15 = vor.u32 %v8772_v48, %v7250_v20 }
 0x1a4   : > { %11285 = vst [vmem:[#allocation38_spill] sm:$0xff] %v10362_v7  ;;  %v7016_v39 = vld [vmem:[#allocation9 + $0xe8] sm:$0xf]  ;;  %7953 = vmatmul.msk.bf16.gmra.mxu1 %vm10353_vm10, %v10362_v7  ;;  %v2435_v32 = vmul.u32 3266489909, %v2403_v41  ;;  %v7637_v21 = vor.u32 %v8868_v52, %v7634_v27  ;;  %v2284_v6 = vshrl.u32 %v2252_v0, 16  ;;  %v2308_v57 = vxor.u32 %v2276_v8, %v2244_v14  ;;  %v2079_v20 = vpop.f32.mrf.mxu3 }
 0x1a5   : > { %v8715_v30 = vld [vmem:[#allocation9 + $0xf4] sm:$0xf0]  ;;  %v2159_v54 = vsel %vm2095_vm14, %v2023_v59, %v2127_v26  ;;  %v2443_v61 = vmul.u32 3266489909, %v2411_v11  ;;  %4323 = vmatpush.bf16.msrb.mxu3 %v7793_v4  ;;  %4374 = vmatpush.bf16.msra.mxu2 %v7253_v15  ;;  %v7397_v16 = vor.u32 %v8808_v35, %v7394_v49  ;;  %v8768_v33 = vld [vmem:[#allocation9 + $0x2a4] sm:$0xf]  ;;  %v10370_v48 = vadd.f32 %v1991_v3, %v10263_v12  ;;  %v2060_v41 = vpop.f32.mrf.mxu2  ;;  %v2043_v11 = vpop.f32.mrf.mxu1 }
 0x1a6   : > { %v7017_v63 = vor.u32 %v8715_v30, %v7016_v39  ;;  %v10367_v55 = vmul.f32 1.4285715, %v2159_v54  ;;  %v2467_v9 = vshrl.u32 %v2435_v32, 16  ;;  %4431 = vmatpush.bf16.msrb.mxu1 %v7637_v21  ;;  %v2316_v28 = vxor.u32 %v2284_v6, %v2252_v0  ;;  %v7234_v27 = vld [vmem:[#allocation9 + $0x2b0] sm:$0xf0]  ;;  %v2024_v26 = vpop.f32.mrf.mxu0 }
 0x1a7   : > { %v2475_v59 = vshrl.u32 %v2443_v61, 16  ;;  %v2340_v52 = vmul.u32 2246822507, %v2308_v57  ;;  %v10373_v14 = vadd.s32 %v9744_v22, %v2234_v36  ;;  %v2061_v8 = vadd.f32 %v2060_v41, %v2042_v53  ;;  %v8864_v49 = vld [vmem:[#allocation9 + $0x5a4] sm:$0xf] }
 0x1a8   : > { %4487 = vmatpush.bf16.msra.mxu0 %v7017_v63  ;;  %v2499_v4 = vxor.u32 %v2467_v9, %v2435_v32  ;;  %v2348_v39 = vmul.u32 2246822507, %v2316_v28  ;;  %v7237_v35 = vor.u32 %v8768_v33, %v7234_v27  ;;  %v7618_v0 = vld [vmem:[#allocation9 + $0x5b0] sm:$0xf0]  ;;  %v2025_v12 = vadd.f32 %v2024_v26, %v10318_v62  ;;  %v7000_v21 = vld [vmem:[#allocation9 + $0xc8] sm:$0xf] }
 0x1a9   : > { %4392 = vmatpush.bf16.msra.mxu3 %v7397_v16  ;;  %7971 = vmatmul.msk.bf16.gmra.mxu0 %vm10141_vm8, %v10012_v31  ;;  %v2507_v3 = vxor.u32 %v2475_v59, %v2443_v61  ;;  %v2372_v15 = vshrl.u32 %v2340_v52, 13  ;;  %v8711_v36 = vld [vmem:[#allocation9 + $0xd4] sm:$0xf0]  ;;  %v2291_v53 = vshrl.u32 %v10359_v50, 16  ;;  %v2080_v30 = vadd.f32 %v2079_v20, %v2061_v8  ;;  %v8804_v54 = vld [vmem:[#allocation9 + $0x3c4] sm:$0xf] }
 0x1aa   : > { %vm2531_vm1 = vcmp.ge.s32.totalorder %v2499_v4, 3435973837  ;;  %v2380_v32 = vshrl.u32 %v2348_v39, 13  ;;  %4375 = vmatpush.bf16.msra.mxu2 %v7237_v35  ;;  %v7621_v6 = vor.u32 %v8864_v49, %v7618_v0  ;;  %vm2103_vm3 = vcmp.gt.f32.partialorder %v2025_v12, 0.0  ;;  %v7378_v28 = vld [vmem:[#allocation9 + $0x3d0] sm:$0xf0] }
 0x1ab   : > { %v2135_v63 = vmul.f32 0.2, %v2025_v12  ;;  %vm2539_vm6 = vcmp.ge.s32.totalorder %v2507_v3, 3435973837  ;;  %v2404_v62 = vxor.u32 %v2372_v15, %v2340_v52  ;;  %vm2096_vm14 = vcmp.gt.f32.partialorder %v2080_v30, 0.0 }
 0x1ac   : > { %v2128_v57 = vmul.f32 0.2, %v2080_v30  ;;  %v2412_v9 = vxor.u32 %v2380_v32, %v2348_v39  ;;  %4432 = vmatpush.bf16.msrb.mxu1 %v7621_v6  ;;  %v7001_v61 = vor.u32 %v8711_v36, %v7000_v21  ;;  %v2044_v33 = vadd.f32 %v2043_v11, %v10276_v40  ;;  %v8764_v59 = vld [vmem:[#allocation9 + $0x284] sm:$0xf]  ;;  %v7218_v27 = vld [vmem:[#allocation9 + $0x290] sm:$0xf0]  ;;  %v2081_v15 = vpop.f32.mrf.mxu3  ;;  %vm10385_vm15 = vmpackc.low %vm2539_vm6, %vm2531_vm1 }
 0x1ad   : > { %v2167_v16 = vsel %vm2103_vm3, %v2025_v12, %v2135_v63  ;;  %v2436_v41 = vmul.u32 3266489909, %v2404_v62  ;;  %v7381_v20 = vor.u32 %v8804_v54, %v7378_v28  ;;  %v7221_v49 = vor.u32 %v8764_v59, %v7218_v27  ;;  %v2062_v52 = vpop.f32.mrf.mxu2  ;;  %v8860_v12 = vld [vmem:[#allocation9 + $0x584] sm:$0xf]  ;;  %v2046_v3 = vpop.f32.mrf.mxu1  ;;  %v7602_v54 = vld [vmem:[#allocation9 + $0x590] sm:$0xf0] }
 0x1ae   : > { %v2160_v8 = vsel %vm2096_vm14, %v2080_v30, %v2128_v57  ;;  %v2571_v26 = vmul.f32 1.4285715, %v2167_v16  ;;  %v2444_v35 = vmul.u32 3266489909, %v2412_v9  ;;  %4488 = vmatpush.bf16.msra.mxu0 %v7001_v61  ;;  %v10390_v21 = vxor.u32 %v2291_v53, %v10359_v50  ;;  %v2027_v4 = vpop.f32.mrf.mxu0  ;;  %v6984_v63 = vld [vmem:[#allocation9 + $0xa8] sm:$0xf] }
 0x1af   : > { %v10381_v0 = vmul.f32 1.4285715, %v2160_v8  ;;  %v2468_v11 = vshrl.u32 %v2436_v41, 16  ;;  %4393 = vmatpush.bf16.msra.mxu3 %v7381_v20  ;;  %v10394_v36 = vadd.s32 %v9983_v18, %v10325_v29  ;;  %v2063_v32 = vadd.f32 %v2062_v52, %v2044_v33  ;;  %4376 = vmatpush.bf16.msra.mxu2 %v7221_v49  ;;  %v8707_v18 = vld [vmem:[#allocation9 + $0xb4] sm:$0xf0] }
 0x1b0   : > { %v10397_v30 = vpack.c.bf16 %v2571_v26, %v10367_v55  ;;  %v2476_v6 = vshrl.u32 %v2444_v35, 16  ;;  %v2299_v62 = vshrl.u32 %v10373_v14, 16  ;;  %v2028_v57 = vadd.f32 %v2027_v4, %v10341_v1  ;;  %v8800_v61 = vld [vmem:[#allocation9 + $0x3a4] sm:$0xf]  ;;  %v7362_v28 = vld [vmem:[#allocation9 + $0x3b0] sm:$0xf0] }
 0x1b1   : > { %v2047_v50 = vadd.f32 %v2046_v3, %v10276_v40  ;;  %v2500_v53 = vxor.u32 %v2468_v11, %v2436_v41  ;;  %v7605_v9 = vor.u32 %v8860_v12, %v7602_v54  ;;  %v2082_v55 = vadd.f32 %v2081_v15, %v2063_v32  ;;  %v8760_v59 = vld [vmem:[#allocation9 + $0x264] sm:$0xf]  ;;  %v7202_v27 = vld [vmem:[#allocation9 + $0x270] sm:$0xf0]  ;;  %v8703_v54 = vld [vmem:[#allocation9 + $0x94] sm:$0xf0] }
 0x1b2   : > { %7956 = vmatmul.msk.bf16.vlgmr.msrb.gmra.mxu2 %vm10385_vm15, %v10397_v30  ;;  %v2508_v16 = vxor.u32 %v2476_v6, %v2444_v35  ;;  %v6985_v33 = vor.u32 %v8707_v18, %v6984_v63  ;;  %v2331_v20 = vxor.u32 %v2299_v62, %v10373_v14  ;;  %v8856_v8 = vld [vmem:[#allocation9 + $0x564] sm:$0xf]  ;;  %vm2111_vm1 = vcmp.gt.f32.partialorder %v2028_v57, 0.0  ;;  %v7586_v15 = vld [vmem:[#allocation9 + $0x570] sm:$0xf0] }
 0x1b3   : > { %v2143_v1 = vmul.f32 0.2, %v2028_v57  ;;  %vm2532_vm3 = vcmp.ge.s32.totalorder %v2500_v53, 3435973837  ;;  %4433 = vmatpush.bf16.msrb.mxu1 %v7605_v9  ;;  %v7365_v41 = vor.u32 %v8800_v61, %v7362_v28  ;;  %vm2104_vm6 = vcmp.gt.f32.partialorder %v2082_v55, 0.0 }
 0x1b4   : > { %v2136_v26 = vmul.f32 0.2, %v2082_v55  ;;  %7974 = vmatmul.msk.bf16.vlgmr.msra.gmra.mxu1 %vm10092_vm13, %v10052_v46  ;;  %vm2540_vm14 = vcmp.ge.s32.totalorder %v2508_v16, 3435973837  ;;  %4489 = vmatpush.bf16.msra.mxu0 %v6985_v33  ;;  %v7205_v35 = vor.u32 %v8760_v59, %v7202_v27  ;;  %v2355_v14 = vmul.u32 2246822507, %v10390_v21 }
 0x1b5   : > { %v2175_v49 = vsel %vm2111_vm1, %v2028_v57, %v2143_v1  ;;  %v2363_v52 = vmul.u32 2246822507, %v2331_v20  ;;  %4394 = vmatpush.bf16.msra.mxu3 %v7365_v41  ;;  %v2235_v11 = vadd.s32 %v10022_v58, %v10325_v29  ;;  %v2011_v12 = vadd.f32 %v10344_v47, %v10370_v48  ;;  %v6968_v6 = vld [vmem:[#allocation9 + $0x88] sm:$0xf]  ;;  %v2065_v62 = vpop.f32.mrf.mxu2  ;;  %v2084_v57 = vpop.f32.mrf.mxu3  ;;  %vm10418_vm1 = vmpackc.low %vm2540_vm14, %vm2532_vm3  ;;  %v8796_v47 = vld [vmem:[#allocation9 + $0x384] sm:$0xf] }
 0x1b6   : > { %v2168_v32 = vsel %vm2104_vm6, %v2082_v55, %v2136_v26  ;;  %v10414_v4 = vmul.f32 1.4285715, %v2175_v49  ;;  %4377 = vmatpush.bf16.msra.mxu2 %v7205_v35  ;;  %v7589_v3 = vor.u32 %v8856_v8, %v7586_v15  ;;  %v11288_v21 = vmov 0  ;;  %v2029_v18 = vpop.f32.mrf.mxu0  ;;  %v2048_v61 = vpop.f32.mrf.mxu1  ;;  %v7346_v28 = vld [vmem:[#allocation9 + $0x390] sm:$0xf0] }
 0x1b7   : > { %v2572_v63 = vmul.f32 1.4285715, %v2168_v32  ;;  %v11289_v21 = vsel %vm10418_vm1, 4294967295, %v11288_v21  ;;  %v2387_v58 = vshrl.u32 %v2355_v14, 13  ;;  %v2395_v29 = vshrl.u32 %v2363_v52, 13 }
 0x1b8   : > { %11290 = vst [vmem:[#allocation39_spill] sm:$0xff] %v11289_v21  ;;  %v6969_v9 = vor.u32 %v8703_v54, %v6968_v6  ;;  %v2066_v48 = vadd.f32 %v2065_v62, %v2047_v50  ;;  %4434 = vmatpush.bf16.msrb.mxu1 %v7589_v3  ;;  %v8756_v55 = vld [vmem:[#allocation9 + $0x244] sm:$0xf]  ;;  %v7186_v33 = vld [vmem:[#allocation9 + $0x250] sm:$0xf0]  ;;  %v2260_v20 = vadd.s32 %v9744_v22, %v10394_v36 }
 0x1b9   : > { %v2268_v53 = vadd.s32 %v9744_v22, %v2235_v11  ;;  %v10426_v16 = vpack.c.bf16 %v2572_v63, %v10381_v0  ;;  %v2030_v59 = vadd.f32 %v2029_v18, %v2011_v12  ;;  %v2049_v27 = vadd.f32 %v2048_v61, %v10276_v40  ;;  %7992 = vmatmul.msk.bf16.vlgmr.msrb.gmra.mxu0 %vm10238_vm4, %v10234_v60  ;;  %v8852_v8 = vld [vmem:[#allocation9 + $0x544] sm:$0xf]  ;;  %v7570_v1 = vld [vmem:[#allocation9 + $0x550] sm:$0xf0]  ;;  %v6952_v41 = vld [vmem:[#allocation9 + $0x68] sm:$0xf] }
 0x1ba   : > { %v2419_v50 = vxor.u32 %v2387_v58, %v2355_v14  ;;  %v2085_v26 = vadd.f32 %v2084_v57, %v2066_v48  ;;  %v2427_v35 = vxor.u32 %v2395_v29, %v2363_v52  ;;  %4490 = vmatpush.bf16.msra.mxu0 %v6969_v9  ;;  %v7349_v36 = vor.u32 %v8796_v47, %v7346_v28  ;;  %v8699_v22 = vld [vmem:[#allocation9 + $0x74] sm:$0xf0]  ;;  %v8792_v15 = vld [vmem:[#allocation9 + $0x364] sm:$0xf]  ;;  %v7330_v0 = vld [vmem:[#allocation9 + $0x370] sm:$0xf0] }
 0x1bb   : > { %v7189_v49 = vor.u32 %v8756_v55, %v7186_v33  ;;  %vm2119_vm3 = vcmp.gt.f32.partialorder %v2030_v59, 0.0  ;;  %v2151_v11 = vmul.f32 0.2, %v2030_v59  ;;  %7962 = vmatmul.msk.bf16.vlgmr.msrb.gmra.mxu3 %vm10418_vm1, %v10426_v16  ;;  %v7573_v12 = vor.u32 %v8852_v8, %v7570_v1  ;;  %v8752_v62 = vld [vmem:[#allocation9 + $0x224] sm:$0xf] }
 0x1bc   : > { %v2451_v40 = vmul.u32 3266489909, %v2419_v50  ;;  %vm2112_vm6 = vcmp.gt.f32.partialorder %v2085_v26, 0.0  ;;  %v2144_v14 = vmul.f32 0.2, %v2085_v26  ;;  %4395 = vmatpush.bf16.msra.mxu3 %v7349_v36  ;;  %v6953_v52 = vor.u32 %v8699_v22, %v6952_v41 }
 0x1bd   : > { %v2459_v32 = vmul.u32 3266489909, %v2427_v35  ;;  %4378 = vmatpush.bf16.msra.mxu2 %v7189_v49  ;;  %v2183_v3 = vsel %vm2119_vm3, %v2030_v59, %v2151_v11  ;;  %4435 = vmatpush.bf16.msrb.mxu1 %v7573_v12  ;;  %v2292_v54 = vshrl.u32 %v2260_v20, 16  ;;  %v2300_v63 = vshrl.u32 %v2268_v53, 16  ;;  %v7170_v47 = vld [vmem:[#allocation9 + $0x230] sm:$0xf0]  ;;  %v2067_v18 = vpop.f32.mrf.mxu2  ;;  %v2086_v49 = vpop.f32.mrf.mxu3 }
 0x1be   : > { %v2483_v6 = vshrl.u32 %v2451_v40, 16  ;;  %v2176_v57 = vsel %vm2112_vm6, %v2085_v26, %v2144_v14  ;;  %v2587_v58 = vmul.f32 1.4285715, %v2183_v3  ;;  %4491 = vmatpush.bf16.msra.mxu0 %v6953_v52  ;;  %v7333_v9 = vor.u32 %v8792_v15, %v7330_v0  ;;  %v8848_v33 = vld [vmem:[#allocation9 + $0x524] sm:$0xf] }
 0x1bf   : > { %v2491_v29 = vshrl.u32 %v2459_v32, 16  ;;  %v10435_v48 = vmul.f32 1.4285715, %v2176_v57  ;;  %v2324_v28 = vxor.u32 %v2292_v54, %v2260_v20  ;;  %v2332_v55 = vxor.u32 %v2300_v63, %v2268_v53  ;;  %v7554_v50 = vld [vmem:[#allocation9 + $0x530] sm:$0xf0] }
 0x1c0   : > { %v2515_v61 = vxor.u32 %v2483_v6, %v2451_v40  ;;  %v2068_v59 = vadd.f32 %v2067_v18, %v2049_v27  ;;  %v10438_v1 = vpack.c.bf16 %v2587_v58, %v10414_v4  ;;  %4396 = vmatpush.bf16.msra.mxu3 %v7333_v9  ;;  %v7173_v41 = vor.u32 %v8752_v62, %v7170_v47  ;;  %v6936_v26 = vld [vmem:[#allocation9 + $0x48] sm:$0xf]  ;;  %v8695_v35 = vld [vmem:[#allocation9 + $0x54] sm:$0xf0]  ;;  %v8788_v36 = vld [vmem:[#allocation9 + $0x344] sm:$0xf] }
 0x1c1   : > { %v2523_v8 = vxor.u32 %v2491_v29, %v2459_v32  ;;  %v2356_v22 = vmul.u32 2246822507, %v2324_v28  ;;  %v2364_v15 = vmul.u32 2246822507, %v2332_v55  ;;  %v7557_v20 = vor.u32 %v8848_v33, %v7554_v50  ;;  %v7314_v11 = vld [vmem:[#allocation9 + $0x350] sm:$0xf0] }
 0x1c2   : > { %vm2547_vm14 = vcmp.ge.s32.totalorder %v2515_v61, 3435973837  ;;  %v2087_v0 = vadd.f32 %v2086_v49, %v2068_v59  ;;  %4379 = vmatpush.bf16.msra.mxu2 %v7173_v41  ;;  %v6937_v53 = vor.u32 %v8695_v35, %v6936_v26  ;;  %v8748_v27 = vld [vmem:[#allocation9 + $0x204] sm:$0xf]  ;;  %v7317_v14 = vor.u32 %v8788_v36, %v7314_v11  ;;  %v7154_v32 = vld [vmem:[#allocation9 + $0x210] sm:$0xf0] }
 0x1c3   : > { %vm2555_vm3 = vcmp.ge.s32.totalorder %v2523_v8, 3435973837  ;;  %v2388_v4 = vshrl.u32 %v2356_v22, 13  ;;  %v2396_v12 = vshrl.u32 %v2364_v15, 13  ;;  %v8844_v52 = vld [vmem:[#allocation9 + $0x504] sm:$0xf]  ;;  %v7157_v6 = vor.u32 %v8748_v27, %v7154_v32  ;;  %4436 = vmatpush.bf16.msrb.mxu1 %v7557_v20 }
 0x1c4   : > { %vm10440_vm6 = vmpackc.low %vm2555_vm3, %vm2547_vm14  ;;  %vm2120_vm1 = vcmp.gt.f32.partialorder %v2087_v0, 0.0  ;;  %v2152_v3 = vmul.f32 0.2, %v2087_v0  ;;  %7977 = vmatmul.msk.bf16.gmra.mxu1 %vm10153_vm9, %v10147_v23  ;;  %v7538_v54 = vld [vmem:[#allocation9 + $0x510] sm:$0xf0]  ;;  %4492 = vmatpush.bf16.msra.mxu0 %v6937_v53 }
 0x1c5   : > { %7959 = vmatmul.msk.bf16.gmra.mxu2 %vm10440_vm6, %v10438_v1  ;;  %v2420_v63 = vxor.u32 %v2388_v4, %v2356_v22  ;;  %v2428_v62 = vxor.u32 %v2396_v12, %v2364_v15  ;;  %v7541_v57 = vor.u32 %v8844_v52, %v7538_v54  ;;  %v6920_v58 = vld [vmem:[#allocation9 + $0x28] sm:$0xf]  ;;  %v8691_v29 = vld [vmem:[#allocation9 + $0x34] sm:$0xf0]  ;;  %v8784_v9 = vld [vmem:[#allocation9 + $0x324] sm:$0xf]  ;;  %4397 = vmatpush.bf16.msra.mxu3 %v7317_v14 }
 0x1c6   : > { %v2184_v47 = vsel %vm2120_vm1, %v2087_v0, %v2152_v3  ;;  %4380 = vmatpush.bf16.msra.mxu2 %v7157_v6  ;;  %v6921_v18 = vor.u32 %v8691_v29, %v6920_v58  ;;  %v7298_v61 = vld [vmem:[#allocation9 + $0x330] sm:$0xf0]  ;;  %v8904_v28 = vld [vmem:[#allocation9 + $0x6e4] sm:$0xf]  ;;  %v6904_v26 = vld [vmem:[#allocation9 + $0x8] sm:$0xf] }
 0x1c7   : > { %v7778_v55 = vld [vmem:[#allocation9 + $0x6f0] sm:$0xf0]  ;;  %v2588_v33 = vmul.f32 1.4285715, %v2184_v47  ;;  %v2452_v50 = vmul.u32 3266489909, %v2420_v63  ;;  %v7301_v8 = vor.u32 %v8784_v9, %v7298_v61  ;;  %4437 = vmatpush.bf16.msrb.mxu1 %v7541_v57 }
 0x1c8   : > { %v2460_v59 = vmul.u32 3266489909, %v2428_v62  ;;  %v7781_v41 = vor.u32 %v8904_v28, %v7778_v55  ;;  %v8687_v35 = vld [vmem:[#allocation9 + $0x14] sm:$0xf0]  ;;  %v7144_v36 = vld [vmem:[#allocation9 + $0x1e8] sm:$0xf]  ;;  %4493 = vmatpush.bf16.msra.mxu0 %v6921_v18 }
 0x1c9   : > { %7995 = vmatmul.msk.bf16.gmra.mxu0 %vm10271_vm2, %v10281_v34  ;;  %v2484_v49 = vshrl.u32 %v2452_v50, 16  ;;  %v8747_v15 = vld [vmem:[#allocation9 + $0x1f4] sm:$0xf0]  ;;  %v8780_v0 = vld [vmem:[#allocation9 + $0x304] sm:$0xf]  ;;  %4398 = vmatpush.bf16.msra.mxu3 %v7301_v8  ;;  %v6905_v20 = vor.u32 %v8687_v35, %v6904_v26  ;;  %v10454_v32 = vpack.c.bf16 %v2588_v33, %v10435_v48 }
 0x1ca   : > { %v2492_v22 = vshrl.u32 %v2460_v59, 16  ;;  %v7145_v53 = vor.u32 %v8747_v15, %v7144_v36  ;;  %v7282_v11 = vld [vmem:[#allocation9 + $0x310] sm:$0xf0]  ;;  %v8900_v27 = vld [vmem:[#allocation9 + $0x6c4] sm:$0xf]  ;;  %4449 = vmatpush.bf16.msrb.mxu2 %v7781_v41 }
 0x1cb   : > { %v7762_v4 = vld [vmem:[#allocation9 + $0x6d0] sm:$0xf0]  ;;  %v2516_v12 = vxor.u32 %v2484_v49, %v2452_v50  ;;  %v7285_v52 = vor.u32 %v8780_v0, %v7282_v11  ;;  %v7128_v3 = vld [vmem:[#allocation9 + $0x1c8] sm:$0xf]  ;;  %v8743_v6 = vld [vmem:[#allocation9 + $0x1d4] sm:$0xf0] }
 0x1cc   : > { %v2524_v14 = vxor.u32 %v2492_v22, %v2460_v59  ;;  %v7528_v54 = vld [vmem:[#allocation9 + $0x4e8] sm:$0xf]  ;;  %4506 = vmatpush.bf16.msra.mxu1 %v7145_v53  ;;  %v7765_v63 = vor.u32 %v8900_v27, %v7762_v4  ;;  %v7129_v62 = vor.u32 %v8743_v6, %v7128_v3  ;;  %v8843_v57 = vld [vmem:[#allocation9 + $0x4f4] sm:$0xf0]  ;;  %v8936_v58 = vld [vmem:[#allocation9 + $0x7e4] sm:$0xf]  ;;  %4494 = vmatpush.bf16.msra.mxu0 %v6905_v20 }
 0x1cd   : > { %v7906_v29 = vld [vmem:[#allocation9 + $0x7f0] sm:$0xf0]  ;;  %vm2548_vm1 = vcmp.ge.s32.totalorder %v2516_v12, 3435973837  ;;  %v7529_v9 = vor.u32 %v8843_v57, %v7528_v54  ;;  %v8896_v18 = vld [vmem:[#allocation9 + $0x6a4] sm:$0xf]  ;;  %4399 = vmatpush.bf16.msra.mxu3 %v7285_v52 }
 0x1ce   : > { %vm2556_vm14 = vcmp.ge.s32.totalorder %v2524_v14, 3435973837  ;;  %v7909_v47 = vor.u32 %v8936_v58, %v7906_v29  ;;  %v7746_v48 = vld [vmem:[#allocation9 + $0x6b0] sm:$0xf0]  ;;  %v7112_v28 = vld [vmem:[#allocation9 + $0x1a8] sm:$0xf]  ;;  %4450 = vmatpush.bf16.msrb.mxu2 %v7765_v63 }
 0x1cf   : > { %vm10456_vm3 = vmpackc.low %vm2556_vm14, %vm2548_vm1  ;;  %v7749_v55 = vor.u32 %v8896_v18, %v7746_v48  ;;  %v8739_v33 = vld [vmem:[#allocation9 + $0x1b4] sm:$0xf0]  ;;  %v7512_v50 = vld [vmem:[#allocation9 + $0x4c8] sm:$0xf]  ;;  %vm11300_vm14 = vnez %v11289_v21 }
 0x1d0   : > { %7965 = vmatmul.msk.bf16.gmra.mxu3 %vm10456_vm3, %v10454_v32  ;;  %v8839_v59 = vld [vmem:[#allocation9 + $0x4d4] sm:$0xf0]  ;;  %4507 = vmatpush.bf16.msra.mxu1 %v7129_v62  ;;  %v8932_v8 = vld [vmem:[#allocation9 + $0x7c4] sm:$0xf]  ;;  %v7890_v41 = vld [vmem:[#allocation9 + $0x7d0] sm:$0xf0]  ;;  %v7113_v35 = vor.u32 %v8739_v33, %v7112_v28 }
 0x1d1   : > { %4563 = vmatpush.bf16.msrb.mxu0 %v7529_v9  ;;  %v8892_v26 = vld [vmem:[#allocation9 + $0x684] sm:$0xf]  ;;  %4468 = vmatpush.bf16.msrb.mxu3 %v7909_v47  ;;  %v7513_v36 = vor.u32 %v8839_v59, %v7512_v50  ;;  %v7730_v49 = vld [vmem:[#allocation9 + $0x690] sm:$0xf0]  ;;  %v7893_v22 = vor.u32 %v8932_v8, %v7890_v41  ;;  %v7096_v15 = vld [vmem:[#allocation9 + $0x188] sm:$0xf] }
 0x1d2   : > { %v8735_v0 = vld [vmem:[#allocation9 + $0x194] sm:$0xf0]  ;;  %v7496_v20 = vld [vmem:[#allocation9 + $0x4a8] sm:$0xf]  ;;  %4451 = vmatpush.bf16.msrb.mxu2 %v7749_v55  ;;  %v7733_v53 = vor.u32 %v8892_v26, %v7730_v49  ;;  %v8928_v27 = vld [vmem:[#allocation9 + $0x7a4] sm:$0xf] }
 0x1d3   : > { %v8835_v11 = vld [vmem:[#allocation9 + $0x4b4] sm:$0xf0]  ;;  %v7874_v4 = vld [vmem:[#allocation9 + $0x7b0] sm:$0xf0]  ;;  %v8888_v12 = vld [vmem:[#allocation9 + $0x664] sm:$0xf]  ;;  %v7097_v52 = vor.u32 %v8735_v0, %v7096_v15  ;;  %v10472_v15 = vpop.f32.mrf.mxu0 }
 0x1d4   : > { %7998 = vmatmul.msk.bf16.vlgmr.msrb.gmra.mxu1 %vm10297_vm11, %v10305_v2  ;;  %v7714_v14 = vld [vmem:[#allocation9 + $0x670] sm:$0xf0]  ;;  %v7497_v3 = vor.u32 %v8835_v11, %v7496_v20  ;;  %v7877_v6 = vor.u32 %v8928_v27, %v7874_v4  ;;  %v7080_v54 = vld [vmem:[#allocation9 + $0x168] sm:$0xf]  ;;  %v8731_v63 = vld [vmem:[#allocation9 + $0x174] sm:$0xf0] }
 0x1d5   : > { %7980 = vmatmul.msk.bf16.vlgmr.msra.gmra.mxu2 %vm10134_vm7, %v10149_v17  ;;  %4508 = vmatpush.bf16.msra.mxu1 %v7113_v35  ;;  %v7480_v62 = vld [vmem:[#allocation9 + $0x488] sm:$0xf]  ;;  %v7717_v57 = vor.u32 %v8888_v12, %v7714_v14  ;;  %v8831_v58 = vld [vmem:[#allocation9 + $0x494] sm:$0xf0]  ;;  %v8924_v29 = vld [vmem:[#allocation9 + $0x784] sm:$0xf]  ;;  %v7081_v48 = vor.u32 %v8731_v63, %v7080_v54 }
 0x1d6   : > { %4564 = vmatpush.bf16.msrb.mxu0 %v7513_v36  ;;  %4469 = vmatpush.bf16.msrb.mxu3 %v7893_v22  ;;  %v7858_v9 = vld [vmem:[#allocation9 + $0x790] sm:$0xf0]  ;;  %v8884_v47 = vld [vmem:[#allocation9 + $0x644] sm:$0xf]  ;;  %v7481_v28 = vor.u32 %v8831_v58, %v7480_v62  ;;  %v7064_v33 = vld [vmem:[#allocation9 + $0x148] sm:$0xf] }
 0x1d7   : > { %4452 = vmatpush.bf16.msrb.mxu2 %v7733_v53  ;;  %v7698_v18 = vld [vmem:[#allocation9 + $0x650] sm:$0xf0]  ;;  %v7861_v55 = vor.u32 %v8924_v29, %v7858_v9  ;;  %v8727_v50 = vld [vmem:[#allocation9 + $0x154] sm:$0xf0]  ;;  %v7464_v59 = vld [vmem:[#allocation9 + $0x468] sm:$0xf] }
 0x1d8   : > { %v7701_v8 = vor.u32 %v8884_v47, %v7698_v18  ;;  %v8827_v41 = vld [vmem:[#allocation9 + $0x474] sm:$0xf0]  ;;  %v8920_v26 = vld [vmem:[#allocation9 + $0x764] sm:$0xf]  ;;  %v7842_v35 = vld [vmem:[#allocation9 + $0x770] sm:$0xf0]  ;;  %v7065_v22 = vor.u32 %v8727_v50, %v7064_v33 }
 0x1d9   : > { %8016 = vmatmul.msk.bf16.vlgmr.msra.gmra.mxu0 %vm10080_vm12, %v11252_v13  ;;  %4509 = vmatpush.bf16.msra.mxu1 %v7097_v52  ;;  %v8880_v36 = vld [vmem:[#allocation9 + $0x624] sm:$0xf]  ;;  %v7682_v49 = vld [vmem:[#allocation9 + $0x630] sm:$0xf0]  ;;  %v7465_v0 = vor.u32 %v8827_v41, %v7464_v59  ;;  %v7845_v20 = vor.u32 %v8920_v26, %v7842_v35  ;;  %v7048_v53 = vld [vmem:[#allocation9 + $0x128] sm:$0xf] }
 0x1da   : > { %4565 = vmatpush.bf16.msrb.mxu0 %v7497_v3  ;;  %4470 = vmatpush.bf16.msrb.mxu3 %v7877_v6  ;;  %v8723_v11 = vld [vmem:[#allocation9 + $0x134] sm:$0xf0]  ;;  %v7448_v27 = vld [vmem:[#allocation9 + $0x448] sm:$0xf]  ;;  %v7685_v4 = vor.u32 %v8880_v36, %v7682_v49  ;;  %v8916_v14 = vld [vmem:[#allocation9 + $0x744] sm:$0xf] }
 0x1db   : > { %4453 = vmatpush.bf16.msrb.mxu2 %v7717_v57  ;;  %v8823_v12 = vld [vmem:[#allocation9 + $0x454] sm:$0xf0]  ;;  %v7826_v52 = vld [vmem:[#allocation9 + $0x750] sm:$0xf0]  ;;  %v8876_v3 = vld [vmem:[#allocation9 + $0x604] sm:$0xf]  ;;  %v7049_v54 = vor.u32 %v8723_v11, %v7048_v53  ;;  %v10483_v11 = vpop.f32.mrf.mxu0 }
 0x1dc   : > { %v7666_v6 = vld [vmem:[#allocation9 + $0x610] sm:$0xf0]  ;;  %v7272_v63 = vld [vmem:[#allocation9 + $0x2e8] sm:$0xf]  ;;  %v8779_v62 = vld [vmem:[#allocation9 + $0x2f4] sm:$0xf0]  ;;  %v7449_v57 = vor.u32 %v8823_v12, %v7448_v27  ;;  %v7829_v58 = vor.u32 %v8916_v14, %v7826_v52 }
 0x1dd   : > { %4510 = vmatpush.bf16.msra.mxu1 %v7081_v48  ;;  %v7032_v29 = vld [vmem:[#allocation9 + $0x108] sm:$0xf]  ;;  %v8719_v9 = vld [vmem:[#allocation9 + $0x114] sm:$0xf0]  ;;  %v7669_v18 = vor.u32 %v8876_v3, %v7666_v6  ;;  %v7273_v33 = vor.u32 %v8779_v62, %v7272_v63  ;;  %v7794_v53 = vld [vmem:[#allocation9 + $0x710] sm:$0xf0] }
 0x1de   : > { %4566 = vmatpush.bf16.msrb.mxu0 %v7481_v28  ;;  %4471 = vmatpush.bf16.msrb.mxu3 %v7861_v55  ;;  %v7432_v47 = vld [vmem:[#allocation9 + $0x428] sm:$0xf]  ;;  %v8819_v48 = vld [vmem:[#allocation9 + $0x434] sm:$0xf0]  ;;  %v8912_v28 = vld [vmem:[#allocation9 + $0x724] sm:$0xf] }
 0x1df   : > { %4454 = vmatpush.bf16.msrb.mxu2 %v7701_v8  ;;  %v7810_v55 = vld [vmem:[#allocation9 + $0x730] sm:$0xf0]  ;;  %v7656_v50 = vld [vmem:[#allocation9 + $0x5e8] sm:$0xf]  ;;  %v8875_v59 = vld [vmem:[#allocation9 + $0x5f4] sm:$0xf0]  ;;  %v7033_v8 = vor.u32 %v8719_v9, %v7032_v29  ;;  %v7433_v35 = vor.u32 %v8819_v48, %v7432_v47 }
 0x1e0   : > { %7986 = vmatmul.msk.bf16.vlgmr.msra.gmra.mxu3 %vm10174_vm0, %v10179_v25  ;;  %v7256_v41 = vld [vmem:[#allocation9 + $0x2c8] sm:$0xf]  ;;  %v8775_v26 = vld [vmem:[#allocation9 + $0x2d4] sm:$0xf0]  ;;  %v7813_v36 = vor.u32 %v8912_v28, %v7810_v55  ;;  %v8713_v14 = vld [vmem:[#allocation9 + $0xec] sm:$0xf] }
 0x1e1   : > { %4511 = vmatpush.bf16.msra.mxu1 %v7065_v22  ;;  %v7416_v49 = vld [vmem:[#allocation9 + $0x408] sm:$0xf]  ;;  %v8815_v22 = vld [vmem:[#allocation9 + $0x414] sm:$0xf0]  ;;  %v7257_v27 = vor.u32 %v8775_v26, %v7256_v41  ;;  %v7018_v52 = vld [vmem:[#allocation9 + $0xf8] sm:$0xf0] }
 0x1e2   : > { %4567 = vmatpush.bf16.msrb.mxu0 %v7465_v0  ;;  %4472 = vmatpush.bf16.msrb.mxu3 %v7845_v20  ;;  %v7657_v0 = vor.u32 %v8875_v59, %v7656_v50  ;;  %v8908_v20 = vld [vmem:[#allocation9 + $0x704] sm:$0xf]  ;;  %v8871_v12 = vld [vmem:[#allocation9 + $0x5d4] sm:$0xf0]  ;;  %v7400_v3 = vld [vmem:[#allocation9 + $0x3e8] sm:$0xf]  ;;  %v7021_v9 = vor.u32 %v8713_v14, %v7018_v52 }
 0x1e3   : > { %4455 = vmatpush.bf16.msrb.mxu2 %v7685_v4  ;;  %v7640_v4 = vld [vmem:[#allocation9 + $0x5c8] sm:$0xf]  ;;  %v8811_v6 = vld [vmem:[#allocation9 + $0x3f4] sm:$0xf0]  ;;  %v7797_v63 = vor.u32 %v8908_v20, %v7794_v53  ;;  %v8709_v55 = vld [vmem:[#allocation9 + $0xcc] sm:$0xf]  ;;  %v10493_v53 = vpop.f32.mrf.mxu0 }
 0x1e4   : > { %8001 = vmatmul.msk.bf16.gmra.mxu1 %vm10353_vm10, %v10362_v7  ;;  %v7240_v62 = vld [vmem:[#allocation9 + $0x2a8] sm:$0xf]  ;;  %v7641_v29 = vor.u32 %v8871_v12, %v7640_v4  ;;  %v7401_v47 = vor.u32 %v8811_v6, %v7400_v3  ;;  %v8867_v48 = vld [vmem:[#allocation9 + $0x5b4] sm:$0xf0]  ;;  %v11296_v41 = vld [vmem:[#allocation32_spill] sm:$0xff] }
 0x1e5   : > { %7983 = vmatmul.msk.bf16.gmra.mxu2 %vm10189_vm5, %v10195_v10  ;;  %4512 = vmatpush.bf16.msra.mxu1 %v7049_v54  ;;  %v7417_v54 = vor.u32 %v8815_v22, %v7416_v49  ;;  %v7384_v50 = vld [vmem:[#allocation9 + $0x3c8] sm:$0xf]  ;;  %v8807_v59 = vld [vmem:[#allocation9 + $0x3d4] sm:$0xf0]  ;;  %vm11297_vm1 = vnez %v11296_v41  ;;  %v8705_v4 = vld [vmem:[#allocation9 + $0xac] sm:$0xf] }
 0x1e6   : > { %4568 = vmatpush.bf16.msrb.mxu0 %v7449_v57  ;;  %4473 = vmatpush.bf16.msrb.mxu3 %v7829_v58  ;;  %v8771_v57 = vld [vmem:[#allocation9 + $0x2b4] sm:$0xf0]  ;;  %v10488_v58 = vpop.f32.mrf.mxu1  ;;  %v7608_v49 = vld [vmem:[#allocation9 + $0x588] sm:$0xf]  ;;  %v7385_v20 = vor.u32 %v8807_v59, %v7384_v50  ;;  %v6986_v3 = vld [vmem:[#allocation9 + $0xb8] sm:$0xf0] }
 0x1e7   : > { %4456 = vmatpush.bf16.msrb.mxu2 %v7669_v18  ;;  %v7624_v18 = vld [vmem:[#allocation9 + $0x5a8] sm:$0xf]  ;;  %v7241_v28 = vor.u32 %v8771_v57, %v7240_v62  ;;  %v8863_v22 = vld [vmem:[#allocation9 + $0x594] sm:$0xf0]  ;;  %v7466_v38 = vld [vmem:[#allocation9 + $0x478] sm:$0xf0] }
 0x1e8   : > { %v7625_v26 = vor.u32 %v8867_v48, %v7624_v18  ;;  %v7368_v12 = vld [vmem:[#allocation9 + $0x3a8] sm:$0xf]  ;;  %v8803_v14 = vld [vmem:[#allocation9 + $0x3b4] sm:$0xf0]  ;;  %v7609_v52 = vor.u32 %v8863_v22, %v7608_v49  ;;  %v8701_v18 = vld [vmem:[#allocation9 + $0x8c] sm:$0xf] }
 0x1e9   : > { %8019 = vmatmul.msk.bf16.gmra.mxu0 %vm10141_vm8, %v10012_v31  ;;  %4513 = vmatpush.bf16.msra.mxu1 %v7033_v8  ;;  %v11295_v8 = vld [vmem:[#allocation31_spill] sm:$0xff]  ;;  %v8859_v62 = vld [vmem:[#allocation9 + $0x574] sm:$0xf0]  ;;  %v7242_v19 = vld [vmem:[#allocation9 + $0x2b8] sm:$0xf0] }
 0x1ea   : > { %4569 = vmatpush.bf16.msrb.mxu0 %v7433_v35  ;;  %4474 = vmatpush.bf16.msrb.mxu3 %v7813_v36  ;;  %v7224_v35 = vld [vmem:[#allocation9 + $0x288] sm:$0xf]  ;;  %v8767_v36 = vld [vmem:[#allocation9 + $0x294] sm:$0xf0]  ;;  %v7770_v21 = vld [vmem:[#allocation9 + $0x6d8] sm:$0xf0] }
 0x1eb   : > { %4525 = vmatpush.bf16.msra.mxu2 %v7273_v33  ;;  %v7002_v33 = vld [vmem:[#allocation9 + $0xd8] sm:$0xf0]  ;;  %v7208_v6 = vld [vmem:[#allocation9 + $0x268] sm:$0xf]  ;;  %v8759_v59 = vld [vmem:[#allocation9 + $0x254] sm:$0xf0] }
 0x1ec   : > { %v7352_v48 = vld [vmem:[#allocation9 + $0x388] sm:$0xf] }
 0x1ed   : > { %4582 = vmatpush.bf16.msrb.mxu1 %v7657_v0  ;;  %v7005_v0 = vor.u32 %v8709_v55, %v7002_v33  ;;  %v6970_v33 = vld [vmem:[#allocation9 + $0x98] sm:$0xf0]  ;;  %v7192_v50 = vld [vmem:[#allocation9 + $0x248] sm:$0xf] }
 0x1ee   : > { %4570 = vmatpush.bf16.msrb.mxu0 %v7417_v54  ;;  %4475 = vmatpush.bf16.msrb.mxu3 %v7797_v63  ;;  %v8763_v54 = vld [vmem:[#allocation9 + $0x274] sm:$0xf0]  ;;  %v7592_v63 = vld [vmem:[#allocation9 + $0x568] sm:$0xf]  ;;  %v10501_v57 = vpop.f32.mrf.mxu1  ;;  %v6973_v49 = vor.u32 %v8701_v18, %v6970_v33  ;;  %v7193_v22 = vor.u32 %v8759_v59, %v7192_v50 }
 0x1ef   : > { %4526 = vmatpush.bf16.msra.mxu2 %v7257_v27  ;;  %v7225_v27 = vor.u32 %v8767_v36, %v7224_v35  ;;  %v7593_v55 = vor.u32 %v8859_v62, %v7592_v63  ;;  %v8855_v35 = vld [vmem:[#allocation9 + $0x554] sm:$0xf0]  ;;  %v8693_v62 = vld [vmem:[#allocation9 + $0x4c] sm:$0xf]  ;;  %v7320_v18 = vld [vmem:[#allocation9 + $0x348] sm:$0xf] }
 0x1f0   : > { %7989 = vmatmul.msk.bf16.gmra.mxu3 %vm11297_vm1, %v11295_v8  ;;  %v7160_v33 = vld [vmem:[#allocation9 + $0x208] sm:$0xf]  ;;  %v8751_v50 = vld [vmem:[#allocation9 + $0x214] sm:$0xf0] }
 0x1f1   : > { %4583 = vmatpush.bf16.msrb.mxu1 %v7641_v29  ;;  %v7369_v29 = vor.u32 %v8803_v14, %v7368_v12  ;;  %v6954_v12 = vld [vmem:[#allocation9 + $0x78] sm:$0xf0]  ;;  %v7176_v14 = vld [vmem:[#allocation9 + $0x228] sm:$0xf] }
 0x1f2   : > { %4639 = vmatpush.bf16.msra.mxu0 %v7021_v9  ;;  %4544 = vmatpush.bf16.msra.mxu3 %v7401_v47  ;;  %v6989_v9 = vor.u32 %v8705_v4, %v6986_v3  ;;  %v7209_v47 = vor.u32 %v8763_v54, %v7208_v6  ;;  %v10506_v3 = vpop.f32.mrf.mxu0  ;;  %v7560_v6 = vld [vmem:[#allocation9 + $0x528] sm:$0xf]  ;;  %v8851_v54 = vld [vmem:[#allocation9 + $0x534] sm:$0xf0] }
 0x1f3   : > { %4527 = vmatpush.bf16.msra.mxu2 %v7241_v28  ;;  %v8799_v28 = vld [vmem:[#allocation9 + $0x394] sm:$0xf0]  ;;  %11298 = vst [vmem:[#allocation40_spill] sm:$0xff] %v10506_v3  ;;  %v7544_v59 = vld [vmem:[#allocation9 + $0x508] sm:$0xf] }
 0x1f4   : > { %8022 = vmatmul.msk.bf16.vlgmr.msra.gmra.mxu1 %vm10092_vm13, %v10052_v46  ;;  %v7353_v36 = vor.u32 %v8799_v28, %v7352_v48  ;;  %v8791_v48 = vld [vmem:[#allocation9 + $0x354] sm:$0xf0]  ;;  %v7530_v3 = vld [vmem:[#allocation9 + $0x4f8] sm:$0xf0]  ;;  %v7736_v5 = vld [vmem:[#allocation9 + $0x688] sm:$0xf] }
 0x1f5   : > { %4584 = vmatpush.bf16.msrb.mxu1 %v7625_v26  ;;  %8004 = vmatmul.msk.bf16.vlgmr.msrb.gmra.mxu2 %vm10385_vm15, %v10397_v30  ;;  %v7576_v26 = vld [vmem:[#allocation9 + $0x548] sm:$0xf] }
 0x1f6   : > { %4640 = vmatpush.bf16.msra.mxu0 %v7005_v0  ;;  %4545 = vmatpush.bf16.msra.mxu3 %v7385_v20  ;;  %v8697_v0 = vld [vmem:[#allocation9 + $0x6c] sm:$0xf]  ;;  %v7336_v20 = vld [vmem:[#allocation9 + $0x368] sm:$0xf]  ;;  %v7577_v4 = vor.u32 %v8855_v35, %v7576_v26  ;;  %v10508_v28 = vpop.f32.mrf.mxu1  ;;  %v8847_v26 = vld [vmem:[#allocation9 + $0x514] sm:$0xf0] }
 0x1f7   : > { %4528 = vmatpush.bf16.msra.mxu2 %v7225_v27  ;;  %v8795_v27 = vld [vmem:[#allocation9 + $0x374] sm:$0xf0]  ;;  %11299 = vst [vmem:[#allocation41_spill] sm:$0xff] %v10508_v28  ;;  %v7784_v35 = vld [vmem:[#allocation9 + $0x6e8] sm:$0xf] }
 0x1f8   : > { %v7337_v63 = vor.u32 %v8795_v27, %v7336_v20  ;;  %v7161_v27 = vor.u32 %v8751_v50, %v7160_v33  ;;  %v7288_v33 = vld [vmem:[#allocation9 + $0x308] sm:$0xf]  ;;  %v8783_v50 = vld [vmem:[#allocation9 + $0x314] sm:$0xf0] }
 0x1f9   : > { %4585 = vmatpush.bf16.msrb.mxu1 %v7609_v52  ;;  %8040 = vmatmul.msk.bf16.vlgmr.msrb.gmra.mxu0 %vm10238_vm4, %v10234_v60  ;;  %v8755_v52 = vld [vmem:[#allocation9 + $0x234] sm:$0xf0] }
 0x1fa   : > { %4546 = vmatpush.bf16.msra.mxu3 %v7369_v29  ;;  %4641 = vmatpush.bf16.msra.mxu0 %v6989_v9  ;;  %v6957_v29 = vor.u32 %v8697_v0, %v6954_v12  ;;  %v7177_v9 = vor.u32 %v8755_v52, %v7176_v14  ;;  %v7146_v0 = vld [vmem:[#allocation9 + $0x1f8] sm:$0xf0]  ;;  %v7304_v12 = vld [vmem:[#allocation9 + $0x328] sm:$0xf]  ;;  %v8787_v14 = vld [vmem:[#allocation9 + $0x334] sm:$0xf0]  ;;  %v7545_v52 = vor.u32 %v8847_v26, %v7544_v59  ;;  %v10513_v28 = vpop.f32.mrf.mxu0 }
 0x1fb   : > { %4529 = vmatpush.bf16.msra.mxu2 %v7209_v47  ;;  %v6938_v47 = vld [vmem:[#allocation9 + $0x58] sm:$0xf0] }
 0x1fc   : > { %v6941_v20 = vor.u32 %v8693_v62, %v6938_v47  ;;  %v7768_v62 = vld [vmem:[#allocation9 + $0x6c8] sm:$0xf]  ;;  %v8741_v47 = vld [vmem:[#allocation9 + $0x1cc] sm:$0xf]  ;;  %v6906_v59 = vld [vmem:[#allocation9 + $0x18] sm:$0xf0] }
 0x1fd   : > { %4586 = vmatpush.bf16.msrb.mxu1 %v7593_v55  ;;  %v7561_v55 = vor.u32 %v8851_v54, %v7560_v6  ;;  %v6922_v6 = vld [vmem:[#allocation9 + $0x38] sm:$0xf0] }
 0x1fe   : > { %4547 = vmatpush.bf16.msra.mxu3 %v7353_v36  ;;  %4642 = vmatpush.bf16.msra.mxu0 %v6973_v49  ;;  %v8907_v36 = vld [vmem:[#allocation9 + $0x6f4] sm:$0xf0]  ;;  %v7321_v49 = vor.u32 %v8791_v48, %v7320_v18  ;;  %v7130_v18 = vld [vmem:[#allocation9 + $0x1d8] sm:$0xf0] }
 0x1ff   : > { %4530 = vmatpush.bf16.msra.mxu2 %v7193_v22  ;;  %v8745_v22 = vld [vmem:[#allocation9 + $0x1ec] sm:$0xf]  ;;  %v7785_v54 = vor.u32 %v8907_v36, %v7784_v35  ;;  %v7912_v35 = vld [vmem:[#allocation9 + $0x7e8] sm:$0xf]  ;;  %v8939_v36 = vld [vmem:[#allocation9 + $0x7f4] sm:$0xf0] }
 0x200   : > { %8010 = vmatmul.msk.bf16.vlgmr.msrb.gmra.mxu3 %vm11300_vm14, %v10426_v16 }
 0x201   : > { %4587 = vmatpush.bf16.msrb.mxu1 %v7577_v4  ;;  %v8689_v4 = vld [vmem:[#allocation9 + $0x2c] sm:$0xf] }
 0x202   : > { %4548 = vmatpush.bf16.msra.mxu3 %v7337_v63  ;;  %4643 = vmatpush.bf16.msra.mxu0 %v6957_v29  ;;  %v7149_v63 = vor.u32 %v8745_v22, %v7146_v0  ;;  %v8903_v29 = vld [vmem:[#allocation9 + $0x6d4] sm:$0xf0]  ;;  %v6925_v48 = vor.u32 %v8689_v4, %v6922_v6  ;;  %v7133_v22 = vor.u32 %v8741_v47, %v7130_v18  ;;  %v8841_v0 = vld [vmem:[#allocation9 + $0x4ec] sm:$0xf] }
 0x203   : > { %4531 = vmatpush.bf16.msra.mxu2 %v7177_v9  ;;  %v7305_v9 = vor.u32 %v8787_v14, %v7304_v12  ;;  %v7769_v26 = vor.u32 %v8903_v29, %v7768_v62  ;;  %v10521_v12 = vpop.f32.mrf.mxu1  ;;  %v8737_v14 = vld [vmem:[#allocation9 + $0x1ac] sm:$0xf]  ;;  %v7913_v6 = vor.u32 %v8939_v36, %v7912_v35  ;;  %v8935_v62 = vld [vmem:[#allocation9 + $0x7d4] sm:$0xf0]  ;;  %v7498_v36 = vld [vmem:[#allocation9 + $0x4b8] sm:$0xf0] }
 0x204   : > { %8025 = vmatmul.msk.bf16.gmra.mxu1 %vm10153_vm9, %v10147_v23  ;;  %11301 = vst [vmem:[#allocation42_spill] sm:$0xff] %v10521_v12  ;;  %v8837_v18 = vld [vmem:[#allocation9 + $0x4cc] sm:$0xf]  ;;  %v7514_v12 = vld [vmem:[#allocation9 + $0x4d8] sm:$0xf0] }
 0x205   : > { %4588 = vmatpush.bf16.msrb.mxu1 %v7561_v55  ;;  %8007 = vmatmul.msk.bf16.gmra.mxu2 %vm10440_vm6, %v10438_v1  ;;  %v8685_v55 = vld [vmem:[#allocation9 + $0xc] sm:$0xf] }
 0x206   : > { %4549 = vmatpush.bf16.msra.mxu3 %v7321_v49  ;;  %4644 = vmatpush.bf16.msra.mxu0 %v6941_v20  ;;  %v7752_v49 = vld [vmem:[#allocation9 + $0x6a8] sm:$0xf]  ;;  %v7289_v20 = vor.u32 %v8783_v50, %v7288_v33  ;;  %v6909_v4 = vor.u32 %v8685_v55, %v6906_v59  ;;  %v8895_v33 = vld [vmem:[#allocation9 + $0x694] sm:$0xf0]  ;;  %v7098_v55 = vld [vmem:[#allocation9 + $0x198] sm:$0xf0]  ;;  %v10528_v50 = vpop.f32.mrf.mxu2 }
 0x207   : > { %4532 = vmatpush.bf16.msra.mxu2 %v7161_v27  ;;  %v8899_v27 = vld [vmem:[#allocation9 + $0x6b4] sm:$0xf0]  ;;  %v7880_v59 = vld [vmem:[#allocation9 + $0x7a8] sm:$0xf]  ;;  %v8833_v35 = vld [vmem:[#allocation9 + $0x4ac] sm:$0xf] }
 0x208   : > { %v7753_v29 = vor.u32 %v8899_v27, %v7752_v49  ;;  %v7720_v27 = vld [vmem:[#allocation9 + $0x668] sm:$0xf] }
 0x209   : > { %4589 = vmatpush.bf16.msrb.mxu1 %v7545_v52  ;;  %8043 = vmatmul.msk.bf16.gmra.mxu0 %vm10271_vm2, %v10281_v34  ;;  %v7114_v52 = vld [vmem:[#allocation9 + $0x1b8] sm:$0xf0]  ;;  %v10526_v34 = vpop.f32.mrf.mxu0 }
 0x20a   : > { %4550 = vmatpush.bf16.msra.mxu3 %v7305_v9  ;;  %4645 = vmatpush.bf16.msra.mxu0 %v6925_v48  ;;  %v7117_v47 = vor.u32 %v8737_v14, %v7114_v52  ;;  %v8733_v48 = vld [vmem:[#allocation9 + $0x18c] sm:$0xf]  ;;  %v8891_v14 = vld [vmem:[#allocation9 + $0x674] sm:$0xf0] }
 0x20b   : > { %4601 = vmatpush.bf16.msrb.mxu2 %v7785_v54  ;;  %v7533_v54 = vor.u32 %v8841_v0, %v7530_v3  ;;  %v7517_v3 = vor.u32 %v8837_v18, %v7514_v12  ;;  %v7737_v0 = vor.u32 %v8895_v33, %v7736_v5  ;;  %v7101_v49 = vor.u32 %v8733_v48, %v7098_v55  ;;  %v8729_v52 = vld [vmem:[#allocation9 + $0x16c] sm:$0xf]  ;;  %v8927_v12 = vld [vmem:[#allocation9 + $0x794] sm:$0xf0]  ;;  %v7704_v18 = vld [vmem:[#allocation9 + $0x648] sm:$0xf] }
 0x20c   : > { %v8829_v5 = vld [vmem:[#allocation9 + $0x48c] sm:$0xf]  ;;  %v7066_v55 = vld [vmem:[#allocation9 + $0x158] sm:$0xf0] }
 0x20d   : > { %4658 = vmatpush.bf16.msra.mxu1 %v7149_v63  ;;  %v7896_v63 = vld [vmem:[#allocation9 + $0x7c8] sm:$0xf]  ;;  %v8725_v33 = vld [vmem:[#allocation9 + $0x14c] sm:$0xf] }
 0x20e   : > { %4551 = vmatpush.bf16.msra.mxu3 %v7289_v20  ;;  %4646 = vmatpush.bf16.msra.mxu0 %v6909_v4  ;;  %v7897_v9 = vor.u32 %v8935_v62, %v7896_v63  ;;  %v7501_v4 = vor.u32 %v8833_v35, %v7498_v36  ;;  %v7482_v63 = vld [vmem:[#allocation9 + $0x498] sm:$0xf0]  ;;  %v7721_v62 = vor.u32 %v8891_v14, %v7720_v27  ;;  %v8825_v36 = vld [vmem:[#allocation9 + $0x46c] sm:$0xf] }
 0x20f   : > { %4602 = vmatpush.bf16.msrb.mxu2 %v7769_v26  ;;  %v8931_v26 = vld [vmem:[#allocation9 + $0x7b4] sm:$0xf0]  ;;  %v7485_v48 = vor.u32 %v8829_v5, %v7482_v63  ;;  %v7069_v27 = vor.u32 %v8725_v33, %v7066_v55  ;;  %v7832_v5 = vld [vmem:[#allocation9 + $0x748] sm:$0xf]  ;;  %v8817_v33 = vld [vmem:[#allocation9 + $0x42c] sm:$0xf] }
 0x210   : > { %8013 = vmatmul.msk.bf16.gmra.mxu3 %vm10456_vm3, %v10454_v32  ;;  %v7881_v20 = vor.u32 %v8931_v26, %v7880_v59  ;;  %v8923_v59 = vld [vmem:[#allocation9 + $0x774] sm:$0xf0]  ;;  %v10541_v26 = vpop.f32.mrf.mxu3 }
 0x211   : > { %4659 = vmatpush.bf16.msra.mxu1 %v7133_v22  ;;  %v10533_v22 = vpop.f32.mrf.mxu1  ;;  %v10543_v35 = vpop.f32.mrf.mxu0  ;;  %v8919_v63 = vld [vmem:[#allocation9 + $0x754] sm:$0xf0] }
 0x212   : > { %4620 = vmatpush.bf16.msrb.mxu3 %v7913_v6  ;;  %4715 = vmatpush.bf16.msrb.mxu0 %v7533_v54  ;;  %v7082_v6 = vld [vmem:[#allocation9 + $0x178] sm:$0xf0]  ;;  %v7864_v54 = vld [vmem:[#allocation9 + $0x788] sm:$0xf]  ;;  %v8915_v55 = vld [vmem:[#allocation9 + $0x734] sm:$0xf0] }
 0x213   : > { %4603 = vmatpush.bf16.msrb.mxu2 %v7753_v29  ;;  %v7085_v29 = vor.u32 %v8729_v52, %v7082_v6  ;;  %v7688_v52 = vld [vmem:[#allocation9 + $0x628] sm:$0xf]  ;;  %v8721_v6 = vld [vmem:[#allocation9 + $0x12c] sm:$0xf] }
 0x214   : > { %8046 = vmatmul.msk.bf16.vlgmr.msrb.gmra.mxu1 %vm10297_vm11, %v10305_v2  ;;  %v8821_v2 = vld [vmem:[#allocation9 + $0x44c] sm:$0xf] }
 0x215   : > { %4660 = vmatpush.bf16.msra.mxu1 %v7117_v47  ;;  %8028 = vmatmul.msk.bf16.vlgmr.msra.gmra.mxu2 %vm10134_vm7, %v10149_v17  ;;  %v7865_v47 = vor.u32 %v8927_v12, %v7864_v54  ;;  %v7469_v54 = vor.u32 %v8825_v36, %v7466_v38  ;;  %v7050_v12 = vld [vmem:[#allocation9 + $0x138] sm:$0xf0]  ;;  %v7453_v38 = vor.u32 %v8821_v2, %v7450_v43  ;;  %v8813_v2 = vld [vmem:[#allocation9 + $0x40c] sm:$0xf] }
 0x216   : > { %4621 = vmatpush.bf16.msrb.mxu3 %v7897_v9  ;;  %4716 = vmatpush.bf16.msrb.mxu0 %v7517_v3  ;;  %v8887_v9 = vld [vmem:[#allocation9 + $0x654] sm:$0xf0]  ;;  %v7848_v3 = vld [vmem:[#allocation9 + $0x768] sm:$0xf]  ;;  %v7274_v36 = vld [vmem:[#allocation9 + $0x2f8] sm:$0xf0] }
 0x217   : > { %4604 = vmatpush.bf16.msrb.mxu2 %v7737_v0  ;;  %v10545_v0 = vpop.f32.mrf.mxu2  ;;  %v7849_v14 = vor.u32 %v8923_v59, %v7848_v3  ;;  %v7434_v3 = vld [vmem:[#allocation9 + $0x438] sm:$0xf0]  ;;  %v8777_v59 = vld [vmem:[#allocation9 + $0x2ec] sm:$0xf] }
 0x219   : > { %4661 = vmatpush.bf16.msra.mxu1 %v7101_v49  ;;  %8064 = vmatmul.msk.bf16.vlgmr.msra.gmra.mxu0 %vm10080_vm12, %v11252_v13  ;;  %v10550_v49 = vpop.f32.mrf.mxu1  ;;  %v7672_v13 = vld [vmem:[#allocation9 + $0x608] sm:$0xf] }
 0x21a   : > { %4622 = vmatpush.bf16.msrb.mxu3 %v7881_v20  ;;  %4717 = vmatpush.bf16.msrb.mxu0 %v7501_v4  ;;  %v7705_v20 = vor.u32 %v8887_v9, %v7704_v18  ;;  %v8883_v4 = vld [vmem:[#allocation9 + $0x634] sm:$0xf0]  ;;  %v8717_v18 = vld [vmem:[#allocation9 + $0x10c] sm:$0xf]  ;;  %v7034_v9 = vld [vmem:[#allocation9 + $0x118] sm:$0xf0] }
 0x21b   : > { %4605 = vmatpush.bf16.msrb.mxu2 %v7721_v62  ;;  %v7689_v42 = vor.u32 %v8883_v4, %v7688_v52  ;;  %v7053_v62 = vor.u32 %v8721_v6, %v7050_v12  ;;  %v7658_v52 = vld [vmem:[#allocation9 + $0x5f8] sm:$0xf0]  ;;  %v10557_v4 = vpop.f32.mrf.mxu3  ;;  %v10559_v6 = vpop.f32.mrf.mxu0 }
 0x21d   : > { %4662 = vmatpush.bf16.msra.mxu1 %v7085_v29  ;;  %v7833_v29 = vor.u32 %v8919_v63, %v7832_v5  ;;  %v7437_v5 = vor.u32 %v8817_v33, %v7434_v3  ;;  %v7277_v63 = vor.u32 %v8777_v59, %v7274_v36  ;;  %v7421_v3 = vor.u32 %v8813_v2, %v7418_v44  ;;  %v8769_v36 = vld [vmem:[#allocation9 + $0x2ac] sm:$0xf]  ;;  %v8160_v2 = vld [vmem:[#allocation11 + $0x60] sm:$0xf] }
 0x21e   : > { %4623 = vmatpush.bf16.msrb.mxu3 %v7865_v47  ;;  %4718 = vmatpush.bf16.msrb.mxu0 %v7485_v48  ;;  %v8879_v47 = vld [vmem:[#allocation9 + $0x614] sm:$0xf0]  ;;  %v7816_v48 = vld [vmem:[#allocation9 + $0x728] sm:$0xf] }
 0x21f   : > { %4606 = vmatpush.bf16.msrb.mxu2 %v7705_v20  ;;  %v7817_v43 = vor.u32 %v8915_v55, %v7816_v48  ;;  %v10561_v12 = vpop.f32.mrf.mxu2  ;;  %v8809_v48 = vld [vmem:[#allocation9 + $0x3ec] sm:$0xf]  ;;  %v7402_v55 = vld [vmem:[#allocation9 + $0x3f8] sm:$0xf0] }
 0x220   : > { %8034 = vmatmul.msk.bf16.vlgmr.msra.gmra.mxu3 %vm10174_vm0, %v10179_v25  ;;  %v7800_v25 = vld [vmem:[#allocation9 + $0x708] sm:$0xf]  ;;  %v7405_v44 = vor.u32 %v8809_v48, %v7402_v55  ;;  %v7226_v48 = vld [vmem:[#allocation9 + $0x298] sm:$0xf0] }
 0x221   : > { %4663 = vmatpush.bf16.msra.mxu1 %v7069_v27  ;;  %v10555_v20 = vpop.f32.mrf.mxu1  ;;  %v7673_v27 = vor.u32 %v8879_v47, %v7672_v13  ;;  %v8869_v47 = vld [vmem:[#allocation9 + $0x5cc] sm:$0xf] }
 0x222   : > { %4624 = vmatpush.bf16.msrb.mxu3 %v7849_v14  ;;  %4719 = vmatpush.bf16.msrb.mxu0 %v7469_v54  ;;  %v8873_v14 = vld [vmem:[#allocation9 + $0x5ec] sm:$0xf]  ;;  %v7037_v54 = vor.u32 %v8717_v18, %v7034_v9  ;;  %v7642_v18 = vld [vmem:[#allocation9 + $0x5d8] sm:$0xf0]  ;;  %v8168_v9 = vld [vmem:[#allocation11 + $0x70] sm:$0xf] }
 0x223   : > { %4607 = vmatpush.bf16.msrb.mxu2 %v7689_v42  ;;  %v8911_v42 = vld [vmem:[#allocation9 + $0x714] sm:$0xf0]  ;;  %v7661_v13 = vor.u32 %v8873_v14, %v7658_v52  ;;  %v7645_v14 = vor.u32 %v8869_v47, %v7642_v18  ;;  %v7245_v47 = vor.u32 %v8769_v36, %v7242_v19  ;;  %v10589_v18 = vpop.f32.mrf.mxu0  ;;  %v7610_v19 = vld [vmem:[#allocation9 + $0x598] sm:$0xf0]  ;;  %v8152_v36 = vld [vmem:[#allocation11 + $0x50] sm:$0xf] }
 0x224   : > { %8049 = vmatmul.msk.bf16.gmra.mxu1 %vm10353_vm10, %v10362_v7  ;;  %v7801_v33 = vor.u32 %v8911_v42, %v7800_v25  ;;  %v8865_v7 = vld [vmem:[#allocation9 + $0x5ac] sm:$0xf]  ;;  %v7386_v42 = vld [vmem:[#allocation9 + $0x3d8] sm:$0xf0]  ;;  %11308 = vst [vmem:[#allocation46_spill] sm:$0xff] %v10589_v18 }
 0x225   : > { %4664 = vmatpush.bf16.msra.mxu1 %v7053_v62  ;;  %8031 = vmatmul.msk.bf16.gmra.mxu2 %vm10189_vm5, %v10195_v10  ;;  %v8773_v62 = vld [vmem:[#allocation9 + $0x2cc] sm:$0xf]  ;;  %v11304_v10 = vld [vmem:[#allocation21_spill] sm:$0xff] }
 0x226   : > { %4625 = vmatpush.bf16.msrb.mxu3 %v7833_v29  ;;  %4720 = vmatpush.bf16.msrb.mxu0 %v7453_v38  ;;  %v7258_v29 = vld [vmem:[#allocation9 + $0x2d8] sm:$0xf0]  ;;  %v8955_v38 = vld [vmem:[#allocation11 + $0x74] sm:$0xf0] }
 0x227   : > { %4608 = vmatpush.bf16.msrb.mxu2 %v7673_v27  ;;  %v7261_v59 = vor.u32 %v8773_v62, %v7258_v29  ;;  %v8169_v52 = vor.u32 %v8955_v38, %v8168_v9  ;;  %v11302_v27 = vld [vmem:[#allocation20_spill] sm:$0xff] }
 0x228   : > { %v10571_v24 = vmul.u32 512, %v11302_v27  ;;  %v8951_v27 = vld [vmem:[#allocation11 + $0x54] sm:$0xf0] }
 0x229   : > { %4665 = vmatpush.bf16.msra.mxu1 %v7037_v54  ;;  %v10574_v54 = vmul.u32 512, %v11304_v10  ;;  %8067 = vmatmul.msk.bf16.gmra.mxu0 %vm10141_vm8, %v10012_v31  ;;  %v10579_v25 = vpop.f32.mrf.mxu1  ;;  %v10587_v31 = vpop.f32.mrf.mxu3 }
 0x22a   : > { %4626 = vmatpush.bf16.msrb.mxu3 %v7817_v43  ;;  %4721 = vmatpush.bf16.msrb.mxu0 %v7437_v5  ;;  %11303 = vst [vmem:[#allocation43_spill] sm:$0xff] %v10571_v24  ;;  %v7626_v43 = vld [vmem:[#allocation9 + $0x5b8] sm:$0xf0]  ;;  %v8953_v5 = vld [vmem:[#allocation11 + $0x64] sm:$0xf0]  ;;  %v10592_v10 = vpop.f32.mrf.mxu2 }
 0x22b   : > { %4677 = vmatpush.bf16.msra.mxu2 %v7277_v63  ;;  %11305 = vst [vmem:[#allocation44_spill] sm:$0xff] %v10574_v54  ;;  %v8805_v63 = vld [vmem:[#allocation9 + $0x3cc] sm:$0xf]  ;;  %v7629_v9 = vor.u32 %v8865_v7, %v7626_v43  ;;  %v8161_v38 = vor.u32 %v8953_v5, %v8160_v2  ;;  %v7210_v2 = vld [vmem:[#allocation9 + $0x278] sm:$0xf0] }
 0x22c   : > { %11306 = vst [vmem:[#allocation45_spill] sm:$0xff] %v10579_v25  ;;  %v8761_v43 = vld [vmem:[#allocation9 + $0x26c] sm:$0xf]  ;;  %v7354_v25 = vld [vmem:[#allocation9 + $0x398] sm:$0xf0] }
 0x22d   : > { %4734 = vmatpush.bf16.msrb.mxu1 %v7661_v13  ;;  %v11307_v13 = vld [vmem:[#allocation22_spill] sm:$0xff] }
 0x22e   : > { %4627 = vmatpush.bf16.msrb.mxu3 %v7801_v33  ;;  %v4844_v62 = vadd.s32 %v10571_v24, %v11307_v13  ;;  %v4848_v29 = vadd.s32 %v10574_v54, %v11307_v13  ;;  %4722 = vmatpush.bf16.msrb.mxu0 %v7421_v3  ;;  %v8765_v33 = vld [vmem:[#allocation9 + $0x28c] sm:$0xf]  ;;  %v7389_v3 = vor.u32 %v8805_v63, %v7386_v42 }
 0x22f   : > { %4678 = vmatpush.bf16.msra.mxu2 %v7261_v59  ;;  %v8861_v59 = vld [vmem:[#allocation9 + $0x58c] sm:$0xf]  ;;  %v7229_v7 = vor.u32 %v8765_v33, %v7226_v48 }
 0x230   : > { %v4861_v55 = vadd.s32 %v10585_v37, %v4844_v62  ;;  %v4865_v54 = vadd.s32 %v10585_v37, %v4848_v29  ;;  %8037 = vmatmul.msk.bf16.gmra.mxu3 %vm11297_vm1, %v11295_v8  ;;  %v7613_v42 = vor.u32 %v8861_v59, %v7610_v19  ;;  %v8153_v62 = vor.u32 %v8951_v27, %v8152_v36  ;;  %v8857_v29 = vld [vmem:[#allocation9 + $0x56c] sm:$0xf]  ;;  %v7594_v8 = vld [vmem:[#allocation9 + $0x578] sm:$0xf0] }
 0x231   : > { %4735 = vmatpush.bf16.msrb.mxu1 %v7645_v14  ;;  %v10598_v14 = vld [vmem:[%s11161_s5] sm:$0xf]  ;;  %v10603_v63 = vpop.f32.mrf.mxu1  ;;  %v8797_v24 = vld [vmem:[#allocation9 + $0x38c] sm:$0xf]  ;;  %v7597_v19 = vor.u32 %v8857_v29, %v7594_v8  ;;  %v7338_v29 = vld [vmem:[#allocation9 + $0x378] sm:$0xf0] }
 0x232   : > { %5451 = vmatpush.bf16.msra.mxu0 %v8169_v52  ;;  %4696 = vmatpush.bf16.msra.mxu3 %v7405_v44  ;;  %v8801_v52 = vld [vmem:[#allocation9 + $0x3ac] sm:$0xf]  ;;  %v7370_v44 = vld [vmem:[#allocation9 + $0x3b8] sm:$0xf0]  ;;  %v4877_v5 = vshrl.u32 %v4861_v55, 16  ;;  %11309 = vst [vmem:[#allocation47_spill] sm:$0xff] %v10603_v63  ;;  %v7357_v51 = vor.u32 %v8797_v24, %v7354_v25 }
 0x233   : > { %4679 = vmatpush.bf16.msra.mxu2 %v7245_v47  ;;  %v10606_v18 = vperm.slane %v10598_v14, 0  ;;  %v7373_v41 = vor.u32 %v8801_v52, %v7370_v44  ;;  %v8144_v47 = vld [vmem:[#allocation11 + $0x40] sm:$0xf]  ;;  %v4881_v33 = vshrl.u32 %v4865_v54, 16  ;;  %v8757_v27 = vld [vmem:[#allocation9 + $0x24c] sm:$0xf]  ;;  %v10623_v52 = vpop.f32.mrf.mxu0 }
 0x234   : > { %v10608_v48 = vxor.u32 %v4877_v5, %v4861_v55  ;;  %8070 = vmatmul.msk.bf16.vlgmr.msra.gmra.mxu1 %vm10092_vm13, %v10052_v46  ;;  %11310 = vst [vmem:[#allocation48_spill] sm:$0xff] %v10623_v52  ;;  %v8853_v46 = vld [vmem:[#allocation9 + $0x54c] sm:$0xf]  ;;  %v8947_v8 = vld [vmem:[#allocation11 + $0x34] sm:$0xf0] }
 0x235   : > { %4736 = vmatpush.bf16.msrb.mxu1 %v7629_v9  ;;  %v7213_v9 = vor.u32 %v8761_v43, %v7210_v2  ;;  %8052 = vmatmul.msk.bf16.vlgmr.msrb.gmra.mxu2 %vm10385_vm15, %v10397_v30  ;;  %v4195_v59 = vadd.f32 %v10483_v11, %v10606_v18  ;;  %v10618_v55 = vpop.f32.mrf.mxu2  ;;  %v7578_v43 = vld [vmem:[#allocation9 + $0x558] sm:$0xf0]  ;;  %v8136_v2 = vld [vmem:[#allocation11 + $0x30] sm:$0xf]  ;;  %v10625_v5 = vxor.u32 %v4881_v33, %v4865_v54  ;;  %v8849_v54 = vld [vmem:[#allocation9 + $0x52c] sm:$0xf] }
 0x236   : > { %5452 = vmatpush.bf16.msra.mxu0 %v8161_v38  ;;  %4697 = vmatpush.bf16.msra.mxu3 %v7389_v3  ;;  %v8949_v38 = vld [vmem:[#allocation11 + $0x44] sm:$0xf0]  ;;  %v7194_v3 = vld [vmem:[#allocation9 + $0x258] sm:$0xf0]  ;;  %v4909_v36 = vmul.u32 2246822507, %v10608_v48  ;;  %v4193_v11 = vadd.f32 %v10472_v15, %v10606_v18 }
 0x237   : > { %4680 = vmatpush.bf16.msra.mxu2 %v7229_v7  ;;  %v10621_v7 = vpop.f32.mrf.mxu3  ;;  %v8145_v44 = vor.u32 %v8949_v38, %v8144_v47  ;;  %v8753_v48 = vld [vmem:[#allocation9 + $0x22c] sm:$0xf]  ;;  %v7178_v63 = vld [vmem:[#allocation9 + $0x238] sm:$0xf0]  ;;  %v4214_v52 = vadd.f32 %v10501_v57, %v4195_v59  ;;  %v11312_v47 = vld [vmem:[#allocation26_spill] sm:$0xff] }
 0x238   : > { %v7562_v25 = vld [vmem:[#allocation9 + $0x538] sm:$0xf0]  ;;  %v4925_v15 = vshrl.u32 %v4909_v36, 13  ;;  %v10636_v33 = vmul.u32 512, %v11312_v47  ;;  %v4913_v57 = vmul.u32 2246822507, %v10625_v5  ;;  %v7181_v59 = vor.u32 %v8753_v48, %v7178_v63 }
 0x239   : > { %4737 = vmatpush.bf16.msrb.mxu1 %v7613_v42  ;;  %v7197_v42 = vor.u32 %v8757_v27, %v7194_v3  ;;  %8088 = vmatmul.msk.bf16.vlgmr.msrb.gmra.mxu0 %vm10238_vm4, %v10234_v60  ;;  %v10633_v24 = vpop.f32.mrf.mxu1  ;;  %v8128_v27 = vld [vmem:[#allocation11 + $0x20] sm:$0xf]  ;;  %v11313_v3 = vld [vmem:[#allocation27_spill] sm:$0xff]  ;;  %v4212_v60 = vadd.f32 %v10488_v58, %v4193_v11  ;;  %v7565_v58 = vor.u32 %v8849_v54, %v7562_v25  ;;  %v7546_v63 = vld [vmem:[#allocation9 + $0x518] sm:$0xf0] }
 0x23a   : > { %5453 = vmatpush.bf16.msra.mxu0 %v8153_v62  ;;  %4698 = vmatpush.bf16.msra.mxu3 %v7373_v41  ;;  %v8793_v62 = vld [vmem:[#allocation9 + $0x36c] sm:$0xf]  ;;  %11311 = vst [vmem:[#allocation49_spill] sm:$0xff] %v10633_v24  ;;  %v7581_v41 = vor.u32 %v8853_v46, %v7578_v43  ;;  %v10640_v45 = vmul.u32 512, %v11313_v3  ;;  %v7322_v43 = vld [vmem:[#allocation9 + $0x358] sm:$0xf0]  ;;  %v4852_v47 = vadd.s32 %v10636_v33, %v11307_v13 }
 0x23b   : > { %4681 = vmatpush.bf16.msra.mxu2 %v7213_v9  ;;  %v8137_v9 = vor.u32 %v8947_v8, %v8136_v2  ;;  %v7341_v38 = vor.u32 %v8793_v62, %v7338_v29  ;;  %v8789_v46 = vld [vmem:[#allocation9 + $0x34c] sm:$0xf]  ;;  %v7162_v2 = vld [vmem:[#allocation9 + $0x218] sm:$0xf0]  ;;  %v4231_v8 = vadd.f32 %v10528_v50, %v4212_v60  ;;  %v10649_v29 = vxor.u32 %v4925_v15, %v4909_v36 }
 0x23c   : > { %v4856_v5 = vadd.s32 %v10640_v45, %v11307_v13  ;;  %v8845_v11 = vld [vmem:[#allocation9 + $0x50c] sm:$0xf]  ;;  %v4869_v48 = vadd.s32 %v10585_v37, %v4852_v47  ;;  %v7325_v13 = vor.u32 %v8789_v46, %v7322_v43  ;;  %v7786_v50 = vld [vmem:[#allocation9 + $0x6f8] sm:$0xf0]  ;;  %v4929_v60 = vshrl.u32 %v4913_v57, 13 }
 0x23d   : > { %4738 = vmatpush.bf16.msrb.mxu1 %v7597_v19  ;;  %v8945_v19 = vld [vmem:[#allocation11 + $0x24] sm:$0xf0]  ;;  %v4308_v62 = vpop.f32.mrf.mxu2  ;;  %v8905_v24 = vld [vmem:[#allocation9 + $0x6ec] sm:$0xf]  ;;  %v7306_v25 = vld [vmem:[#allocation9 + $0x338] sm:$0xf0]  ;;  %v4250_v15 = vadd.f32 %v10541_v26, %v4231_v8 }
 0x23e   : > { %5454 = vmatpush.bf16.msra.mxu0 %v8145_v44  ;;  %4699 = vmatpush.bf16.msra.mxu3 %v7357_v51  ;;  %v4233_v44 = vadd.f32 %v10545_v0, %v4214_v52  ;;  %v8749_v51 = vld [vmem:[#allocation9 + $0x20c] sm:$0xf]  ;;  %v8129_v52 = vor.u32 %v8945_v19, %v8128_v27  ;;  %v7789_v27 = vor.u32 %v8905_v24, %v7786_v50  ;;  %v8112_v19 = vld [vmem:[#allocation11] sm:$0xf]  ;;  %v8941_v46 = vld [vmem:[#allocation11 + $0x4] sm:$0xf0] }
 0x23f   : > { %4682 = vmatpush.bf16.msra.mxu2 %v7197_v42  ;;  %v8120_v42 = vld [vmem:[#allocation11 + $0x10] sm:$0xf]  ;;  %v10653_v0 = vpop.f32.mrf.mxu3  ;;  %v7165_v36 = vor.u32 %v8749_v51, %v7162_v2  ;;  %v8785_v54 = vld [vmem:[#allocation9 + $0x32c] sm:$0xf]  ;;  %v4957_v43 = vmul.u32 3266489909, %v10649_v29  ;;  %v10664_v26 = vxor.u32 %v4929_v60, %v4913_v57  ;;  %v8113_v60 = vor.u32 %v8941_v46, %v8112_v19 }
 0x240   : > { %v4252_v3 = vadd.f32 %v10557_v4, %v4233_v44  ;;  %8058 = vmatmul.msk.bf16.vlgmr.msrb.gmra.mxu3 %vm11300_vm14, %v10426_v16  ;;  %v4873_v4 = vadd.s32 %v10585_v37, %v4856_v5  ;;  %v7309_v51 = vor.u32 %v8785_v54, %v7306_v25  ;;  %v8781_v2 = vld [vmem:[#allocation9 + $0x30c] sm:$0xf]  ;;  %v7290_v24 = vld [vmem:[#allocation9 + $0x318] sm:$0xf0]  ;;  %v8954_v8 = vld [vmem:[#allocation11 + $0x74] sm:$0xf] }
 0x241   : > { %4739 = vmatpush.bf16.msrb.mxu1 %v7581_v41  ;;  %v8943_v41 = vld [vmem:[#allocation11 + $0x14] sm:$0xf0]  ;;  %v8901_v5 = vld [vmem:[#allocation9 + $0x6cc] sm:$0xf]  ;;  %v11314_v46 = vld [vmem:[#allocation34_spill] sm:$0xff] }
 0x242   : > { %5455 = vmatpush.bf16.msra.mxu0 %v8137_v9  ;;  %4700 = vmatpush.bf16.msra.mxu3 %v7341_v38  ;;  %v4271_v47 = vadd.f32 %v10526_v34, %v4252_v3  ;;  %v10661_v9 = vpop.f32.mrf.mxu0  ;;  %v7549_v38 = vor.u32 %v8845_v11, %v7546_v63  ;;  %v8121_v44 = vor.u32 %v8943_v41, %v8120_v42  ;;  %v10667_v3 = vpop.f32.mrf.mxu1  ;;  %v8937_v57 = vld [vmem:[#allocation9 + $0x7ec] sm:$0xf]  ;;  %v7914_v63 = vld [vmem:[#allocation9 + $0x7f8] sm:$0xf0]  ;;  %v4961_v41 = vmul.u32 3266489909, %v10664_v26 }
 0x243   : > { %4683 = vmatpush.bf16.msra.mxu2 %v7181_v59  ;;  %v4885_v59 = vshrl.u32 %v4869_v48, 16  ;;  %v4269_v34 = vadd.f32 %v10513_v28, %v4250_v15  ;;  %v7773_v42 = vor.u32 %v8901_v5, %v7770_v21  ;;  %v7917_v15 = vor.u32 %v8937_v57, %v7914_v63  ;;  %v7722_v29 = vld [vmem:[#allocation9 + $0x678] sm:$0xf0] }
 0x244   : > { %v4290_v11 = vadd.f32 %v10550_v49, %v4271_v47  ;;  %8073 = vmatmul.msk.bf16.gmra.mxu1 %vm10153_vm9, %v10147_v23  ;;  %v7754_v23 = vld [vmem:[#allocation9 + $0x6b8] sm:$0xf0]  ;;  %v4198_v21 = vadd.f32 %v10493_v53, %v10606_v18  ;;  %v11316_v53 = vld [vmem:[#allocation40_spill] sm:$0xff]  ;;  %v4977_v26 = vshrl.u32 %v4961_v41, 16 }
 0x245   : > { %4740 = vmatpush.bf16.msrb.mxu1 %v7565_v58  ;;  %v4889_v58 = vshrl.u32 %v4873_v4, 16  ;;  %8055 = vmatmul.msk.bf16.gmra.mxu2 %vm10440_vm6, %v10438_v1  ;;  %v4288_v28 = vadd.f32 %v10533_v22, %v4269_v34  ;;  %v8893_v34 = vld [vmem:[#allocation9 + $0x68c] sm:$0xf] }
 0x246   : > { %5456 = vmatpush.bf16.msra.mxu0 %v8129_v52  ;;  %4701 = vmatpush.bf16.msra.mxu3 %v7325_v13  ;;  %v8170_v13 = vld [vmem:[#allocation11 + $0x78] sm:$0xf0]  ;;  %v10677_v52 = vxor.u32 %v4885_v59, %v4869_v48  ;;  %v4309_v50 = vadd.f32 %v4308_v62, %v4290_v11  ;;  %v4973_v48 = vshrl.u32 %v4957_v43, 16 }
 0x247   : > { %4684 = vmatpush.bf16.msra.mxu2 %v7165_v36  ;;  %v4327_v49 = vpop.f32.mrf.mxu3  ;;  %v7293_v36 = vor.u32 %v8781_v2, %v7290_v24  ;;  %v4307_v54 = vadd.f32 %v10618_v55, %v4288_v28  ;;  %v8173_v22 = vor.u32 %v8954_v8, %v8170_v13  ;;  %v10683_v47 = vxor.u32 %v4889_v58, %v4873_v4  ;;  %v7898_v4 = vld [vmem:[#allocation9 + $0x7d8] sm:$0xf0] }
 0x248   : > { %v10681_v25 = vpop.f32.mrf.mxu2  ;;  %v4328_v62 = vadd.f32 %v4327_v49, %v4309_v50  ;;  %v7757_v55 = vor.u32 %v8897_v56, %v7754_v23  ;;  %v4200_v2 = vadd.f32 %v11316_v53, %v10606_v18  ;;  %v11317_v58 = vld [vmem:[#allocation41_spill] sm:$0xff]  ;;  %v4989_v57 = vxor.u32 %v4973_v48, %v4957_v43  ;;  %v8950_v18 = vld [vmem:[#allocation11 + $0x54] sm:$0xf]  ;;  %v8929_v49 = vld [vmem:[#allocation9 + $0x7ac] sm:$0xf] }
 0x249   : > { %4741 = vmatpush.bf16.msrb.mxu1 %v7549_v38  ;;  %v8952_v38 = vld [vmem:[#allocation11 + $0x64] sm:$0xf]  ;;  %v4326_v19 = vadd.f32 %v10653_v0, %v4307_v54  ;;  %8091 = vmatmul.msk.bf16.gmra.mxu0 %vm10271_vm2, %v11314_v46  ;;  %v7738_v0 = vld [vmem:[#allocation9 + $0x698] sm:$0xf0]  ;;  %v4921_v8 = vmul.u32 2246822507, %v10683_v47  ;;  %v4217_v11 = vadd.f32 %v11317_v58, %v4198_v21  ;;  %v4993_v54 = vxor.u32 %v4977_v26, %v4961_v41 }
 0x24a   : > { %5457 = vmatpush.bf16.msra.mxu0 %v8121_v44  ;;  %4702 = vmatpush.bf16.msra.mxu3 %v7309_v51  ;;  %v8933_v44 = vld [vmem:[#allocation9 + $0x7cc] sm:$0xf]  ;;  %v4917_v51 = vmul.u32 2246822507, %v10677_v52  ;;  %v10696_v5 = vpop.f32.mrf.mxu0  ;;  %v4811_v13 = vmul.f32 0.2, %v4328_v62  ;;  %v10702_v52 = vpop.f32.mrf.mxu1  ;;  %v7741_v50 = vor.u32 %v8893_v34, %v7738_v0 }
 0x24b   : > { %4753 = vmatpush.bf16.msrb.mxu2 %v7789_v27  ;;  %v8162_v27 = vld [vmem:[#allocation11 + $0x68] sm:$0xf0]  ;;  %v7901_v63 = vor.u32 %v8933_v44, %v7898_v4  ;;  %v8154_v28 = vld [vmem:[#allocation11 + $0x58] sm:$0xf0]  ;;  %vm4795_vm12 = vcmp.gt.f32.partialorder %v4328_v62, 0.0  ;;  %v4236_v23 = vadd.f32 %v10561_v12, %v4217_v11  ;;  %vm4791_vm13 = vcmp.gt.f32.partialorder %v4326_v19, 0.0 }
 0x24c   : > { %v8165_v24 = vor.u32 %v8952_v38, %v8162_v27  ;;  %v8157_v47 = vor.u32 %v8950_v18, %v8154_v28  ;;  %v4937_v21 = vshrl.u32 %v4921_v8, 13  ;;  %v4827_v27 = vsel %vm4795_vm12, %v4328_v62, %v4811_v13  ;;  %v8948_v12 = vld [vmem:[#allocation11 + $0x44] sm:$0xf]  ;;  %v8146_v41 = vld [vmem:[#allocation11 + $0x48] sm:$0xf0] }
 0x24d   : > { %v4255_v38 = vadd.f32 %v10587_v31, %v4236_v23  ;;  %vm5005_vm8 = vcmp.ge.s32.totalorder %v4989_v57, 3435973837  ;;  %vm5009_vm9 = vcmp.ge.s32.totalorder %v4993_v54, 3435973837  ;;  %v8925_v31 = vld [vmem:[#allocation9 + $0x78c] sm:$0xf]  ;;  %v8149_v26 = vor.u32 %v8948_v12, %v8146_v41 }
 0x24e   : > { %5458 = vmatpush.bf16.msra.mxu0 %v8113_v60  ;;  %4703 = vmatpush.bf16.msra.mxu3 %v7293_v36  ;;  %v4933_v60 = vshrl.u32 %v4917_v51, 13  ;;  %v11318_v36 = vld [vmem:[#allocation42_spill] sm:$0xff]  ;;  %v5025_v62 = vmul.f32 1.4285715, %v4827_v27  ;;  %v8885_v34 = vld [vmem:[#allocation9 + $0x64c] sm:$0xf]  ;;  %vm10731_vm4 = vmpackc.low %vm5009_vm9, %vm5005_vm8 }
 0x24f   : > { %4754 = vmatpush.bf16.msrb.mxu2 %v7773_v42  ;;  %v4807_v42 = vmul.f32 0.2, %v4326_v19  ;;  %v4219_v56 = vadd.f32 %v11318_v36, %v4200_v2  ;;  %v4274_v4 = vadd.f32 %v10543_v35, %v4255_v38  ;;  %v7866_v2 = vld [vmem:[#allocation9 + $0x798] sm:$0xf0]  ;;  %v8946_v13 = vld [vmem:[#allocation11 + $0x34] sm:$0xf] }
 0x250   : > { %8061 = vmatmul.msk.bf16.gmra.mxu3 %vm10456_vm3, %v10454_v32  ;;  %v4313_v43 = vpop.f32.mrf.mxu2  ;;  %v7706_v0 = vld [vmem:[#allocation9 + $0x658] sm:$0xf0]  ;;  %v8921_v28 = vld [vmem:[#allocation9 + $0x76c] sm:$0xf]  ;;  %v8232_v36 = vld [vmem:[#allocation11 + $0xf0] sm:$0xf] }
 0x251   : > { %v4238_v48 = vadd.f32 %v10592_v10, %v4219_v56  ;;  %v4823_v53 = vsel %vm4791_vm13, %v4326_v19, %v4807_v42  ;;  %v4293_v58 = vadd.f32 %v10555_v20, %v4274_v4  ;;  %v11320_v19 = vld [vmem:[#allocation36_spill] sm:$0xff]  ;;  %v7869_v20 = vor.u32 %v8925_v31, %v7866_v2  ;;  %v8971_v56 = vld [vmem:[#allocation11 + $0xf4] sm:$0xf0]  ;;  %v8944_v38 = vld [vmem:[#allocation11 + $0x24] sm:$0xf] }
 0x252   : > { %5527 = vmatpush.bf16.msrb.mxu0 %v8173_v22  ;;  %4772 = vmatpush.bf16.msrb.mxu3 %v7917_v15  ;;  %v7882_v22 = vld [vmem:[#allocation9 + $0x7b8] sm:$0xf0]  ;;  %v8889_v15 = vld [vmem:[#allocation9 + $0x66c] sm:$0xf]  ;;  %v5021_v18 = vmul.f32 1.4285715, %v4823_v53  ;;  %v10740_v23 = vpop.f32.mrf.mxu1 }
 0x253   : > { %4755 = vmatpush.bf16.msrb.mxu2 %v7757_v55  ;;  %v7885_v46 = vor.u32 %v8929_v49, %v7882_v22  ;;  %v7725_v59 = vor.u32 %v8889_v15, %v7722_v29  ;;  %v10712_v55 = vxor.u32 %v4933_v60, %v4917_v51  ;;  %v4257_v44 = vadd.f32 %v10621_v7, %v4238_v48  ;;  %v4330_v10 = vpop.f32.mrf.mxu3  ;;  %v10721_v7 = vpop.f32.mrf.mxu0  ;;  %v7850_v60 = vld [vmem:[#allocation9 + $0x778] sm:$0xf0]  ;;  %v8881_v29 = vld [vmem:[#allocation9 + $0x62c] sm:$0xf]  ;;  %v8224_v27 = vld [vmem:[#allocation11 + $0xe0] sm:$0xf] }
 0x254   : > { %8094 = vmatmul.msk.bf16.vlgmr.msrb.gmra.mxu1 %vm10297_vm11, %v11320_v19  ;;  %v7709_v49 = vor.u32 %v8885_v34, %v7706_v0  ;;  %v10738_v57 = vpack.c.bf16 %v5025_v62, %v5021_v18  ;;  %v7853_v41 = vor.u32 %v8921_v28, %v7850_v60  ;;  %v8917_v4 = vld [vmem:[#allocation9 + $0x74c] sm:$0xf]  ;;  %v7834_v53 = vld [vmem:[#allocation9 + $0x758] sm:$0xf0]  ;;  %v8942_v0 = vld [vmem:[#allocation11 + $0x14] sm:$0xf] }
 0x255   : > { %v4276_v51 = vadd.f32 %v10559_v6, %v4257_v44  ;;  %8076 = vmatmul.msk.bf16.vlgmr.msra.gmra.mxu2 %vm10134_vm7, %v10149_v17  ;;  %v4965_v6 = vmul.u32 3266489909, %v10712_v55  ;;  %v11324_v17 = vld [vmem:[#allocation45_spill] sm:$0xff]  ;;  %v8216_v35 = vld [vmem:[#allocation11 + $0xd0] sm:$0xf] }
 0x256   : > { %5528 = vmatpush.bf16.msrb.mxu0 %v8165_v24  ;;  %4773 = vmatpush.bf16.msrb.mxu3 %v7901_v63  ;;  %v10717_v24 = vxor.u32 %v4937_v21, %v4921_v8  ;;  %v8138_v63 = vld [vmem:[#allocation11 + $0x38] sm:$0xf0]  ;;  %v8233_v21 = vor.u32 %v8971_v56, %v8232_v36  ;;  %v11325_v28 = vld [vmem:[#allocation28_spill] sm:$0xff]  ;;  %v8208_v36 = vld [vmem:[#allocation11 + $0xc0] sm:$0xf] }
 0x257   : > { %4756 = vmatpush.bf16.msrb.mxu2 %v7741_v50  ;;  %v4295_v42 = vadd.f32 %v11324_v17, %v4276_v51  ;;  %v4312_v50 = vadd.f32 %v10681_v25, %v4293_v58  ;;  %v8141_v15 = vor.u32 %v8946_v13, %v8138_v63  ;;  %v8130_v25 = vld [vmem:[#allocation11 + $0x28] sm:$0xf0]  ;;  %v4981_v55 = vshrl.u32 %v4965_v6, 16  ;;  %v7818_v18 = vld [vmem:[#allocation9 + $0x738] sm:$0xf0] }
 0x258   : > { %v10742_v54 = vpop.f32.mrf.mxu2  ;;  %v4969_v22 = vmul.u32 3266489909, %v10717_v24  ;;  %5470 = vmatpush.bf16.msra.mxu1 %v8233_v21  ;;  %v8133_v62 = vor.u32 %v8944_v38, %v8130_v25  ;;  %v8122_v24 = vld [vmem:[#allocation11 + $0x18] sm:$0xf0]  ;;  %v7837_v58 = vor.u32 %v8917_v4, %v7834_v53  ;;  %v8913_v63 = vld [vmem:[#allocation9 + $0x72c] sm:$0xf] }
 0x259   : > { %v4331_v48 = vadd.f32 %v4330_v10, %v4312_v50  ;;  %v4314_v12 = vadd.f32 %v4313_v43, %v4295_v42  ;;  %8368 = vmatmul.msk.bf16.vlgmr.msra.gmra.mxu0 %vm10731_vm4, %v10738_v57  ;;  %v8877_v43 = vld [vmem:[#allocation9 + $0x60c] sm:$0xf]  ;;  %v4997_v11 = vxor.u32 %v4981_v55, %v4965_v6  ;;  %v8965_v56 = vld [vmem:[#allocation11 + $0xc4] sm:$0xf0]  ;;  %v7821_v21 = vor.u32 %v8913_v63, %v7818_v18  ;;  %v11329_v4 = vld [vmem:[#allocation30_spill] sm:$0xff] }
 0x25a   : > { %5529 = vmatpush.bf16.msrb.mxu0 %v8157_v47  ;;  %4774 = vmatpush.bf16.msrb.mxu3 %v7885_v46  ;;  %v7690_v47 = vld [vmem:[#allocation9 + $0x638] sm:$0xf0]  ;;  %v8969_v46 = vld [vmem:[#allocation11 + $0xe4] sm:$0xf0]  ;;  %v4985_v2 = vshrl.u32 %v4969_v22, 16 }
 0x25b   : > { %4757 = vmatpush.bf16.msrb.mxu2 %v7725_v59  ;;  %v4332_v59 = vpop.f32.mrf.mxu3  ;;  %v7693_v44 = vor.u32 %v8881_v29, %v7690_v47  ;;  %v8225_v31 = vor.u32 %v8969_v46, %v8224_v27  ;;  %v4815_v34 = vmul.f32 0.2, %v4331_v48  ;;  %v10748_v19 = vpop.f32.mrf.mxu0  ;;  %vm4799_vm2 = vcmp.gt.f32.partialorder %v4331_v48, 0.0  ;;  %v8114_v29 = vld [vmem:[#allocation11 + $0x8] sm:$0xf0] }
 0x25c   : > { %v4333_v10 = vadd.f32 %v4332_v59, %v4314_v12  ;;  %v5001_v50 = vxor.u32 %v4985_v2, %v4969_v22  ;;  %v10756_v47 = vpop.f32.mrf.mxu1  ;;  %v8909_v27 = vld [vmem:[#allocation9 + $0x70c] sm:$0xf]  ;;  %v7802_v22 = vld [vmem:[#allocation9 + $0x718] sm:$0xf0]  ;;  %v8209_v12 = vor.u32 %v8965_v56, %v8208_v36  ;;  %v8192_v63 = vld [vmem:[#allocation11 + $0xa0] sm:$0xf] }
 0x25d   : > { %5471 = vmatpush.bf16.msra.mxu1 %v8225_v31  ;;  %v4831_v38 = vsel %vm4799_vm2, %v4331_v48, %v4815_v34  ;;  %v11327_v59 = vld [vmem:[#allocation23_spill] sm:$0xff]  ;;  %v11331_v48 = vld [vmem:[#allocation38_spill] sm:$0xff]  ;;  %v8963_v34 = vld [vmem:[#allocation11 + $0xb4] sm:$0xf0] }
 0x25e   : > { %5530 = vmatpush.bf16.msrb.mxu0 %v8149_v26  ;;  %4775 = vmatpush.bf16.msrb.mxu3 %v7869_v20  ;;  %v7674_v26 = vld [vmem:[#allocation9 + $0x618] sm:$0xf0]  ;;  %vm4803_vm7 = vcmp.gt.f32.partialorder %v4333_v10, 0.0  ;;  %v4819_v51 = vmul.f32 0.2, %v4333_v10  ;;  %v11328_v55 = vld [vmem:[#allocation43_spill] sm:$0xff] }
 0x25f   : > { %4758 = vmatpush.bf16.msrb.mxu2 %v7709_v49  ;;  %v7677_v13 = vor.u32 %v8877_v43, %v7674_v26  ;;  %v8967_v20 = vld [vmem:[#allocation11 + $0xd4] sm:$0xf0]  ;;  %v8125_v49 = vor.u32 %v8942_v0, %v8122_v24  ;;  %vm5017_vm11 = vcmp.ge.s32.totalorder %v5001_v50, 3435973837  ;;  %v7805_v43 = vor.u32 %v8909_v27, %v7802_v22  ;;  %v8200_v26 = vld [vmem:[#allocation11 + $0xb0] sm:$0xf] }
 0x260   : > { %8082 = vmatmul.msk.bf16.vlgmr.msra.gmra.mxu3 %vm10174_vm0, %v11325_v28  ;;  %v10753_v42 = vpop.f32.mrf.mxu2  ;;  %v8217_v60 = vor.u32 %v8967_v20, %v8216_v35  ;;  %v4835_v6 = vsel %vm4803_vm7, %v4333_v10, %v4819_v51  ;;  %vm5013_vm0 = vcmp.ge.s32.totalorder %v4997_v11, 3435973837  ;;  %v11333_v10 = vld [vmem:[#allocation44_spill] sm:$0xff]  ;;  %v8201_v24 = vor.u32 %v8963_v34, %v8200_v26  ;;  %v8961_v18 = vld [vmem:[#allocation11 + $0xa4] sm:$0xf0] }
 0x261   : > { %v4849_v2 = vadd.s32 %v11333_v10, %v11327_v59  ;;  %vm10771_vm12 = vmpackc.low %vm5017_vm11, %vm5013_vm0  ;;  %v8193_v28 = vor.u32 %v8961_v18, %v8192_v63  ;;  %v8959_v36 = vld [vmem:[#allocation11 + $0x94] sm:$0xf0]  ;;  %v8176_v22 = vld [vmem:[#allocation11 + $0x80] sm:$0xf] }
 0x262   : > { %5531 = vmatpush.bf16.msrb.mxu0 %v8141_v15  ;;  %4776 = vmatpush.bf16.msrb.mxu3 %v7853_v41  ;;  %v8940_v15 = vld [vmem:[#allocation11 + $0x4] sm:$0xf]  ;;  %v5033_v41 = vmul.f32 1.4285715, %v4835_v6  ;;  %v10789_v6 = vperm.slane %v10598_v14, 1 }
 0x263   : > { %4759 = vmatpush.bf16.msrb.mxu2 %v7693_v44  ;;  %v10758_v25 = vpop.f32.mrf.mxu3  ;;  %5472 = vmatpush.bf16.msra.mxu1 %v8217_v60  ;;  %v8117_v46 = vor.u32 %v8940_v15, %v8114_v29  ;;  %v4845_v44 = vadd.s32 %v11328_v55, %v11327_v59  ;;  %v4866_v20 = vadd.s32 %v10585_v37, %v4849_v2  ;;  %v8184_v60 = vld [vmem:[#allocation11 + $0x90] sm:$0xf]  ;;  %v11336_v15 = vld [vmem:[#allocation31_spill] sm:$0xff]  ;;  %v8970_v34 = vld [vmem:[#allocation11 + $0xf4] sm:$0xf] }
 0x264   : > { %8097 = vmatmul.msk.bf16.gmra.mxu1 %vm10353_vm10, %v11331_v48  ;;  %v10786_v17 = vpop.f32.mrf.mxu1  ;;  %v8185_v56 = vor.u32 %v8959_v36, %v8184_v60  ;;  %v4853_v48 = vadd.s32 %v10636_v33, %v11327_v59  ;;  %v4857_v2 = vadd.s32 %v10640_v45, %v11327_v59  ;;  %v11340_v60 = vld [vmem:[#allocation48_spill] sm:$0xff]  ;;  %v11341_v29 = vld [vmem:[#allocation49_spill] sm:$0xff] }
 0x265   : > { %8079 = vmatmul.msk.bf16.gmra.mxu2 %vm10189_vm5, %v11329_v4  ;;  %v4862_v35 = vadd.s32 %v10585_v37, %v4845_v44  ;;  %v11338_v4 = vld [vmem:[#allocation46_spill] sm:$0xff]  ;;  %v4347_v36 = vadd.f32 %v11340_v60, %v10789_v6  ;;  %v8218_v8 = vld [vmem:[#allocation11 + $0xd8] sm:$0xf0]  ;;  %v8958_v0 = vld [vmem:[#allocation11 + $0x94] sm:$0xf] }
 0x266   : > { %5532 = vmatpush.bf16.msrb.mxu0 %v8133_v62  ;;  %4777 = vmatpush.bf16.msrb.mxu3 %v7837_v58  ;;  %v5029_v62 = vmul.f32 1.4285715, %v4831_v38  ;;  %v4345_v14 = vadd.f32 %v11338_v4, %v10789_v6 }
 0x267   : > { %4760 = vmatpush.bf16.msrb.mxu2 %v7677_v13  ;;  %5473 = vmatpush.bf16.msra.mxu1 %v8209_v12  ;;  %v10780_v13 = vpop.f32.mrf.mxu0  ;;  %v4878_v50 = vshrl.u32 %v4862_v35, 16  ;;  %v8957_v12 = vld [vmem:[#allocation11 + $0x84] sm:$0xf0] }
 0x268   : > { %v10775_v51 = vpop.f32.mrf.mxu2  ;;  %v10777_v58 = vpack.c.bf16 %v5033_v41, %v5029_v62  ;;  %v8177_v44 = vor.u32 %v8957_v12, %v8176_v22  ;;  %v11339_v62 = vld [vmem:[#allocation47_spill] sm:$0xff] }
 0x269   : > { %v4894_v38 = vxor.u32 %v4878_v50, %v4862_v35  ;;  %v8226_v50 = vld [vmem:[#allocation11 + $0xe8] sm:$0xf0] }
 0x26a   : > { %5533 = vmatpush.bf16.msrb.mxu0 %v8125_v49  ;;  %4778 = vmatpush.bf16.msrb.mxu3 %v7821_v21  ;;  %v4882_v49 = vshrl.u32 %v4866_v20, 16 }
 0x26b   : > { %8371 = vmatmul.msk.bf16.gmra.mxu0 %vm10771_vm12, %v10777_v58  ;;  %v4403_v11 = vpop.f32.mrf.mxu3  ;;  %5474 = vmatpush.bf16.msra.mxu1 %v8201_v24  ;;  %v4910_v53 = vmul.u32 2246822507, %v4894_v38  ;;  %v8234_v24 = vld [vmem:[#allocation11 + $0xf8] sm:$0xf0]  ;;  %v4366_v38 = vadd.f32 %v11341_v29, %v4347_v36 }
 0x26c   : > { %v4898_v27 = vxor.u32 %v4882_v49, %v4866_v20  ;;  %v10810_v26 = vpop.f32.mrf.mxu1  ;;  %v8237_v20 = vor.u32 %v8970_v34, %v8234_v24  ;;  %v4874_v49 = vadd.s32 %v10585_v37, %v4857_v2  ;;  %v8202_v29 = vld [vmem:[#allocation11 + $0xb8] sm:$0xf0] }
 0x26d   : > { %v4926_v18 = vshrl.u32 %v4910_v53, 13 }
 0x26e   : > { %5534 = vmatpush.bf16.msrb.mxu0 %v8117_v46  ;;  %4779 = vmatpush.bf16.msrb.mxu3 %v7805_v43  ;;  %v4914_v31 = vmul.u32 2246822507, %v4898_v27  ;;  %v4364_v43 = vadd.f32 %v11339_v62, %v4345_v14  ;;  %v4890_v4 = vshrl.u32 %v4874_v49, 16  ;;  %v4385_v14 = vadd.f32 %v10753_v42, %v4366_v38 }
 0x26f   : > { %5475 = vmatpush.bf16.msra.mxu1 %v8193_v28  ;;  %v10796_v41 = vpop.f32.mrf.mxu0  ;;  %v4870_v28 = vadd.s32 %v10585_v37, %v4853_v48  ;;  %v4942_v27 = vxor.u32 %v4926_v18, %v4910_v53  ;;  %v8966_v48 = vld [vmem:[#allocation11 + $0xd4] sm:$0xf]  ;;  %v8210_v18 = vld [vmem:[#allocation11 + $0xc8] sm:$0xf0] }
 0x270   : > { %8085 = vmatmul.msk.bf16.gmra.mxu3 %vm11297_vm1, %v11336_v15  ;;  %v10794_v21 = vpop.f32.mrf.mxu2  ;;  %v4383_v35 = vadd.f32 %v10742_v54, %v4364_v43  ;;  %v4930_v39 = vshrl.u32 %v4914_v31, 13  ;;  %v4404_v2 = vadd.f32 %v4403_v11, %v4385_v14  ;;  %v4906_v42 = vxor.u32 %v4890_v4, %v4874_v49 }
 0x271   : > { %v4886_v22 = vshrl.u32 %v4870_v28, 16  ;;  %v4958_v34 = vmul.u32 3266489909, %v4942_v27  ;;  %v4350_v11 = vadd.f32 %v10661_v9, %v10789_v6  ;;  %v8960_v9 = vld [vmem:[#allocation11 + $0xa4] sm:$0xf] }
 0x272   : > { %v4922_v36 = vmul.u32 2246822507, %v4906_v42 }
 0x273   : > { %v10798_v46 = vpop.f32.mrf.mxu3  ;;  %5476 = vmatpush.bf16.msra.mxu1 %v8185_v56  ;;  %v4402_v56 = vadd.f32 %v10758_v25, %v4383_v35  ;;  %v4902_v24 = vxor.u32 %v4886_v22, %v4870_v28  ;;  %v8964_v35 = vld [vmem:[#allocation11 + $0xc4] sm:$0xf]  ;;  %v4369_v49 = vadd.f32 %v10667_v3, %v4350_v11  ;;  %v4352_v22 = vadd.f32 %v10696_v5, %v10789_v6 }
 0x274   : > { %v10828_v62 = vpop.f32.mrf.mxu1  ;;  %v4938_v4 = vshrl.u32 %v4922_v36, 13 }
 0x275   : > { %8100 = vmatmul.msk.bf16.vlgmr.msrb.gmra.mxu2 %vm10385_vm15, %v10397_v30  ;;  %v8968_v30 = vld [vmem:[#allocation11 + $0xe4] sm:$0xf]  ;;  %v4421_v25 = vadd.f32 %v10721_v7, %v4402_v56  ;;  %v4918_v60 = vmul.u32 2246822507, %v4902_v24  ;;  %v8962_v56 = vld [vmem:[#allocation11 + $0xb4] sm:$0xf] }
 0x276   : > { %v8229_v54 = vor.u32 %v8968_v30, %v8226_v50  ;;  %v4423_v30 = vadd.f32 %v10748_v19, %v4404_v2  ;;  %v4388_v19 = vadd.f32 %v10775_v51, %v4369_v49  ;;  %v8205_v40 = vor.u32 %v8962_v56, %v8202_v29  ;;  %v8956_v24 = vld [vmem:[#allocation11 + $0x84] sm:$0xf]  ;;  %v8296_v49 = vld [vmem:[#allocation11 + $0x170] sm:$0xf]  ;;  %v8288_v56 = vld [vmem:[#allocation11 + $0x160] sm:$0xf] }
 0x277   : > { %5477 = vmatpush.bf16.msra.mxu1 %v8177_v44  ;;  %v10824_v12 = vpop.f32.mrf.mxu0  ;;  %v4946_v44 = vxor.u32 %v4930_v39, %v4914_v31  ;;  %v4440_v7 = vadd.f32 %v10740_v23, %v4421_v25  ;;  %v4934_v27 = vshrl.u32 %v4918_v60, 13  ;;  %v4371_v51 = vadd.f32 %v10702_v52, %v4352_v22  ;;  %v8985_v29 = vld [vmem:[#allocation11 + $0x164] sm:$0xf0] }
 0x278   : > { %v4458_v63 = vpop.f32.mrf.mxu2  ;;  %v4407_v14 = vadd.f32 %v10798_v46, %v4388_v19  ;;  %v4954_v46 = vxor.u32 %v4938_v4, %v4922_v36 }
 0x279   : > { %v4962_v31 = vmul.u32 3266489909, %v4946_v44  ;;  %v4459_v50 = vadd.f32 %v4458_v63, %v4440_v7  ;;  %v4442_v63 = vadd.f32 %v10756_v47, %v4423_v30  ;;  %v4950_v6 = vxor.u32 %v4934_v27, %v4918_v60 }
 0x27a   : > { %v4390_v2 = vadd.f32 %v10794_v21, %v4371_v51  ;;  %v4426_v43 = vadd.f32 %v10780_v13, %v4407_v14  ;;  %v8981_v51 = vld [vmem:[#allocation11 + $0x144] sm:$0xf0] }
 0x27b   : > { %8392 = vmatmul.msk.bf16.vlgmr.msrb.gmra.mxu0 %vm10731_vm4, %v10738_v57  ;;  %5546 = vmatpush.bf16.msrb.mxu1 %v8237_v20  ;;  %v10821_v15 = vpop.f32.mrf.mxu3  ;;  %v8221_v57 = vor.u32 %v8966_v48, %v8218_v8  ;;  %v8213_v20 = vor.u32 %v8964_v35, %v8210_v18  ;;  %v4978_v28 = vshrl.u32 %v4962_v31, 16  ;;  %v4966_v18 = vmul.u32 3266489909, %v4950_v6 }
 0x27c   : > { %v10848_v25 = vpop.f32.mrf.mxu1  ;;  %v4409_v52 = vadd.f32 %v10821_v15, %v4390_v2  ;;  %v4445_v11 = vadd.f32 %v10786_v17, %v4426_v43  ;;  %v8976_v43 = vld [vmem:[#allocation11 + $0x124] sm:$0xf] }
 0x27d   : > { %v4994_v3 = vxor.u32 %v4978_v28, %v4962_v31  ;;  %v8178_v31 = vld [vmem:[#allocation11 + $0x88] sm:$0xf0]  ;;  %v4982_v17 = vshrl.u32 %v4966_v18, 16 }
 0x27e   : > { %v8181_v15 = vor.u32 %v8956_v24, %v8178_v31  ;;  %v11347_v24 = vld [vmem:[#allocation25_spill] sm:$0xff] }
 0x27f   : > { %5547 = vmatpush.bf16.msrb.mxu1 %v8229_v54  ;;  %v10841_v54 = vpop.f32.mrf.mxu0  ;;  %vm5010_vm10 = vcmp.ge.s32.totalorder %v4994_v3, 3435973837  ;;  %v4846_v31 = vadd.s32 %v11328_v55, %v11347_v24 }
 0x280   : > { %8106 = vmatmul.msk.bf16.vlgmr.msrb.gmra.mxu3 %vm11300_vm14, %v10426_v16  ;;  %v4460_v53 = vpop.f32.mrf.mxu2  ;;  %v4974_v16 = vshrl.u32 %v4958_v34, 16 }
 0x281   : > { %v4461_v48 = vadd.f32 %v4460_v53, %v4442_v63  ;;  %v4998_v63 = vxor.u32 %v4982_v17, %v4966_v18 }
 0x282   : > { %v4990_v44 = vxor.u32 %v4974_v16, %v4958_v34 }
 0x283   : > { %5548 = vmatpush.bf16.msrb.mxu1 %v8221_v57  ;;  %v4477_v39 = vpop.f32.mrf.mxu3  ;;  %vm5014_vm14 = vcmp.ge.s32.totalorder %v4998_v63, 3435973837 }
 0x284   : > { %v4478_v23 = vadd.f32 %v4477_v39, %v4459_v50  ;;  %vm5006_vm15 = vcmp.ge.s32.totalorder %v4990_v44, 3435973837  ;;  %v4970_v39 = vmul.u32 3266489909, %v4954_v46  ;;  %v4428_v50 = vadd.f32 %v10796_v41, %v4409_v52  ;;  %v10872_v60 = vpop.f32.mrf.mxu1 }
 0x285   : > { %8103 = vmatmul.msk.bf16.gmra.mxu2 %vm10440_vm6, %v10438_v1  ;;  %v8194_v1 = vld [vmem:[#allocation11 + $0xa8] sm:$0xf0]  ;;  %vm10865_vm1 = vmpackc.low %vm5010_vm10, %vm5006_vm15  ;;  %v4850_v52 = vadd.s32 %v11333_v10, %v11347_v24 }
 0x286   : > { %v4808_v8 = vmul.f32 0.2, %v4478_v23  ;;  %v8197_v47 = vor.u32 %v8960_v9, %v8194_v1  ;;  %vm4792_vm5 = vcmp.gt.f32.partialorder %v4478_v23, 0.0  ;;  %v4986_v28 = vshrl.u32 %v4970_v39, 16 }
 0x287   : > { %5549 = vmatpush.bf16.msrb.mxu1 %v8213_v20  ;;  %v10860_v7 = vpop.f32.mrf.mxu0  ;;  %v4447_v9 = vadd.f32 %v10810_v26, %v4428_v50  ;;  %v8289_v1 = vor.u32 %v8985_v29, %v8288_v56  ;;  %v10914_v56 = vld [vmem:[%s11161_s5] sm:$0xf] }
 0x288   : > { %v4463_v38 = vpop.f32.mrf.mxu2  ;;  %v4824_v53 = vsel %vm4792_vm5, %v4478_v23, %v4808_v8  ;;  %v8987_v23 = vld [vmem:[#allocation11 + $0x174] sm:$0xf0]  ;;  %v5002_v27 = vxor.u32 %v4986_v28, %v4970_v39  ;;  %v8977_v39 = vld [vmem:[#allocation11 + $0x124] sm:$0xf0]  ;;  %v8248_v28 = vld [vmem:[#allocation11 + $0x110] sm:$0xf] }
 0x289   : > { %v5022_v13 = vmul.f32 1.4285715, %v4824_v53  ;;  %v4464_v16 = vadd.f32 %v4463_v38, %v4445_v11  ;;  %v8297_v41 = vor.u32 %v8987_v23, %v8296_v49  ;;  %v8983_v8 = vld [vmem:[#allocation11 + $0x154] sm:$0xf0]  ;;  %v4863_v11 = vadd.s32 %v10585_v37, %v4846_v31  ;;  %v8984_v31 = vld [vmem:[#allocation11 + $0x164] sm:$0xf] }
 0x28a   : > { %vm5018_vm13 = vcmp.ge.s32.totalorder %v5002_v27, 3435973837  ;;  %v10917_v29 = vperm.slane %v10914_v56, 2 }
 0x28b   : > { %8395 = vmatmul.msk.bf16.gmra.mxu0 %vm10771_vm12, %v10777_v58  ;;  %5550 = vmatpush.bf16.msrb.mxu1 %v8205_v40  ;;  %v4479_v57 = vpop.f32.mrf.mxu3  ;;  %v8186_v58 = vld [vmem:[#allocation11 + $0x98] sm:$0xf0]  ;;  %vm10888_vm9 = vmpackc.low %vm5018_vm13, %vm5014_vm14 }
 0x28c   : > { %v4480_v5 = vadd.f32 %v4479_v57, %v4461_v48  ;;  %v8189_v42 = vor.u32 %v8958_v0, %v8186_v58  ;;  %5489 = vmatpush.bf16.msra.mxu2 %v8297_v41  ;;  %v10882_v4 = vpop.f32.mrf.mxu1  ;;  %v8280_v48 = vld [vmem:[#allocation11 + $0x150] sm:$0xf] }
 0x28d   : > { %v8281_v6 = vor.u32 %v8983_v8, %v8280_v48  ;;  %v4858_v8 = vadd.s32 %v10640_v45, %v11347_v24 }
 0x28e   : > { %vm4796_vm6 = vcmp.gt.f32.partialorder %v4480_v5, 0.0  ;;  %v4812_v34 = vmul.f32 0.2, %v4480_v5 }
 0x28f   : > { %5551 = vmatpush.bf16.msrb.mxu1 %v8197_v47  ;;  %v10880_v22 = vpop.f32.mrf.mxu0  ;;  %v8272_v47 = vld [vmem:[#allocation11 + $0x140] sm:$0xf] }
 0x290   : > { %v4828_v35 = vsel %vm4796_vm6, %v4480_v5, %v4812_v34  ;;  %8109 = vmatmul.msk.bf16.gmra.mxu3 %vm10456_vm3, %v10454_v32  ;;  %v4465_v21 = vpop.f32.mrf.mxu2  ;;  %5490 = vmatpush.bf16.msra.mxu2 %v8289_v1  ;;  %v8273_v53 = vor.u32 %v8981_v51, %v8272_v47  ;;  %v8986_v51 = vld [vmem:[#allocation11 + $0x174] sm:$0xf] }
 0x291   : > { %v5026_v20 = vmul.f32 1.4285715, %v4828_v35  ;;  %v4466_v38 = vadd.f32 %v4465_v21, %v4447_v9  ;;  %v8264_v35 = vld [vmem:[#allocation11 + $0x130] sm:$0xf]  ;;  %v8979_v21 = vld [vmem:[#allocation11 + $0x134] sm:$0xf0] }
 0x292   : > { %v8265_v18 = vor.u32 %v8979_v21, %v8264_v35  ;;  %v4875_v35 = vadd.s32 %v10585_v37, %v4858_v8 }
 0x293   : > { %5552 = vmatpush.bf16.msrb.mxu1 %v8189_v42  ;;  %v10869_v61 = vpack.c.bf16 %v5026_v20, %v5022_v13  ;;  %v4482_v32 = vpop.f32.mrf.mxu3  ;;  %v8256_v20 = vld [vmem:[#allocation11 + $0x120] sm:$0xf] }
 0x294   : > { %v4483_v36 = vadd.f32 %v4482_v32, %v4464_v16  ;;  %5491 = vmatpush.bf16.msra.mxu2 %v8281_v6  ;;  %v10903_v42 = vpop.f32.mrf.mxu1  ;;  %v8257_v32 = vor.u32 %v8977_v39, %v8256_v20  ;;  %v4879_v16 = vshrl.u32 %v4863_v11, 16 }
 0x295   : > { %8374 = vmatmul.msk.bf16.vlgmr.msra.gmra.mxu1 %vm10865_vm1, %v10869_v61 }
 0x296   : > { %v4816_v40 = vmul.f32 0.2, %v4483_v36  ;;  %vm4800_vm3 = vcmp.gt.f32.partialorder %v4483_v36, 0.0  ;;  %v4895_v41 = vxor.u32 %v4879_v16, %v4863_v11 }
 0x297   : > { %5553 = vmatpush.bf16.msrb.mxu1 %v8181_v15  ;;  %v10894_v58 = vpop.f32.mrf.mxu0  ;;  %v4867_v15 = vadd.s32 %v10585_v37, %v4850_v52  ;;  %v8290_v52 = vld [vmem:[#allocation11 + $0x168] sm:$0xf0] }
 0x298   : > { %v10878_v19 = vpop.f32.mrf.mxu2  ;;  %v4832_v14 = vsel %vm4800_vm3, %v4483_v36, %v4816_v40  ;;  %5492 = vmatpush.bf16.msra.mxu2 %v8273_v53  ;;  %v8975_v36 = vld [vmem:[#allocation11 + $0x114] sm:$0xf0]  ;;  %v8973_v40 = vld [vmem:[#allocation11 + $0x104] sm:$0xf0]  ;;  %v8293_v21 = vor.u32 %v8984_v31, %v8290_v52  ;;  %v4504_v52 = vadd.f32 %v10880_v22, %v10917_v29 }
 0x299   : > { %v5030_v2 = vmul.f32 1.4285715, %v4832_v14  ;;  %v4883_v17 = vshrl.u32 %v4867_v15, 16  ;;  %v8249_v23 = vor.u32 %v8975_v36, %v8248_v28  ;;  %v4854_v14 = vadd.s32 %v10636_v33, %v11347_v24  ;;  %v8982_v28 = vld [vmem:[#allocation11 + $0x154] sm:$0xf] }
 0x29b   : > { %v4484_v44 = vpop.f32.mrf.mxu3  ;;  %v4899_v63 = vxor.u32 %v4883_v17, %v4867_v15 }
 0x29c   : > { %v4485_v3 = vadd.f32 %v4484_v44, %v4466_v38  ;;  %5493 = vmatpush.bf16.msra.mxu2 %v8265_v18  ;;  %v10921_v27 = vpop.f32.mrf.mxu1  ;;  %v8240_v38 = vld [vmem:[#allocation11 + $0x100] sm:$0xf] }
 0x29d   : > { %v8241_v44 = vor.u32 %v8973_v40, %v8240_v38  ;;  %v4915_v48 = vmul.u32 2246822507, %v4899_v63 }
 0x29e   : > { %vm4804_vm8 = vcmp.gt.f32.partialorder %v4485_v3, 0.0  ;;  %v4820_v26 = vmul.f32 0.2, %v4485_v3 }
 0x29f   : > { %v10909_v49 = vpop.f32.mrf.mxu0 }
 0x2a0   : > { %v4836_v57 = vsel %vm4804_vm8, %v4485_v3, %v4820_v26  ;;  %v10884_v5 = vpop.f32.mrf.mxu2  ;;  %5494 = vmatpush.bf16.msra.mxu2 %v8257_v32  ;;  %v4497_v3 = vadd.f32 %v10824_v12, %v10917_v29  ;;  %v4911_v26 = vmul.u32 2246822507, %v4895_v41  ;;  %v4891_v32 = vshrl.u32 %v4875_v35, 16 }
 0x2a1   : > { %v5034_v46 = vmul.f32 1.4285715, %v4836_v57  ;;  %v8298_v57 = vld [vmem:[#allocation11 + $0x178] sm:$0xf0] }
 0x2a2   : > { %v4516_v47 = vadd.f32 %v10828_v62, %v4497_v3  ;;  %v4927_v30 = vshrl.u32 %v4911_v26, 13  ;;  %v4499_v62 = vadd.f32 %v10841_v54, %v10917_v29  ;;  %v8282_v54 = vld [vmem:[#allocation11 + $0x158] sm:$0xf0]  ;;  %v8274_v3 = vld [vmem:[#allocation11 + $0x148] sm:$0xf0] }
 0x2a3   : > { %v4553_v34 = vpop.f32.mrf.mxu3  ;;  %v10892_v0 = vpack.c.bf16 %v5034_v46, %v5030_v2  ;;  %v8301_v2 = vor.u32 %v8986_v51, %v8298_v57  ;;  %v4871_v46 = vadd.s32 %v10585_v37, %v4854_v14 }
 0x2a4   : > { %5495 = vmatpush.bf16.msra.mxu2 %v8249_v23  ;;  %v4535_v6 = vadd.f32 %v10878_v19, %v4516_v47  ;;  %v4518_v19 = vadd.f32 %v10848_v25, %v4499_v62  ;;  %v10945_v20 = vpop.f32.mrf.mxu1  ;;  %v4943_v11 = vxor.u32 %v4927_v30, %v4911_v26  ;;  %v4907_v25 = vxor.u32 %v4891_v32, %v4875_v35  ;;  %v8266_v30 = vld [vmem:[#allocation11 + $0x138] sm:$0xf0] }
 0x2a5   : > { %8377 = vmatmul.msk.bf16.gmra.mxu1 %vm10888_vm9, %v10892_v0  ;;  %v4887_v39 = vshrl.u32 %v4871_v46, 16 }
 0x2a6   : > { %v4554_v24 = vadd.f32 %v4553_v34, %v4535_v6  ;;  %v4537_v16 = vadd.f32 %v10884_v5, %v4518_v19  ;;  %v8285_v34 = vor.u32 %v8982_v28, %v8282_v54  ;;  %v4959_v63 = vmul.u32 3266489909, %v4943_v11  ;;  %v8974_v28 = vld [vmem:[#allocation11 + $0x114] sm:$0xf]  ;;  %v8250_v54 = vld [vmem:[#allocation11 + $0x118] sm:$0xf0] }
 0x2a7   : > { %v10937_v53 = vpop.f32.mrf.mxu0  ;;  %v4903_v41 = vxor.u32 %v4887_v39, %v4871_v46  ;;  %v4923_v51 = vmul.u32 2246822507, %v4907_v25  ;;  %v8978_v46 = vld [vmem:[#allocation11 + $0x134] sm:$0xf] }
 0x2a8   : > { %v10905_v13 = vpop.f32.mrf.mxu2  ;;  %5496 = vmatpush.bf16.msra.mxu2 %v8241_v44  ;;  %v4573_v17 = vadd.f32 %v10894_v58, %v4554_v24  ;;  %v8980_v44 = vld [vmem:[#allocation11 + $0x144] sm:$0xf]  ;;  %v4502_v58 = vadd.f32 %v10860_v7, %v10917_v29  ;;  %v4975_v47 = vshrl.u32 %v4959_v63, 16  ;;  %v8269_v31 = vor.u32 %v8978_v46, %v8266_v30 }
 0x2a9   : > { %v8277_v26 = vor.u32 %v8980_v44, %v8274_v3  ;;  %v4919_v8 = vmul.u32 2246822507, %v4903_v41  ;;  %v4939_v62 = vshrl.u32 %v4923_v51, 13 }
 0x2aa   : > { %v4592_v40 = vadd.f32 %v10903_v42, %v4573_v17  ;;  %v4521_v57 = vadd.f32 %v10872_v60, %v4502_v58  ;;  %v4991_v35 = vxor.u32 %v4975_v47, %v4959_v63  ;;  %v8360_v47 = vld [vmem:[#allocation11 + $0x1f0] sm:$0xf] }
 0x2ab   : > { %v4555_v50 = vpop.f32.mrf.mxu3  ;;  %v4955_v22 = vxor.u32 %v4939_v62, %v4923_v51  ;;  %v9003_v51 = vld [vmem:[#allocation11 + $0x1f4] sm:$0xf0] }
 0x2ac   : > { %5565 = vmatpush.bf16.msrb.mxu2 %v8301_v2  ;;  %v4556_v36 = vadd.f32 %v4555_v50, %v4537_v16  ;;  %v10959_v6 = vpop.f32.mrf.mxu1  ;;  %v4540_v7 = vadd.f32 %v10905_v13, %v4521_v57  ;;  %v4523_v13 = vadd.f32 %v10882_v4, %v4504_v52  ;;  %vm5007_vm7 = vcmp.ge.s32.totalorder %v4991_v35, 3435973837  ;;  %v8972_v4 = vld [vmem:[#allocation11 + $0x104] sm:$0xf]  ;;  %v8352_v57 = vld [vmem:[#allocation11 + $0x1e0] sm:$0xf] }
 0x2ad   : > { %v4971_v44 = vmul.u32 3266489909, %v4955_v22  ;;  %v8999_v62 = vld [vmem:[#allocation11 + $0x1d4] sm:$0xf0] }
 0x2af   : > { %v10950_v14 = vpop.f32.mrf.mxu0 }
 0x2b0   : > { %v10919_v9 = vpop.f32.mrf.mxu2  ;;  %5566 = vmatpush.bf16.msrb.mxu2 %v8293_v21 }
 0x2b1   : > { %v4542_v16 = vadd.f32 %v10919_v9, %v4523_v13 }
 0x2b3   : > { %v10923_v1 = vpop.f32.mrf.mxu3 }
 0x2b4   : > { %5567 = vmatpush.bf16.msrb.mxu2 %v8285_v34  ;;  %v4559_v24 = vadd.f32 %v10923_v1, %v4540_v7  ;;  %v8242_v34 = vld [vmem:[#allocation11 + $0x108] sm:$0xf0] }
 0x2b5   : > { %8398 = vmatmul.msk.bf16.vlgmr.msrb.gmra.mxu1 %vm10865_vm1, %v10869_v61  ;;  %v4931_v61 = vshrl.u32 %v4915_v48, 13 }
 0x2b6   : > { %v4578_v29 = vadd.f32 %v10937_v53, %v4559_v24  ;;  %v8336_v24 = vld [vmem:[#allocation11 + $0x1c0] sm:$0xf] }
 0x2b7   : > { %v4947_v15 = vxor.u32 %v4931_v61, %v4915_v48  ;;  %v4575_v48 = vadd.f32 %v10909_v49, %v4556_v36  ;;  %v4935_v61 = vshrl.u32 %v4919_v8, 13  ;;  %v10967_v32 = vpop.f32.mrf.mxu0  ;;  %v10971_v36 = vpop.f32.mrf.mxu1 }
 0x2b8   : > { %v4610_v12 = vpop.f32.mrf.mxu2  ;;  %5568 = vmatpush.bf16.msrb.mxu2 %v8277_v26  ;;  %v4597_v53 = vadd.f32 %v10945_v20, %v4578_v29  ;;  %v4987_v20 = vshrl.u32 %v4971_v44, 16 }
 0x2b9   : > { %v4963_v38 = vmul.u32 3266489909, %v4947_v15  ;;  %v4611_v50 = vadd.f32 %v4610_v12, %v4592_v40  ;;  %v4594_v49 = vadd.f32 %v10921_v27, %v4575_v48  ;;  %v4951_v15 = vxor.u32 %v4935_v61, %v4919_v8 }
 0x2bb   : > { %v10942_v18 = vpop.f32.mrf.mxu3  ;;  %v4979_v42 = vshrl.u32 %v4963_v38, 16  ;;  %v4967_v9 = vmul.u32 3266489909, %v4951_v15 }
 0x2bc   : > { %5569 = vmatpush.bf16.msrb.mxu2 %v8269_v31 }
 0x2bd   : > { %v4995_v60 = vxor.u32 %v4979_v42, %v4963_v38  ;;  %v8253_v38 = vor.u32 %v8974_v28, %v8250_v54  ;;  %v11352_v28 = vld [vmem:[#allocation18_spill] sm:$0xff] }
 0x2be   : > { %v4847_v54 = vadd.s32 %v11328_v55, %v11352_v28 }
 0x2bf   : > { %vm5011_vm2 = vcmp.ge.s32.totalorder %v4995_v60, 3435973837  ;;  %v10987_v42 = vpop.f32.mrf.mxu0 }
 0x2c0   : > { %v4612_v23 = vpop.f32.mrf.mxu2  ;;  %vm10977_vm11 = vmpackc.low %vm5011_vm2, %vm5007_vm7 }
 0x2c1   : > { %v4613_v21 = vadd.f32 %v4612_v23, %v4594_v49  ;;  %v4561_v23 = vadd.f32 %v10942_v18, %v4542_v16  ;;  %v5003_v49 = vxor.u32 %v4987_v20, %v4971_v44  ;;  %v11024_v20 = vperm.slane %v10914_v56, 3 }
 0x2c3   : > { %v4629_v5 = vpop.f32.mrf.mxu3  ;;  %v4580_v58 = vadd.f32 %v10950_v14, %v4561_v23  ;;  %v8361_v14 = vor.u32 %v9003_v51, %v8360_v47  ;;  %vm5019_vm15 = vcmp.ge.s32.totalorder %v5003_v49, 3435973837  ;;  %v4851_v23 = vadd.s32 %v11333_v10, %v11352_v28  ;;  %v8991_v10 = vld [vmem:[#allocation11 + $0x194] sm:$0xf0]  ;;  %v8304_v51 = vld [vmem:[#allocation11 + $0x180] sm:$0xf] }
 0x2c4   : > { %v4630_v2 = vadd.f32 %v4629_v5, %v4611_v50  ;;  %v8245_v5 = vor.u32 %v8972_v4, %v8242_v34  ;;  %v4983_v50 = vshrl.u32 %v4967_v9, 16  ;;  %v8328_v4 = vld [vmem:[#allocation11 + $0x1b0] sm:$0xf]  ;;  %v8995_v34 = vld [vmem:[#allocation11 + $0x1b4] sm:$0xf0]  ;;  %v4651_v3 = vadd.f32 %v10987_v42, %v11024_v20 }
 0x2c5   : > { %8401 = vmatmul.msk.bf16.gmra.mxu1 %vm10888_vm9, %v10892_v0  ;;  %v8258_v0 = vld [vmem:[#allocation11 + $0x128] sm:$0xf0]  ;;  %v4599_v46 = vadd.f32 %v10959_v6, %v4580_v58  ;;  %5508 = vmatpush.bf16.msra.mxu3 %v8361_v14  ;;  %v8344_v6 = vld [vmem:[#allocation11 + $0x1d0] sm:$0xf]  ;;  %v4868_v44 = vadd.s32 %v10585_v37, %v4851_v23 }
 0x2c6   : > { %v4809_v19 = vmul.f32 0.2, %v4630_v2  ;;  %v8261_v39 = vor.u32 %v8976_v43, %v8258_v0  ;;  %vm4793_vm4 = vcmp.gt.f32.partialorder %v4630_v2, 0.0  ;;  %v4999_v7 = vxor.u32 %v4983_v50, %v4967_v9  ;;  %v8320_v9 = vld [vmem:[#allocation11 + $0x1a0] sm:$0xf] }
 0x2c7   : > { %v8345_v13 = vor.u32 %v8999_v62, %v8344_v6  ;;  %v8312_v58 = vld [vmem:[#allocation11 + $0x190] sm:$0xf] }
 0x2c8   : > { %v4615_v12 = vpop.f32.mrf.mxu2  ;;  %v4825_v1 = vsel %vm4793_vm4, %v4630_v2, %v4809_v19  ;;  %5570 = vmatpush.bf16.msrb.mxu2 %v8261_v39  ;;  %v9001_v2 = vld [vmem:[#allocation11 + $0x1e4] sm:$0xf0]  ;;  %vm5015_vm5 = vcmp.ge.s32.totalorder %v4999_v7, 3435973837  ;;  %v8313_v50 = vor.u32 %v8991_v10, %v8312_v58  ;;  %v4649_v7 = vadd.f32 %v10967_v32, %v11024_v20 }
 0x2c9   : > { %v5023_v25 = vmul.f32 1.4285715, %v4825_v1  ;;  %v4616_v48 = vadd.f32 %v4615_v12, %v4597_v53  ;;  %v10992_v12 = vpop.f32.mrf.mxu1  ;;  %v8353_v43 = vor.u32 %v9001_v2, %v8352_v57  ;;  %vm11000_vm6 = vmpackc.low %vm5019_vm15, %vm5015_vm5  ;;  %v8989_v57 = vld [vmem:[#allocation11 + $0x184] sm:$0xf0] }
 0x2ca   : > { %v8305_v14 = vor.u32 %v8989_v57, %v8304_v51 }
 0x2cb   : > { %v4631_v27 = vpop.f32.mrf.mxu3  ;;  %5509 = vmatpush.bf16.msra.mxu3 %v8353_v43  ;;  %v9002_v43 = vld [vmem:[#allocation11 + $0x1f4] sm:$0xf] }
 0x2cc   : > { %v4632_v11 = vadd.f32 %v4631_v27, %v4613_v21  ;;  %5571 = vmatpush.bf16.msrb.mxu2 %v8253_v38  ;;  %v8997_v21 = vld [vmem:[#allocation11 + $0x1c4] sm:$0xf0]  ;;  %v10996_v27 = vpop.f32.mrf.mxu0 }
 0x2cd   : > { %v8337_v22 = vor.u32 %v8997_v21, %v8336_v24  ;;  %v8993_v38 = vld [vmem:[#allocation11 + $0x1a4] sm:$0xf0]  ;;  %v8354_v24 = vld [vmem:[#allocation11 + $0x1e8] sm:$0xf0] }
 0x2ce   : > { %vm4797_vm0 = vcmp.gt.f32.partialorder %v4632_v11, 0.0  ;;  %v4813_v17 = vmul.f32 0.2, %v4632_v11 }
 0x2cf   : > { %5510 = vmatpush.bf16.msra.mxu3 %v8345_v13 }
 0x2d0   : > { %v4829_v41 = vsel %vm4797_vm0, %v4632_v11, %v4813_v17  ;;  %v4617_v63 = vpop.f32.mrf.mxu2  ;;  %5572 = vmatpush.bf16.msrb.mxu2 %v8245_v5 }
 0x2d1   : > { %v5027_v40 = vmul.f32 1.4285715, %v4829_v41  ;;  %v4618_v61 = vadd.f32 %v4617_v63, %v4599_v46  ;;  %v11006_v17 = vpop.f32.mrf.mxu1  ;;  %v8329_v41 = vor.u32 %v8995_v34, %v8328_v4  ;;  %v8346_v4 = vld [vmem:[#allocation11 + $0x1d8] sm:$0xf0] }
 0x2d3   : > { %v10981_v26 = vpack.c.bf16 %v5027_v40, %v5023_v25  ;;  %v4634_v18 = vpop.f32.mrf.mxu3  ;;  %5511 = vmatpush.bf16.msra.mxu3 %v8337_v22  ;;  %v4864_v25 = vadd.s32 %v10585_v37, %v4847_v54  ;;  %v8321_v40 = vor.u32 %v8993_v38, %v8320_v9  ;;  %v8998_v54 = vld [vmem:[#allocation11 + $0x1d4] sm:$0xf] }
 0x2d4   : > { %v4635_v8 = vadd.f32 %v4634_v18, %v4616_v48  ;;  %v11019_v53 = vpop.f32.mrf.mxu0  ;;  %v4884_v48 = vshrl.u32 %v4868_v44, 16  ;;  %v8349_v23 = vor.u32 %v8998_v54, %v8346_v4 }
 0x2d5   : > { %8380 = vmatmul.msk.bf16.vlgmr.msra.gmra.mxu2 %vm10977_vm11, %v10981_v26  ;;  %v4880_v5 = vshrl.u32 %v4864_v25, 16 }
 0x2d6   : > { %v4817_v31 = vmul.f32 0.2, %v4635_v8  ;;  %vm4801_vm12 = vcmp.gt.f32.partialorder %v4635_v8, 0.0  ;;  %v4900_v2 = vxor.u32 %v4884_v48, %v4868_v44 }
 0x2d7   : > { %5512 = vmatpush.bf16.msra.mxu3 %v8329_v41  ;;  %v4896_v47 = vxor.u32 %v4880_v5, %v4864_v25 }
 0x2d8   : > { %v10990_v30 = vpop.f32.mrf.mxu2  ;;  %v4833_v35 = vsel %vm4801_vm12, %v4635_v8, %v4817_v31  ;;  %v4916_v31 = vmul.u32 2246822507, %v4900_v2  ;;  %v8994_v2 = vld [vmem:[#allocation11 + $0x1b4] sm:$0xf] }
 0x2d9   : > { %v5031_v11 = vmul.f32 1.4285715, %v4833_v35  ;;  %v11021_v18 = vpop.f32.mrf.mxu1  ;;  %v4912_v56 = vmul.u32 2246822507, %v4896_v47  ;;  %v4859_v35 = vadd.s32 %v10640_v45, %v11352_v28 }
 0x2db   : > { %v4636_v0 = vpop.f32.mrf.mxu3  ;;  %5513 = vmatpush.bf16.msra.mxu3 %v8321_v40  ;;  %v4928_v62 = vshrl.u32 %v4912_v56, 13  ;;  %v4876_v45 = vadd.s32 %v10585_v37, %v4859_v35 }
 0x2dc   : > { %v4637_v52 = vadd.f32 %v4636_v0, %v4618_v61  ;;  %v4724_v49 = vpop.f32.mrf.mxu0  ;;  %v4668_v61 = vadd.f32 %v10971_v36, %v4649_v7  ;;  %v4855_v0 = vadd.s32 %v10636_v33, %v11352_v28  ;;  %v9000_v36 = vld [vmem:[#allocation11 + $0x1e4] sm:$0xf] }
 0x2dd   : > { %v8357_v13 = vor.u32 %v9000_v36, %v8354_v24  ;;  %v4892_v41 = vshrl.u32 %v4876_v45, 16  ;;  %v8990_v24 = vld [vmem:[#allocation11 + $0x194] sm:$0xf] }
 0x2de   : > { %vm4805_vm10 = vcmp.gt.f32.partialorder %v4637_v52, 0.0  ;;  %v4821_v60 = vmul.f32 0.2, %v4637_v52  ;;  %v4687_v32 = vadd.f32 %v10990_v30, %v4668_v61  ;;  %v4872_v33 = vadd.s32 %v10585_v37, %v4855_v0  ;;  %v8996_v37 = vld [vmem:[#allocation11 + $0x1c4] sm:$0xf] }
 0x2df   : > { %5514 = vmatpush.bf16.msra.mxu3 %v8313_v50  ;;  %v4670_v30 = vadd.f32 %v10992_v12, %v4651_v3  ;;  %v8338_v12 = vld [vmem:[#allocation11 + $0x1c8] sm:$0xf0]  ;;  %v4908_v50 = vxor.u32 %v4892_v41, %v4876_v45 }
 0x2e0   : > { %v4837_v19 = vsel %vm4805_vm10, %v4637_v52, %v4821_v60  ;;  %v10994_v39 = vpop.f32.mrf.mxu2  ;;  %v8362_v52 = vld [vmem:[#allocation11 + $0x1f8] sm:$0xf0]  ;;  %v8341_v48 = vor.u32 %v8996_v37, %v8338_v12  ;;  %v8322_v0 = vld [vmem:[#allocation11 + $0x1a8] sm:$0xf0] }
 0x2e1   : > { %v5035_v15 = vmul.f32 1.4285715, %v4837_v19  ;;  %v4743_v60 = vpop.f32.mrf.mxu1  ;;  %v8365_v6 = vor.u32 %v9002_v43, %v8362_v52  ;;  %v4932_v19 = vshrl.u32 %v4916_v31, 13  ;;  %v4689_v22 = vadd.f32 %v10994_v39, %v4670_v30  ;;  %v8992_v43 = vld [vmem:[#allocation11 + $0x1a4] sm:$0xf] }
 0x2e2   : > { %v4654_v39 = vadd.f32 %v10996_v27, %v11024_v20  ;;  %v8325_v3 = vor.u32 %v8992_v43, %v8322_v0  ;;  %v9009_v43 = vld [vmem:[#allocation12 + $0x28] sm:$0xff]  ;;  %v9008_v0 = vld [vmem:[#allocation12 + $0x20] sm:$0xff] }
 0x2e3   : > { %v11004_v29 = vpack.c.bf16 %v5035_v15, %v5031_v11  ;;  %v4705_v1 = vpop.f32.mrf.mxu3  ;;  %5515 = vmatpush.bf16.msra.mxu3 %v8305_v14  ;;  %v4944_v15 = vxor.u32 %v4928_v62, %v4912_v56  ;;  %v4948_v28 = vxor.u32 %v4932_v19, %v4916_v31  ;;  %v8330_v14 = vld [vmem:[#allocation11 + $0x1b8] sm:$0xf0]  ;;  %v4924_v31 = vmul.u32 2246822507, %v4908_v50 }
 0x2e4   : > { %v4706_v21 = vadd.f32 %v4705_v1, %v4687_v32  ;;  %v4888_v1 = vshrl.u32 %v4872_v33, 16  ;;  %v4726_v34 = vpop.f32.mrf.mxu0  ;;  %v4673_v57 = vadd.f32 %v11006_v17, %v4654_v39  ;;  %v8333_v27 = vor.u32 %v8994_v2, %v8330_v14 }
 0x2e5   : > { %8383 = vmatmul.msk.bf16.gmra.mxu2 %vm11000_vm6, %v11004_v29  ;;  %v4960_v38 = vmul.u32 3266489909, %v4944_v15  ;;  %v4964_v44 = vmul.u32 3266489909, %v4948_v28  ;;  %v4656_v17 = vadd.f32 %v11019_v53, %v11024_v20  ;;  %v4940_v36 = vshrl.u32 %v4924_v31, 13 }
 0x2e6   : > { %v4725_v42 = vadd.f32 %v4724_v49, %v4706_v21  ;;  %v4904_v5 = vxor.u32 %v4888_v1, %v4872_v33  ;;  %v8314_v21 = vld [vmem:[#allocation11 + $0x198] sm:$0xf0] }
 0x2e7   : > { %5584 = vmatpush.bf16.msrb.mxu3 %v8365_v6  ;;  %v4980_v49 = vshrl.u32 %v4964_v44, 16  ;;  %v8317_v30 = vor.u32 %v8990_v24, %v8314_v21  ;;  %v4956_v15 = vxor.u32 %v4940_v36, %v4924_v31  ;;  %v9010_v31 = vld [vmem:[#allocation12 + $0x30] sm:$0xff]  ;;  %v9005_v21 = vld [vmem:[#allocation12 + $0x8] sm:$0xff] }
 0x2e8   : > { %v11015_v63 = vpop.f32.mrf.mxu2  ;;  %v4744_v40 = vadd.f32 %v4743_v60, %v4725_v42  ;;  %v4920_v56 = vmul.u32 2246822507, %v4904_v5  ;;  %v8306_v42 = vld [vmem:[#allocation11 + $0x188] sm:$0xf0] }
 0x2e9   : > { %v4745_v25 = vpop.f32.mrf.mxu1  ;;  %v4692_v61 = vadd.f32 %v11015_v63, %v4673_v57  ;;  %v4996_v62 = vxor.u32 %v4980_v49, %v4964_v44 }
 0x2ea   : > { %v4936_v6 = vshrl.u32 %v4920_v56, 13 }
 0x2eb   : > { %v4707_v55 = vpop.f32.mrf.mxu3  ;;  %5585 = vmatpush.bf16.msrb.mxu3 %v8357_v13  ;;  %vm5012_vm13 = vcmp.ge.s32.totalorder %v4996_v62, 3435973837 }
 0x2ec   : > { %v4708_v9 = vadd.f32 %v4707_v55, %v4689_v22  ;;  %v4976_v55 = vshrl.u32 %v4960_v38, 16  ;;  %v4729_v35 = vpop.f32.mrf.mxu0  ;;  %v8988_v22 = vld [vmem:[#allocation11 + $0x184] sm:$0xf] }
 0x2ee   : > { %v4727_v47 = vadd.f32 %v4726_v34, %v4708_v9 }
 0x2ef   : > { %5586 = vmatpush.bf16.msrb.mxu3 %v8349_v23  ;;  %v8309_v23 = vor.u32 %v8988_v22, %v8306_v42 }
 0x2f0   : > { %v11026_v8 = vpop.f32.mrf.mxu2  ;;  %v4746_v52 = vadd.f32 %v4745_v25, %v4727_v47 }
 0x2f1   : > { %v4748_v13 = vpop.f32.mrf.mxu1 }
 0x2f3   : > { %v11028_v46 = vpop.f32.mrf.mxu3  ;;  %5587 = vmatpush.bf16.msrb.mxu3 %v8341_v48 }
 0x2f4   : > { %v4711_v16 = vadd.f32 %v11028_v46, %v4692_v61  ;;  %v4731_v41 = vpop.f32.mrf.mxu0  ;;  %v9011_v61 = vld [vmem:[#allocation12 + $0x38] sm:$0xff] }
 0x2f5   : > { %8404 = vmatmul.msk.bf16.vlgmr.msrb.gmra.mxu2 %vm10977_vm11, %v10981_v26  ;;  %5873 = vmatpush.bf16.msra.mxu0 %v9011_v61 }
 0x2f6   : > { %v4730_v20 = vadd.f32 %v4729_v35, %v4711_v16  ;;  %9020 = vmatpush.bf16.msra.mxu2 %v9011_v61  ;;  %v11356_v35 = vld [vmem:[#allocation21_spill] sm:$0xff] }
 0x2f7   : > { %5588 = vmatpush.bf16.msrb.mxu3 %v8333_v27  ;;  %v5629_v16 = vmul.u32 256, %v11356_v35 }
 0x2f8   : > { %v4762_v26 = vpop.f32.mrf.mxu2  ;;  %v4749_v34 = vadd.f32 %v4748_v13, %v4730_v20  ;;  %v11358_v20 = vld [vmem:[#allocation26_spill] sm:$0xff] }
 0x2f9   : > { %v4763_v51 = vadd.f32 %v4762_v26, %v4744_v40  ;;  %v4675_v26 = vadd.f32 %v11021_v18, %v4656_v17  ;;  %v4952_v18 = vxor.u32 %v4936_v6, %v4920_v56  ;;  %v4972_v40 = vmul.u32 3266489909, %v4956_v15  ;;  %v4750_v12 = vpop.f32.mrf.mxu1  ;;  %5874 = vmatpush.bf16.msra.mxu0 %v9010_v31 }
 0x2fa   : > { %9021 = vmatpush.bf16.msra.mxu2 %v9010_v31 }
 0x2fb   : > { %v11044_v11 = vpop.f32.mrf.mxu3  ;;  %v4694_v53 = vadd.f32 %v11026_v8, %v4675_v26  ;;  %5589 = vmatpush.bf16.msrb.mxu3 %v8325_v3  ;;  %v4968_v25 = vmul.u32 3266489909, %v4952_v18  ;;  %v11080_v3 = vstv %s5627_s30  ;;  %v9006_v26 = vld [vmem:[#allocation12 + $0x10] sm:$0xff] }
 0x2fc   : > { %v5460_v36 = vpop.f32.mrf.mxu0 }
 0x2fd   : > { %v4713_v28 = vadd.f32 %v11044_v11, %v4694_v53  ;;  %v4984_v39 = vshrl.u32 %v4968_v25, 16  ;;  %5875 = vmatpush.bf16.msra.mxu0 %v9009_v43 }
 0x2fe   : > { %9022 = vmatpush.bf16.msra.mxu2 %v9009_v43 }
 0x2ff   : > { %5590 = vmatpush.bf16.msrb.mxu3 %v8317_v30  ;;  %v4732_v44 = vadd.f32 %v4731_v41, %v4713_v28  ;;  %v9004_v30 = vld [vmem:[#allocation12] sm:$0xff] }
 0x300   : > { %v4764_v58 = vpop.f32.mrf.mxu2 }
 0x301   : > { %v4765_v60 = vadd.f32 %v4764_v58, %v4746_v52  ;;  %v4988_v58 = vshrl.u32 %v4972_v40, 16  ;;  %5876 = vmatpush.bf16.msra.mxu0 %v9008_v0  ;;  %v11355_v52 = vld [vmem:[#allocation20_spill] sm:$0xff] }
 0x302   : > { %9023 = vmatpush.bf16.msra.mxu2 %v9008_v0  ;;  %v5628_v17 = vmul.u32 256, %v11355_v52 }
 0x303   : > { %v4781_v10 = vpop.f32.mrf.mxu3  ;;  %5591 = vmatpush.bf16.msrb.mxu3 %v8309_v23  ;;  %v5004_v57 = vxor.u32 %v4988_v58, %v4972_v40  ;;  %v9018_v23 = vld [vmem:[#allocation12 + $0x70] sm:$0xff] }
 0x304   : > { %v4782_v7 = vadd.f32 %v4781_v10, %v4763_v51  ;;  %v4751_v10 = vadd.f32 %v4750_v12, %v4732_v44  ;;  %v5000_v51 = vxor.u32 %v4984_v39, %v4968_v25  ;;  %v5462_v28 = vpop.f32.mrf.mxu0  ;;  %v9017_v39 = vld [vmem:[#allocation12 + $0x68] sm:$0xff]  ;;  %v5633_v43 = vadd.s32 %v5628_v17, %v11327_v59 }
 0x305   : > { %8407 = vmatmul.msk.bf16.gmra.mxu2 %vm11000_vm6, %v11004_v29  ;;  %v4992_v29 = vxor.u32 %v4976_v55, %v4960_v38  ;;  %vm5020_vm2 = vcmp.ge.s32.totalorder %v5004_v57, 3435973837 }
 0x306   : > { %v4810_v32 = vmul.f32 0.2, %v4782_v7  ;;  %vm4794_vm1 = vcmp.gt.f32.partialorder %v4782_v7, 0.0  ;;  %vm5016_vm7 = vcmp.ge.s32.totalorder %v5000_v51, 3435973837 }
 0x307   : > { %vm5008_vm3 = vcmp.ge.s32.totalorder %v4992_v29, 3435973837  ;;  %vm8387_vm0 = vmpackc.low %vm5020_vm2, %vm5016_vm7  ;;  %v9007_v29 = vld [vmem:[#allocation12 + $0x18] sm:$0xff] }
 0x308   : > { %v4767_v46 = vpop.f32.mrf.mxu2  ;;  %v4826_v33 = vsel %vm4794_vm1, %v4782_v7, %v4810_v32  ;;  %vm11063_vm8 = vmpackc.low %vm5012_vm13, %vm5008_vm3  ;;  %5877 = vmatpush.bf16.msra.mxu0 %v9007_v29  ;;  %9024 = vmatpush.bf16.msra.mxu2 %v9007_v29 }
 0x309   : > { %v5024_v4 = vmul.f32 1.4285715, %v4826_v33  ;;  %v4768_v37 = vadd.f32 %v4767_v46, %v4749_v34  ;;  %v5630_v46 = vmul.u32 256, %v11358_v20  ;;  %v11359_v33 = vld [vmem:[#allocation27_spill] sm:$0xff]  ;;  %v11095_v34 = vld [vmem:[%s11163_s7] sm:$0x3] }
 0x30a   : > { %v11100_v44 = vperm.slane %v11095_v34, 0  ;;  %v11123_v20 = vperm.slane %v11095_v34, 1 }
 0x30b   : > { %v4783_v63 = vpop.f32.mrf.mxu3 }
 0x30c   : > { %v4784_v19 = vadd.f32 %v4783_v63, %v4765_v60  ;;  %v11357_v60 = vld [vmem:[#allocation22_spill] sm:$0xff]  ;;  %5878 = vmatpush.bf16.msra.mxu0 %v9006_v26  ;;  %9025 = vmatpush.bf16.msra.mxu2 %v9006_v26  ;;  %v5461_v58 = vadd.f32 %v5460_v36, %v11100_v44  ;;  %v5463_v61 = vadd.f32 %v5462_v28, %v11100_v44 }
 0x30d   : > { %v5632_v32 = vadd.s32 %v5628_v17, %v11357_v60  ;;  %v5634_v6 = vadd.s32 %v5629_v16, %v11357_v60  ;;  %v5636_v22 = vadd.s32 %v5630_v46, %v11357_v60 }
 0x30e   : > { %vm4798_vm14 = vcmp.gt.f32.partialorder %v4784_v19, 0.0  ;;  %v4814_v45 = vmul.f32 0.2, %v4784_v19 }
 0x30f   : > { %v5641_v63 = vadd.s32 %v11080_v3, %v5632_v32  ;;  %v5643_v62 = vadd.s32 %v11080_v3, %v5634_v6  ;;  %v5645_v41 = vadd.s32 %v11080_v3, %v5636_v22  ;;  %v5635_v32 = vadd.s32 %v5629_v16, %v11327_v59 }
 0x310   : > { %v4830_v54 = vsel %vm4798_vm14, %v4784_v19, %v4814_v45  ;;  %v4769_v5 = vpop.f32.mrf.mxu2  ;;  %5879 = vmatpush.bf16.msra.mxu0 %v9005_v21  ;;  %9026 = vmatpush.bf16.msra.mxu2 %v9005_v21  ;;  %v5631_v45 = vmul.u32 256, %v11359_v33  ;;  %v5642_v21 = vadd.s32 %v11080_v3, %v5633_v43 }
 0x311   : > { %v5028_v1 = vmul.f32 1.4285715, %v4830_v54  ;;  %v4770_v48 = vadd.f32 %v4769_v5, %v4751_v10  ;;  %v5649_v19 = vshrl.u32 %v5641_v63, 16  ;;  %v5651_v13 = vshrl.u32 %v5643_v62, 16  ;;  %v5465_v10 = vpop.f32.mrf.mxu0 }
 0x312   : > { %v5479_v24 = vpop.f32.mrf.mxu1  ;;  %v5638_v42 = vadd.s32 %v5631_v45, %v11357_v60  ;;  %v9015_v60 = vld [vmem:[#allocation12 + $0x58] sm:$0xff] }
 0x313   : > { %v8385_v9 = vpack.c.bf16 %v5028_v1, %v5024_v4  ;;  %v4786_v38 = vpop.f32.mrf.mxu3  ;;  %v5657_v18 = vxor.u32 %v5649_v19, %v5641_v63  ;;  %v5659_v15 = vxor.u32 %v5651_v13, %v5643_v62  ;;  %v9019_v1 = vld [vmem:[#allocation12 + $0x78] sm:$0xff]  ;;  %v9014_v62 = vld [vmem:[#allocation12 + $0x50] sm:$0xff] }
 0x314   : > { %v4787_v11 = vadd.f32 %v4786_v38, %v4768_v37  ;;  %5880 = vmatpush.bf16.msra.mxu0 %v9004_v30  ;;  %9027 = vmatpush.bf16.msra.mxu2 %v9004_v30  ;;  %v5653_v37 = vshrl.u32 %v5645_v41, 16 }
 0x315   : > { %8386 = vmatmul.msk.bf16.vlgmr.msra.gmra.mxu3 %vm11063_vm8, %v8385_v9  ;;  %v5665_v54 = vmul.u32 2246822507, %v5657_v18  ;;  %v5667_v4 = vmul.u32 2246822507, %v5659_v15  ;;  %5892 = vmatpush.bf16.msra.mxu1 %v9019_v1 }
 0x316   : > { %v4818_v50 = vmul.f32 0.2, %v4787_v11  ;;  %vm4802_vm9 = vcmp.gt.f32.partialorder %v4787_v11, 0.0  ;;  %9028 = vmatpush.bf16.msra.mxu3 %v9019_v1  ;;  %v5466_v1 = vadd.f32 %v5465_v10, %v11100_v44 }
 0x317   : > { %v5673_v25 = vshrl.u32 %v5665_v54, 13  ;;  %v5675_v40 = vshrl.u32 %v5667_v4, 13 }
 0x318   : > { %v4834_v2 = vsel %vm4802_vm9, %v4787_v11, %v4818_v50 }
 0x319   : > { %v5032_v49 = vmul.f32 1.4285715, %v4834_v2  ;;  %5893 = vmatpush.bf16.msra.mxu1 %v9018_v23  ;;  %v5681_v12 = vxor.u32 %v5673_v25, %v5665_v54  ;;  %v5683_v5 = vxor.u32 %v5675_v40, %v5667_v4  ;;  %v5467_v19 = vpop.f32.mrf.mxu0  ;;  %v9013_v54 = vld [vmem:[#allocation12 + $0x48] sm:$0xff] }
 0x31a   : > { %v5481_v8 = vpop.f32.mrf.mxu1  ;;  %9029 = vmatpush.bf16.msra.mxu3 %v9018_v23  ;;  %v5468_v10 = vadd.f32 %v5467_v19, %v11100_v44 }
 0x31b   : > { %v4788_v47 = vpop.f32.mrf.mxu3  ;;  %v5691_v2 = vmul.u32 3266489909, %v5683_v5  ;;  %v5482_v6 = vadd.f32 %v5481_v8, %v5463_v61 }
 0x31c   : > { %v4789_v55 = vadd.f32 %v4788_v47, %v4770_v48  ;;  %v5661_v48 = vxor.u32 %v5653_v37, %v5645_v41  ;;  %v5480_v47 = vadd.f32 %v5479_v24, %v5461_v58 }
 0x31d   : > { %5894 = vmatpush.bf16.msra.mxu1 %v9017_v39  ;;  %v5699_v29 = vshrl.u32 %v5691_v2, 16 }
 0x31e   : > { %vm4806_vm4 = vcmp.gt.f32.partialorder %v4789_v55, 0.0  ;;  %v4822_v14 = vmul.f32 0.2, %v4789_v55  ;;  %9030 = vmatpush.bf16.msra.mxu3 %v9017_v39 }
 0x31f   : > { %v5707_v13 = vxor.u32 %v5699_v29, %v5691_v2  ;;  %v5637_v2 = vadd.s32 %v5630_v46, %v11327_v59 }
 0x320   : > { %v4838_v7 = vsel %vm4806_vm4, %v4789_v55, %v4822_v14  ;;  %v5689_v55 = vmul.u32 3266489909, %v5681_v12  ;;  %v9016_v14 = vld [vmem:[#allocation12 + $0x60] sm:$0xff] }
 0x321   : > { %v5036_v56 = vmul.f32 1.4285715, %v4838_v7  ;;  %5895 = vmatpush.bf16.msra.mxu1 %v9016_v14  ;;  %vm5715_vm15 = vcmp.ge.s32.totalorder %v5707_v13, 3435973837  ;;  %v9012_v12 = vld [vmem:[#allocation12 + $0x40] sm:$0xff]  ;;  %v5536_v58 = vpop.f32.mrf.mxu0  ;;  %v5646_v29 = vadd.s32 %v11080_v3, %v5637_v2 }
 0x322   : > { %v5484_v51 = vpop.f32.mrf.mxu1  ;;  %9031 = vmatpush.bf16.msra.mxu3 %v9016_v14  ;;  %v5697_v0 = vshrl.u32 %v5689_v55, 16  ;;  %v5639_v14 = vadd.s32 %v5631_v45, %v11327_v59 }
 0x323   : > { %v8388_v27 = vpack.c.bf16 %v5036_v56, %v5032_v49  ;;  %v5669_v56 = vmul.u32 2246822507, %v5661_v48 }
 0x324   : > { %v5705_v17 = vxor.u32 %v5697_v0, %v5689_v55 }
 0x325   : > { %8389 = vmatmul.msk.bf16.gmra.mxu3 %vm8387_vm0, %v8388_v27  ;;  %v5677_v26 = vshrl.u32 %v5669_v56, 13  ;;  %5896 = vmatpush.bf16.msra.mxu1 %v9015_v60 }
 0x326   : > { %9032 = vmatpush.bf16.msra.mxu3 %v9015_v60  ;;  %vm5713_vm5 = vcmp.ge.s32.totalorder %v5705_v17, 3435973837  ;;  %v5648_v60 = vadd.s32 %v11080_v3, %v5639_v14 }
 0x327   : > { %v5685_v16 = vxor.u32 %v5677_v26, %v5669_v56  ;;  %vm8478_vm10 = vmpackc.low %vm5715_vm15, %vm5713_vm5  ;;  %v5654_v26 = vshrl.u32 %v5646_v29, 16 }
 0x329   : > { %5897 = vmatpush.bf16.msra.mxu1 %v9014_v62 }
 0x32a   : > { %v5486_v35 = vpop.f32.mrf.mxu1  ;;  %9033 = vmatpush.bf16.msra.mxu3 %v9014_v62  ;;  %v5537_v62 = vadd.f32 %v5536_v58, %v11123_v20 }
 0x32d   : > { %5898 = vmatpush.bf16.msra.mxu1 %v9013_v54 }
 0x32e   : > { %9034 = vmatpush.bf16.msra.mxu3 %v9013_v54 }
 0x331   : > { %5899 = vmatpush.bf16.msra.mxu1 %v9012_v12 }
 0x332   : > { %9035 = vmatpush.bf16.msra.mxu3 %v9012_v12  ;;  %v5555_v55 = vpop.f32.mrf.mxu1 }
 0x333   : > { %v5556_v19 = vadd.f32 %v5555_v55, %v5537_v62 }
 0x335   : > { %8410 = vmatmul.msk.bf16.vlgmr.msrb.gmra.mxu3 %vm11063_vm8, %v8385_v9  ;;  %v5647_v9 = vadd.s32 %v11080_v3, %v5638_v42  ;;  %v5650_v42 = vshrl.u32 %v5642_v21, 16 }
 0x337   : > { %v5655_v11 = vshrl.u32 %v5647_v9, 16  ;;  %v5658_v40 = vxor.u32 %v5650_v42, %v5642_v21 }
 0x339   : > { %v5663_v50 = vxor.u32 %v5655_v11, %v5647_v9  ;;  %v5693_v9 = vmul.u32 3266489909, %v5685_v16 }
 0x33b   : > { %v5701_v48 = vshrl.u32 %v5693_v9, 16 }
 0x33d   : > { %v5709_v56 = vxor.u32 %v5701_v48, %v5693_v9 }
 0x33f   : > { %vm5717_vm1 = vcmp.ge.s32.totalorder %v5709_v56, 3435973837 }
 0x345   : > { %8413 = vmatmul.msk.bf16.gmra.mxu3 %vm8387_vm0, %v8388_v27  ;;  %v5671_v27 = vmul.u32 2246822507, %v5663_v50 }
 0x347   : > { %v5679_v63 = vshrl.u32 %v5671_v27, 13 }
 0x349   : > { %v5687_v18 = vxor.u32 %v5679_v63, %v5671_v27  ;;  %v5656_v63 = vshrl.u32 %v5648_v60, 16 }
 0x34b   : > { %v5695_v25 = vmul.u32 3266489909, %v5687_v18 }
 0x358   : > { %v5498_v53 = vpop.f32.mrf.mxu2 }
 0x359   : > { %v5499_v7 = vadd.f32 %v5498_v53, %v5480_v47  ;;  %v5644_v53 = vadd.s32 %v11080_v3, %v5635_v32  ;;  %v5703_v47 = vshrl.u32 %v5695_v25, 16  ;;  %v5538_v32 = vpop.f32.mrf.mxu0 }
 0x35a   : > { %v5539_v18 = vadd.f32 %v5538_v32, %v11123_v20 }
 0x35b   : > { %v5652_v4 = vshrl.u32 %v5644_v53, 16  ;;  %v5711_v44 = vxor.u32 %v5703_v47, %v5695_v25 }
 0x35d   : > { %v5660_v5 = vxor.u32 %v5652_v4, %v5644_v53  ;;  %vm5719_vm14 = vcmp.ge.s32.totalorder %v5711_v44, 3435973837 }
 0x35e   : > { %vm8481_vm13 = vmpackc.low %vm5719_vm14, %vm5717_vm1 }
 0x360   : > { %v5500_v38 = vpop.f32.mrf.mxu2 }
 0x361   : > { %v5501_v36 = vadd.f32 %v5500_v38, %v5482_v6  ;;  %v5485_v38 = vadd.f32 %v5484_v51, %v5466_v1  ;;  %v5668_v51 = vmul.u32 2246822507, %v5660_v5  ;;  %v5541_v1 = vpop.f32.mrf.mxu0 }
 0x363   : > { %v5676_v0 = vshrl.u32 %v5668_v51, 13 }
 0x365   : > { %v5684_v6 = vxor.u32 %v5676_v0, %v5668_v51 }
 0x367   : > { %v5692_v53 = vmul.u32 3266489909, %v5684_v6 }
 0x368   : > { %v5503_v49 = vpop.f32.mrf.mxu2 }
 0x369   : > { %v5504_v39 = vadd.f32 %v5503_v49, %v5485_v38  ;;  %v5700_v42 = vshrl.u32 %v5692_v53, 16  ;;  %v5543_v51 = vpop.f32.mrf.mxu0 }
 0x36b   : > { %v5708_v25 = vxor.u32 %v5700_v42, %v5692_v53 }
 0x36d   : > { %vm5716_vm7 = vcmp.ge.s32.totalorder %v5708_v25, 3435973837 }
 0x370   : > { %v5505_v28 = vpop.f32.mrf.mxu2 }
 0x378   : > { %v5574_v49 = vpop.f32.mrf.mxu2 }
 0x379   : > { %v5575_v16 = vadd.f32 %v5574_v49, %v5556_v19 }
 0x398   : > { %v5517_v57 = vpop.f32.mrf.mxu3 }
 0x399   : > { %v5518_v31 = vadd.f32 %v5517_v57, %v5499_v7  ;;  %v5666_v57 = vmul.u32 2246822507, %v5658_v40  ;;  %v5487_v7 = vadd.f32 %v5486_v35, %v5468_v10  ;;  %v5664_v35 = vxor.u32 %v5656_v63, %v5648_v60 }
 0x39a   : > { %v5542_v10 = vadd.f32 %v5541_v1, %v11123_v20 }
 0x39b   : > { %v5611_v24 = vmul.f32 0.2, %v5518_v31  ;;  %vm5603_vm11 = vcmp.gt.f32.partialorder %v5518_v31, 0.0  ;;  %v5506_v27 = vadd.f32 %v5505_v28, %v5487_v7  ;;  %v5672_v54 = vmul.u32 2246822507, %v5664_v35 }
 0x39d   : > { %v5619_v15 = vsel %vm5603_vm11, %v5518_v31, %v5611_v24  ;;  %v5674_v31 = vshrl.u32 %v5666_v57, 13  ;;  %v5557_v24 = vpop.f32.mrf.mxu1 }
 0x39e   : > { %v5721_v23 = vmul.f32 1.4285715, %v5619_v15  ;;  %v5558_v4 = vadd.f32 %v5557_v24, %v5539_v18 }
 0x39f   : > { %v5682_v45 = vxor.u32 %v5674_v31, %v5666_v57 }
 0x3a0   : > { %v5519_v52 = vpop.f32.mrf.mxu3 }
 0x3a1   : > { %v5520_v30 = vadd.f32 %v5519_v52, %v5501_v36  ;;  %v5690_v34 = vmul.u32 3266489909, %v5682_v45  ;;  %v5576_v52 = vpop.f32.mrf.mxu2 }
 0x3a3   : > { %vm5605_vm12 = vcmp.gt.f32.partialorder %v5520_v30, 0.0  ;;  %v5613_v22 = vmul.f32 0.2, %v5520_v30 }
 0x3a5   : > { %v5621_v8 = vsel %vm5605_vm12, %v5520_v30, %v5613_v22  ;;  %v5662_v30 = vxor.u32 %v5654_v26, %v5646_v29  ;;  %v5698_v22 = vshrl.u32 %v5690_v34, 16  ;;  %v5560_v9 = vpop.f32.mrf.mxu1 }
 0x3a6   : > { %v5723_v41 = vmul.f32 1.4285715, %v5621_v8  ;;  %v5577_v8 = vadd.f32 %v5576_v52, %v5558_v4  ;;  %v5561_v55 = vadd.f32 %v5560_v9, %v5542_v10 }
 0x3a7   : > { %v5670_v28 = vmul.u32 2246822507, %v5662_v30 }
 0x3a8   : > { %v8479_v37 = vpack.c.bf16 %v5723_v41, %v5721_v23  ;;  %v5522_v11 = vpop.f32.mrf.mxu3  ;;  %v5706_v41 = vxor.u32 %v5698_v22, %v5690_v34 }
 0x3a9   : > { %v5523_v50 = vadd.f32 %v5522_v11, %v5504_v39  ;;  %v5678_v40 = vshrl.u32 %v5670_v28, 13  ;;  %v5579_v12 = vpop.f32.mrf.mxu2 }
 0x3aa   : > { %8480 = vmatmul.msk.bf16.vlgmr.msra.gmra.mxu0 %vm8478_vm10, %v8479_v37  ;;  %v5680_v37 = vshrl.u32 %v5672_v54, 13  ;;  %vm5714_vm4 = vcmp.ge.s32.totalorder %v5706_v41, 3435973837  ;;  %v5580_v56 = vadd.f32 %v5579_v12, %v5561_v55 }
 0x3ab   : > { %v5615_v61 = vmul.f32 0.2, %v5523_v50  ;;  %vm5607_vm6 = vcmp.gt.f32.partialorder %v5523_v50, 0.0  ;;  %v5686_v58 = vxor.u32 %v5678_v40, %v5670_v28  ;;  %vm8484_vm2 = vmpackc.low %vm5716_vm7, %vm5714_vm4 }
 0x3ac   : > { %v5688_v48 = vxor.u32 %v5680_v37, %v5672_v54 }
 0x3ad   : > { %v5623_v59 = vsel %vm5607_vm6, %v5523_v50, %v5615_v61  ;;  %v5694_v7 = vmul.u32 3266489909, %v5686_v58  ;;  %v5544_v61 = vadd.f32 %v5543_v51, %v11123_v20 }
 0x3ae   : > { %v5725_v21 = vmul.f32 1.4285715, %v5623_v59  ;;  %v5696_v49 = vmul.u32 3266489909, %v5688_v48 }
 0x3b0   : > { %v5524_v43 = vpop.f32.mrf.mxu3  ;;  %v5704_v0 = vshrl.u32 %v5696_v49, 16 }
 0x3b1   : > { %v5525_v46 = vadd.f32 %v5524_v43, %v5506_v27  ;;  %v5562_v27 = vpop.f32.mrf.mxu1  ;;  %v5581_v31 = vpop.f32.mrf.mxu2  ;;  %v5702_v43 = vshrl.u32 %v5694_v7, 16 }
 0x3b2   : > { %v5563_v29 = vadd.f32 %v5562_v27, %v5544_v61  ;;  %v5712_v45 = vxor.u32 %v5704_v0, %v5696_v49 }
 0x3b3   : > { %vm5609_vm3 = vcmp.gt.f32.partialorder %v5525_v46, 0.0  ;;  %v5617_v33 = vmul.f32 0.2, %v5525_v46 }
 0x3b4   : > { %v5582_v60 = vadd.f32 %v5581_v31, %v5563_v29  ;;  %vm5720_vm5 = vcmp.ge.s32.totalorder %v5712_v45, 3435973837 }
 0x3b5   : > { %v5625_v36 = vsel %vm5609_vm3, %v5525_v46, %v5617_v33  ;;  %v5710_v33 = vxor.u32 %v5702_v43, %v5694_v7 }
 0x3b6   : > { %v5727_v3 = vmul.f32 1.4285715, %v5625_v36 }
 0x3b7   : > { %vm5718_vm12 = vcmp.ge.s32.totalorder %v5710_v33, 3435973837 }
 0x3b8   : > { %v8482_v17 = vpack.c.bf16 %v5727_v3, %v5725_v21  ;;  %v5593_v13 = vpop.f32.mrf.mxu3  ;;  %vm8487_vm15 = vmpackc.low %vm5720_vm5, %vm5718_vm12  ;;  %v9139_v21 = vld [vmem:[%s11165_s9] ss:$0 sm:$0xff] }
 0x3b9   : > { %v5594_v15 = vadd.f32 %v5593_v13, %v5575_v16 }
 0x3ba   : > { %8483 = vmatmul.msk.bf16.vlgmr.msra.gmra.mxu2 %vm8481_vm13, %v8482_v17 }
 0x3bb   : > { %v5612_v23 = vmul.f32 0.2, %v5594_v15  ;;  %vm5604_vm8 = vcmp.gt.f32.partialorder %v5594_v15, 0.0 }
 0x3bd   : > { %v5620_v5 = vsel %vm5604_vm8, %v5594_v15, %v5612_v23 }
 0x3be   : > { %v5722_v47 = vmul.f32 1.4285715, %v5620_v5 }
 0x3c0   : > { %v5595_v38 = vpop.f32.mrf.mxu3 }
 0x3c1   : > { %v5596_v11 = vadd.f32 %v5595_v38, %v5577_v8 }
 0x3c3   : > { %vm5606_vm9 = vcmp.gt.f32.partialorder %v5596_v11, 0.0  ;;  %v5614_v39 = vmul.f32 0.2, %v5596_v11 }
 0x3c5   : > { %v5622_v50 = vsel %vm5606_vm9, %v5596_v11, %v5614_v39 }
 0x3c6   : > { %v5724_v57 = vmul.f32 1.4285715, %v5622_v50 }
 0x3c8   : > { %v8485_v2 = vpack.c.bf16 %v5724_v57, %v5722_v47  ;;  %v5598_v14 = vpop.f32.mrf.mxu3 }
 0x3c9   : > { %v5599_v44 = vadd.f32 %v5598_v14, %v5580_v56 }
 0x3ca   : > { %8486 = vmatmul.msk.bf16.vlgmr.msra.gmra.mxu1 %vm8484_vm2, %v8485_v2 }
 0x3cb   : > { %v5616_v46 = vmul.f32 0.2, %v5599_v44  ;;  %vm5608_vm0 = vcmp.gt.f32.partialorder %v5599_v44, 0.0 }
 0x3cd   : > { %v5624_v6 = vsel %vm5608_vm0, %v5599_v44, %v5616_v46 }
 0x3ce   : > { %v5726_v62 = vmul.f32 1.4285715, %v5624_v6 }
 0x3d0   : > { %v5600_v59 = vpop.f32.mrf.mxu3 }
 0x3d1   : > { %v5601_v32 = vadd.f32 %v5600_v59, %v5582_v60 }
 0x3d3   : > { %vm5610_vm11 = vcmp.gt.f32.partialorder %v5601_v32, 0.0  ;;  %v5618_v26 = vmul.f32 0.2, %v5601_v32 }
 0x3d5   : > { %v5626_v63 = vsel %vm5610_vm11, %v5601_v32, %v5618_v26 }
 0x3d6   : > { %v5728_v20 = vmul.f32 1.4285715, %v5626_v63 }
 0x3d8   : > { %v8488_v36 = vpack.c.bf16 %v5728_v20, %v5726_v62 }
 0x3da   : > { %8489 = vmatmul.msk.bf16.vlgmr.msra.gmra.mxu3 %vm8487_vm15, %v8488_v36 }
 0x427   : > { %v5882_v24 = vpop.f32.mrf.mxu0 }
 0x428   : > { %v5883_v3 = vadd.f32 %v9139_v21, %v5882_v24 }
 0x42f   : > { %v5884_v17 = vpop.f32.mrf.mxu0 }
 0x430   : > { %v5885_v53 = vadd.f32 %v9139_v21, %v5884_v17 }
 0x43d   : > { %v5887_v42 = vpop.f32.mrf.mxu2 }
 0x43e   : > { %v5888_v54 = vadd.f32 %v9139_v21, %v5887_v42 }
 0x445   : > { %v5889_v25 = vpop.f32.mrf.mxu2 }
 0x446   : > { %v5890_v5 = vadd.f32 %v9139_v21, %v5889_v25 }
 0x447   : > { %v5901_v19 = vpop.f32.mrf.mxu1 }
 0x448   : > { %v5902_v34 = vadd.f32 %v5901_v19, %v5883_v3 }
 0x44a   : > { %v5911_v52 = vsub.f32 0.0, %v5902_v34 }
 0x44c   : > { %v5915_v13 = vmul.f32 1.442695, %v5911_v52 }
 0x44e   : > { %9140 = vpow2.f32 %v5915_v13 }
 0x44f   : > { %v5903_v30 = vpop.f32.mrf.mxu1 }
 0x450   : > { %v5904_v35 = vadd.f32 %v5903_v30, %v5885_v53 }
 0x452   : > { %v5912_v16 = vsub.f32 0.0, %v5904_v35 }
 0x454   : > { %v9141_v18 = vpop.eup %9140  ;;  %v5917_v15 = vmul.f32 1.442695, %v5912_v16 }
 0x455   : > { %v5923_v22 = vadd.f32 1.0, %v9141_v18 }
 0x456   : > { %9142 = vpow2.f32 %v5917_v15 }
 0x457   : > { %9144 = vrcp.f32 %v5923_v22  ;;  %v5938_v40 = vand.u32 2147483648, %v5923_v22  ;;  %v5936_v11 = vand.u32 2147483647, %v5923_v22  ;;  %vm5932_vm6 = vweird.f32 %v5923_v22 }
 0x459   : > { %v5939_v48 = vor.u32 1.1754944e-38, %v5938_v40  ;;  %vm5937_vm3 = vcmp.eq.f32.partialorder %v5936_v11, 8.507059e+37 }
 0x45c   : > { %v9143_v28 = vpop.eup %9142 }
 0x45d   : > { %v9145_v4 = vpop.eup %9144  ;;  %v5924_v1 = vadd.f32 1.0, %v9143_v28  ;;  %v5906_v8 = vpop.f32.mrf.mxu3 }
 0x45e   : > { %v5928_v23 = vmul.f32 %v9145_v4, %v5923_v22  ;;  %v5907_v41 = vadd.f32 %v5906_v8, %v5888_v54  ;;  %vm5933_vm10 = vweird.f32 %v9145_v4 }
 0x45f   : > { %9146 = vrcp.f32 %v5924_v1  ;;  %vm5934_vm1 = vmor %vm5932_vm6, %vm5933_vm10  ;;  %v5953_v14 = vand.u32 2147483648, %v5924_v1  ;;  %v5951_v56 = vand.u32 2147483647, %v5924_v1  ;;  %vm5947_vm13 = vweird.f32 %v5924_v1 }
 0x460   : > { %v5929_v9 = vsub.f32 1.0, %v5928_v23  ;;  %v5913_v38 = vsub.f32 0.0, %v5907_v41 }
 0x461   : > { %v5954_v31 = vor.u32 1.1754944e-38, %v5953_v14  ;;  %vm5952_vm9 = vcmp.eq.f32.partialorder %v5951_v56, 8.507059e+37 }
 0x462   : > { %v5930_v37 = vmul.f32 %v9145_v4, %v5929_v9  ;;  %v5919_v12 = vmul.f32 1.442695, %v5913_v38 }
 0x464   : > { %v5931_v39 = vadd.f32 %v9145_v4, %v5930_v37  ;;  %9148 = vpow2.f32 %v5919_v12 }
 0x465   : > { %v9147_v58 = vpop.eup %9146  ;;  %v5908_v10 = vpop.f32.mrf.mxu3 }
 0x466   : > { %v5935_v50 = vsel %vm5934_vm1, %v9145_v4, %v5931_v39  ;;  %v5943_v47 = vmul.f32 %v9147_v58, %v5924_v1  ;;  %v5909_v57 = vadd.f32 %v5908_v10, %v5890_v5  ;;  %vm5948_vm14 = vweird.f32 %v9147_v58 }
 0x467   : > { %v5940_v55 = vsel %vm5937_vm3, %v5939_v48, %v5935_v50  ;;  %vm5949_vm8 = vmor %vm5947_vm13, %vm5948_vm14 }
 0x468   : > { %5987 = vst [vmem:[%s11137_s22] sm:$0xff] %v5940_v55  ;;  %v5944_v51 = vsub.f32 1.0, %v5943_v47  ;;  %v5914_v2 = vsub.f32 0.0, %v5909_v57 }
 0x46a   : > { %v9149_v7 = vpop.eup %9148  ;;  %v5945_v49 = vmul.f32 %v9147_v58, %v5944_v51  ;;  %v5921_v27 = vmul.f32 1.442695, %v5914_v2 }
 0x46b   : > { %v5925_v61 = vadd.f32 1.0, %v9149_v7 }
 0x46c   : > { %v5946_v44 = vadd.f32 %v9147_v58, %v5945_v49  ;;  %9150 = vpow2.f32 %v5921_v27 }
 0x46d   : > { %9152 = vrcp.f32 %v5925_v61  ;;  %v5968_v45 = vand.u32 2147483648, %v5925_v61  ;;  %v5966_v6 = vand.u32 2147483647, %v5925_v61  ;;  %vm5962_vm7 = vweird.f32 %v5925_v61 }
 0x46e   : > { %v5950_v43 = vsel %vm5949_vm8, %v9147_v58, %v5946_v44 }
 0x46f   : > { %v5955_v0 = vsel %vm5952_vm9, %v5954_v31, %v5950_v43  ;;  %v5969_v62 = vor.u32 1.1754944e-38, %v5968_v45  ;;  %vm5967_vm0 = vcmp.eq.f32.partialorder %v5966_v6, 8.507059e+37 }
 0x470   : > { %5988 = vst [vmem:[%s11137_s22 + $0x8] sm:$0xff] %v5955_v0 }
 0x472   : > { %v9151_v29 = vpop.eup %9150 }
 0x473   : > { %v9153_v60 = vpop.eup %9152  ;;  %v5926_v46 = vadd.f32 1.0, %v9151_v29 }
 0x474   : > { %v5958_v59 = vmul.f32 %v9153_v60, %v5925_v61  ;;  %vm5963_vm4 = vweird.f32 %v9153_v60 }
 0x475   : > { %9154 = vrcp.f32 %v5926_v46  ;;  %vm5964_vm2 = vmor %vm5962_vm7, %vm5963_vm4  ;;  %v5983_v3 = vand.u32 2147483648, %v5926_v46  ;;  %v5981_v34 = vand.u32 2147483647, %v5926_v46  ;;  %vm5977_vm12 = vweird.f32 %v5926_v46 }
 0x476   : > { %v5959_v33 = vsub.f32 1.0, %v5958_v59 }
 0x477   : > { %v5984_v17 = vor.u32 1.1754944e-38, %v5983_v3  ;;  %vm5982_vm15 = vcmp.eq.f32.partialorder %v5981_v34, 8.507059e+37 }
 0x478   : > { %v5960_v32 = vmul.f32 %v9153_v60, %v5959_v33 }
 0x47a   : > { %v5961_v26 = vadd.f32 %v9153_v60, %v5960_v32 }
 0x47b   : > { %v9155_v63 = vpop.eup %9154 }
 0x47c   : > { %v5965_v20 = vsel %vm5964_vm2, %v9153_v60, %v5961_v26  ;;  %v5973_v36 = vmul.f32 %v9155_v63, %v5926_v46  ;;  %vm5978_vm11 = vweird.f32 %v9155_v63 }
 0x47d   : > { %v5970_v24 = vsel %vm5967_vm0, %v5969_v62, %v5965_v20  ;;  %vm5979_vm5 = vmor %vm5977_vm12, %vm5978_vm11 }
 0x47e   : > { %5989 = vst [vmem:[%s11137_s22 + $0x10] sm:$0xff] %v5970_v24  ;;  %v5974_v21 = vsub.f32 1.0, %v5973_v36 }
 0x480   : > { %v5975_v19 = vmul.f32 %v9155_v63, %v5974_v21 }
 0x482   : > { %v5976_v52 = vadd.f32 %v9155_v63, %v5975_v19 }
 0x484   : > { %v5980_v13 = vsel %vm5979_vm5, %v9155_v63, %v5976_v52 }
 0x485   : > { %v5985_v53 = vsel %vm5982_vm15, %v5984_v17, %v5980_v13 }
 0x486   : > { %5990 = vst [vmem:[%s11137_s22 + $0x18] sm:$0xff] %v5985_v53 }
 0x487 PF: > { %p24_p3 = scmp.ge.s32.totalorder %s9523_s23, 4   ;;  %s11360_s15 = smov %s9376_s16 }
 0x488   : > { %s11361_s16 = smov %s9380_s17  ;;  %s11362_s17 = smov %s9534_s26 }
 0x489   : > { %s11363_s18 = smov %s9523_s23  ;;  %26 = sbr.rel (!%p24_p3) target bundleno = 10 (0xa), region = 116 }
 0x48e   :  { %6013 = vsyncpa [#allocation5], 1 }
 0x48f   :  { %6015 = vsyncpa [#allocation5 + $0x1], 1 }
 0x490   :  { %6016 = vsyncpa [#allocation7], 1 }
 0x491   :  { %6017 = vsyncpa [#allocation10], 1 }
 0x492   :  { %6018 = vsyncpa [#allocation13], 1 }

</bundles_post_ra>
